<compile_context>
chip_gen: v7x
topology: tpu7x:2x2x1
jax: 0.10.0
libtpu: 0.0.40
codegen_flags: <defaults>
</compile_context>

<pallas_src>
import functools

import jax
import jax.numpy as jnp
from jax import lax
from jax.experimental import pallas as pl
from jax.experimental.pallas import tpu as pltpu

EPS = 1e-5       # nn.BatchNorm3d default eps
L2_EPS = 1e-12   # F.normalize default eps


# --------------------------------------------------------------------------
# Chip-aware sizing helpers.
# --------------------------------------------------------------------------
def _vmem_limit_bytes():
    """~30 MiB scoped VMEM on 64-MiB parts (v7x), ~48 MiB on 128-MiB parts."""
    try:
        cap = getattr(pltpu.get_tpu_info(), "vmem_capacity_bytes", 128 << 20)
    except Exception:  # pragma: no cover - CPU/interpret fallback
        cap = 128 << 20
    return (30 << 20) if cap <= (64 << 20) else (48 << 20)


def _divisor_tile(n_pad, cap):
    """Largest multiple of 128 <= cap that divides n_pad (n_pad % 128 == 0)."""
    t = max(128, min(int(cap), n_pad)) // 128 * 128
    while n_pad % t != 0:
        t -= 128
    return t


def _pick_tile(n_pad, c, vmem_budget):
    # ~6 double-buffered f32 (C, tn) tiles live across the streaming passes.
    return _divisor_tile(n_pad, min(4096, vmem_budget // (6 * max(c, 1) * 4)))


def _pick_query_tile(n_pad, vmem_budget):
    # a few (TQ, Npad) f32 strips (sim/work/iota/pick) live in the kNN loop.
    return _divisor_tile(n_pad, min(512, max(128, vmem_budget // (6 * n_pad * 4))))


# --------------------------------------------------------------------------
# Pass 1: fc1 conv, z1 -> HBM, per-grid-step BN1 partial stats (no accumulator
# => both grid axes "parallel" for megacore).
# --------------------------------------------------------------------------
def _fc1_stats_kernel(x_ref, p_ref, z1_ref, stats_ref, *, n_valid, n_pad):
    c = p_ref.shape[0]
    tn = x_ref.shape[2]
    x = x_ref[0].astype(jnp.float32)                    # (C, TN)
    w1 = p_ref[:, :c]                                   # (C, C)
    b1 = p_ref[:, c:c + 1]                              # (C, 1)
    z = jnp.dot(w1, x, preferred_element_type=jnp.float32) + b1
    z1_ref[0] = z.astype(z1_ref.dtype)

    if n_valid < n_pad:                                 # static: mask pad lanes
        col = pl.program_id(1) * tn + lax.broadcasted_iota(jnp.int32, (1, tn), 1)
        zm = jnp.where(col < n_valid, z, 0.0)
    else:
        zm = z
    stats_ref[...] = jnp.concatenate(
        [jnp.sum(zm, axis=1, keepdims=True),
         jnp.sum(zm * zm, axis=1, keepdims=True)], axis=1)[None, None]


# --------------------------------------------------------------------------
# Pass 2: per-(batch, query-strip) graph convolution (MRConv) + fc2 conv +
# per-batch BN2 partial stats.
# --------------------------------------------------------------------------
def _graph_kernel(z1_ref, fold_ref, gc_ref, fc2_ref, z2_ref, stats_ref,
                  h1_sc, fn_sc, *, k, n_valid, knn_dtype):
    nc = fold_ref.shape[0]        # C
    nc2 = gc_ref.shape[0]         # 2C
    npad = h1_sc.shape[1]         # padded node count
    tq = z2_ref.shape[2]          # query strip width
    q = pl.program_id(1)

    a1 = fold_ref[:, 0:1]
    c1 = fold_ref[:, 1:2]

    # ---- per-batch precompute (q is the inner "arbitrary" axis, so q == 0
    # runs before every other strip of the same batch on the same core).
    @pl.when(q == 0)
    def _():
        h1 = a1 * z1_ref[0].astype(jnp.float32) + c1            # folded BN1
        h1_sc[...] = h1
        ss = jnp.sum(h1 * h1, axis=0, keepdims=True)            # (1, Npad)
        fn_sc[...] = (h1 / jnp.maximum(jnp.sqrt(ss), L2_EPS)).astype(fn_sc.dtype)

    qstart = pl.multiple_of(q * tq, tq)
    h1_q = h1_sc[:, pl.ds(qstart, tq)]                          # (C, TQ) f32
    fq = fn_sc[:, pl.ds(qstart, tq)]                            # (C, TQ)
    fn_full = fn_sc[...]                                        # (C, Npad)
    h1_gather = h1_sc[...].astype(knn_dtype)                    # gather keys

    # ---- cosine similarity strip on the MXU: (TQ, Npad)
    sim = lax.dot_general(fq, fn_full, (((0,), (0,)), ((), ())),
                          preferred_element_type=jnp.float32)

    col = lax.broadcasted_iota(jnp.int32, (tq, npad), 1)
    row_g = q * tq + lax.broadcasted_iota(jnp.int32, (tq, npad), 0)
    invalid = col == row_g                    # self edge handled analytically
    if n_valid < npad:                        # static: never pick padded nodes
        invalid = jnp.logical_or(invalid, col >= n_valid)
    work = jnp.where(invalid, -jnp.inf, sim)
    colf = col.astype(jnp.float32)

    # ---- kNN selection + max-relative gather.
    # Self edge contributes h1_i - h1_i = 0, i.e. run_max starts at h1_q and
    # only k-1 non-self neighbours are selected (review opt #7).  Each pick is
    # applied as a one-hot (C,Npad)@(Npad,TQ) MXU matmul instead of a
    # (C, N, N) intermediate (review opt #1).
    run_max = h1_q
    for _ in range(k - 1):
        row_max = jnp.max(work, axis=1, keepdims=True)
        # tie-break on the lowest column index so exactly one pick per step
        pick_col = jnp.min(jnp.where(work >= row_max, colf, float(npad)),
                           axis=1, keepdims=True)
        pick = colf == pick_col                                 # (TQ, Npad)
        gath = lax.dot_general(h1_gather, pick.astype(knn_dtype),
                               (((1,), (1,)), ((), ())),
                               preferred_element_type=jnp.float32)  # (C, TQ)
        run_max = jnp.maximum(run_max, gath)
        work = jnp.where(pick, -jnp.inf, work)
    mrel = run_max - h1_q                                       # (C, TQ)

    # ---- BasicConv([2C, 2C], bias=True, norm=None, act=relu).  The channel
    # interleave cat(h1, mrel) is folded into an even/odd column split of Wg.
    wg_h = gc_ref[:, :nc]
    wg_m = gc_ref[:, nc:2 * nc]
    bg = gc_ref[:, 2 * nc:2 * nc + 1]
    h2 = (jnp.dot(wg_h, h1_q, preferred_element_type=jnp.float32)
          + jnp.dot(wg_m, mrel, preferred_element_type=jnp.float32) + bg)
    h2 = jnp.maximum(h2, 0.0)                                   # (2C, TQ)

    # ---- fc2: 1x1x1 conv (2C -> C); its BatchNorm is applied in pass 3.
    w2 = fc2_ref[:, :nc2]
    b2 = fc2_ref[:, nc2:nc2 + 1]
    z2 = jnp.dot(w2, h2, preferred_element_type=jnp.float32) + b2
    z2_ref[0] = z2.astype(z2_ref.dtype)

    # ---- BN2 partial statistics (per batch; reduced over B outside -> the
    # batch grid axis stays "parallel" for megacore, review opt #3).
    if n_valid < npad:
        colq = qstart + lax.broadcasted_iota(jnp.int32, (1, tq), 1)
        z2s = jnp.where(colq < n_valid, z2, 0.0)
    else:
        z2s = z2
    upd = jnp.concatenate([jnp.sum(z2s, axis=1, keepdims=True),
                           jnp.sum(z2s * z2s, axis=1, keepdims=True)], axis=1)

    @pl.when(q == 0)
    def _():
        stats_ref[...] = jnp.zeros_like(stats_ref)

    stats_ref[...] += upd[None]


# --------------------------------------------------------------------------
# Pass 3: folded BN2 (single per-channel FMA) + residual add.
# --------------------------------------------------------------------------
def _finalize_kernel(z2_ref, x_ref, aff_ref, o_ref):
    a2 = aff_ref[:, 0:1]
    c2 = aff_ref[:, 1:2]
    z2 = z2_ref[0].astype(jnp.float32)
    x = x_ref[0].astype(jnp.float32)
    o_ref[0] = (a2 * z2 + c2 + x).astype(o_ref.dtype)


# --------------------------------------------------------------------------
# Wrapper
# --------------------------------------------------------------------------
def grapher_forward(x, params, *, k=9, knn_dtype=jnp.float32):
    """x: (B, C, H, W, D) float32 -> (B, C, H, W, D).

    knn_dtype=jnp.bfloat16 switches the similarity and one-hot gather matmuls
    to bf16 (2x MXU, half the N^2 operand footprint); kNN ranking in bf16 can
    legitimately flip near-tied neighbours, so f32 is the validated default.
    """
    B, C, H, W, D = x.shape
    N = H * W * D
    C2 = 2 * C
    assert N >= k, "need at least k graph nodes per volume"

    # Pad the node axis to a multiple of 128 so every tile is lane-dense.
    n_pad = ((N + 127) // 128) * 128
    xf = x.reshape(B, C, N)
    if n_pad != N:
        xf = jnp.pad(xf, ((0, 0), (0, 0), (0, n_pad - N)))

    vmem_limit = _vmem_limit_bytes()
    tn = _pick_tile(n_pad, C, vmem_limit)          # streaming tile (passes 1/3)
    n_tiles = n_pad // tn
    tq = _pick_query_tile(n_pad, vmem_limit)       # kNN query strip (pass 2)
    n_q = n_pad // tq
    m_total = B * N                                # valid elements per channel

    w1, b1, g1, be1 = params["w1"], params["b1"], params["g1"], params["be1"]
    wg, bg = params["wg"], params["bg"]
    w2, b2, g2, be2 = params["w2"], params["b2"], params["g2"], params["be2"]

    # ---------------- pass 1: fc1 conv + BN1 global statistics ---------------
    fc1w = jnp.concatenate([w1, b1], axis=1)                       # (C, C+1)
    z1, stats1p = pl.pallas_call(
        functools.partial(_fc1_stats_kernel, n_valid=N, n_pad=n_pad),
        out_shape=(jax.ShapeDtypeStruct((B, C, n_pad), jnp.float32),
                   jax.ShapeDtypeStruct((B, n_tiles, C, 2), jnp.float32)),
        grid=(B, n_tiles),
        in_specs=[
            pl.BlockSpec((1, C, tn), lambda b, t: (b, 0, t)),
            pl.BlockSpec((C, C + 1), lambda b, t: (0, 0)),
        ],
        out_specs=(pl.BlockSpec((1, C, tn), lambda b, t: (b, 0, t)),
                   pl.BlockSpec((1, 1, C, 2), lambda b, t: (b, t, 0, 0))),
        compiler_params=pltpu.CompilerParams(
            dimension_semantics=("parallel", "parallel"),
            vmem_limit_bytes=vmem_limit),
    )(xf, fc1w)

    stats1 = jnp.sum(stats1p, axis=(0, 1))                         # (C, 2)
    m1 = stats1[:, 0:1] / m_total
    v1 = jnp.maximum(stats1[:, 1:2] / m_total - m1 * m1, 0.0)  # biased var (PyTorch BN)
    a1 = g1 * lax.rsqrt(v1 + EPS)
    c1 = be1 - a1 * m1                                         # BN1 folded to one FMA

    # ---------------- pass 2: graph conv + fc2 conv + BN2 stats --------------
    fold1 = jnp.concatenate([a1, c1], axis=1)                      # (C, 2)
    gcp = jnp.concatenate([wg[:, 0::2], wg[:, 1::2], bg], axis=1)  # (2C, 2C+1)
    fc2p = jnp.concatenate([w2, b2], axis=1)                       # (C, 2C+1)

    z2, stats2p = pl.pallas_call(
        functools.partial(_graph_kernel, k=k, n_valid=N, knn_dtype=knn_dtype),
        out_shape=(jax.ShapeDtypeStruct((B, C, n_pad), x.dtype),
                   jax.ShapeDtypeStruct((B, C, 2), jnp.float32)),
        grid=(B, n_q),
        in_specs=[
            pl.BlockSpec((1, C, n_pad), lambda b, q: (b, 0, 0)),   # fetched once / batch
            pl.BlockSpec((C, 2), lambda b, q: (0, 0)),
            pl.BlockSpec((C2, C2 + 1), lambda b, q: (0, 0)),
            pl.BlockSpec((C, C2 + 1), lambda b, q: (0, 0)),
        ],
        out_specs=(pl.BlockSpec((1, C, tq), lambda b, q: (b, 0, q)),
                   pl.BlockSpec((1, C, 2), lambda b, q: (b, 0, 0))),
        scratch_shapes=[pltpu.VMEM((C, n_pad), jnp.float32),       # h1 (folded BN1)
                        pltpu.VMEM((C, n_pad), knn_dtype)],        # L2-normalized h1
        compiler_params=pltpu.CompilerParams(
            dimension_semantics=("parallel", "arbitrary"),
            vmem_limit_bytes=vmem_limit),
    )(z1, fold1, gcp, fc2p)

    stats2 = jnp.sum(stats2p, axis=0)                              # (C, 2)
    m2 = stats2[:, 0:1] / m_total
    v2 = jnp.maximum(stats2[:, 1:2] / m_total - m2 * m2, 0.0)
    a2 = g2 * lax.rsqrt(v2 + EPS)
    c2 = be2 - a2 * m2
    aff2 = jnp.concatenate([a2, c2], axis=1)                       # (C, 2)

    # ---------------- pass 3: folded BN2 + residual (megacore parallel) ------
    out = pl.pallas_call(
        _finalize_kernel,
        out_shape=jax.ShapeDtypeStruct((B, C, n_pad), x.dtype),
        grid=(B, n_tiles),
        in_specs=[
            pl.BlockSpec((1, C, tn), lambda b, t: (b, 0, t)),
            pl.BlockSpec((1, C, tn), lambda b, t: (b, 0, t)),
            pl.BlockSpec((C, 2), lambda b, t: (0, 0)),
        ],
        out_specs=pl.BlockSpec((1, C, tn), lambda b, t: (b, 0, t)),
        input_output_aliases={0: 0},        # reuse z2's HBM buffer for the output
        compiler_params=pltpu.CompilerParams(
            dimension_semantics=("parallel", "parallel"),
            vmem_limit_bytes=vmem_limit),
    )(z2, xf, aff2)

    if n_pad != N:
        out = out[:, :, :N]
    return out.reshape(B, C, H, W, D)


# --------------------------------------------------------------------------
# Pure-JAX reference (mirrors the PyTorch module) for validation.
# --------------------------------------------------------------------------
def grapher_reference(x, params, k):
    B, C, H, W, D = x.shape
    N = H * W * D
    xf = x.reshape(B, C, N).astype(jnp.float32)

    def conv(w, b, v):
        return jnp.einsum('oc,bcn->bon', w, v) + b[None]

    def bn(v, g, be):
        m = jnp.mean(v, axis=(0, 2), keepdims=True)
        var = jnp.mean((v - m) ** 2, axis=(0, 2), keepdims=True)
        return g[None] * (v - m) / jnp.sqrt(var + EPS) + be[None]

    h1 = bn(conv(params['w1'], params['b1'], xf), params['g1'], params['be1'])

    nrm = jnp.sqrt(jnp.sum(h1 * h1, axis=1, keepdims=True))
    fnrm = h1 / jnp.maximum(nrm, L2_EPS)
    sim = jnp.einsum('bcn,bcm->bnm', fnrm, fnrm)
    _, idx = lax.top_k(sim, k)                                  # (B, N, k)
    gathered = jax.vmap(lambda hb, ib: hb[:, ib])(h1, idx)      # (B, C, N, k)
    mrel = jnp.max(gathered - h1[..., None], axis=-1)           # (B, C, N)

    cat = jnp.stack([h1, mrel], axis=2).reshape(B, 2 * C, N)    # interleaved channels
    h2 = jax.nn.relu(conv(params['wg'], params['bg'], cat))
    y = bn(conv(params['w2'], params['b2'], h2), params['g2'], params['be2'])
    return (y + xf).reshape(B, C, H, W, D)


def init_params(key, channels):
    """Deterministic synthetic parameters (shapes match the PyTorch module)."""
    C, C2 = channels, 2 * channels
    ks = jax.random.split(key, 10)
    rnd = lambda kk, shape, s: s * jax.random.normal(kk, shape, jnp.float32)
    return dict(
        w1=rnd(ks[0], (C, C), 0.4),          # fc1 Conv3d(C, C, 1) weight (out, in)
        b1=rnd(ks[1], (C, 1), 0.1),
        g1=1.0 + rnd(ks[2], (C, 1), 0.05),   # BatchNorm3d(C) weight
        be1=rnd(ks[3], (C, 1), 0.05),        # BatchNorm3d(C) bias
        wg=rnd(ks[4], (C2, C2), 0.3),        # BasicConv Conv3d(2C, 2C, 1) weight
        bg=rnd(ks[5], (C2, 1), 0.1),
        w2=rnd(ks[6], (C, C2), 0.3),         # fc2 Conv3d(2C, C, 1) weight
        b2=rnd(ks[7], (C, 1), 0.1),
        g2=1.0 + rnd(ks[8], (C, 1), 0.05),
        be2=rnd(ks[9], (C, 1), 0.05),
    )


if __name__ == "__main__":
    key = jax.random.PRNGKey(0)
    kx, kp, kx2 = jax.random.split(key, 3)

    K_NEIGHBORS = 9                          # Grapher default kernel_size
    C = 4
    params = init_params(kp, C)
    fwd = jax.jit(functools.partial(grapher_forward, k=K_NEIGHBORS))

    # ---- test 1: N = 8*8*4 = 256 nodes (lane aligned), f32 kNN path ---------
    x = jax.random.normal(kx, (2, C, 8, 8, 4), jnp.float32)
    out = jax.block_until_ready(fwd(x, params))
    assert out.shape == x.shape and out.dtype == x.dtype
    ref = grapher_reference(x, params, K_NEIGHBORS)
    err = float(jnp.max(jnp.abs(out - ref)))
    assert err < 2e-3, f"mismatch vs reference: max abs err = {err}"

    # ---- test 2: N = 6*5*4 = 120 nodes -> padded to 128 (exercises masking) -
    x2 = jax.random.normal(kx2, (2, C, 6, 5, 4), jnp.float32)
    out2 = jax.block_until_ready(fwd(x2, params))
    ref2 = grapher_reference(x2, params, K_NEIGHBORS)
    err2 = float(jnp.max(jnp.abs(out2 - ref2)))
    assert err2 < 2e-3, f"padded-N mismatch vs reference: max abs err = {err2}"

    # ---- test 3: opt-in bf16 similarity/gather path (perf mode). bf16 kNN
    # ranking can legitimately flip near-tied neighbours vs the f32 reference,
    # so this is a compile/run + finiteness smoke test only.
    fwd_bf16 = jax.jit(functools.partial(grapher_forward, k=K_NEIGHBORS,
                                         knn_dtype=jnp.bfloat16))
    out_bf16 = jax.block_until_ready(fwd_bf16(x, params))
    assert out_bf16.shape == x.shape
    assert bool(jnp.all(jnp.isfinite(out_bf16)))

    print("KERNEL_OK")
</pallas_src>

<mosaic_0001>
module attributes {stable_mosaic.version = 11 : i64} {
  func.func @_finalize_kernel(%arg0: i32, %arg1: i32, %arg2: memref<1x4x256xf32, #tpu.memory_space<vmem>>, %arg3: memref<1x4x256xf32, #tpu.memory_space<vmem>>, %arg4: memref<4x2xf32, #tpu.memory_space<vmem>>, %arg5: memref<1x4x256xf32, #tpu.memory_space<vmem>>) attributes {dimension_semantics = [#tpu.dimension_semantics<parallel>, #tpu.dimension_semantics<parallel>], iteration_bounds = array<i64: 2, 1>, scalar_prefetch = 0 : i64, scratch_operands = 0 : i64, tpu.core_type = #tpu.core_type<tc>, window_params = [{transform_indices = @transform_0, window_bounds = array<i64: 1, 4, 256>}, {transform_indices = @transform_1, window_bounds = array<i64: 1, 4, 256>}, {pipeline_mode = #tpu.pipeline_mode<synchronous>, transform_indices = @transform_2, window_bounds = array<i64: 4, 2>}, {transform_indices = @transform_3, window_bounds = array<i64: 1, 4, 256>}]} {
    %c0 = arith.constant 0 : index
    %c0_0 = arith.constant 0 : index
    %0 = vector.load %arg4[%c0, %c0_0] : memref<4x2xf32, #tpu.memory_space<vmem>>, vector<4x1xf32>
    %c0_1 = arith.constant 0 : index
    %c1 = arith.constant 1 : index
    %1 = vector.load %arg4[%c0_1, %c1] : memref<4x2xf32, #tpu.memory_space<vmem>>, vector<4x1xf32>
    %c0_2 = arith.constant 0 : index
    %c0_3 = arith.constant 0 : index
    %c0_4 = arith.constant 0 : index
    %2 = vector.load %arg2[%c0_2, %c0_3, %c0_4] : memref<1x4x256xf32, #tpu.memory_space<vmem>>, vector<1x4x256xf32>
    %3 = vector.shape_cast %2 : vector<1x4x256xf32> to vector<4x256xf32>
    %c0_5 = arith.constant 0 : index
    %c0_6 = arith.constant 0 : index
    %c0_7 = arith.constant 0 : index
    %4 = vector.load %arg3[%c0_5, %c0_6, %c0_7] : memref<1x4x256xf32, #tpu.memory_space<vmem>>, vector<1x4x256xf32>
    %5 = vector.shape_cast %4 : vector<1x4x256xf32> to vector<4x256xf32>
    %6 = vector.broadcast %0 : vector<4x1xf32> to vector<4x256xf32>
    %7 = arith.mulf %6, %3 : vector<4x256xf32>
    %8 = vector.broadcast %1 : vector<4x1xf32> to vector<4x256xf32>
    %9 = arith.addf %7, %8 : vector<4x256xf32>
    %10 = arith.addf %9, %5 : vector<4x256xf32>
    %c0_8 = arith.constant 0 : index
    %c0_9 = arith.constant 0 : index
    %c0_10 = arith.constant 0 : index
    %11 = vector.load %arg5[%c0_8, %c0_9, %c0_10] : memref<1x4x256xf32, #tpu.memory_space<vmem>>, vector<1x4x256xf32>
    %12 = vector.shape_cast %11 : vector<1x4x256xf32> to vector<4x256xf32>
    %13 = vector.shape_cast %10 : vector<4x256xf32> to vector<1x4x256xf32>
    tpu.vector_store %arg5[%c0_8, %c0_9, %c0_10], %13 {strides = array<i32>} : memref<1x4x256xf32, #tpu.memory_space<vmem>>, vector<1x4x256xf32>,
    return
  }
  func.func @transform_0(%arg0: i32, %arg1: i32) -> (i32, i32, i32) {
    %c0_i32 = arith.constant 0 : i32
    %c0_i32_0 = arith.constant 0 : i32
    return %arg0, %c0_i32, %arg1 : i32, i32, i32
  }
  func.func @transform_1(%arg0: i32, %arg1: i32) -> (i32, i32, i32) {
    %c0_i32 = arith.constant 0 : i32
    %c0_i32_0 = arith.constant 0 : i32
    return %arg0, %c0_i32, %arg1 : i32, i32, i32
  }
  func.func @transform_2(%arg0: i32, %arg1: i32) -> (i32, i32) {
    %c0_i32 = arith.constant 0 : i32
    %c0_i32_0 = arith.constant 0 : i32
    %c0_i32_1 = arith.constant 0 : i32
    return %c0_i32, %c0_i32_0 : i32, i32
  }
  func.func @transform_3(%arg0: i32, %arg1: i32) -> (i32, i32, i32) {
    %c0_i32 = arith.constant 0 : i32
    %c0_i32_0 = arith.constant 0 : i32
    return %arg0, %c0_i32, %arg1 : i32, i32, i32
  }
}

module attributes {stable_mosaic.version = 11 : i64} {
  func.func @_fc1_stats_kernel(%arg0: i32, %arg1: i32, %arg2: memref<1x4x256xf32, #tpu.memory_space<vmem>>, %arg3: memref<4x5xf32, #tpu.memory_space<vmem>>, %arg4: memref<1x4x256xf32, #tpu.memory_space<vmem>>, %arg5: memref<1x1x4x2xf32, #tpu.memory_space<vmem>>) attributes {dimension_semantics = [#tpu.dimension_semantics<parallel>, #tpu.dimension_semantics<parallel>], iteration_bounds = array<i64: 2, 1>, scalar_prefetch = 0 : i64, scratch_operands = 0 : i64, tpu.core_type = #tpu.core_type<tc>, window_params = [{transform_indices = @transform_0, window_bounds = array<i64: 1, 4, 256>}, {pipeline_mode = #tpu.pipeline_mode<synchronous>, transform_indices = @transform_1, window_bounds = array<i64: 4, 5>}, {transform_indices = @transform_2, window_bounds = array<i64: 1, 4, 256>}, {transform_indices = @transform_3, window_bounds = array<i64: 1, 1, 4, 2>}]} {
    %c0 = arith.constant 0 : index
    %c0_0 = arith.constant 0 : index
    %c0_1 = arith.constant 0 : index
    %0 = vector.load %arg2[%c0, %c0_0, %c0_1] : memref<1x4x256xf32, #tpu.memory_space<vmem>>, vector<1x4x256xf32>
    %1 = vector.shape_cast %0 : vector<1x4x256xf32> to vector<4x256xf32>
    %c0_2 = arith.constant 0 : index
    %c0_3 = arith.constant 0 : index
    %2 = vector.load %arg3[%c0_2, %c0_3] : memref<4x5xf32, #tpu.memory_space<vmem>>, vector<4x4xf32>
    %c0_4 = arith.constant 0 : index
    %c4 = arith.constant 4 : index
    %3 = vector.load %arg3[%c0_4, %c4] : memref<4x5xf32, #tpu.memory_space<vmem>>, vector<4x1xf32>
    %cst = arith.constant dense<0.000000e+00> : vector<4x256xf32>
    %4 = tpu.matmul %2, %1, %cst {dimension_numbers = #tpu.dot_dimension_numbers<[1], [0], [0], [1], [0, 0, 1, 1], [], []>} : vector<4x4xf32>, vector<4x256xf32>, vector<4x256xf32> -> vector<4x256xf32>
    %5 = vector.broadcast %3 : vector<4x1xf32> to vector<4x256xf32>
    %6 = arith.addf %4, %5 : vector<4x256xf32>
    %c0_5 = arith.constant 0 : index
    %c0_6 = arith.constant 0 : index
    %c0_7 = arith.constant 0 : index
    %7 = vector.load %arg4[%c0_5, %c0_6, %c0_7] : memref<1x4x256xf32, #tpu.memory_space<vmem>>, vector<1x4x256xf32>
    %8 = vector.shape_cast %7 : vector<1x4x256xf32> to vector<4x256xf32>
    %9 = vector.shape_cast %6 : vector<4x256xf32> to vector<1x4x256xf32>
    tpu.vector_store %arg4[%c0_5, %c0_6, %c0_7], %9 {strides = array<i32>} : memref<1x4x256xf32, #tpu.memory_space<vmem>>, vector<1x4x256xf32>,
    %cst_8 = arith.constant dense<0.000000e+00> : vector<4xf32>
    %10 = vector.multi_reduction <add>, %6, %cst_8 [1] : vector<4x256xf32> to vector<4xf32>
    %11 = vector.shape_cast %10 : vector<4xf32> to vector<4x1xf32>
    %12 = arith.mulf %6, %6 : vector<4x256xf32>
    %cst_9 = arith.constant dense<0.000000e+00> : vector<4xf32>
    %13 = vector.multi_reduction <add>, %12, %cst_9 [1] : vector<4x256xf32> to vector<4xf32>
    %14 = vector.shape_cast %13 : vector<4xf32> to vector<4x1xf32>
    %15 = tpu.concatenate %11, %14 in 1 : vector<4x1xf32>, vector<4x1xf32> -> vector<4x2xf32>
    %16 = vector.shape_cast %15 : vector<4x2xf32> to vector<1x1x4x2xf32>
    %c0_10 = arith.constant 0 : index
    %c0_11 = arith.constant 0 : index
    %c0_12 = arith.constant 0 : index
    %c0_13 = arith.constant 0 : index
    %17 = vector.load %arg5[%c0_10, %c0_11, %c0_12, %c0_13] : memref<1x1x4x2xf32, #tpu.memory_space<vmem>>, vector<1x1x4x2xf32>
    tpu.vector_store %arg5[%c0_10, %c0_11, %c0_12, %c0_13], %16 {strides = array<i32>} : memref<1x1x4x2xf32, #tpu.memory_space<vmem>>, vector<1x1x4x2xf32>,
    return
  }
  func.func @transform_0(%arg0: i32, %arg1: i32) -> (i32, i32, i32) {
    %c0_i32 = arith.constant 0 : i32
    %c0_i32_0 = arith.constant 0 : i32
    return %arg0, %c0_i32, %arg1 : i32, i32, i32
  }
  func.func @transform_1(%arg0: i32, %arg1: i32) -> (i32, i32) {
    %c0_i32 = arith.constant 0 : i32
    %c0_i32_0 = arith.constant 0 : i32
    %c0_i32_1 = arith.constant 0 : i32
    return %c0_i32, %c0_i32_0 : i32, i32
  }
  func.func @transform_2(%arg0: i32, %arg1: i32) -> (i32, i32, i32) {
    %c0_i32 = arith.constant 0 : i32
    %c0_i32_0 = arith.constant 0 : i32
    return %arg0, %c0_i32, %arg1 : i32, i32, i32
  }
  func.func @transform_3(%arg0: i32, %arg1: i32) -> (i32, i32, i32, i32) {
    %c0_i32 = arith.constant 0 : i32
    %c0_i32_0 = arith.constant 0 : i32
    %c0_i32_1 = arith.constant 0 : i32
    return %arg0, %arg1, %c0_i32, %c0_i32_0 : i32, i32, i32, i32
  }
}

module attributes {stable_mosaic.version = 11 : i64} {
  func.func @_graph_kernel(%arg0: i32, %arg1: i32, %arg2: memref<1x4x256xf32, #tpu.memory_space<vmem>>, %arg3: memref<4x2xf32, #tpu.memory_space<vmem>>, %arg4: memref<8x9xf32, #tpu.memory_space<vmem>>, %arg5: memref<4x9xf32, #tpu.memory_space<vmem>>, %arg6: memref<1x4x256xf32, #tpu.memory_space<vmem>>, %arg7: memref<1x4x2xf32, #tpu.memory_space<vmem>>, %arg8: memref<4x256xf32, #tpu.memory_space<vmem>>, %arg9: memref<4x256xf32, #tpu.memory_space<vmem>>) attributes {dimension_semantics = [#tpu.dimension_semantics<parallel>, #tpu.dimension_semantics<arbitrary>], iteration_bounds = array<i64: 2, 1>, scalar_prefetch = 0 : i64, scratch_operands = 2 : i64, tpu.core_type = #tpu.core_type<tc>, window_params = [{transform_indices = @transform_0, window_bounds = array<i64: 1, 4, 256>}, {pipeline_mode = #tpu.pipeline_mode<synchronous>, transform_indices = @transform_1, window_bounds = array<i64: 4, 2>}, {pipeline_mode = #tpu.pipeline_mode<synchronous>, transform_indices = @transform_2, window_bounds = array<i64: 8, 9>}, {pipeline_mode = #tpu.pipeline_mode<synchronous>, transform_indices = @transform_3, window_bounds = array<i64: 4, 9>}, {transform_indices = @transform_4, window_bounds = array<i64: 1, 4, 256>}, {transform_indices = @transform_5, window_bounds = array<i64: 1, 4, 2>}]} {
    %c0 = arith.constant 0 : index
    %c0_0 = arith.constant 0 : index
    %0 = vector.load %arg3[%c0, %c0_0] : memref<4x2xf32, #tpu.memory_space<vmem>>, vector<4x1xf32>
    %c0_1 = arith.constant 0 : index
    %c1 = arith.constant 1 : index
    %1 = vector.load %arg3[%c0_1, %c1] : memref<4x2xf32, #tpu.memory_space<vmem>>, vector<4x1xf32>
    %c0_i32 = arith.constant 0 : i32
    %2 = arith.cmpi eq, %arg1, %c0_i32 : i32
    %3 = arith.extui %2 : i1 to i32
    %c0_i32_2 = arith.constant 0 : i32
    %4 = arith.cmpi ne, %3, %c0_i32_2 : i32
    scf.if %4 {
      %c0_75 = arith.constant 0 : index
      %c0_76 = arith.constant 0 : index
      %c0_77 = arith.constant 0 : index
      %181 = vector.load %arg2[%c0_75, %c0_76, %c0_77] : memref<1x4x256xf32, #tpu.memory_space<vmem>>, vector<1x4x256xf32>
      %182 = vector.shape_cast %181 : vector<1x4x256xf32> to vector<4x256xf32>
      %183 = vector.broadcast %0 : vector<4x1xf32> to vector<4x256xf32>
      %184 = arith.mulf %183, %182 : vector<4x256xf32>
      %185 = vector.broadcast %1 : vector<4x1xf32> to vector<4x256xf32>
      %186 = arith.addf %184, %185 : vector<4x256xf32>
      %c0_78 = arith.constant 0 : index
      %c0_79 = arith.constant 0 : index
      %187 = vector.load %arg8[%c0_78, %c0_79] : memref<4x256xf32, #tpu.memory_space<vmem>>, vector<4x256xf32>
      tpu.vector_store %arg8[%c0_78, %c0_79], %186 {strides = array<i32>} : memref<4x256xf32, #tpu.memory_space<vmem>>, vector<4x256xf32>,
      %188 = arith.mulf %186, %186 : vector<4x256xf32>
      %cst_80 = arith.constant dense<0.000000e+00> : vector<256xf32>
      %189 = vector.multi_reduction <add>, %188, %cst_80 [0] : vector<4x256xf32> to vector<256xf32>
      %190 = vector.shape_cast %189 : vector<256xf32> to vector<1x256xf32>
      %191 = math.sqrt %190 : vector<1x256xf32>
      %cst_81 = arith.constant 9.99999996E-13 : f32
      %192 = vector.broadcast %cst_81 : f32 to vector<1x256xf32>
      %193 = arith.maximumf %191, %192 : vector<1x256xf32>
      %194 = vector.broadcast %193 : vector<1x256xf32> to vector<4x256xf32>
      %195 = arith.divf %186, %194 : vector<4x256xf32>
      %c0_82 = arith.constant 0 : index
      %c0_83 = arith.constant 0 : index
      %196 = vector.load %arg9[%c0_82, %c0_83] : memref<4x256xf32, #tpu.memory_space<vmem>>, vector<4x256xf32>
      tpu.vector_store %arg9[%c0_82, %c0_83], %195 {strides = array<i32>} : memref<4x256xf32, #tpu.memory_space<vmem>>, vector<4x256xf32>,
    } else {
    }
    %c256_i32 = arith.constant 256 : i32
    %5 = arith.muli %arg1, %c256_i32 : i32
    %6 = tpu.assume_multiple %5, 256 : i32
    %c0_3 = arith.constant 0 : index
    %7 = arith.index_cast %6 : i32 to index
    %8 = vector.load %arg8[%c0_3, %7] : memref<4x256xf32, #tpu.memory_space<vmem>>, vector<4x256xf32>
    %c0_4 = arith.constant 0 : index
    %9 = arith.index_cast %6 : i32 to index
    %10 = vector.load %arg9[%c0_4, %9] : memref<4x256xf32, #tpu.memory_space<vmem>>, vector<4x256xf32>
    %c0_5 = arith.constant 0 : index
    %c0_6 = arith.constant 0 : index
    %11 = vector.load %arg9[%c0_5, %c0_6] : memref<4x256xf32, #tpu.memory_space<vmem>>, vector<4x256xf32>
    %c0_7 = arith.constant 0 : index
    %c0_8 = arith.constant 0 : index
    %12 = vector.load %arg8[%c0_7, %c0_8] : memref<4x256xf32, #tpu.memory_space<vmem>>, vector<4x256xf32>
    %cst = arith.constant dense<0.000000e+00> : vector<256x256xf32>
    %13 = tpu.matmul %10, %11, %cst {dimension_numbers = #tpu.dot_dimension_numbers<[0], [0], [1], [1], [0, 1, 1, 1], [], []>} : vector<4x256xf32>, vector<4x256xf32>, vector<256x256xf32> -> vector<256x256xf32>
    %14 = tpu.iota {dimensions = array<i32: 1>} : vector<256x256xi32>
    %c256_i32_9 = arith.constant 256 : i32
    %15 = arith.muli %arg1, %c256_i32_9 : i32
    %16 = tpu.iota {dimensions = array<i32: 0>} : vector<256x256xi32>
    %17 = vector.broadcast %15 : i32 to vector<256x256xi32>
    %18 = arith.addi %17, %16 : vector<256x256xi32>
    %19 = arith.cmpi eq, %14, %18 : vector<256x256xi32>
    %cst_10 = arith.constant 0xFF800000 : f32
    %20 = vector.broadcast %cst_10 : f32 to vector<256x256xf32>
    %21 = arith.select %19, %20, %13 : vector<256x256xi1>, vector<256x256xf32>
    %22 = arith.sitofp %14 : vector<256x256xi32> to vector<256x256xf32>
    %cst_11 = arith.constant dense<0xFF800000> : vector<256xf32>
    %23 = vector.multi_reduction <maximumf>, %21, %cst_11 [1] : vector<256x256xf32> to vector<256xf32>
    %24 = vector.shape_cast %23 : vector<256xf32> to vector<256x1xf32>
    %25 = vector.broadcast %24 : vector<256x1xf32> to vector<256x256xf32>
    %26 = arith.cmpf oge, %21, %25 : vector<256x256xf32>
    %cst_12 = arith.constant 2.560000e+02 : f32
    %27 = vector.broadcast %cst_12 : f32 to vector<256x256xf32>
    %28 = arith.select %26, %22, %27 : vector<256x256xi1>, vector<256x256xf32>
    %cst_13 = arith.constant dense<0x7F800000> : vector<256xf32>
    %29 = vector.multi_reduction <minimumf>, %28, %cst_13 [1] : vector<256x256xf32> to vector<256xf32>
    %30 = vector.shape_cast %29 : vector<256xf32> to vector<256x1xf32>
    %31 = vector.broadcast %30 : vector<256x1xf32> to vector<256x256xf32>
    %32 = arith.cmpf oeq, %22, %31 : vector<256x256xf32>
    %33 = arith.extui %32 : vector<256x256xi1> to vector<256x256xi32>
    %34 = arith.sitofp %33 : vector<256x256xi32> to vector<256x256xf32>
    %cst_14 = arith.constant dense<0.000000e+00> : vector<4x256xf32>
    %35 = tpu.matmul %12, %34, %cst_14 {dimension_numbers = #tpu.dot_dimension_numbers<[1], [1], [0], [0], [0, 0, 1, 0], [], []>} : vector<4x256xf32>, vector<256x256xf32>, vector<4x256xf32> -> vector<4x256xf32>
    %36 = arith.maximumf %8, %35 : vector<4x256xf32>
    %cst_15 = arith.constant 0xFF800000 : f32
    %37 = vector.broadcast %cst_15 : f32 to vector<256x256xf32>
    %38 = arith.select %32, %37, %21 : vector<256x256xi1>, vector<256x256xf32>
    %cst_16 = arith.constant dense<0xFF800000> : vector<256xf32>
    %39 = vector.multi_reduction <maximumf>, %38, %cst_16 [1] : vector<256x256xf32> to vector<256xf32>
    %40 = vector.shape_cast %39 : vector<256xf32> to vector<256x1xf32>
    %41 = vector.broadcast %40 : vector<256x1xf32> to vector<256x256xf32>
    %42 = arith.cmpf oge, %38, %41 : vector<256x256xf32>
    %cst_17 = arith.constant 2.560000e+02 : f32
    %43 = vector.broadcast %cst_17 : f32 to vector<256x256xf32>
    %44 = arith.select %42, %22, %43 : vector<256x256xi1>, vector<256x256xf32>
    %cst_18 = arith.constant dense<0x7F800000> : vector<256xf32>
    %45 = vector.multi_reduction <minimumf>, %44, %cst_18 [1] : vector<256x256xf32> to vector<256xf32>
    %46 = vector.shape_cast %45 : vector<256xf32> to vector<256x1xf32>
    %47 = vector.broadcast %46 : vector<256x1xf32> to vector<256x256xf32>
    %48 = arith.cmpf oeq, %22, %47 : vector<256x256xf32>
    %49 = arith.extui %48 : vector<256x256xi1> to vector<256x256xi32>
    %50 = arith.sitofp %49 : vector<256x256xi32> to vector<256x256xf32>
    %cst_19 = arith.constant dense<0.000000e+00> : vector<4x256xf32>
    %51 = tpu.matmul %12, %50, %cst_19 {dimension_numbers = #tpu.dot_dimension_numbers<[1], [1], [0], [0], [0, 0, 1, 0], [], []>} : vector<4x256xf32>, vector<256x256xf32>, vector<4x256xf32> -> vector<4x256xf32>
    %52 = arith.maximumf %36, %51 : vector<4x256xf32>
    %cst_20 = arith.constant 0xFF800000 : f32
    %53 = vector.broadcast %cst_20 : f32 to vector<256x256xf32>
    %54 = arith.select %48, %53, %38 : vector<256x256xi1>, vector<256x256xf32>
    %cst_21 = arith.constant dense<0xFF800000> : vector<256xf32>
    %55 = vector.multi_reduction <maximumf>, %54, %cst_21 [1] : vector<256x256xf32> to vector<256xf32>
    %56 = vector.shape_cast %55 : vector<256xf32> to vector<256x1xf32>
    %57 = vector.broadcast %56 : vector<256x1xf32> to vector<256x256xf32>
    %58 = arith.cmpf oge, %54, %57 : vector<256x256xf32>
    %cst_22 = arith.constant 2.560000e+02 : f32
    %59 = vector.broadcast %cst_22 : f32 to vector<256x256xf32>
    %60 = arith.select %58, %22, %59 : vector<256x256xi1>, vector<256x256xf32>
    %cst_23 = arith.constant dense<0x7F800000> : vector<256xf32>
    %61 = vector.multi_reduction <minimumf>, %60, %cst_23 [1] : vector<256x256xf32> to vector<256xf32>
    %62 = vector.shape_cast %61 : vector<256xf32> to vector<256x1xf32>
    %63 = vector.broadcast %62 : vector<256x1xf32> to vector<256x256xf32>
    %64 = arith.cmpf oeq, %22, %63 : vector<256x256xf32>
    %65 = arith.extui %64 : vector<256x256xi1> to vector<256x256xi32>
    %66 = arith.sitofp %65 : vector<256x256xi32> to vector<256x256xf32>
    %cst_24 = arith.constant dense<0.000000e+00> : vector<4x256xf32>
    %67 = tpu.matmul %12, %66, %cst_24 {dimension_numbers = #tpu.dot_dimension_numbers<[1], [1], [0], [0], [0, 0, 1, 0], [], []>} : vector<4x256xf32>, vector<256x256xf32>, vector<4x256xf32> -> vector<4x256xf32>
    %68 = arith.maximumf %52, %67 : vector<4x256xf32>
    %cst_25 = arith.constant 0xFF800000 : f32
    %69 = vector.broadcast %cst_25 : f32 to vector<256x256xf32>
    %70 = arith.select %64, %69, %54 : vector<256x256xi1>, vector<256x256xf32>
    %cst_26 = arith.constant dense<0xFF800000> : vector<256xf32>
    %71 = vector.multi_reduction <maximumf>, %70, %cst_26 [1] : vector<256x256xf32> to vector<256xf32>
    %72 = vector.shape_cast %71 : vector<256xf32> to vector<256x1xf32>
    %73 = vector.broadcast %72 : vector<256x1xf32> to vector<256x256xf32>
    %74 = arith.cmpf oge, %70, %73 : vector<256x256xf32>
    %cst_27 = arith.constant 2.560000e+02 : f32
    %75 = vector.broadcast %cst_27 : f32 to vector<256x256xf32>
    %76 = arith.select %74, %22, %75 : vector<256x256xi1>, vector<256x256xf32>
    %cst_28 = arith.constant dense<0x7F800000> : vector<256xf32>
    %77 = vector.multi_reduction <minimumf>, %76, %cst_28 [1] : vector<256x256xf32> to vector<256xf32>
    %78 = vector.shape_cast %77 : vector<256xf32> to vector<256x1xf32>
    %79 = vector.broadcast %78 : vector<256x1xf32> to vector<256x256xf32>
    %80 = arith.cmpf oeq, %22, %79 : vector<256x256xf32>
    %81 = arith.extui %80 : vector<256x256xi1> to vector<256x256xi32>
    %82 = arith.sitofp %81 : vector<256x256xi32> to vector<256x256xf32>
    %cst_29 = arith.constant dense<0.000000e+00> : vector<4x256xf32>
    %83 = tpu.matmul %12, %82, %cst_29 {dimension_numbers = #tpu.dot_dimension_numbers<[1], [1], [0], [0], [0, 0, 1, 0], [], []>} : vector<4x256xf32>, vector<256x256xf32>, vector<4x256xf32> -> vector<4x256xf32>
    %84 = arith.maximumf %68, %83 : vector<4x256xf32>
    %cst_30 = arith.constant 0xFF800000 : f32
    %85 = vector.broadcast %cst_30 : f32 to vector<256x256xf32>
    %86 = arith.select %80, %85, %70 : vector<256x256xi1>, vector<256x256xf32>
    %cst_31 = arith.constant dense<0xFF800000> : vector<256xf32>
    %87 = vector.multi_reduction <maximumf>, %86, %cst_31 [1] : vector<256x256xf32> to vector<256xf32>
    %88 = vector.shape_cast %87 : vector<256xf32> to vector<256x1xf32>
    %89 = vector.broadcast %88 : vector<256x1xf32> to vector<256x256xf32>
    %90 = arith.cmpf oge, %86, %89 : vector<256x256xf32>
    %cst_32 = arith.constant 2.560000e+02 : f32
    %91 = vector.broadcast %cst_32 : f32 to vector<256x256xf32>
    %92 = arith.select %90, %22, %91 : vector<256x256xi1>, vector<256x256xf32>
    %cst_33 = arith.constant dense<0x7F800000> : vector<256xf32>
    %93 = vector.multi_reduction <minimumf>, %92, %cst_33 [1] : vector<256x256xf32> to vector<256xf32>
    %94 = vector.shape_cast %93 : vector<256xf32> to vector<256x1xf32>
    %95 = vector.broadcast %94 : vector<256x1xf32> to vector<256x256xf32>
    %96 = arith.cmpf oeq, %22, %95 : vector<256x256xf32>
    %97 = arith.extui %96 : vector<256x256xi1> to vector<256x256xi32>
    %98 = arith.sitofp %97 : vector<256x256xi32> to vector<256x256xf32>
    %cst_34 = arith.constant dense<0.000000e+00> : vector<4x256xf32>
    %99 = tpu.matmul %12, %98, %cst_34 {dimension_numbers = #tpu.dot_dimension_numbers<[1], [1], [0], [0], [0, 0, 1, 0], [], []>} : vector<4x256xf32>, vector<256x256xf32>, vector<4x256xf32> -> vector<4x256xf32>
    %100 = arith.maximumf %84, %99 : vector<4x256xf32>
    %cst_35 = arith.constant 0xFF800000 : f32
    %101 = vector.broadcast %cst_35 : f32 to vector<256x256xf32>
    %102 = arith.select %96, %101, %86 : vector<256x256xi1>, vector<256x256xf32>
    %cst_36 = arith.constant dense<0xFF800000> : vector<256xf32>
    %103 = vector.multi_reduction <maximumf>, %102, %cst_36 [1] : vector<256x256xf32> to vector<256xf32>
    %104 = vector.shape_cast %103 : vector<256xf32> to vector<256x1xf32>
    %105 = vector.broadcast %104 : vector<256x1xf32> to vector<256x256xf32>
    %106 = arith.cmpf oge, %102, %105 : vector<256x256xf32>
    %cst_37 = arith.constant 2.560000e+02 : f32
    %107 = vector.broadcast %cst_37 : f32 to vector<256x256xf32>
    %108 = arith.select %106, %22, %107 : vector<256x256xi1>, vector<256x256xf32>
    %cst_38 = arith.constant dense<0x7F800000> : vector<256xf32>
    %109 = vector.multi_reduction <minimumf>, %108, %cst_38 [1] : vector<256x256xf32> to vector<256xf32>
    %110 = vector.shape_cast %109 : vector<256xf32> to vector<256x1xf32>
    %111 = vector.broadcast %110 : vector<256x1xf32> to vector<256x256xf32>
    %112 = arith.cmpf oeq, %22, %111 : vector<256x256xf32>
    %113 = arith.extui %112 : vector<256x256xi1> to vector<256x256xi32>
    %114 = arith.sitofp %113 : vector<256x256xi32> to vector<256x256xf32>
    %cst_39 = arith.constant dense<0.000000e+00> : vector<4x256xf32>
    %115 = tpu.matmul %12, %114, %cst_39 {dimension_numbers = #tpu.dot_dimension_numbers<[1], [1], [0], [0], [0, 0, 1, 0], [], []>} : vector<4x256xf32>, vector<256x256xf32>, vector<4x256xf32> -> vector<4x256xf32>
    %116 = arith.maximumf %100, %115 : vector<4x256xf32>
    %cst_40 = arith.constant 0xFF800000 : f32
    %117 = vector.broadcast %cst_40 : f32 to vector<256x256xf32>
    %118 = arith.select %112, %117, %102 : vector<256x256xi1>, vector<256x256xf32>
    %cst_41 = arith.constant dense<0xFF800000> : vector<256xf32>
    %119 = vector.multi_reduction <maximumf>, %118, %cst_41 [1] : vector<256x256xf32> to vector<256xf32>
    %120 = vector.shape_cast %119 : vector<256xf32> to vector<256x1xf32>
    %121 = vector.broadcast %120 : vector<256x1xf32> to vector<256x256xf32>
    %122 = arith.cmpf oge, %118, %121 : vector<256x256xf32>
    %cst_42 = arith.constant 2.560000e+02 : f32
    %123 = vector.broadcast %cst_42 : f32 to vector<256x256xf32>
    %124 = arith.select %122, %22, %123 : vector<256x256xi1>, vector<256x256xf32>
    %cst_43 = arith.constant dense<0x7F800000> : vector<256xf32>
    %125 = vector.multi_reduction <minimumf>, %124, %cst_43 [1] : vector<256x256xf32> to vector<256xf32>
    %126 = vector.shape_cast %125 : vector<256xf32> to vector<256x1xf32>
    %127 = vector.broadcast %126 : vector<256x1xf32> to vector<256x256xf32>
    %128 = arith.cmpf oeq, %22, %127 : vector<256x256xf32>
    %129 = arith.extui %128 : vector<256x256xi1> to vector<256x256xi32>
    %130 = arith.sitofp %129 : vector<256x256xi32> to vector<256x256xf32>
    %cst_44 = arith.constant dense<0.000000e+00> : vector<4x256xf32>
    %131 = tpu.matmul %12, %130, %cst_44 {dimension_numbers = #tpu.dot_dimension_numbers<[1], [1], [0], [0], [0, 0, 1, 0], [], []>} : vector<4x256xf32>, vector<256x256xf32>, vector<4x256xf32> -> vector<4x256xf32>
    %132 = arith.maximumf %116, %131 : vector<4x256xf32>
    %cst_45 = arith.constant 0xFF800000 : f32
    %133 = vector.broadcast %cst_45 : f32 to vector<256x256xf32>
    %134 = arith.select %128, %133, %118 : vector<256x256xi1>, vector<256x256xf32>
    %cst_46 = arith.constant dense<0xFF800000> : vector<256xf32>
    %135 = vector.multi_reduction <maximumf>, %134, %cst_46 [1] : vector<256x256xf32> to vector<256xf32>
    %136 = vector.shape_cast %135 : vector<256xf32> to vector<256x1xf32>
    %137 = vector.broadcast %136 : vector<256x1xf32> to vector<256x256xf32>
    %138 = arith.cmpf oge, %134, %137 : vector<256x256xf32>
    %cst_47 = arith.constant 2.560000e+02 : f32
    %139 = vector.broadcast %cst_47 : f32 to vector<256x256xf32>
    %140 = arith.select %138, %22, %139 : vector<256x256xi1>, vector<256x256xf32>
    %cst_48 = arith.constant dense<0x7F800000> : vector<256xf32>
    %141 = vector.multi_reduction <minimumf>, %140, %cst_48 [1] : vector<256x256xf32> to vector<256xf32>
    %142 = vector.shape_cast %141 : vector<256xf32> to vector<256x1xf32>
    %143 = vector.broadcast %142 : vector<256x1xf32> to vector<256x256xf32>
    %144 = arith.cmpf oeq, %22, %143 : vector<256x256xf32>
    %145 = arith.extui %144 : vector<256x256xi1> to vector<256x256xi32>
    %146 = arith.sitofp %145 : vector<256x256xi32> to vector<256x256xf32>
    %cst_49 = arith.constant dense<0.000000e+00> : vector<4x256xf32>
    %147 = tpu.matmul %12, %146, %cst_49 {dimension_numbers = #tpu.dot_dimension_numbers<[1], [1], [0], [0], [0, 0, 1, 0], [], []>} : vector<4x256xf32>, vector<256x256xf32>, vector<4x256xf32> -> vector<4x256xf32>
    %148 = arith.maximumf %132, %147 : vector<4x256xf32>
    %149 = arith.subf %148, %8 : vector<4x256xf32>
    %c0_50 = arith.constant 0 : index
    %c0_51 = arith.constant 0 : index
    %150 = vector.load %arg4[%c0_50, %c0_51] : memref<8x9xf32, #tpu.memory_space<vmem>>, vector<8x4xf32>
    %c0_52 = arith.constant 0 : index
    %c4 = arith.constant 4 : index
    %151 = vector.load %arg4[%c0_52, %c4] : memref<8x9xf32, #tpu.memory_space<vmem>>, vector<8x4xf32>
    %c0_53 = arith.constant 0 : index
    %c8 = arith.constant 8 : index
    %152 = vector.load %arg4[%c0_53, %c8] : memref<8x9xf32, #tpu.memory_space<vmem>>, vector<8x1xf32>
    %cst_54 = arith.constant dense<0.000000e+00> : vector<8x256xf32>
    %153 = tpu.matmul %150, %8, %cst_54 {dimension_numbers = #tpu.dot_dimension_numbers<[1], [0], [0], [1], [0, 0, 1, 1], [], []>} : vector<8x4xf32>, vector<4x256xf32>, vector<8x256xf32> -> vector<8x256xf32>
    %cst_55 = arith.constant dense<0.000000e+00> : vector<8x256xf32>
    %154 = tpu.matmul %151, %149, %cst_55 {dimension_numbers = #tpu.dot_dimension_numbers<[1], [0], [0], [1], [0, 0, 1, 1], [], []>} : vector<8x4xf32>, vector<4x256xf32>, vector<8x256xf32> -> vector<8x256xf32>
    %155 = arith.addf %153, %154 : vector<8x256xf32>
    %156 = vector.broadcast %152 : vector<8x1xf32> to vector<8x256xf32>
    %157 = arith.addf %155, %156 : vector<8x256xf32>
    %cst_56 = arith.constant 0.000000e+00 : f32
    %158 = vector.broadcast %cst_56 : f32 to vector<8x256xf32>
    %159 = arith.maximumf %157, %158 : vector<8x256xf32>
    %c0_57 = arith.constant 0 : index
    %c0_58 = arith.constant 0 : index
    %160 = vector.load %arg5[%c0_57, %c0_58] : memref<4x9xf32, #tpu.memory_space<vmem>>, vector<4x8xf32>
    %c0_59 = arith.constant 0 : index
    %c8_60 = arith.constant 8 : index
    %161 = vector.load %arg5[%c0_59, %c8_60] : memref<4x9xf32, #tpu.memory_space<vmem>>, vector<4x1xf32>
    %cst_61 = arith.constant dense<0.000000e+00> : vector<4x256xf32>
    %162 = tpu.matmul %160, %159, %cst_61 {dimension_numbers = #tpu.dot_dimension_numbers<[1], [0], [0], [1], [0, 0, 1, 1], [], []>} : vector<4x8xf32>, vector<8x256xf32>, vector<4x256xf32> -> vector<4x256xf32>
    %163 = vector.broadcast %161 : vector<4x1xf32> to vector<4x256xf32>
    %164 = arith.addf %162, %163 : vector<4x256xf32>
    %c0_62 = arith.constant 0 : index
    %c0_63 = arith.constant 0 : index
    %c0_64 = arith.constant 0 : index
    %165 = vector.load %arg6[%c0_62, %c0_63, %c0_64] : memref<1x4x256xf32, #tpu.memory_space<vmem>>, vector<1x4x256xf32>
    %166 = vector.shape_cast %165 : vector<1x4x256xf32> to vector<4x256xf32>
    %167 = vector.shape_cast %164 : vector<4x256xf32> to vector<1x4x256xf32>
    tpu.vector_store %arg6[%c0_62, %c0_63, %c0_64], %167 {strides = array<i32>} : memref<1x4x256xf32, #tpu.memory_space<vmem>>, vector<1x4x256xf32>,
    %cst_65 = arith.constant dense<0.000000e+00> : vector<4xf32>
    %168 = vector.multi_reduction <add>, %164, %cst_65 [1] : vector<4x256xf32> to vector<4xf32>
    %169 = vector.shape_cast %168 : vector<4xf32> to vector<4x1xf32>
    %170 = arith.mulf %164, %164 : vector<4x256xf32>
    %cst_66 = arith.constant dense<0.000000e+00> : vector<4xf32>
    %171 = vector.multi_reduction <add>, %170, %cst_66 [1] : vector<4x256xf32> to vector<4xf32>
    %172 = vector.shape_cast %171 : vector<4xf32> to vector<4x1xf32>
    %173 = tpu.concatenate %169, %172 in 1 : vector<4x1xf32>, vector<4x1xf32> -> vector<4x2xf32>
    %c0_i32_67 = arith.constant 0 : i32
    %174 = arith.cmpi eq, %arg1, %c0_i32_67 : i32
    %175 = arith.extui %174 : i1 to i32
    %c0_i32_68 = arith.constant 0 : i32
    %176 = arith.cmpi ne, %175, %c0_i32_68 : i32
    scf.if %176 {
      %cst_75 = arith.constant 0.000000e+00 : f32
      %181 = vector.broadcast %cst_75 : f32 to vector<1x4x2xf32>
      %c0_76 = arith.constant 0 : index
      %c0_77 = arith.constant 0 : index
      %c0_78 = arith.constant 0 : index
      %182 = vector.load %arg7[%c0_76, %c0_77, %c0_78] : memref<1x4x2xf32, #tpu.memory_space<vmem>>, vector<1x4x2xf32>
      tpu.vector_store %arg7[%c0_76, %c0_77, %c0_78], %181 {strides = array<i32>} : memref<1x4x2xf32, #tpu.memory_space<vmem>>, vector<1x4x2xf32>,
    } else {
    }
    %c0_69 = arith.constant 0 : index
    %c0_70 = arith.constant 0 : index
    %c0_71 = arith.constant 0 : index
    %177 = vector.load %arg7[%c0_69, %c0_70, %c0_71] : memref<1x4x2xf32, #tpu.memory_space<vmem>>, vector<1x4x2xf32>
    %178 = vector.shape_cast %173 : vector<4x2xf32> to vector<1x4x2xf32>
    %179 = arith.addf %177, %178 : vector<1x4x2xf32>
    %c0_72 = arith.constant 0 : index
    %c0_73 = arith.constant 0 : index
    %c0_74 = arith.constant 0 : index
    %180 = vector.load %arg7[%c0_72, %c0_73, %c0_74] : memref<1x4x2xf32, #tpu.memory_space<vmem>>, vector<1x4x2xf32>
    tpu.vector_store %arg7[%c0_72, %c0_73, %c0_74], %179 {strides = array<i32>} : memref<1x4x2xf32, #tpu.memory_space<vmem>>, vector<1x4x2xf32>,
    return
  }
  func.func @transform_0(%arg0: i32, %arg1: i32) -> (i32, i32, i32) {
    %c0_i32 = arith.constant 0 : i32
    %c0_i32_0 = arith.constant 0 : i32
    %c0_i32_1 = arith.constant 0 : i32
    return %arg0, %c0_i32, %c0_i32_0 : i32, i32, i32
  }
  func.func @transform_1(%arg0: i32, %arg1: i32) -> (i32, i32) {
    %c0_i32 = arith.constant 0 : i32
    %c0_i32_0 = arith.constant 0 : i32
    %c0_i32_1 = arith.constant 0 : i32
    return %c0_i32, %c0_i32_0 : i32, i32
  }
  func.func @transform_2(%arg0: i32, %arg1: i32) -> (i32, i32) {
    %c0_i32 = arith.constant 0 : i32
    %c0_i32_0 = arith.constant 0 : i32
    %c0_i32_1 = arith.constant 0 : i32
    return %c0_i32, %c0_i32_0 : i32, i32
  }
  func.func @transform_3(%arg0: i32, %arg1: i32) -> (i32, i32) {
    %c0_i32 = arith.constant 0 : i32
    %c0_i32_0 = arith.constant 0 : i32
    %c0_i32_1 = arith.constant 0 : i32
    return %c0_i32, %c0_i32_0 : i32, i32
  }
  func.func @transform_4(%arg0: i32, %arg1: i32) -> (i32, i32, i32) {
    %c0_i32 = arith.constant 0 : i32
    %c0_i32_0 = arith.constant 0 : i32
    return %arg0, %c0_i32, %arg1 : i32, i32, i32
  }
  func.func @transform_5(%arg0: i32, %arg1: i32) -> (i32, i32, i32) {
    %c0_i32 = arith.constant 0 : i32
    %c0_i32_0 = arith.constant 0 : i32
    %c0_i32_1 = arith.constant 0 : i32
    return %arg0, %c0_i32, %c0_i32_0 : i32, i32, i32
  }
}

</mosaic_0001>

<bundles_post_ra>
// kernel: grapher_forward.5
= control target key start
LH: loop header
LB: loop body
LE: loop exit
PB: predicated region body
PF: predicated region fallthrough
CT: control target
= control target key end

     0   :  { %s472_s12 = smov 0   ;;  %s474_s13 = smov 0   ;;  %s511_s0 = inlined_call_operand.vmem [shape: f32[2,4,256], index: 0, kind: input, shape index: {}, may-alias: {0,3}]   ;;  %s512_s1 = inlined_call_operand.vmem [shape: f32[2,4,256], index: 1, kind: input, shape index: {}]   ;;  %s513_s2 = inlined_call_operand.vmem [shape: f32[4,2], index: 2, kind: input, shape index: {}]   ;;  %s514_s3 = inlined_call_operand.vmem [shape: f32[2,4,256], index: 3, kind: output, shape index: {}, may-alias: {0,3}]  }
   0x1   :  { %s476_s14 = smov 0  }
   0x2 LB: > { %s25_s15 = sadd.s32 1, %s444_s13  ;;  %p384_p0 = scmp.ge.s32.totalorder %s448_s14, 1  ;;  %s448_s14 = sphi %s476_s14, %s13_s14   ;;  %s444_s13 = sphi %s474_s13, %s516_s13   ;;  %s440_s12 = sphi %s472_s12, %s515_s12  }
   0x3   : > { %p27_p1 = scmp.ge.s32.totalorder %s25_s15, 2  ;;  %p175_p2 = scmp.lt.s32.totalorder %s448_s14, 3 }
   0x5   : > { %s518_s15 = smov (%p27_p1, %s25_s15), 0  ;;  %p176_p3 = pnand %p384_p0, %p175_p2 }
   0x6   : > { %v246_v0 = vld [vmem:[%s513_s2] sm:$0xf] (!%p176_p3)  ;;  %v450_v1 = vmov (!%p176_p3), 0   ;;  %v451_v2 = vmov (!%p176_p3), 1   ;;  %p217_p4 = scmp.lt.s32.totalorder (!%p176_p3), %s440_s12, 1 }
   0x7   : > { %179 = sbr.rel (%p176_p3) target bundleno = 148 (0x94), region = 32  ;;  %422 = vset.pattern.permute.xlu0 (!%p176_p3), %v450_v1 }
   0x8   : > { %251 = vperm.xlu0 (!%p176_p3), %422, %v246_v0  }
   0xc   : > { %423 = vset.pattern.permute.xlu0 (!%p176_p3), %v451_v2 }
   0xd   : > { %260 = vperm.xlu0 (!%p176_p3), %423, %v246_v0  }
   0xe   : > { %s520_s12 = smov (!%p217_p4, %s440_s12), 1 }
   0xf   : > { %s393_s18 = sshll.u32 %s520_s12, 3 }
  0x10   : > { %s224_s21 = scalar_lea.vmem %s511_s0, %s393_s18  ;;  %s234_s24 = scalar_lea.vmem %s512_s1, %s393_s18 }
  0x11   : > { %v247_v3 = vld [vmem:[%s224_s21] sm:$0xff]  ;;  %s244_s27 = scalar_lea.vmem %s514_s3, %s393_s18 }
  0x12   : > { %v255_v5 = vcombine.high %v247_v3, %v247_v3  ;;  %v248_v6 = vld [vmem:[%s234_s24] sm:$0xff] }
  0x13   : > { %v266_v9 = vcombine.high %v248_v6, %v248_v6 }
  0x87   : > { %v252_v4 = vpop.permute.xlu0 %251 }
  0x88   : > { %v257_v7 = vmul.f32 %v252_v4, %v247_v3  ;;  %v258_v8 = vmul.f32 %v255_v5, %v252_v4 }
  0x8c   : > { %v261_v10 = vpop.permute.xlu0 %260 }
  0x8d   : > { %v263_v11 = vadd.f32 %v261_v10, %v257_v7  ;;  %v264_v12 = vadd.f32 %v261_v10, %v258_v8 }
  0x8f   : > { %v268_v13 = vadd.f32 %v263_v11, %v248_v6  ;;  %v269_v14 = vadd.f32 %v266_v9, %v264_v12 }
  0x91   : > { %v272_v15 = vcombine.low %v268_v13, %v269_v14 }
  0x93   : > { %274 = vst [vmem:[%s244_s27] sm:$0xff] %v272_v15 }
  0x94 PF: > { %s13_s14 = sadd.s32 1, %s448_s14   ;;  %s515_s12 = smov %s444_s13 }
  0x95   : > { %p10_p5 = scmp.ge.s32.totalorder %s13_s14, 4   ;;  %s516_s13 = smov %s518_s15 }
  0x97   :  { %12 = sbr.rel (!%p10_p5) target bundleno = 2 (0x2), region = 65 }

// kernel: grapher_forward.3
= control target key start
LH: loop header
LB: loop body
LE: loop exit
PB: predicated region body
PF: predicated region fallthrough
CT: control target
= control target key end

     0   :  { %s557_s12 = smov 0   ;;  %s559_s13 = smov 0   ;;  %s606_s0 = inlined_call_operand.vmem [shape: f32[2,4,256], index: 0, kind: input, shape index: {}]   ;;  %s607_s1 = inlined_call_operand.vmem [shape: f32[4,5], index: 1, kind: input, shape index: {}]   ;;  %s608_s2 = inlined_call_operand.vmem [shape: f32[2,4,256], index: 2, kind: output, shape index: {0}]   ;;  %s609_s3 = inlined_call_operand.vmem [shape: f32[2,1,4,2], index: 3, kind: output, shape index: {1}]  }
   0x1   :  { %s561_s14 = smov 0  }
   0x2 LB: > { %s26_s15 = sadd.s32 1, %s529_s13  ;;  %p470_p0 = scmp.ge.s32.totalorder %s533_s14, 1  ;;  %s533_s14 = sphi %s561_s14, %s14_s14   ;;  %s529_s13 = sphi %s559_s13, %s611_s13   ;;  %s525_s12 = sphi %s557_s12, %s610_s12  }
   0x3   : > { %p28_p1 = scmp.ge.s32.totalorder %s26_s15, 2  ;;  %p163_p2 = scmp.lt.s32.totalorder %s533_s14, 3 }
   0x5   : > { %s613_s15 = smov (%p28_p1, %s26_s15), 0  ;;  %p164_p3 = pnand %p470_p0, %p163_p2 }
   0x6   : > { %p203_p4 = scmp.lt.s32.totalorder (!%p164_p3), %s525_s12, 1  ;;  %v535_v0 = vmov (!%p164_p3), 0.0   ;;  %v230_v1 = vld [vmem:[%s607_s1] sm:$0xf] (!%p164_p3)  ;;  %v536_v2 = vmov (!%p164_p3), 4   ;;  %vm241_vm0 = vcmask (!%p164_p3), 1043456  }
   0x7   : > { %167 = sbr.rel (%p164_p3) target bundleno = 386 (0x182), region = 28  ;;  %310 = vmatprep.mubr.f32.mxu0 (!%p164_p3), %v535_v0  ;;  %509 = vset.pattern.permute.xlu0 (!%p164_p3), %v536_v2  ;;  %vm238_vm1 = vcmask (!%p164_p3), 31744   ;;  %vm334_vm2 = vcmask (!%p164_p3), 7168   ;;  %vm336_vm3 = vcmask (!%p164_p3), 11264  }
   0x8   : > { %233 = vperm.xlu0 (!%p164_p3), %509, %v230_v1  }
   0xe   : > { %s615_s12 = smov (!%p203_p4, %s525_s12), 1 }
   0xf   : > { %s481_s18 = sshll.u32 %s615_s12, 3  ;;  %s475_s25 = sshll.u32 %s615_s12, 2 }
  0x10   : > { %s210_s21 = scalar_lea.vmem %s606_s0, %s481_s18  ;;  %s220_s24 = scalar_lea.vmem %s608_s2, %s481_s18 }
  0x11   : > { %v229_v3 = vld [vmem:[%s210_s21] sm:$0xff]  ;;  %s228_s28 = scalar_lea.vmem %s609_s3, %s475_s25 }
  0x12   : > { %v237_v4 = vcombine.high %v229_v3, %v229_v3 }
  0x14   : > { %476 = vmatprep.subr.msk.mxu0 %vm241_vm0, %v237_v4 }
  0x15   : > { %477 = vmatpush1.msk.msra.mxu0 %vm241_vm0, %v229_v3 }
  0x16   : > { %478 = vmatmul.mubr.msk.f32.vlgmr.msra.gmra.mrb[0].mxu0 %vm238_vm1, %v230_v1 }
  0x87   : > { %v234_v5 = vpop.permute.xlu0 %233 }
  0xe9   : > { %v312_v6 = vpop.f32.mrb[0].mxu0 }
  0xea   : > { %v313_v7 = vadd.f32 %v312_v6, %v234_v5  ;;  %v314_v8 = vpop.f32.mrb[1].mxu0 }
  0xeb   : > { %v315_v9 = vadd.f32 %v314_v8, %v234_v5 }
  0xec   : > { %v322_v10 = vsel %vm241_vm0, %v313_v7, 0.0  ;;  %v327_v11 = vmul.f32 %v313_v7, %v313_v7 }
  0xed   : > { %v319_v12 = vcombine.low %v313_v7, %v315_v9  ;;  %v323_v13 = vsel %vm241_vm0, %v315_v9, 0.0  ;;  %v328_v14 = vmul.f32 %v315_v9, %v315_v9 }
  0xee   : > { %v324_v15 = vadd.f32 %v323_v13, %v322_v10  ;;  %v329_v16 = vsel %vm241_vm0, %v327_v11, 0.0 }
  0xef   : > { %321 = vst [vmem:[%s220_s24] sm:$0xff] %v319_v12  ;;  %v330_v17 = vsel %vm241_vm0, %v328_v14, 0.0 }
  0xf0   : > { %325 = vadd.xlane.f32.xlu0 %v324_v15  ;;  %v331_v18 = vadd.f32 %v330_v17, %v329_v16 }
  0xf2   : > { %332 = vadd.xlane.f32.xlu1 %v331_v18 }
 0x17d   : > { %v326_v19 = vpop.xlane.xlu0 %325 }
 0x17f   : > { %v333_v20 = vpop.xlane.xlu1 %332 }
 0x180   : > { %v335_v21 = vsel %vm334_vm2, %v326_v19, %v333_v20 }
 0x181   : > { %337 = vst.msk [vmem:[%s228_s28] sm:$0xf] %vm336_vm3, %v335_v21 }
 0x182 PF: > { %s14_s14 = sadd.s32 1, %s533_s14   ;;  %s610_s12 = smov %s529_s13 }
 0x183   : > { %p11_p5 = scmp.ge.s32.totalorder %s14_s14, 4   ;;  %s611_s13 = smov %s613_s15 }
 0x185   :  { %13 = sbr.rel (!%p11_p5) target bundleno = 2 (0x2), region = 70 }

// kernel: grapher_forward.4
= control target key start
LH: loop header
LB: loop body
LE: loop exit
PB: predicated region body
PF: predicated region fallthrough
CT: control target
= control target key end

     0   :  { %s8214_s18 = smov 0   ;;  %s8216_s19 = smov 0   ;;  %s12866_s0 = inlined_call_operand.vmem [shape: f32[2,4,256], index: 0, kind: input, shape index: {}]   ;;  %s12867_s1 = inlined_call_operand.vmem [shape: f32[4,2], index: 1, kind: input, shape index: {}]   ;;  %s12868_s2 = inlined_call_operand.vmem [shape: f32[8,9], index: 2, kind: input, shape index: {}]   ;;  %s12869_s3 = inlined_call_operand.vmem [shape: f32[4,9], index: 3, kind: input, shape index: {}]   ;;  %s12870_s4 = inlined_call_operand.vmem [shape: f32[2,4,256], index: 4, kind: output, shape index: {0}]   ;;  %s12871_s5 = inlined_call_operand.vmem [shape: f32[2,4,2], index: 5, kind: output, shape index: {1}]  }
   0x1   :  { %s8218_s20 = smov 0  }
   0x2 LB: > { %s28_s21 = sadd.s32 1, %s8172_s19  ;;  %p6520_p0 = scmp.ge.s32.totalorder %s8176_s20, 1  ;;  %s8176_s20 = sphi %s8218_s20, %s16_s20   ;;  %s8172_s19 = sphi %s8216_s19, %s13629_s19   ;;  %s8168_s18 = sphi %s8214_s18, %s13628_s18  }
   0x3   : > { %p30_p1 = scmp.ge.s32.totalorder %s28_s21, 2  ;;  %p204_p2 = scmp.lt.s32.totalorder %s8176_s20, 3 }
   0x5   : > { %s13631_s21 = smov (%p30_p1, %s28_s21), 0  ;;  %p205_p3 = pnand %p6520_p0, %p204_p2 }
   0x7   : > { %208 = sbr.rel (%p205_p3) target bundleno = 3897 (0xf39), region = 36 }
   0xe   : > { %v259_v0 = vld [vmem:[%s12867_s1] sm:$0xf]  ;;  %v8178_v1 = vmov 0   ;;  %v8179_v2 = vmov 1   ;;  %p240_p4 = scmp.lt.s32.totalorder %s8168_s18, 1  ;;  %v12872_v3 = vmov 0.0  }
   0xf   : > { %8141 = vset.pattern.permute.xlu0 %v8178_v1  ;;  %574 = vmatprep.mubr.f32.mxu0 %v12872_v3  ;;  %vm288_vm0 = vcmask 1043456   ;;  %vm408_vm5 = vcmask 31744   ;;  %s8182_s30 = smov 124  }
  0x10   : > { %267 = vperm.xlu0 %8141, %v259_v0   ;;  %s13633_s18 = smov (!%p240_p4, %s8168_s18), 1 }
  0x11   : > { %s7593_s24 = sshll.u32 %s13633_s18, 3  ;;  %s6525_s11 = sshll.u32 %s13633_s18, 2 }
  0x12   : > { %s244_s27 = scalar_lea.vmem %s12866_s0, %s7593_s24  ;;  %s253_s10 = scalar_lea.vmem %s12870_s4, %s7593_s24 }
  0x13   : > { %v264_v4 = vld [vmem:[%s244_s27] sm:$0xff]  ;;  %s258_s14 = scalar_lea.vmem %s12871_s5, %s6525_s11 }
  0x14   : > { %8142 = vset.pattern.permute.xlu0 %v8179_v2  ;;  %v271_v6 = vcombine.high %v264_v4, %v264_v4 }
  0x15   : > { %276 = vperm.xlu0 %8142, %v259_v0  }
  0x8f   : > { %v268_v5 = vpop.permute.xlu0 %267 }
  0x90   : > { %v273_v7 = vmul.f32 %v268_v5, %v264_v4  ;;  %v274_v8 = vmul.f32 %v271_v6, %v268_v5 }
  0x94   : > { %v277_v9 = vpop.permute.xlu0 %276 }
  0x95   : > { %v279_v10 = vadd.f32 %v277_v9, %v273_v7  ;;  %v280_v11 = vadd.f32 %v277_v9, %v274_v8 }
  0x97   : > { %v8244_v12 = vcombine.low %v279_v10, %v280_v11  ;;  %v286_v13 = vmul.f32 %v279_v10, %v279_v10  ;;  %v287_v14 = vmul.f32 %v280_v11, %v280_v11  ;;  %v8246_v15 = vcombine.low %v280_v11, %v280_v11 }
  0x99   : > { %13137 = vst [vmem:[#allocation4_spill] sm:$0xff] %v8244_v12  ;;  %13138 = vst [vmem:[#allocation5_spill] sm:$0xff] %v8246_v15  ;;  %v289_v16 = vsel %vm288_vm0, %v286_v13, 0.0  ;;  %v296_v17 = vsel %vm288_vm0, %v287_v14, 0.0  ;;  %1545 = vmatprep.mubr.f32.mxu1 %v8246_v15 }
  0x9a   : > { %v290_v18 = vrot.slane %v289_v16, 4  ;;  %v297_v19 = vrot.slane %v296_v17, 4 }
  0x9c   : > { %v291_v20 = vadd.f32 %v290_v18, %v289_v16  ;;  %v298_v21 = vadd.f32 %v297_v19, %v296_v17  ;;  %v767_v19 = vlaneseq }
  0x9e   : > { %v292_v22 = vrot.slane %v291_v20, 2  ;;  %v299_v23 = vrot.slane %v298_v21, 2 }
  0xa0   : > { %v293_v24 = vadd.f32 %v292_v22, %v291_v20  ;;  %v300_v25 = vadd.f32 %v299_v23, %v298_v21  ;;  %v8317_v20 = vand.u32 127, %v767_v19  ;;  %v8319_v21 = vshrl.u32 %v767_v19, 7 }
  0xa2   : > { %v294_v26 = vrot.slane %v293_v24, 1  ;;  %v301_v27 = vrot.slane %v300_v25, 1  ;;  %vm836_vm6 = vcmp.eq.s32.totalorder %v8317_v20, %v8319_v21  ;;  %v772_v22 = vadd.s32 8, %v8319_v21 }
  0xa4   : > { %v295_v28 = vadd.f32 %v294_v26, %v293_v24  ;;  %v302_v29 = vadd.f32 %v301_v27, %v300_v25  ;;  %vm838_vm7 = vcmp.eq.s32.totalorder %v8317_v20, %v772_v22  ;;  %v773_v27 = vadd.s32 16, %v8319_v21 }
  0xa6   : > { %8146 = vrsqrt.f32 %v302_v29  ;;  %vm312_vm1 = vcmp.eq.f32.partialorder %v302_v29, inf  ;;  %v315_v33 = vand.u32 2147483648, %v302_v29  ;;  %vm314_vm2 = vcmp.eq.f32.partialorder %v302_v29, 0.0 }
  0xa7   : > { %8148 = vrsqrt.f32 %v295_v28  ;;  %vm305_vm3 = vcmp.eq.f32.partialorder %v295_v28, inf  ;;  %v308_v36 = vand.u32 2147483648, %v295_v28  ;;  %vm307_vm4 = vcmp.eq.f32.partialorder %v295_v28, 0.0 }
  0xa8   : > { %vm840_vm8 = vcmp.eq.s32.totalorder %v8317_v20, %v773_v27 }
  0xb0   : > { %v8147_v30 = vpop.eup %8146 }
  0xb1   : > { %v8149_v31 = vpop.eup %8148  ;;  %v311_v32 = vmul.f32 %v8147_v30, %v302_v29 }
  0xb2   : > { %v304_v34 = vmul.f32 %v8149_v31, %v295_v28 }
  0xb3   : > { %v313_v35 = vsel %vm312_vm1, %v302_v29, %v311_v32  ;;  %v774_v32 = vadd.s32 24, %v8319_v21 }
  0xb4   : > { %v316_v37 = vsel %vm314_vm2, %v315_v33, %v313_v35  ;;  %v306_v38 = vsel %vm305_vm3, %v295_v28, %v304_v34 }
  0xb5   : > { %v318_v39 = vmax.f32 %v316_v37, 1e-12  ;;  %v309_v40 = vsel %vm307_vm4, %v308_v36, %v306_v38  ;;  %vm842_vm9 = vcmp.eq.s32.totalorder %v8317_v20, %v774_v32  ;;  %v775_v37 = vadd.s32 32, %v8319_v21 }
  0xb6   : > { %v317_v41 = vmax.f32 %v309_v40, 1e-12  ;;  %v785_v32 = vadd.s32 112, %v8319_v21 }
  0xb7   : > { %8150 = vrcp.f32 %v318_v39  ;;  %vm844_vm10 = vcmp.eq.s32.totalorder %v8317_v20, %v775_v37 }
  0xb8   : > { %8152 = vrcp.f32 %v317_v41 }
  0xc1   : > { %v8151_v42 = vpop.eup %8150 }
  0xc2   : > { %v8153_v43 = vpop.eup %8152  ;;  %v322_v44 = vmul.f32 %v8151_v42, %v280_v11  ;;  %v776_v42 = vadd.s32 40, %v8319_v21 }
  0xc3   : > { %v320_v45 = vmul.f32 %v8153_v43, %v279_v10 }
  0xc4   : > { %v7595_v46 = vcombine.low %v322_v44, %v322_v44  ;;  %vm846_vm11 = vcmp.eq.s32.totalorder %v8317_v20, %v776_v42 }
  0xc5   : > { %v325_v47 = vcombine.low %v320_v45, %v322_v44 }
  0xc6   : > { %6526 = vmatprep.subr.msk.mxu0 %vm288_vm0, %v7595_v46 }
  0xc7   : > { %342 = vxpose.xlu1.b32.start.end [1/1] (short) %v325_v47, 128  ;;  %6527 = vmatpush1.msk.msra.mxu0 %vm288_vm0, %v325_v47  ;;  %v777_v47 = vadd.s32 48, %v8319_v21 }
  0xc9   : > { %vm848_vm12 = vcmp.eq.s32.totalorder %v8317_v20, %v777_v47 }
 0x104   : > { %374 = vxpose.xlu1.b32.start.end [1/1] (short) %v7595_v46, 128 }
 0x147   : > { %v358_v48 = vpop.trf.xlu1 }
 0x148   : > { %6528 = vmatmul.mubr.msk.f32.vlgmr.msra.gmra.mrb[0].mxu0 %vm408_vm5, %v358_v48 }
 0x149   : > { %580 = vmatprep.mubr.f32.mxu0 %v12872_v3 }
 0x14b   : > { %v359_v49 = vpop.trf.xlu1 }
 0x14c   : > { %6529 = vmatmul.mubr.msk.f32.gmra.mrb[2].mxu0 %vm408_vm5, %v359_v49 }
 0x14d   : > { %586 = vmatprep.mubr.f32.mxu0 %v12872_v3 }
 0x14f   : > { %v360_v50 = vpop.trf.xlu1 }
 0x150   : > { %6530 = vmatmul.mubr.msk.f32.gmra.mrb[4].mxu0 %vm408_vm5, %v360_v50 }
 0x151   : > { %592 = vmatprep.mubr.f32.mxu0 %v12872_v3 }
 0x153   : > { %v361_v51 = vpop.trf.xlu1 }
 0x154   : > { %6531 = vmatmul.mubr.msk.f32.gmra.mrb[6].mxu0 %vm408_vm5, %v361_v51 }
 0x155   : > { %598 = vmatprep.mubr.f32.mxu0 %v12872_v3 }
 0x157   : > { %v362_v52 = vpop.trf.xlu1 }
 0x158   : > { %6532 = vmatmul.mubr.msk.f32.gmra.mrb[8].mxu0 %vm408_vm5, %v362_v52  ;;  %v778_v52 = vadd.s32 56, %v8319_v21 }
 0x159   : > { %604 = vmatprep.mubr.f32.mxu0 %v12872_v3 }
 0x15a   : > { %vm850_vm13 = vcmp.eq.s32.totalorder %v8317_v20, %v778_v52 }
 0x15b   : > { %v363_v53 = vpop.trf.xlu1 }
 0x15c   : > { %6533 = vmatmul.mubr.msk.f32.gmra.mrb[10].mxu0 %vm408_vm5, %v363_v53 }
 0x15d   : > { %610 = vmatprep.mubr.f32.mxu0 %v12872_v3 }
 0x15f   : > { %v364_v54 = vpop.trf.xlu1 }
 0x160   : > { %6534 = vmatmul.mubr.msk.f32.gmra.mrb[12].mxu0 %vm408_vm5, %v364_v54 }
 0x161   : > { %616 = vmatprep.mubr.f32.mxu0 %v12872_v3 }
 0x163   : > { %v365_v55 = vpop.trf.xlu1 }
 0x164   : > { %6535 = vmatmul.mubr.msk.f32.gmra.mrb[14].mxu0 %vm408_vm5, %v365_v55 }
 0x165   : > { %622 = vmatprep.mubr.f32.mxu0 %v12872_v3 }
 0x167   : > { %v366_v56 = vpop.trf.xlu1 }
 0x168   : > { %6536 = vmatmul.mubr.msk.f32.gmra.mrb[16].mxu0 %vm408_vm5, %v366_v56 }
 0x169   : > { %628 = vmatprep.mubr.f32.mxu0 %v12872_v3 }
 0x16b   : > { %v367_v57 = vpop.trf.xlu1 }
 0x16c   : > { %6537 = vmatmul.mubr.msk.f32.gmra.mrb[18].mxu0 %vm408_vm5, %v367_v57  ;;  %v779_v57 = vadd.s32 64, %v8319_v21 }
 0x16d   : > { %634 = vmatprep.mubr.f32.mxu0 %v12872_v3 }
 0x16e   : > { %vm852_vm14 = vcmp.eq.s32.totalorder %v8317_v20, %v779_v57 }
 0x16f   : > { %v368_v58 = vpop.trf.xlu1 }
 0x170   : > { %6538 = vmatmul.mubr.msk.f32.gmra.mrb[20].mxu0 %vm408_vm5, %v368_v58 }
 0x171   : > { %640 = vmatprep.mubr.f32.mxu0 %v12872_v3 }
 0x173   : > { %v369_v59 = vpop.trf.xlu1 }
 0x174   : > { %6539 = vmatmul.mubr.msk.f32.gmra.mrb[22].mxu0 %vm408_vm5, %v369_v59 }
 0x175   : > { %646 = vmatprep.mubr.f32.mxu0 %v12872_v3 }
 0x177   : > { %v370_v60 = vpop.trf.xlu1 }
 0x178   : > { %6540 = vmatmul.mubr.msk.f32.gmra.mrb[24].mxu0 %vm408_vm5, %v370_v60 }
 0x179   : > { %652 = vmatprep.mubr.f32.mxu0 %v12872_v3 }
 0x17b   : > { %v371_v61 = vpop.trf.xlu1 }
 0x17c   : > { %6541 = vmatmul.mubr.msk.f32.gmra.mrb[26].mxu0 %vm408_vm5, %v371_v61 }
 0x17d   : > { %658 = vmatprep.mubr.f32.mxu0 %v12872_v3 }
 0x17f   : > { %v372_v62 = vpop.trf.xlu1 }
 0x180   : > { %6542 = vmatmul.mubr.msk.f32.gmra.mrb[28].mxu0 %vm408_vm5, %v372_v62  ;;  %v780_v62 = vadd.s32 72, %v8319_v21 }
 0x181   : > { %664 = vmatprep.mubr.f32.mxu0 %v12872_v3 }
 0x182   : > { %vm854_vm15 = vcmp.eq.s32.totalorder %v8317_v20, %v780_v62 }
 0x183   : > { %v373_v63 = vpop.trf.xlu1 }
 0x184   : > { %6543 = vmatmul.mubr.msk.f32.gmra.mrb[30].mxu0 %vm408_vm5, %v373_v63 }
 0x185   : > { %670 = vmatprep.mubr.f32.mxu0 %v12872_v3 }
 0x187   : > { %v390_v0 = vpop.trf.xlu1 }
 0x188   : > { %6544 = vmatmul.mubr.msk.f32.gmra.mrb[32].mxu0 %vm408_vm5, %v390_v0 }
 0x189   : > { %676 = vmatprep.mubr.f32.mxu0 %v12872_v3 }
 0x18b   : > { %v391_v1 = vpop.trf.xlu1 }
 0x18c   : > { %6545 = vmatmul.mubr.msk.f32.gmra.mrb[34].mxu0 %vm408_vm5, %v391_v1 }
 0x18d   : > { %682 = vmatprep.mubr.f32.mxu0 %v12872_v3 }
 0x18f   : > { %v392_v2 = vpop.trf.xlu1 }
 0x190   : > { %6546 = vmatmul.mubr.msk.f32.gmra.mrb[36].mxu0 %vm408_vm5, %v392_v2 }
 0x191   : > { %688 = vmatprep.mubr.f32.mxu0 %v12872_v3 }
 0x193   : > { %v393_v4 = vpop.trf.xlu1 }
 0x194   : > { %6547 = vmatmul.mubr.msk.f32.gmra.mrb[38].mxu0 %vm408_vm5, %v393_v4  ;;  %v781_v4 = vadd.s32 80, %v8319_v21 }
 0x195   : > { %694 = vmatprep.mubr.f32.mxu0 %v12872_v3 }
 0x196   : > { %vm856_vm1 = vcmp.eq.s32.totalorder %v8317_v20, %v781_v4  ;;  %v789_v4 = vadd.s32 144, %v8319_v21 }
 0x197   : > { %v394_v5 = vpop.trf.xlu1 }
 0x198   : > { %6548 = vmatmul.mubr.msk.f32.gmra.mrb[40].mxu0 %vm408_vm5, %v394_v5 }
 0x199   : > { %700 = vmatprep.mubr.f32.mxu0 %v12872_v3 }
 0x19b   : > { %v395_v6 = vpop.trf.xlu1 }
 0x19c   : > { %6549 = vmatmul.mubr.msk.f32.gmra.mrb[42].mxu0 %vm408_vm5, %v395_v6 }
 0x19d   : > { %706 = vmatprep.mubr.f32.mxu0 %v12872_v3 }
 0x19f   : > { %v396_v7 = vpop.trf.xlu1 }
 0x1a0   : > { %6550 = vmatmul.mubr.msk.f32.gmra.mrb[44].mxu0 %vm408_vm5, %v396_v7 }
 0x1a1   : > { %712 = vmatprep.mubr.f32.mxu0 %v12872_v3 }
 0x1a3   : > { %v397_v8 = vpop.trf.xlu1 }
 0x1a4   : > { %6551 = vmatmul.mubr.msk.f32.gmra.mrb[46].mxu0 %vm408_vm5, %v397_v8 }
 0x1a5   : > { %718 = vmatprep.mubr.f32.mxu0 %v12872_v3 }
 0x1a7   : > { %v398_v9 = vpop.trf.xlu1 }
 0x1a8   : > { %6552 = vmatmul.mubr.msk.f32.gmra.mrb[48].mxu0 %vm408_vm5, %v398_v9  ;;  %v782_v9 = vadd.s32 88, %v8319_v21 }
 0x1a9   : > { %724 = vmatprep.mubr.f32.mxu0 %v12872_v3 }
 0x1aa   : > { %vm858_vm2 = vcmp.eq.s32.totalorder %v8317_v20, %v782_v9 }
 0x1ab   : > { %v399_v10 = vpop.trf.xlu1 }
 0x1ac   : > { %6553 = vmatmul.mubr.msk.f32.gmra.mrb[50].mxu0 %vm408_vm5, %v399_v10 }
 0x1ad   : > { %730 = vmatprep.mubr.f32.mxu0 %v12872_v3 }
 0x1af   : > { %v400_v11 = vpop.trf.xlu1 }
 0x1b0   : > { %6554 = vmatmul.mubr.msk.f32.gmra.mrb[52].mxu0 %vm408_vm5, %v400_v11 }
 0x1b1   : > { %736 = vmatprep.mubr.f32.mxu0 %v12872_v3 }
 0x1b3   : > { %v401_v13 = vpop.trf.xlu1 }
 0x1b4   : > { %6555 = vmatmul.mubr.msk.f32.gmra.mrb[54].mxu0 %vm408_vm5, %v401_v13 }
 0x1b5   : > { %742 = vmatprep.mubr.f32.mxu0 %v12872_v3 }
 0x1b7   : > { %v402_v14 = vpop.trf.xlu1 }
 0x1b8   : > { %6556 = vmatmul.mubr.msk.f32.gmra.mrb[56].mxu0 %vm408_vm5, %v402_v14 }
 0x1b9   : > { %748 = vmatprep.mubr.f32.mxu0 %v12872_v3 }
 0x1bb   : > { %v403_v16 = vpop.trf.xlu1 }
 0x1bc   : > { %6557 = vmatmul.mubr.msk.f32.gmra.mrb[58].mxu0 %vm408_vm5, %v403_v16  ;;  %v783_v16 = vadd.s32 96, %v8319_v21 }
 0x1bd   : > { %754 = vmatprep.mubr.f32.mxu0 %v12872_v3 }
 0x1be   : > { %vm860_vm3 = vcmp.eq.s32.totalorder %v8317_v20, %v783_v16 }
 0x1bf   : > { %v404_v17 = vpop.trf.xlu1 }
 0x1c0   : > { %6558 = vmatmul.mubr.msk.f32.gmra.mrb[60].mxu0 %vm408_vm5, %v404_v17 }
 0x1c1   : > { %760 = vmatprep.mubr.f32.mxu0 %v12872_v3 }
 0x1c3   : > { %v405_v18 = vpop.trf.xlu1 }
 0x1c4   : > { %6559 = vmatmul.mubr.msk.f32.gmra.mrb[62].mxu0 %vm408_vm5, %v405_v18 }
 0x1c5   : > { %2197 = vmatprep.mubr.f32.mxu0 %v8246_v15 }
 0x21b   : > { %v576_v23 = vpop.f32.mrb[0].mxu0 }
 0x21c   : > { %v8324_v24 = vsel %vm836_vm6, -inf, %v576_v23  ;;  %v8326_v25 = vpop.f32.mrb[1].mxu0  ;;  %v784_v23 = vadd.s32 104, %v8319_v21  ;;  %vm864_vm6 = vcmp.eq.s32.totalorder %v8317_v20, %v785_v32 }
 0x21d   : > { %v966_v26 = vmax.f32 %v8324_v24, %v8326_v25 }
 0x21e   : > { %vm862_vm4 = vcmp.eq.s32.totalorder %v8317_v20, %v784_v23 }
 0x21f   : > { %967 = vmax.xlane.f32.xlu0 %v966_v26  ;;  %v582_v28 = vpop.f32.mrb[2].mxu0 }
 0x220   : > { %v8332_v29 = vsel %vm838_vm7, -inf, %v582_v28  ;;  %v8334_v30 = vpop.f32.mrb[3].mxu0 }
 0x221   : > { %v969_v31 = vmax.f32 %v8332_v29, %v8334_v30 }
 0x223   : > { %970 = vmax.xlane.f32.xlu0 %v969_v31  ;;  %v588_v33 = vpop.f32.mrb[4].mxu0 }
 0x224   : > { %v8340_v34 = vsel %vm840_vm8, -inf, %v588_v33  ;;  %v8342_v35 = vpop.f32.mrb[5].mxu0 }
 0x225   : > { %v972_v36 = vmax.f32 %v8340_v34, %v8342_v35 }
 0x227   : > { %973 = vmax.xlane.f32.xlu0 %v972_v36  ;;  %v594_v38 = vpop.f32.mrb[6].mxu0 }
 0x228   : > { %v8348_v39 = vsel %vm842_vm9, -inf, %v594_v38  ;;  %v8350_v40 = vpop.f32.mrb[7].mxu0 }
 0x229   : > { %13139 = vst [vmem:[#allocation6_spill] sm:$0xff] %v8348_v39  ;;  %v975_v41 = vmax.f32 %v8348_v39, %v8350_v40 }
 0x22b   : > { %976 = vmax.xlane.f32.xlu0 %v975_v41  ;;  %v600_v43 = vpop.f32.mrb[8].mxu0  ;;  %v786_v41 = vadd.s32 120, %v8319_v21 }
 0x22c   : > { %v8356_v44 = vsel %vm844_vm10, -inf, %v600_v43  ;;  %v8358_v45 = vpop.f32.mrb[9].mxu0 }
 0x22d   : > { %13140 = vst [vmem:[#allocation7_spill] sm:$0xff] %v8358_v45  ;;  %v978_v46 = vmax.f32 %v8356_v44, %v8358_v45  ;;  %vm866_vm7 = vcmp.eq.s32.totalorder %v8317_v20, %v786_v41  ;;  %v792_v41 = vadd.s32 168, %v8319_v21 }
 0x22f   : > { %979 = vmax.xlane.f32.xlu0 %v978_v46  ;;  %v606_v48 = vpop.f32.mrb[10].mxu0 }
 0x230   : > { %v8364_v49 = vsel %vm846_vm11, -inf, %v606_v48  ;;  %v8366_v50 = vpop.f32.mrb[11].mxu0  ;;  %v8444_v48 = vadd.s32 128, %v8317_v20 }
 0x231   : > { %v981_v51 = vmax.f32 %v8364_v49, %v8366_v50 }
 0x232   : > { %vm873_vm10 = vcmp.eq.s32.totalorder %v8444_v48, %v789_v4 }
 0x233   : > { %982 = vmax.xlane.f32.xlu0 %v981_v51  ;;  %v612_v53 = vpop.f32.mrb[12].mxu0  ;;  %v787_v51 = vadd.s32 128, %v8319_v21 }
 0x234   : > { %v8372_v54 = vsel %vm848_vm12, -inf, %v612_v53  ;;  %v8374_v55 = vpop.f32.mrb[13].mxu0 }
 0x235   : > { %13141 = vst [vmem:[#allocation8_spill] sm:$0xff] %v8374_v55  ;;  %v984_v56 = vmax.f32 %v8372_v54, %v8374_v55  ;;  %vm869_vm8 = vcmp.eq.s32.totalorder %v8444_v48, %v787_v51 }
 0x237   : > { %985 = vmax.xlane.f32.xlu0 %v984_v56  ;;  %v618_v58 = vpop.f32.mrb[14].mxu0 }
 0x238   : > { %v8380_v59 = vsel %vm850_vm13, -inf, %v618_v58  ;;  %v8382_v60 = vpop.f32.mrb[15].mxu0  ;;  %v788_v58 = vadd.s32 136, %v8319_v21  ;;  %vm879_vm13 = vcmp.eq.s32.totalorder %v8444_v48, %v792_v41 }
 0x239   : > { %v987_v61 = vmax.f32 %v8380_v59, %v8382_v60 }
 0x23a   : > { %vm871_vm9 = vcmp.eq.s32.totalorder %v8444_v48, %v788_v58 }
 0x23b   : > { %988 = vmax.xlane.f32.xlu1 %v987_v61  ;;  %v624_v63 = vpop.f32.mrb[16].mxu0 }
 0x23c   : > { %v8388_v0 = vsel %vm852_vm14, -inf, %v624_v63  ;;  %v8390_v1 = vpop.f32.mrb[17].mxu0 }
 0x23d   : > { %v990_v2 = vmax.f32 %v8388_v0, %v8390_v1 }
 0x23f   : > { %991 = vmax.xlane.f32.xlu0 %v990_v2  ;;  %v630_v5 = vpop.f32.mrb[18].mxu0 }
 0x240   : > { %v8396_v6 = vsel %vm854_vm15, -inf, %v630_v5  ;;  %v8398_v7 = vpop.f32.mrb[19].mxu0 }
 0x241   : > { %v993_v8 = vmax.f32 %v8396_v6, %v8398_v7 }
 0x243   : > { %994 = vmax.xlane.f32.xlu0 %v993_v8  ;;  %v636_v10 = vpop.f32.mrb[20].mxu0 }
 0x244   : > { %v8404_v11 = vsel %vm856_vm1, -inf, %v636_v10  ;;  %v8406_v13 = vpop.f32.mrb[21].mxu0 }
 0x245   : > { %v996_v14 = vmax.f32 %v8404_v11, %v8406_v13 }
 0x247   : > { %997 = vmax.xlane.f32.xlu0 %v996_v14  ;;  %v642_v17 = vpop.f32.mrb[22].mxu0  ;;  %v790_v14 = vadd.s32 152, %v8319_v21 }
 0x248   : > { %v8412_v18 = vsel %vm858_vm2, -inf, %v642_v17  ;;  %v8414_v19 = vpop.f32.mrb[23].mxu0 }
 0x249   : > { %v999_v22 = vmax.f32 %v8412_v18, %v8414_v19  ;;  %vm875_vm11 = vcmp.eq.s32.totalorder %v8444_v48, %v790_v14 }
 0x24b   : > { %1000 = vmax.xlane.f32.xlu0 %v999_v22  ;;  %v648_v26 = vpop.f32.mrb[24].mxu0 }
 0x24c   : > { %v8420_v27 = vsel %vm860_vm3, -inf, %v648_v26  ;;  %v8422_v28 = vpop.f32.mrb[25].mxu0  ;;  %v791_v26 = vadd.s32 160, %v8319_v21 }
 0x24d   : > { %v1002_v31 = vmax.f32 %v8420_v27, %v8422_v28 }
 0x24e   : > { %vm877_vm12 = vcmp.eq.s32.totalorder %v8444_v48, %v791_v26  ;;  %v795_v26 = vadd.s32 192, %v8319_v21 }
 0x24f   : > { %1003 = vmax.xlane.f32.xlu0 %v1002_v31  ;;  %v654_v33 = vpop.f32.mrb[26].mxu0 }
 0x250   : > { %v8428_v36 = vsel %vm862_vm4, -inf, %v654_v33  ;;  %v8430_v37 = vpop.f32.mrb[27].mxu0  ;;  %vm885_vm1 = vcmp.eq.s32.totalorder %v8444_v48, %v795_v26 }
 0x251   : > { %v1005_v38 = vmax.f32 %v8428_v36, %v8430_v37 }
 0x253   : > { %1006 = vmax.xlane.f32.xlu0 %v1005_v38  ;;  %v660_v42 = vpop.f32.mrb[28].mxu0 }
 0x254   : > { %v8436_v43 = vsel %vm864_vm6, -inf, %v660_v42  ;;  %v8438_v46 = vpop.f32.mrb[29].mxu0 }
 0x255   : > { %v1008_v47 = vmax.f32 %v8436_v43, %v8438_v46 }
 0x257   : > { %1009 = vmax.xlane.f32.xlu0 %v1008_v47  ;;  %v666_v52 = vpop.f32.mrb[30].mxu0 }
 0x258   : > { %v8447_v53 = vsel %vm866_vm7, -inf, %v666_v52  ;;  %v8449_v56 = vpop.f32.mrb[31].mxu0 }
 0x259   : > { %v1011_v57 = vmax.f32 %v8447_v53, %v8449_v56 }
 0x25b   : > { %1012 = vmax.xlane.f32.xlu0 %v1011_v57  ;;  %v8455_v61 = vpop.f32.mrb[32].mxu0  ;;  %v793_v57 = vadd.s32 176, %v8319_v21 }
 0x25c   : > { %v674_v62 = vpop.f32.mrb[33].mxu0 }
 0x25d   : > { %v8457_v63 = vsel %vm869_vm8, -inf, %v674_v62  ;;  %vm881_vm14 = vcmp.eq.s32.totalorder %v8444_v48, %v793_v57 }
 0x25e   : > { %v1014_v2 = vmax.f32 %v8455_v61, %v8457_v63 }
 0x25f   : > { %v8463_v5 = vpop.f32.mrb[34].mxu0 }
 0x260   : > { %1015 = vmax.xlane.f32.xlu0 %v1014_v2  ;;  %v680_v8 = vpop.f32.mrb[35].mxu0 }
 0x261   : > { %v8465_v9 = vsel %vm871_vm9, -inf, %v680_v8  ;;  %v794_v8 = vadd.s32 184, %v8319_v21 }
 0x262   : > { %v1017_v10 = vmax.f32 %v8463_v5, %v8465_v9 }
 0x263   : > { %v8471_v16 = vpop.f32.mrb[36].mxu0  ;;  %vm883_vm15 = vcmp.eq.s32.totalorder %v8444_v48, %v794_v8 }
 0x264   : > { %13142 = vst [vmem:[#allocation9_spill] sm:$0xff] %v8471_v16  ;;  %1018 = vmax.xlane.f32.xlu0 %v1017_v10  ;;  %v686_v17 = vpop.f32.mrb[37].mxu0 }
 0x265   : > { %v8473_v22 = vsel %vm873_vm10, -inf, %v686_v17 }
 0x266   : > { %13143 = vst [vmem:[#allocation10_spill] sm:$0xff] %v8473_v22  ;;  %v1020_v23 = vmax.f32 %v8471_v16, %v8473_v22 }
 0x267   : > { %v8479_v31 = vpop.f32.mrb[38].mxu0 }
 0x268   : > { %13144 = vst [vmem:[#allocation11_spill] sm:$0xff] %v8479_v31  ;;  %1021 = vmax.xlane.f32.xlu0 %v1020_v23  ;;  %v692_v32 = vpop.f32.mrb[39].mxu0 }
 0x269   : > { %v8481_v33 = vsel %vm875_vm11, -inf, %v692_v32 }
 0x26a   : > { %13145 = vst [vmem:[#allocation12_spill] sm:$0xff] %v8481_v33  ;;  %v1023_v38 = vmax.f32 %v8479_v31, %v8481_v33 }
 0x26b   : > { %v8487_v42 = vpop.f32.mrb[40].mxu0 }
 0x26c   : > { %13146 = vst [vmem:[#allocation13_spill] sm:$0xff] %v8487_v42  ;;  %1024 = vmax.xlane.f32.xlu0 %v1023_v38  ;;  %v698_v47 = vpop.f32.mrb[41].mxu0 }
 0x26d   : > { %v8489_v51 = vsel %vm877_vm12, -inf, %v698_v47 }
 0x26e   : > { %13147 = vst [vmem:[#allocation14_spill] sm:$0xff] %v8489_v51  ;;  %v1026_v52 = vmax.f32 %v8487_v42, %v8489_v51 }
 0x26f   : > { %v8495_v58 = vpop.f32.mrb[42].mxu0 }
 0x270   : > { %13148 = vst [vmem:[#allocation15_spill] sm:$0xff] %v8495_v58  ;;  %1027 = vmax.xlane.f32.xlu0 %v1026_v52  ;;  %v704_v62 = vpop.f32.mrb[43].mxu0 }
 0x271   : > { %v8497_v2 = vsel %vm879_vm13, -inf, %v704_v62 }
 0x272   : > { %13149 = vst [vmem:[#allocation16_spill] sm:$0xff] %v8497_v2  ;;  %v1029_v4 = vmax.f32 %v8495_v58, %v8497_v2 }
 0x273   : > { %v8503_v10 = vpop.f32.mrb[44].mxu0 }
 0x274   : > { %13150 = vst [vmem:[#allocation17_spill] sm:$0xff] %v8503_v10  ;;  %1030 = vmax.xlane.f32.xlu0 %v1029_v4  ;;  %v710_v14 = vpop.f32.mrb[45].mxu0 }
 0x275   : > { %v8505_v17 = vsel %vm881_vm14, -inf, %v710_v14 }
 0x276   : > { %13151 = vst [vmem:[#allocation18_spill] sm:$0xff] %v8505_v17  ;;  %v1032_v23 = vmax.f32 %v8503_v10, %v8505_v17  ;;  %v8554_v17 = vcvt.s32.f32 %v8444_v48 }
 0x277   : > { %v8511_v32 = vpop.f32.mrb[46].mxu0 }
 0x278   : > { %13152 = vst [vmem:[#allocation19_spill] sm:$0xff] %v8511_v32  ;;  %1033 = vmax.xlane.f32.xlu0 %v1032_v23  ;;  %v716_v38 = vpop.f32.mrb[47].mxu0 }
 0x279   : > { %v8513_v41 = vsel %vm883_vm15, -inf, %v716_v38 }
 0x27a   : > { %13153 = vst [vmem:[#allocation20_spill] sm:$0xff] %v8513_v41  ;;  %v1035_v47 = vmax.f32 %v8511_v32, %v8513_v41  ;;  %v8551_v32 = vcvt.s32.f32 %v8317_v20 }
 0x27b   : > { %v8518_v52 = vpop.f32.mrb[48].mxu0 }
 0x27c   : > { %13154 = vst [vmem:[#allocation21_spill] sm:$0xff] %v8518_v52  ;;  %1036 = vmax.xlane.f32.xlu0 %v1035_v47  ;;  %v722_v57 = vpop.f32.mrb[49].mxu0 }
 0x27d   : > { %v8520_v62 = vsel %vm885_vm1, -inf, %v722_v57 }
 0x27e   : > { %13155 = vst [vmem:[#allocation22_spill] sm:$0xff] %v8520_v62  ;;  %v1038_v4 = vmax.f32 %v8518_v52, %v8520_v62 }
 0x27f   : > { %v8524_v8 = vpop.f32.mrb[50].mxu0 }
 0x280   : > { %1039 = vmax.xlane.f32.xlu0 %v1038_v4  ;;  %v728_v14 = vpop.f32.mrb[51].mxu0 }
 0x283   : > { %v8526_v23 = vpop.f32.mrb[52].mxu0 }
 0x284   : > { %13156 = vst [vmem:[#allocation23_spill] sm:$0xff] %v8526_v23  ;;  %v8528_v38 = vpop.f32.mrb[53].mxu0 }
 0x287   : > { %v8530_v3 = vpop.f32.mrb[54].mxu0 }
 0x288   : > { %v8532_v26 = vpop.f32.mrb[55].mxu0 }
 0x28b   : > { %v8534_v15 = vpop.f32.mrb[56].mxu0 }
 0x28c   : > { %v8536_v47 = vpop.f32.mrb[57].mxu0 }
 0x28f   : > { %v8538_v57 = vpop.f32.mrb[58].mxu0 }
 0x290   : > { %v8540_v12 = vpop.f32.mrb[59].mxu0 }
 0x293   : > { %v8542_v62 = vpop.f32.mrb[60].mxu0 }
 0x294   : > { %v8544_v4 = vpop.f32.mrb[61].mxu0 }
 0x297   : > { %v8546_v52 = vpop.f32.mrb[62].mxu0 }
 0x298   : > { %v8548_v41 = vpop.f32.mrb[63].mxu0 }
 0x2ac   : > { %v968_v10 = vpop.xlane.xlu0 %967 }
 0x2ad   : > { %vm1062_vm2 = vcmp.ge.f32.partialorder %v8324_v24, %v968_v10  ;;  %vm1063_vm3 = vcmp.ge.f32.partialorder %v8326_v25, %v968_v10 }
 0x2ae   : > { %v1126_v2 = vsel %vm1062_vm2, %v8551_v32, 256.0  ;;  %v1127_v58 = vsel %vm1063_vm3, %v8554_v17, 256.0 }
 0x2af   : > { %v1190_v51 = vmin.f32 %v1126_v2, %v1127_v58 }
 0x2b0   : > { %v971_v42 = vpop.xlane.xlu0 %970 }
 0x2b1   : > { %1191 = vmin.xlane.f32.xlu0 %v1190_v51  ;;  %vm1064_vm4 = vcmp.ge.f32.partialorder %v8332_v29, %v971_v42  ;;  %vm1065_vm6 = vcmp.ge.f32.partialorder %v8334_v30, %v971_v42 }
 0x2b2   : > { %v1128_v20 = vsel %vm1064_vm4, %v8551_v32, 256.0  ;;  %v1129_v33 = vsel %vm1065_vm6, %v8554_v17, 256.0 }
 0x2b3   : > { %v1193_v31 = vmin.f32 %v1128_v20, %v1129_v33 }
 0x2b4   : > { %v974_v22 = vpop.xlane.xlu0 %973 }
 0x2b5   : > { %1194 = vmin.xlane.f32.xlu0 %v1193_v31  ;;  %vm1066_vm7 = vcmp.ge.f32.partialorder %v8340_v34, %v974_v22  ;;  %vm1067_vm8 = vcmp.ge.f32.partialorder %v8342_v35, %v974_v22  ;;  %v796_v22 = vadd.s32 200, %v8319_v21 }
 0x2b6   : > { %v1130_v10 = vsel %vm1066_vm7, %v8551_v32, 256.0  ;;  %v1131_v58 = vsel %vm1067_vm8, %v8554_v17, 256.0 }
 0x2b7   : > { %v1196_v51 = vmin.f32 %v1130_v10, %v1131_v58  ;;  %vm887_vm13 = vcmp.eq.s32.totalorder %v8444_v48, %v796_v22 }
 0x2b8   : > { %v977_v2 = vpop.xlane.xlu0 %976 }
 0x2b9   : > { %1197 = vmin.xlane.f32.xlu0 %v1196_v51  ;;  %vm1068_vm9 = vcmp.ge.f32.partialorder %v8348_v39, %v977_v2  ;;  %vm1069_vm10 = vcmp.ge.f32.partialorder %v8350_v40, %v977_v2 }
 0x2ba   : > { %v1132_v42 = vsel %vm1068_vm9, %v8551_v32, 256.0  ;;  %v1133_v33 = vsel %vm1069_vm10, %v8554_v17, 256.0 }
 0x2bb   : > { %v1199_v31 = vmin.f32 %v1132_v42, %v1133_v33 }
 0x2bc   : > { %v980_v20 = vpop.xlane.xlu0 %979 }
 0x2bd   : > { %1200 = vmin.xlane.f32.xlu0 %v1199_v31  ;;  %vm1070_vm11 = vcmp.ge.f32.partialorder %v8356_v44, %v980_v20  ;;  %vm1071_vm12 = vcmp.ge.f32.partialorder %v8358_v45, %v980_v20  ;;  %v8582_v31 = vsel %vm887_vm13, -inf, %v728_v14  ;;  %v797_v45 = vadd.s32 208, %v8319_v21 }
 0x2be   : > { %v1134_v10 = vsel %vm1070_vm11, %v8551_v32, 256.0  ;;  %v1135_v58 = vsel %vm1071_vm12, %v8554_v17, 256.0 }
 0x2bf   : > { %v1202_v51 = vmin.f32 %v1134_v10, %v1135_v58  ;;  %v798_v10 = vadd.s32 216, %v8319_v21  ;;  %vm889_vm3 = vcmp.eq.s32.totalorder %v8444_v48, %v797_v45 }
 0x2c0   : > { %v983_v39 = vpop.xlane.xlu0 %982 }
 0x2c1   : > { %1203 = vmin.xlane.f32.xlu0 %v1202_v51  ;;  %vm1072_vm14 = vcmp.ge.f32.partialorder %v8364_v49, %v983_v39  ;;  %vm1073_vm15 = vcmp.ge.f32.partialorder %v8366_v50, %v983_v39  ;;  %v1041_v39 = vmax.f32 %v8524_v8, %v8582_v31  ;;  %vm891_vm4 = vcmp.eq.s32.totalorder %v8444_v48, %v798_v10 }
 0x2c2   : > { %v1136_v2 = vsel %vm1072_vm14, %v8551_v32, 256.0  ;;  %v1137_v42 = vsel %vm1073_vm15, %v8554_v17, 256.0  ;;  %v800_v10 = vadd.s32 232, %v8319_v21 }
 0x2c3   : > { %v1205_v33 = vmin.f32 %v1136_v2, %v1137_v42 }
 0x2c4   : > { %v986_v20 = vpop.xlane.xlu0 %985  ;;  %vm895_vm11 = vcmp.eq.s32.totalorder %v8444_v48, %v800_v10  ;;  %v802_v10 = vadd.s32 248, %v8319_v21 }
 0x2c5   : > { %1206 = vmin.xlane.f32.xlu0 %v1205_v33  ;;  %vm1074_vm1 = vcmp.ge.f32.partialorder %v8372_v54, %v986_v20  ;;  %vm1075_vm2 = vcmp.ge.f32.partialorder %v8374_v55, %v986_v20  ;;  %v8599_v20 = vsel %vm889_vm3, -inf, %v8528_v38  ;;  %v8602_v55 = vsel %vm891_vm4, -inf, %v8532_v26 }
 0x2c6   : > { %v1138_v58 = vsel %vm1074_vm1, %v8551_v32, 256.0  ;;  %v1139_v51 = vsel %vm1075_vm2, %v8554_v17, 256.0  ;;  %v1047_v38 = vmax.f32 %v8530_v3, %v8602_v55  ;;  %vm899_vm2 = vcmp.eq.s32.totalorder %v8444_v48, %v802_v10 }
 0x2c7   : > { %v1208_v33 = vmin.f32 %v1138_v58, %v1139_v51 }
 0x2c8   : > { %v989_v22 = vpop.xlane.xlu1 %988 }
 0x2c9   : > { %1042 = vmax.xlane.f32.xlu0 %v1041_v39  ;;  %vm1076_vm6 = vcmp.ge.f32.partialorder %v8380_v59, %v989_v22  ;;  %vm1077_vm7 = vcmp.ge.f32.partialorder %v8382_v60, %v989_v22  ;;  %v799_v39 = vadd.s32 224, %v8319_v21  ;;  %v1044_v22 = vmax.f32 %v8526_v23, %v8599_v20 }
 0x2ca   : > { %v1140_v14 = vsel %vm1076_vm6, %v8551_v32, 256.0  ;;  %v1141_v2 = vsel %vm1077_vm7, %v8554_v17, 256.0 }
 0x2cb   : > { %v1211_v42 = vmin.f32 %v1140_v14, %v1141_v2  ;;  %vm893_vm10 = vcmp.eq.s32.totalorder %v8444_v48, %v799_v39  ;;  %v8624_v39 = vsel %vm895_vm11, -inf, %v8540_v12 }
 0x2cc   : > { %v992_v45 = vpop.xlane.xlu0 %991 }
 0x2cd   : > { %1212 = vmin.xlane.f32.xlu1 %v1211_v42  ;;  %1209 = vmin.xlane.f32.xlu0 %v1208_v33  ;;  %vm1078_vm8 = vcmp.ge.f32.partialorder %v8388_v0, %v992_v45  ;;  %vm1079_vm9 = vcmp.ge.f32.partialorder %v8390_v1, %v992_v45  ;;  %v8621_v45 = vsel %vm893_vm10, -inf, %v8536_v47  ;;  %v1053_v47 = vmax.f32 %v8538_v57, %v8624_v39 }
 0x2ce   : > { %v1142_v58 = vsel %vm1078_vm8, %v8551_v32, 256.0  ;;  %v1143_v51 = vsel %vm1079_vm9, %v8554_v17, 256.0 }
 0x2cf   : > { %v1214_v42 = vmin.f32 %v1142_v58, %v1143_v51 }
 0x2d0   : > { %v995_v26 = vpop.xlane.xlu0 %994 }
 0x2d1   : > { %1045 = vmax.xlane.f32.xlu0 %v1044_v22  ;;  %1048 = vmax.xlane.f32.xlu1 %v1047_v38  ;;  %vm1080_vm12 = vcmp.ge.f32.partialorder %v8396_v6, %v995_v26  ;;  %vm1081_vm13 = vcmp.ge.f32.partialorder %v8398_v7, %v995_v26  ;;  %v801_v38 = vadd.s32 240, %v8319_v21  ;;  %v1050_v26 = vmax.f32 %v8534_v15, %v8621_v45 }
 0x2d2   : > { %v1144_v14 = vsel %vm1080_vm12, %v8551_v32, 256.0  ;;  %v1145_v2 = vsel %vm1081_vm13, %v8554_v17, 256.0 }
 0x2d3   : > { %v1217_v33 = vmin.f32 %v1144_v14, %v1145_v2  ;;  %vm897_vm1 = vcmp.eq.s32.totalorder %v8444_v48, %v801_v38 }
 0x2d4   : > { %v998_v22 = vpop.xlane.xlu0 %997 }
 0x2d5   : > { %1215 = vmin.xlane.f32.xlu0 %v1214_v42  ;;  %1218 = vmin.xlane.f32.xlu1 %v1217_v33  ;;  %vm1082_vm14 = vcmp.ge.f32.partialorder %v8404_v11, %v998_v22  ;;  %vm1083_vm15 = vcmp.ge.f32.partialorder %v8406_v13, %v998_v22  ;;  %v8643_v33 = vsel %vm897_vm1, -inf, %v8544_v4  ;;  %v8646_v22 = vsel %vm899_vm2, -inf, %v8548_v41 }
 0x2d6   : > { %v1146_v58 = vsel %vm1082_vm14, %v8551_v32, 256.0  ;;  %v1147_v51 = vsel %vm1083_vm15, %v8554_v17, 256.0  ;;  %v1056_v48 = vmax.f32 %v8542_v62, %v8643_v33  ;;  %v1059_v10 = vmax.f32 %v8546_v52, %v8646_v22 }
 0x2d7   : > { %v1220_v2 = vmin.f32 %v1146_v58, %v1147_v51 }
 0x2d8   : > { %v1001_v12 = vpop.xlane.xlu0 %1000 }
 0x2d9   : > { %1051 = vmax.xlane.f32.xlu0 %v1050_v26  ;;  %1054 = vmax.xlane.f32.xlu1 %v1053_v47  ;;  %vm1084_vm3 = vcmp.ge.f32.partialorder %v8412_v18, %v1001_v12  ;;  %vm1085_vm4 = vcmp.ge.f32.partialorder %v8414_v19, %v1001_v12 }
 0x2da   : > { %v1148_v21 = vsel %vm1084_vm3, %v8551_v32, 256.0  ;;  %v1149_v14 = vsel %vm1085_vm4, %v8554_v17, 256.0 }
 0x2db   : > { %v1223_v42 = vmin.f32 %v1148_v21, %v1149_v14 }
 0x2dc   : > { %v1004_v38 = vpop.xlane.xlu0 %1003 }
 0x2dd   : > { %1221 = vmin.xlane.f32.xlu0 %v1220_v2  ;;  %1224 = vmin.xlane.f32.xlu1 %v1223_v42  ;;  %vm1086_vm6 = vcmp.ge.f32.partialorder %v8420_v27, %v1004_v38  ;;  %vm1087_vm7 = vcmp.ge.f32.partialorder %v8422_v28, %v1004_v38 }
 0x2de   : > { %v1150_v4 = vsel %vm1086_vm6, %v8551_v32, 256.0  ;;  %v1151_v47 = vsel %vm1087_vm7, %v8554_v17, 256.0 }
 0x2df   : > { %v1226_v58 = vmin.f32 %v1150_v4, %v1151_v47 }
 0x2e0   : > { %v1007_v26 = vpop.xlane.xlu0 %1006 }
 0x2e1   : > { %1057 = vmax.xlane.f32.xlu0 %v1056_v48  ;;  %1060 = vmax.xlane.f32.xlu1 %v1059_v10  ;;  %vm1088_vm8 = vcmp.ge.f32.partialorder %v8428_v36, %v1007_v26  ;;  %vm1089_vm9 = vcmp.ge.f32.partialorder %v8430_v37, %v1007_v26 }
 0x2e2   : > { %v1152_v41 = vsel %vm1088_vm8, %v8551_v32, 256.0  ;;  %v1153_v12 = vsel %vm1089_vm9, %v8554_v17, 256.0 }
 0x2e3   : > { %v1229_v51 = vmin.f32 %v1152_v41, %v1153_v12 }
 0x2e4   : > { %v1010_v21 = vpop.xlane.xlu0 %1009 }
 0x2e5   : > { %1227 = vmin.xlane.f32.xlu0 %v1226_v58  ;;  %1230 = vmin.xlane.f32.xlu1 %v1229_v51  ;;  %vm1090_vm10 = vcmp.ge.f32.partialorder %v8436_v43, %v1010_v21  ;;  %vm1091_vm11 = vcmp.ge.f32.partialorder %v8438_v46, %v1010_v21 }
 0x2e6   : > { %v1154_v14 = vsel %vm1090_vm10, %v8551_v32, 256.0  ;;  %v1155_v2 = vsel %vm1091_vm11, %v8554_v17, 256.0 }
 0x2e7   : > { %v1232_v42 = vmin.f32 %v1154_v14, %v1155_v2 }
 0x2e8   : > { %v1013_v38 = vpop.xlane.xlu0 %1012 }
 0x2e9   : > { %1233 = vmin.xlane.f32.xlu0 %v1232_v42  ;;  %vm1092_vm12 = vcmp.ge.f32.partialorder %v8447_v53, %v1013_v38  ;;  %vm1093_vm13 = vcmp.ge.f32.partialorder %v8449_v56, %v1013_v38  ;;  %v13157_v42 = vld [vmem:[#allocation10_spill] sm:$0xff] }
 0x2ea   : > { %v1156_v48 = vsel %vm1092_vm12, %v8551_v32, 256.0  ;;  %v1157_v10 = vsel %vm1093_vm13, %v8554_v17, 256.0 }
 0x2eb   : > { %v1235_v26 = vmin.f32 %v1156_v48, %v1157_v10 }
 0x2ed   : > { %v1016_v4 = vpop.xlane.xlu0 %1015  ;;  %1236 = vmin.xlane.f32.xlu1 %v1235_v26 }
 0x2ee   : > { %vm1094_vm14 = vcmp.ge.f32.partialorder %v8455_v61, %v1016_v4  ;;  %vm1095_vm15 = vcmp.ge.f32.partialorder %v8457_v63, %v1016_v4  ;;  %v13158_v4 = vld [vmem:[#allocation11_spill] sm:$0xff] }
 0x2ef   : > { %v1158_v47 = vsel %vm1094_vm14, %v8551_v32, 256.0  ;;  %v1159_v41 = vsel %vm1095_vm15, %v8554_v17, 256.0 }
 0x2f0   : > { %v1238_v12 = vmin.f32 %v1158_v47, %v1159_v41  ;;  %v13159_v47 = vld [vmem:[#allocation12_spill] sm:$0xff] }
 0x2f1   : > { %v1019_v58 = vpop.xlane.xlu0 %1018 }
 0x2f2   : > { %1239 = vmin.xlane.f32.xlu0 %v1238_v12  ;;  %vm1096_vm1 = vcmp.ge.f32.partialorder %v8463_v5, %v1019_v58  ;;  %vm1097_vm2 = vcmp.ge.f32.partialorder %v8465_v9, %v1019_v58 }
 0x2f3   : > { %v1160_v51 = vsel %vm1096_vm1, %v8551_v32, 256.0  ;;  %v1161_v21 = vsel %vm1097_vm2, %v8554_v17, 256.0 }
 0x2f4   : > { %v1241_v14 = vmin.f32 %v1160_v51, %v1161_v21 }
 0x2f5   : > { %v1022_v2 = vpop.xlane.xlu0 %1021 }
 0x2f6   : > { %1242 = vmin.xlane.f32.xlu1 %v1241_v14  ;;  %vm1098_vm3 = vcmp.ge.f32.partialorder %v8471_v16, %v1022_v2  ;;  %vm1099_vm4 = vcmp.ge.f32.partialorder %v13157_v42, %v1022_v2 }
 0x2f7   : > { %v1162_v38 = vsel %vm1098_vm3, %v8551_v32, 256.0  ;;  %v1163_v48 = vsel %vm1099_vm4, %v8554_v17, 256.0 }
 0x2f8   : > { %v1244_v10 = vmin.f32 %v1162_v38, %v1163_v48  ;;  %v13160_v38 = vld [vmem:[#allocation13_spill] sm:$0xff]  ;;  %v13161_v48 = vld [vmem:[#allocation14_spill] sm:$0xff] }
 0x2f9   : > { %v1025_v26 = vpop.xlane.xlu0 %1024 }
 0x2fa   : > { %1245 = vmin.xlane.f32.xlu0 %v1244_v10  ;;  %vm1100_vm6 = vcmp.ge.f32.partialorder %v13158_v4, %v1025_v26  ;;  %vm1101_vm7 = vcmp.ge.f32.partialorder %v13159_v47, %v1025_v26 }
 0x2fb   : > { %v1164_v41 = vsel %vm1100_vm6, %v8551_v32, 256.0  ;;  %v1165_v12 = vsel %vm1101_vm7, %v8554_v17, 256.0 }
 0x2fc   : > { %v1247_v58 = vmin.f32 %v1164_v41, %v1165_v12 }
 0x2fd   : > { %v1028_v51 = vpop.xlane.xlu0 %1027 }
 0x2fe   : > { %1248 = vmin.xlane.f32.xlu1 %v1247_v58  ;;  %vm1102_vm10 = vcmp.ge.f32.partialorder %v13160_v38, %v1028_v51  ;;  %vm1103_vm11 = vcmp.ge.f32.partialorder %v13161_v48, %v1028_v51  ;;  %v13164_v51 = vld [vmem:[#allocation15_spill] sm:$0xff]  ;;  %v12907_v38 = vmov 1.0|1.0  }
 0x2ff   : > { %v1166_v58 = vsel %vm1102_vm10, %v8551_v32, 256.0  ;;  %v1167_v47 = vsel %vm1103_vm11, %v8554_v17, 256.0 }
 0x301   : > { %v1031_v21 = vpop.xlane.xlu0 %1030 }
 0x302   : > { %vm1104_vm14 = vcmp.ge.f32.partialorder %v13164_v51, %v1031_v21  ;;  %v13168_v51 = vld [vmem:[#allocation17_spill] sm:$0xff] }
 0x305   : > { %v1034_v14 = vpop.xlane.xlu0 %1033 }
 0x306   : > { %vm1106_vm3 = vcmp.ge.f32.partialorder %v13168_v51, %v1034_v14 }
 0x309   : > { %v1037_v2 = vpop.xlane.xlu0 %1036 }
 0x30d   : > { %v8684_v42 = vpop.xlane.xlu0 %1039 }
 0x33e   : > { %v1192_v16 = vpop.xlane.xlu0 %1191 }
 0x33f   : > { %vm1286_vm8 = vcmp.eq.f32.partialorder %v8551_v32, %v1192_v16  ;;  %vm1287_vm9 = vcmp.eq.f32.partialorder %v8554_v17, %v1192_v16 }
 0x340   : > { %v8693_v10 = vsel %vm1286_vm8, -inf, %v8324_v24  ;;  %v8696_v26 = vsel %vm1287_vm9, -inf, %v8326_v25  ;;  %v13165_v24 = vld [vmem:[#allocation16_spill] sm:$0xff] }
 0x341   : > { %13162 = vst [vmem:[#allocation11_spill] sm:$0xff] %v8693_v10  ;;  %13163 = vst [vmem:[#allocation24_spill] sm:$0xff] %v8696_v26  ;;  %v1621_v41 = vmax.f32 %v8693_v10, %v8696_v26  ;;  %vm1105_vm15 = vcmp.ge.f32.partialorder %v13165_v24, %v1031_v21  ;;  %v1168_v24 = vsel %vm1104_vm14, %v8551_v32, 256.0 }
 0x342   : > { %v1195_v12 = vpop.xlane.xlu0 %1194 }
 0x343   : > { %1622 = vmax.xlane.f32.xlu0 %v1621_v41  ;;  %vm1289_vm12 = vcmp.eq.f32.partialorder %v8554_v17, %v1195_v12  ;;  %vm1288_vm13 = vcmp.eq.f32.partialorder %v8551_v32, %v1195_v12  ;;  %v1250_v41 = vmin.f32 %v1166_v58, %v1167_v47 }
 0x344   : > { %vm7597_vm1 = vmpackc.low %vm1289_vm12, %vm1287_vm9  ;;  %v8707_v25 = vsel %vm1289_vm12, -inf, %v8334_v30  ;;  %v8710_v48 = vsel %vm1288_vm13, -inf, %v8332_v29  ;;  %v1169_v30 = vsel %vm1105_vm15, %v8554_v17, 256.0  ;;  %v13169_v29 = vld [vmem:[#allocation18_spill] sm:$0xff] }
 0x345   : > { %13166 = vst [vmem:[#allocation25_spill] sm:$0xff] %v8707_v25  ;;  %13167 = vst [vmem:[#allocation26_spill] sm:$0xff] %v8710_v48  ;;  %7598 = vmatprep.subr.msk.bf16.mxu1 %vm7597_vm1, %v12907_v38  ;;  %v1624_v12 = vmax.f32 %v8710_v48, %v8707_v25  ;;  %vm1107_vm7 = vcmp.ge.f32.partialorder %v13169_v29, %v1034_v14  ;;  %v13170_v14 = vld [vmem:[#allocation19_spill] sm:$0xff]  ;;  %v13175_v29 = vmov 1.0|1.0  }
 0x346   : > { %vm7599_vm2 = vmpackc.low %vm1288_vm13, %vm1286_vm8  ;;  %v1198_v21 = vpop.xlane.xlu0 %1197  ;;  %vm1108_vm8 = vcmp.ge.f32.partialorder %v13170_v14, %v1037_v2 }
 0x347   : > { %7600 = vmatpush1.bf16.xpose.msk.msra.mxu1 %vm7599_vm2, %v12907_v38  ;;  %vm1290_vm4 = vcmp.eq.f32.partialorder %v8551_v32, %v1198_v21  ;;  %vm1291_vm6 = vcmp.eq.f32.partialorder %v8554_v17, %v1198_v21  ;;  %1251 = vmin.xlane.f32.xlu0 %v1250_v41  ;;  %v1253_v38 = vmin.f32 %v1168_v24, %v1169_v30  ;;  %v1170_v41 = vsel %vm1106_vm3, %v8551_v32, 256.0 }
 0x348   : > { %1625 = vmax.xlane.f32.xlu1 %v1624_v12  ;;  %v8727_v16 = vsel %vm1290_vm4, -inf, %v8340_v34  ;;  %v8732_v47 = vsel %vm1291_vm6, -inf, %v8342_v35  ;;  %v1171_v12 = vsel %vm1107_vm7, %v8554_v17, 256.0  ;;  %v13171_v34 = vld [vmem:[#allocation20_spill] sm:$0xff]  ;;  %v13172_v35 = vld [vmem:[#allocation6_spill] sm:$0xff] }
 0x349   : > { %v1627_v58 = vmax.f32 %v8727_v16, %v8732_v47  ;;  %vm1109_vm11 = vcmp.ge.f32.partialorder %v13171_v34, %v1037_v2  ;;  %v1256_v14 = vmin.f32 %v1170_v41, %v1171_v12  ;;  %v13178_v41 = vld [vmem:[#allocation7_spill] sm:$0xff] }
 0x34a   : > { %v1201_v51 = vpop.xlane.xlu0 %1200 }
 0x34b   : > { %vm1292_vm9 = vcmp.eq.f32.partialorder %v8551_v32, %v1201_v51  ;;  %vm1293_vm10 = vcmp.eq.f32.partialorder %v8554_v17, %v1201_v51  ;;  %1628 = vmax.xlane.f32.xlu0 %v1627_v58  ;;  %v1172_v51 = vsel %vm1108_vm8, %v8551_v32, 256.0  ;;  %v1173_v58 = vsel %vm1109_vm11, %v8554_v17, 256.0 }
 0x34c   : > { %1254 = vmin.xlane.f32.xlu1 %v1253_v38  ;;  %vm7601_vm12 = vmpackc.low %vm1293_vm10, %vm1291_vm6  ;;  %v8745_v24 = vsel %vm1292_vm9, -inf, %v13172_v35  ;;  %v8748_v30 = vsel %vm1293_vm10, -inf, %v8350_v40  ;;  %v13176_v35 = vld [vmem:[#allocation21_spill] sm:$0xff]  ;;  %v13177_v40 = vld [vmem:[#allocation22_spill] sm:$0xff]  ;;  %v1259_v34 = vmin.f32 %v1172_v51, %v1173_v58 }
 0x34d   : > { %13173 = vst [vmem:[#allocation6_spill] sm:$0xff] %v8745_v24  ;;  %13174 = vst [vmem:[#allocation27_spill] sm:$0xff] %v8748_v30  ;;  %7602 = vmatprep.subr.msk.bf16.mxu1 %vm7601_vm12, %v13175_v29  ;;  %v1630_v38 = vmax.f32 %v8745_v24, %v8748_v30  ;;  %vm1110_vm14 = vcmp.ge.f32.partialorder %v13176_v35, %v8684_v42  ;;  %vm1111_vm2 = vcmp.ge.f32.partialorder %v13177_v40, %v8684_v42 }
 0x34e   : > { %vm7603_vm13 = vmpackc.low %vm1292_vm9, %vm1290_vm4  ;;  %v1204_v2 = vpop.xlane.xlu0 %1203 }
 0x34f   : > { %7604 = vmatpush1.bf16.xpose.msk.msra.mxu1 %vm7603_vm13, %v13175_v29  ;;  %vm1294_vm15 = vcmp.eq.f32.partialorder %v8551_v32, %v1204_v2  ;;  %vm1295_vm1 = vcmp.eq.f32.partialorder %v8554_v17, %v1204_v2  ;;  %1257 = vmin.xlane.f32.xlu0 %v1256_v14  ;;  %v1174_v14 = vsel %vm1110_vm14, %v8551_v32, 256.0 }
 0x350   : > { %1631 = vmax.xlane.f32.xlu1 %v1630_v38  ;;  %v8767_v21 = vsel %vm1294_vm15, -inf, %v8356_v44  ;;  %v8772_v12 = vsel %vm1295_vm1, -inf, %v13178_v41  ;;  %v1175_v38 = vsel %vm1111_vm2, %v8554_v17, 256.0 }
 0x351   : > { %v1633_v35 = vmax.f32 %v8767_v21, %v8772_v12  ;;  %v1262_v51 = vmin.f32 %v1174_v14, %v1175_v38 }
 0x352   : > { %v1207_v30 = vpop.xlane.xlu0 %1206 }
 0x353   : > { %vm1296_vm3 = vcmp.eq.f32.partialorder %v8551_v32, %v1207_v30  ;;  %vm1297_vm4 = vcmp.eq.f32.partialorder %v8554_v17, %v1207_v30  ;;  %1634 = vmax.xlane.f32.xlu0 %v1633_v35 }
 0x354   : > { %1260 = vmin.xlane.f32.xlu1 %v1259_v34  ;;  %vm7605_vm6 = vmpackc.low %vm1297_vm4, %vm1295_vm1  ;;  %v8783_v44 = vsel %vm1296_vm3, -inf, %v8364_v49  ;;  %v8786_v42 = vsel %vm1297_vm4, -inf, %v8366_v50 }
 0x355   : > { %7606 = vmatprep.subr.msk.bf16.mxu1 %vm7605_vm6, %v13175_v29  ;;  %vm7607_vm7 = vmpackc.low %vm1296_vm3, %vm1294_vm15  ;;  %v1636_v30 = vmax.f32 %v8783_v44, %v8786_v42 }
 0x356   : > { %v1043_v34 = vpop.xlane.xlu0 %1042 }
 0x357   : > { %7608 = vmatpush1.bf16.xpose.msk.msra.mxu1 %vm7607_vm7, %v13175_v29  ;;  %1263 = vmin.xlane.f32.xlu0 %v1262_v51  ;;  %vm1112_vm8 = vcmp.ge.f32.partialorder %v8524_v8, %v1043_v34  ;;  %vm1113_vm9 = vcmp.ge.f32.partialorder %v8582_v31, %v1043_v34  ;;  %v13181_v51 = vld [vmem:[#allocation8_spill] sm:$0xff] }
 0x358   : > { %1637 = vmax.xlane.f32.xlu1 %v1636_v30  ;;  %v1176_v49 = vsel %vm1112_vm8, %v8551_v32, 256.0  ;;  %v1177_v50 = vsel %vm1113_vm9, %v8554_v17, 256.0 }
 0x359   : > { %v1265_v58 = vmin.f32 %v1176_v49, %v1177_v50 }
 0x35a   : > { %v1213_v2 = vpop.xlane.xlu1 %1212  ;;  %v1210_v35 = vpop.xlane.xlu0 %1209 }
 0x35b   : > { %vm1300_vm10 = vcmp.eq.f32.partialorder %v8551_v32, %v1213_v2  ;;  %vm1301_vm11 = vcmp.eq.f32.partialorder %v8554_v17, %v1213_v2  ;;  %vm1298_vm12 = vcmp.eq.f32.partialorder %v8551_v32, %v1210_v35  ;;  %vm1299_vm13 = vcmp.eq.f32.partialorder %v8554_v17, %v1210_v35 }
 0x35c   : > { %1266 = vmin.xlane.f32.xlu1 %v1265_v58  ;;  %v8803_v41 = vsel %vm1300_vm10, -inf, %v8380_v59  ;;  %v8806_v14 = vsel %vm1301_vm11, -inf, %v8382_v60  ;;  %v8809_v38 = vsel %vm1298_vm12, -inf, %v8372_v54  ;;  %v8812_v30 = vsel %vm1299_vm13, -inf, %v13181_v51  ;;  %vm7609_vm14 = vmpackc.low %vm1301_vm11, %vm1299_vm13 }
 0x35d   : > { %13179 = vst [vmem:[#allocation22_spill] sm:$0xff] %v8803_v41  ;;  %13180 = vst [vmem:[#allocation7_spill] sm:$0xff] %v8806_v14  ;;  %7610 = vmatprep.subr.msk.bf16.mxu1 %vm7609_vm14, %v13175_v29  ;;  %v1639_v34 = vmax.f32 %v8809_v38, %v8812_v30  ;;  %v1642_v59 = vmax.f32 %v8803_v41, %v8806_v14 }
 0x35e   : > { %13182 = vst [vmem:[#allocation8_spill] sm:$0xff] %v8812_v30  ;;  %vm7611_vm15 = vmpackc.low %vm1300_vm10, %vm1298_vm12  ;;  %v1046_v60 = vpop.xlane.xlu0 %1045  ;;  %v1049_v49 = vpop.xlane.xlu1 %1048 }
 0x35f   : > { %7612 = vmatpush1.bf16.xpose.msk.msra.mxu1 %vm7611_vm15, %v13175_v29  ;;  %vm1114_vm1 = vcmp.ge.f32.partialorder %v8526_v23, %v1046_v60  ;;  %vm1115_vm2 = vcmp.ge.f32.partialorder %v8599_v20, %v1046_v60  ;;  %vm1116_vm3 = vcmp.ge.f32.partialorder %v8530_v3, %v1049_v49  ;;  %vm1117_vm4 = vcmp.ge.f32.partialorder %v8602_v55, %v1049_v49 }
 0x360   : > { %1640 = vmax.xlane.f32.xlu0 %v1639_v34  ;;  %v1178_v54 = vsel %vm1114_vm1, %v8551_v32, 256.0  ;;  %v1179_v50 = vsel %vm1115_vm2, %v8554_v17, 256.0  ;;  %v1180_v58 = vsel %vm1116_vm3, %v8551_v32, 256.0  ;;  %v1181_v2 = vsel %vm1117_vm4, %v8554_v17, 256.0  ;;  %1643 = vmax.xlane.f32.xlu1 %v1642_v59 }
 0x361   : > { %v1268_v35 = vmin.f32 %v1178_v54, %v1179_v50  ;;  %v1271_v51 = vmin.f32 %v1180_v58, %v1181_v2 }
 0x362   : > { %v1216_v14 = vpop.xlane.xlu0 %1215  ;;  %v1219_v23 = vpop.xlane.xlu1 %1218 }
 0x363   : > { %vm1302_vm6 = vcmp.eq.f32.partialorder %v8551_v32, %v1216_v14  ;;  %vm1303_vm7 = vcmp.eq.f32.partialorder %v8554_v17, %v1216_v14  ;;  %vm1304_vm8 = vcmp.eq.f32.partialorder %v8551_v32, %v1219_v23  ;;  %vm1305_vm9 = vcmp.eq.f32.partialorder %v8554_v17, %v1219_v23 }
 0x364   : > { %1269 = vmin.xlane.f32.xlu0 %v1268_v35  ;;  %v8833_v34 = vsel %vm1302_vm6, -inf, %v8388_v0  ;;  %v8836_v60 = vsel %vm1303_vm7, -inf, %v8390_v1  ;;  %v8839_v59 = vsel %vm1304_vm8, -inf, %v8396_v6  ;;  %v8842_v49 = vsel %vm1305_vm9, -inf, %v8398_v7  ;;  %1272 = vmin.xlane.f32.xlu1 %v1271_v51  ;;  %vm7613_vm10 = vmpackc.low %vm1305_vm9, %vm1303_vm7 }
 0x365   : > { %7614 = vmatprep.subr.msk.bf16.mxu1 %vm7613_vm10, %v13175_v29  ;;  %vm7615_vm11 = vmpackc.low %vm1304_vm8, %vm1302_vm6  ;;  %v1645_v23 = vmax.f32 %v8833_v34, %v8836_v60  ;;  %v1648_v0 = vmax.f32 %v8839_v59, %v8842_v49 }
 0x366   : > { %v1052_v1 = vpop.xlane.xlu0 %1051  ;;  %v1055_v14 = vpop.xlane.xlu1 %1054 }
 0x367   : > { %7616 = vmatpush1.bf16.xpose.msk.msra.mxu1 %vm7615_vm11, %v13175_v29  ;;  %vm1118_vm12 = vcmp.ge.f32.partialorder %v8534_v15, %v1052_v1  ;;  %vm1119_vm13 = vcmp.ge.f32.partialorder %v8621_v45, %v1052_v1  ;;  %vm1120_vm14 = vcmp.ge.f32.partialorder %v8538_v57, %v1055_v14  ;;  %vm1121_vm15 = vcmp.ge.f32.partialorder %v8624_v39, %v1055_v14 }
 0x368   : > { %1646 = vmax.xlane.f32.xlu0 %v1645_v23  ;;  %v1182_v6 = vsel %vm1118_vm12, %v8551_v32, 256.0  ;;  %v1183_v7 = vsel %vm1119_vm13, %v8554_v17, 256.0  ;;  %v1184_v54 = vsel %vm1120_vm14, %v8551_v32, 256.0  ;;  %v1185_v50 = vsel %vm1121_vm15, %v8554_v17, 256.0  ;;  %1649 = vmax.xlane.f32.xlu1 %v1648_v0 }
 0x369   : > { %v1274_v58 = vmin.f32 %v1182_v6, %v1183_v7  ;;  %v1277_v2 = vmin.f32 %v1184_v54, %v1185_v50 }
 0x36a   : > { %v1222_v35 = vpop.xlane.xlu0 %1221  ;;  %v1225_v51 = vpop.xlane.xlu1 %1224 }
 0x36b   : > { %vm1306_vm1 = vcmp.eq.f32.partialorder %v8551_v32, %v1222_v35  ;;  %vm1307_vm2 = vcmp.eq.f32.partialorder %v8554_v17, %v1222_v35  ;;  %vm1308_vm3 = vcmp.eq.f32.partialorder %v8551_v32, %v1225_v51  ;;  %vm1309_vm4 = vcmp.eq.f32.partialorder %v8554_v17, %v1225_v51 }
 0x36c   : > { %1275 = vmin.xlane.f32.xlu0 %v1274_v58  ;;  %v8863_v23 = vsel %vm1306_vm1, -inf, %v8404_v11  ;;  %v8866_v1 = vsel %vm1307_vm2, -inf, %v8406_v13  ;;  %v8869_v0 = vsel %vm1308_vm3, -inf, %v8412_v18  ;;  %v8872_v14 = vsel %vm1309_vm4, -inf, %v8414_v19  ;;  %1278 = vmin.xlane.f32.xlu1 %v1277_v2  ;;  %vm7617_vm6 = vmpackc.low %vm1309_vm4, %vm1307_vm2 }
 0x36d   : > { %7618 = vmatprep.subr.msk.bf16.mxu1 %vm7617_vm6, %v13175_v29  ;;  %vm7619_vm7 = vmpackc.low %vm1308_vm3, %vm1306_vm1  ;;  %v1651_v6 = vmax.f32 %v8863_v23, %v8866_v1  ;;  %v1654_v11 = vmax.f32 %v8869_v0, %v8872_v14 }
 0x36e   : > { %v1058_v13 = vpop.xlane.xlu0 %1057  ;;  %v1061_v7 = vpop.xlane.xlu1 %1060 }
 0x36f   : > { %7620 = vmatpush1.bf16.xpose.msk.msra.mxu1 %vm7619_vm7, %v13175_v29  ;;  %vm1122_vm8 = vcmp.ge.f32.partialorder %v8542_v62, %v1058_v13  ;;  %vm1123_vm9 = vcmp.ge.f32.partialorder %v8643_v33, %v1058_v13  ;;  %vm1124_vm10 = vcmp.ge.f32.partialorder %v8546_v52, %v1061_v7  ;;  %vm1125_vm11 = vcmp.ge.f32.partialorder %v8646_v22, %v1061_v7 }
 0x370   : > { %1652 = vmax.xlane.f32.xlu0 %v1651_v6  ;;  %v1186_v18 = vsel %vm1122_vm8, %v8551_v32, 256.0  ;;  %v1187_v19 = vsel %vm1123_vm9, %v8554_v17, 256.0  ;;  %v1188_v54 = vsel %vm1124_vm10, %v8551_v32, 256.0  ;;  %v1189_v50 = vsel %vm1125_vm11, %v8554_v17, 256.0  ;;  %1655 = vmax.xlane.f32.xlu1 %v1654_v11 }
 0x371   : > { %v1280_v58 = vmin.f32 %v1186_v18, %v1187_v19  ;;  %v1283_v2 = vmin.f32 %v1188_v54, %v1189_v50 }
 0x372   : > { %v1228_v35 = vpop.xlane.xlu0 %1227  ;;  %v1231_v51 = vpop.xlane.xlu1 %1230 }
 0x373   : > { %vm1310_vm12 = vcmp.eq.f32.partialorder %v8551_v32, %v1228_v35  ;;  %vm1311_vm13 = vcmp.eq.f32.partialorder %v8554_v17, %v1228_v35  ;;  %vm1312_vm14 = vcmp.eq.f32.partialorder %v8551_v32, %v1231_v51  ;;  %vm1313_vm15 = vcmp.eq.f32.partialorder %v8554_v17, %v1231_v51 }
 0x374   : > { %1281 = vmin.xlane.f32.xlu0 %v1280_v58  ;;  %v8893_v6 = vsel %vm1310_vm12, -inf, %v8420_v27  ;;  %v8896_v13 = vsel %vm1311_vm13, -inf, %v8422_v28  ;;  %v8899_v11 = vsel %vm1312_vm14, -inf, %v8428_v36  ;;  %v8902_v7 = vsel %vm1313_vm15, -inf, %v8430_v37  ;;  %1284 = vmin.xlane.f32.xlu1 %v1283_v2  ;;  %vm7621_vm1 = vmpackc.low %vm1313_vm15, %vm1311_vm13 }
 0x375   : > { %13183 = vst [vmem:[#allocation28_spill] sm:$0xff] %v8899_v11  ;;  %7622 = vmatprep.subr.msk.bf16.mxu1 %vm7621_vm1, %v13175_v29  ;;  %vm7623_vm2 = vmpackc.low %vm1312_vm14, %vm1310_vm12  ;;  %v1657_v18 = vmax.f32 %v8893_v6, %v8896_v13  ;;  %v1660_v27 = vmax.f32 %v8899_v11, %v8902_v7 }
 0x376   : > { %v1234_v19 = vpop.xlane.xlu0 %1233 }
 0x377   : > { %7624 = vmatpush1.bf16.xpose.msk.msra.mxu1 %vm7623_vm2, %v13175_v29  ;;  %vm1314_vm3 = vcmp.eq.f32.partialorder %v8551_v32, %v1234_v19  ;;  %vm1315_vm4 = vcmp.eq.f32.partialorder %v8554_v17, %v1234_v19 }
 0x378   : > { %1658 = vmax.xlane.f32.xlu0 %v1657_v18  ;;  %v8915_v28 = vsel %vm1314_vm3, -inf, %v8436_v43  ;;  %v8918_v36 = vsel %vm1315_vm4, -inf, %v8438_v46  ;;  %1661 = vmax.xlane.f32.xlu1 %v1660_v27 }
 0x379   : > { %v1663_v37 = vmax.f32 %v8915_v28, %v8918_v36 }
 0x37a   : > { %v1237_v54 = vpop.xlane.xlu1 %1236 }
 0x37b   : > { %vm1316_vm6 = vcmp.eq.f32.partialorder %v8551_v32, %v1237_v54  ;;  %vm1317_vm7 = vcmp.eq.f32.partialorder %v8554_v17, %v1237_v54 }
 0x37c   : > { %1664 = vmax.xlane.f32.xlu0 %v1663_v37  ;;  %v8925_v50 = vsel %vm1316_vm6, -inf, %v8447_v53  ;;  %v8928_v58 = vsel %vm1317_vm7, -inf, %v8449_v56  ;;  %vm7625_vm8 = vmpackc.low %vm1317_vm7, %vm1315_vm4 }
 0x37d   : > { %7626 = vmatprep.subr.msk.bf16.mxu1 %vm7625_vm8, %v13175_v29  ;;  %vm7627_vm9 = vmpackc.low %vm1316_vm6, %vm1314_vm3  ;;  %v1666_v43 = vmax.f32 %v8925_v50, %v8928_v58 }
 0x37f   : > { %7628 = vmatpush1.bf16.xpose.msk.msra.mxu1 %vm7627_vm9, %v13175_v29  ;;  %v1240_v46 = vpop.xlane.xlu0 %1239  ;;  %1667 = vmax.xlane.f32.xlu1 %v1666_v43 }
 0x380   : > { %vm1318_vm10 = vcmp.eq.f32.partialorder %v8551_v32, %v1240_v46  ;;  %vm1319_vm11 = vcmp.eq.f32.partialorder %v8554_v17, %v1240_v46  ;;  %v13186_v46 = vld [vmem:[#allocation12_spill] sm:$0xff] }
 0x381   : > { %v8939_v53 = vsel %vm1318_vm10, -inf, %v8455_v61  ;;  %v8942_v56 = vsel %vm1319_vm11, -inf, %v8457_v63 }
 0x382   : > { %v1669_v2 = vmax.f32 %v8939_v53, %v8942_v56 }
 0x383   : > { %v1243_v35 = vpop.xlane.xlu1 %1242 }
 0x384   : > { %vm1320_vm12 = vcmp.eq.f32.partialorder %v8551_v32, %v1243_v35  ;;  %vm1321_vm13 = vcmp.eq.f32.partialorder %v8554_v17, %v1243_v35  ;;  %1670 = vmax.xlane.f32.xlu0 %v1669_v2 }
 0x385   : > { %v8949_v51 = vsel %vm1320_vm12, -inf, %v8463_v5  ;;  %v8952_v18 = vsel %vm1321_vm13, -inf, %v8465_v9  ;;  %vm7629_vm14 = vmpackc.low %vm1321_vm13, %vm1319_vm11  ;;  %v13184_v5 = vld [vmem:[#allocation9_spill] sm:$0xff]  ;;  %v13185_v9 = vld [vmem:[#allocation10_spill] sm:$0xff] }
 0x386   : > { %7630 = vmatprep.subr.msk.bf16.mxu1 %vm7629_vm14, %v13175_v29  ;;  %vm7631_vm15 = vmpackc.low %vm1320_vm12, %vm1318_vm10  ;;  %v1672_v61 = vmax.f32 %v8949_v51, %v8952_v18 }
 0x387   : > { %v1246_v63 = vpop.xlane.xlu0 %1245  ;;  %7632 = vmatpush1.bf16.xpose.msk.msra.mxu1 %vm7631_vm15, %v13175_v29 }
 0x388   : > { %vm1322_vm1 = vcmp.eq.f32.partialorder %v8551_v32, %v1246_v63  ;;  %vm1323_vm2 = vcmp.eq.f32.partialorder %v8554_v17, %v1246_v63  ;;  %1673 = vmax.xlane.f32.xlu1 %v1672_v61 }
 0x389   : > { %v8961_v27 = vsel %vm1322_vm1, -inf, %v13184_v5  ;;  %v8964_v19 = vsel %vm1323_vm2, -inf, %v13185_v9 }
 0x38a   : > { %v1675_v37 = vmax.f32 %v8961_v27, %v8964_v19 }
 0x38b   : > { %v1249_v54 = vpop.xlane.xlu1 %1248 }
 0x38c   : > { %vm1324_vm3 = vcmp.eq.f32.partialorder %v8551_v32, %v1249_v54  ;;  %vm1325_vm4 = vcmp.eq.f32.partialorder %v8554_v17, %v1249_v54  ;;  %1676 = vmax.xlane.f32.xlu0 %v1675_v37  ;;  %v13187_v54 = vld [vmem:[#allocation13_spill] sm:$0xff] }
 0x38d   : > { %v8971_v43 = vsel %vm1324_vm3, -inf, %v13158_v4  ;;  %v8974_v2 = vsel %vm1325_vm4, -inf, %v13186_v46  ;;  %vm7633_vm6 = vmpackc.low %vm1325_vm4, %vm1323_vm2 }
 0x38e   : > { %7634 = vmatprep.subr.msk.bf16.mxu1 %vm7633_vm6, %v13175_v29  ;;  %vm7635_vm7 = vmpackc.low %vm1324_vm3, %vm1322_vm1  ;;  %v1678_v35 = vmax.f32 %v8971_v43, %v8974_v2 }
 0x38f   : > { %7636 = vmatpush1.bf16.xpose.msk.msra.mxu1 %vm7635_vm7, %v13175_v29 }
 0x390   : > { %1679 = vmax.xlane.f32.xlu1 %v1678_v35  ;;  %v13189_v35 = vld [vmem:[#allocation14_spill] sm:$0xff] }
 0x3d0   : > { %v1623_v61 = vpop.xlane.xlu0 %1622 }
 0x3d1   : > { %vm1717_vm8 = vcmp.ge.f32.partialorder %v8693_v10, %v1623_v61  ;;  %vm1718_vm9 = vcmp.ge.f32.partialorder %v8696_v26, %v1623_v61 }
 0x3d2   : > { %v1781_v4 = vsel %vm1717_vm8, %v8551_v32, 256.0  ;;  %v1782_v63 = vsel %vm1718_vm9, %v8554_v17, 256.0 }
 0x3d3   : > { %v1845_v5 = vmin.f32 %v1781_v4, %v1782_v63 }
 0x3d4   : > { %v1252_v9 = vpop.xlane.xlu0 %1251 }
 0x3d5   : > { %v1626_v37 = vpop.xlane.xlu1 %1625  ;;  %vm1326_vm10 = vcmp.eq.f32.partialorder %v8551_v32, %v1252_v9  ;;  %vm1327_vm11 = vcmp.eq.f32.partialorder %v8554_v17, %v1252_v9  ;;  %1846 = vmin.xlane.f32.xlu0 %v1845_v5 }
 0x3d6   : > { %vm1719_vm12 = vcmp.ge.f32.partialorder %v8710_v48, %v1626_v37  ;;  %vm1720_vm13 = vcmp.ge.f32.partialorder %v8707_v25, %v1626_v37  ;;  %v8991_v46 = vsel %vm1326_vm10, -inf, %v13187_v54  ;;  %v8996_v61 = vsel %vm1327_vm11, -inf, %v13189_v35  ;;  %v13191_v25 = vld [vmem:[#allocation15_spill] sm:$0xff] }
 0x3d7   : > { %13188 = vst [vmem:[#allocation9_spill] sm:$0xff] %v8991_v46  ;;  %13190 = vst [vmem:[#allocation10_spill] sm:$0xff] %v8996_v61  ;;  %v1783_v4 = vsel %vm1719_vm12, %v8551_v32, 256.0  ;;  %v1784_v63 = vsel %vm1720_vm13, %v8554_v17, 256.0  ;;  %v1681_v48 = vmax.f32 %v8991_v46, %v8996_v61  ;;  %v13193_v61 = vld [vmem:[#allocation16_spill] sm:$0xff] }
 0x3d8   : > { %v1848_v26 = vmin.f32 %v1783_v4, %v1784_v63  ;;  %v1629_v37 = vpop.xlane.xlu0 %1628 }
 0x3d9   : > { %v1255_v5 = vpop.xlane.xlu1 %1254  ;;  %vm1721_vm14 = vcmp.ge.f32.partialorder %v8727_v16, %v1629_v37  ;;  %vm1722_vm15 = vcmp.ge.f32.partialorder %v8732_v47, %v1629_v37  ;;  %1682 = vmax.xlane.f32.xlu0 %v1681_v48 }
 0x3da   : > { %vm1328_vm1 = vcmp.eq.f32.partialorder %v8551_v32, %v1255_v5  ;;  %vm1329_vm2 = vcmp.eq.f32.partialorder %v8554_v17, %v1255_v5  ;;  %v1785_v54 = vsel %vm1721_vm14, %v8551_v32, 256.0  ;;  %v1786_v35 = vsel %vm1722_vm15, %v8554_v17, 256.0  ;;  %1849 = vmin.xlane.f32.xlu1 %v1848_v26  ;;  %v13195_v26 = vld [vmem:[#allocation27_spill] sm:$0xff]  ;;  %v13198_v5 = vld [vmem:[#allocation18_spill] sm:$0xff] }
 0x3db   : > { %v9009_v10 = vsel %vm1328_vm1, -inf, %v13191_v25  ;;  %v9012_v4 = vsel %vm1329_vm2, -inf, %v13193_v61  ;;  %vm7637_vm3 = vmpackc.low %vm1329_vm2, %vm1327_vm11  ;;  %v1851_v48 = vmin.f32 %v1785_v54, %v1786_v35  ;;  %v13196_v61 = vld [vmem:[#allocation17_spill] sm:$0xff] }
 0x3dc   : > { %13192 = vst [vmem:[#allocation12_spill] sm:$0xff] %v9009_v10  ;;  %13194 = vst [vmem:[#allocation13_spill] sm:$0xff] %v9012_v4  ;;  %7638 = vmatprep.subr.msk.bf16.mxu1 %vm7637_vm3, %v13175_v29  ;;  %v1684_v63 = vmax.f32 %v9009_v10, %v9012_v4  ;;  %v1258_v37 = vpop.xlane.xlu0 %1257 }
 0x3dd   : > { %vm7639_vm4 = vmpackc.low %vm1328_vm1, %vm1326_vm10  ;;  %v1632_v25 = vpop.xlane.xlu1 %1631  ;;  %vm1330_vm6 = vcmp.eq.f32.partialorder %v8551_v32, %v1258_v37  ;;  %vm1331_vm7 = vcmp.eq.f32.partialorder %v8554_v17, %v1258_v37  ;;  %1852 = vmin.xlane.f32.xlu0 %v1851_v48 }
 0x3de   : > { %7640 = vmatpush1.bf16.xpose.msk.msra.mxu1 %vm7639_vm4, %v13175_v29  ;;  %vm1723_vm8 = vcmp.ge.f32.partialorder %v8745_v24, %v1632_v25  ;;  %vm1724_vm9 = vcmp.ge.f32.partialorder %v13195_v26, %v1632_v25  ;;  %v9029_v9 = vsel %vm1330_vm6, -inf, %v13196_v61  ;;  %v9034_v54 = vsel %vm1331_vm7, -inf, %v13198_v5  ;;  %1685 = vmax.xlane.f32.xlu1 %v1684_v63  ;;  %v13200_v63 = vld [vmem:[#allocation19_spill] sm:$0xff] }
 0x3df   : > { %13197 = vst [vmem:[#allocation14_spill] sm:$0xff] %v9029_v9  ;;  %13199 = vst [vmem:[#allocation15_spill] sm:$0xff] %v9034_v54  ;;  %v1787_v35 = vsel %vm1723_vm8, %v8551_v32, 256.0  ;;  %v1788_v4 = vsel %vm1724_vm9, %v8554_v17, 256.0  ;;  %v1687_v24 = vmax.f32 %v9029_v9, %v9034_v54  ;;  %v13201_v54 = vld [vmem:[#allocation20_spill] sm:$0xff] }
 0x3e0   : > { %v1854_v25 = vmin.f32 %v1787_v35, %v1788_v4  ;;  %v1635_v48 = vpop.xlane.xlu0 %1634 }
 0x3e1   : > { %v1261_v26 = vpop.xlane.xlu1 %1260  ;;  %vm1725_vm10 = vcmp.ge.f32.partialorder %v8767_v21, %v1635_v48  ;;  %vm1726_vm11 = vcmp.ge.f32.partialorder %v8772_v12, %v1635_v48  ;;  %1688 = vmax.xlane.f32.xlu0 %v1687_v24 }
 0x3e2   : > { %vm1332_vm12 = vcmp.eq.f32.partialorder %v8551_v32, %v1261_v26  ;;  %vm1333_vm13 = vcmp.eq.f32.partialorder %v8554_v17, %v1261_v26  ;;  %v1789_v61 = vsel %vm1725_vm10, %v8551_v32, 256.0  ;;  %v1790_v5 = vsel %vm1726_vm11, %v8554_v17, 256.0  ;;  %1855 = vmin.xlane.f32.xlu1 %v1854_v25 }
 0x3e3   : > { %v9047_v10 = vsel %vm1332_vm12, -inf, %v13200_v63  ;;  %v9050_v4 = vsel %vm1333_vm13, -inf, %v13201_v54  ;;  %vm7641_vm14 = vmpackc.low %vm1333_vm13, %vm1331_vm7  ;;  %v1857_v24 = vmin.f32 %v1789_v61, %v1790_v5  ;;  %v13202_v54 = vld [vmem:[#allocation21_spill] sm:$0xff] }
 0x3e4   : > { %7642 = vmatprep.subr.msk.bf16.mxu1 %vm7641_vm14, %v13175_v29  ;;  %vm7643_vm15 = vmpackc.low %vm1332_vm12, %vm1330_vm6  ;;  %v1690_v26 = vmax.f32 %v9047_v10, %v9050_v4  ;;  %v1264_v35 = vpop.xlane.xlu0 %1263 }
 0x3e5   : > { %v1638_v48 = vpop.xlane.xlu1 %1637  ;;  %vm1334_vm1 = vcmp.eq.f32.partialorder %v8551_v32, %v1264_v35  ;;  %vm1335_vm2 = vcmp.eq.f32.partialorder %v8554_v17, %v1264_v35  ;;  %1858 = vmin.xlane.f32.xlu0 %v1857_v24 }
 0x3e6   : > { %7644 = vmatpush1.bf16.xpose.msk.msra.mxu1 %vm7643_vm15, %v13175_v29  ;;  %vm1727_vm3 = vcmp.ge.f32.partialorder %v8783_v44, %v1638_v48  ;;  %vm1728_vm4 = vcmp.ge.f32.partialorder %v8786_v42, %v1638_v48  ;;  %v9067_v37 = vsel %vm1334_vm1, -inf, %v13202_v54  ;;  %v9072_v25 = vsel %vm1335_vm2, -inf, %v13177_v40  ;;  %1691 = vmax.xlane.f32.xlu1 %v1690_v26 }
 0x3e7   : > { %v1791_v61 = vsel %vm1727_vm3, %v8551_v32, 256.0  ;;  %v1792_v5 = vsel %vm1728_vm4, %v8554_v17, 256.0  ;;  %v1693_v63 = vmax.f32 %v9067_v37, %v9072_v25 }
 0x3e8   : > { %v1860_v48 = vmin.f32 %v1791_v61, %v1792_v5 }
 0x3e9   : > { %v1267_v24 = vpop.xlane.xlu1 %1266  ;;  %1694 = vmax.xlane.f32.xlu0 %v1693_v63  ;;  %v13205_v63 = vld [vmem:[#allocation7_spill] sm:$0xff] }
 0x3ea   : > { %vm1336_vm6 = vcmp.eq.f32.partialorder %v8551_v32, %v1267_v24  ;;  %vm1337_vm7 = vcmp.eq.f32.partialorder %v8554_v17, %v1267_v24  ;;  %1861 = vmin.xlane.f32.xlu1 %v1860_v48 }
 0x3eb   : > { %v9081_v54 = vsel %vm1336_vm6, -inf, %v8524_v8  ;;  %v9084_v40 = vsel %vm1337_vm7, -inf, %v8582_v31  ;;  %vm7645_vm8 = vmpackc.low %vm1337_vm7, %vm1335_vm2 }
 0x3ec   : > { %13203 = vst [vmem:[#allocation16_spill] sm:$0xff] %v9081_v54  ;;  %13204 = vst [vmem:[#allocation17_spill] sm:$0xff] %v9084_v40  ;;  %7646 = vmatprep.subr.msk.bf16.mxu1 %vm7645_vm8, %v13175_v29  ;;  %v1696_v26 = vmax.f32 %v9081_v54, %v9084_v40 }
 0x3ed   : > { %vm7647_vm9 = vmpackc.low %vm1336_vm6, %vm1334_vm1  ;;  %v1641_v61 = vpop.xlane.xlu0 %1640  ;;  %v1644_v8 = vpop.xlane.xlu1 %1643 }
 0x3ee   : > { %7648 = vmatpush1.bf16.xpose.msk.msra.mxu1 %vm7647_vm9, %v13175_v29  ;;  %vm1729_vm10 = vcmp.ge.f32.partialorder %v8809_v38, %v1641_v61  ;;  %vm1730_vm11 = vcmp.ge.f32.partialorder %v8812_v30, %v1641_v61  ;;  %vm1731_vm12 = vcmp.ge.f32.partialorder %v8803_v41, %v1644_v8  ;;  %vm1732_vm13 = vcmp.ge.f32.partialorder %v13205_v63, %v1644_v8  ;;  %v13206_v30 = vld [vmem:[#allocation23_spill] sm:$0xff] }
 0x3ef   : > { %v1793_v31 = vsel %vm1729_vm10, %v8551_v32, 256.0  ;;  %v1794_v5 = vsel %vm1730_vm11, %v8554_v17, 256.0  ;;  %1697 = vmax.xlane.f32.xlu1 %v1696_v26  ;;  %v1795_v35 = vsel %vm1731_vm12, %v8551_v32, 256.0  ;;  %v1796_v48 = vsel %vm1732_vm13, %v8554_v17, 256.0 }
 0x3f0   : > { %v1863_v24 = vmin.f32 %v1793_v31, %v1794_v5  ;;  %v1866_v54 = vmin.f32 %v1795_v35, %v1796_v48 }
 0x3f1   : > { %v1270_v40 = vpop.xlane.xlu0 %1269  ;;  %v1273_v61 = vpop.xlane.xlu1 %1272 }
 0x3f2   : > { %vm1338_vm14 = vcmp.eq.f32.partialorder %v8551_v32, %v1270_v40  ;;  %vm1339_vm15 = vcmp.eq.f32.partialorder %v8554_v17, %v1270_v40  ;;  %1864 = vmin.xlane.f32.xlu0 %v1863_v24  ;;  %vm1340_vm1 = vcmp.eq.f32.partialorder %v8551_v32, %v1273_v61  ;;  %vm1341_vm2 = vcmp.eq.f32.partialorder %v8554_v17, %v1273_v61 }
 0x3f3   : > { %v9107_v41 = vsel %vm1338_vm14, -inf, %v13206_v30  ;;  %v9110_v26 = vsel %vm1339_vm15, -inf, %v8599_v20  ;;  %1867 = vmin.xlane.f32.xlu1 %v1866_v54  ;;  %v9115_v8 = vsel %vm1340_vm1, -inf, %v8530_v3  ;;  %v9118_v31 = vsel %vm1341_vm2, -inf, %v8602_v55  ;;  %vm7649_vm3 = vmpackc.low %vm1341_vm2, %vm1339_vm15 }
 0x3f4   : > { %13207 = vst [vmem:[#allocation18_spill] sm:$0xff] %v9107_v41  ;;  %13208 = vst [vmem:[#allocation19_spill] sm:$0xff] %v9110_v26  ;;  %v1699_v5 = vmax.f32 %v9107_v41, %v9110_v26  ;;  %7650 = vmatprep.subr.msk.bf16.mxu1 %vm7649_vm3, %v13175_v29  ;;  %v1702_v20 = vmax.f32 %v9115_v8, %v9118_v31 }
 0x3f5   : > { %13209 = vst [vmem:[#allocation20_spill] sm:$0xff] %v9115_v8  ;;  %v1647_v30 = vpop.xlane.xlu0 %1646  ;;  %vm7651_vm4 = vmpackc.low %vm1340_vm1, %vm1338_vm14  ;;  %v1650_v3 = vpop.xlane.xlu1 %1649 }
 0x3f6   : > { %vm1733_vm6 = vcmp.ge.f32.partialorder %v8833_v34, %v1647_v30  ;;  %vm1734_vm7 = vcmp.ge.f32.partialorder %v8836_v60, %v1647_v30  ;;  %7652 = vmatpush1.bf16.xpose.msk.msra.mxu1 %vm7651_vm4, %v13175_v29  ;;  %1700 = vmax.xlane.f32.xlu0 %v1699_v5  ;;  %vm1735_vm8 = vcmp.ge.f32.partialorder %v8839_v59, %v1650_v3 }
 0x3f7   : > { %v1797_v55 = vsel %vm1733_vm6, %v8551_v32, 256.0  ;;  %v1798_v54 = vsel %vm1734_vm7, %v8554_v17, 256.0  ;;  %vm1736_vm9 = vcmp.ge.f32.partialorder %v8842_v49, %v1650_v3  ;;  %1703 = vmax.xlane.f32.xlu1 %v1702_v20  ;;  %v1799_v40 = vsel %vm1735_vm8, %v8551_v32, 256.0 }
 0x3f8   : > { %v1800_v35 = vsel %vm1736_vm9, %v8554_v17, 256.0  ;;  %v1869_v48 = vmin.f32 %v1797_v55, %v1798_v54 }
 0x3f9   : > { %v1276_v24 = vpop.xlane.xlu0 %1275  ;;  %v1872_v61 = vmin.f32 %v1799_v40, %v1800_v35  ;;  %v1279_v5 = vpop.xlane.xlu1 %1278 }
 0x3fa   : > { %vm1342_vm10 = vcmp.eq.f32.partialorder %v8551_v32, %v1276_v24  ;;  %vm1343_vm11 = vcmp.eq.f32.partialorder %v8554_v17, %v1276_v24  ;;  %1870 = vmin.xlane.f32.xlu0 %v1869_v48  ;;  %vm1344_vm12 = vcmp.eq.f32.partialorder %v8551_v32, %v1279_v5  ;;  %vm1345_vm13 = vcmp.eq.f32.partialorder %v8554_v17, %v1279_v5 }
 0x3fb   : > { %v9141_v30 = vsel %vm1342_vm10, -inf, %v8534_v15  ;;  %v9144_v20 = vsel %vm1343_vm11, -inf, %v8621_v45  ;;  %1873 = vmin.xlane.f32.xlu1 %v1872_v61  ;;  %v9149_v3 = vsel %vm1344_vm12, -inf, %v8538_v57  ;;  %v9152_v55 = vsel %vm1345_vm13, -inf, %v8624_v39  ;;  %vm7653_vm14 = vmpackc.low %vm1345_vm13, %vm1343_vm11 }
 0x3fc   : > { %v1705_v54 = vmax.f32 %v9141_v30, %v9144_v20  ;;  %7654 = vmatprep.subr.msk.bf16.mxu1 %vm7653_vm14, %v13175_v29  ;;  %vm7655_vm15 = vmpackc.low %vm1344_vm12, %vm1342_vm10  ;;  %v1708_v45 = vmax.f32 %v9149_v3, %v9152_v55 }
 0x3fd   : > { %v1653_v15 = vpop.xlane.xlu0 %1652  ;;  %v1656_v57 = vpop.xlane.xlu1 %1655 }
 0x3fe   : > { %vm1737_vm1 = vcmp.ge.f32.partialorder %v8863_v23, %v1653_v15  ;;  %vm1738_vm2 = vcmp.ge.f32.partialorder %v8866_v1, %v1653_v15  ;;  %7656 = vmatpush1.bf16.xpose.msk.msra.mxu1 %vm7655_vm15, %v13175_v29  ;;  %1706 = vmax.xlane.f32.xlu0 %v1705_v54  ;;  %vm1739_vm3 = vcmp.ge.f32.partialorder %v8869_v0, %v1656_v57 }
 0x3ff   : > { %v1801_v39 = vsel %vm1737_vm1, %v8551_v32, 256.0  ;;  %v1802_v40 = vsel %vm1738_vm2, %v8554_v17, 256.0  ;;  %vm1740_vm4 = vcmp.ge.f32.partialorder %v8872_v14, %v1656_v57  ;;  %1709 = vmax.xlane.f32.xlu1 %v1708_v45  ;;  %v1803_v35 = vsel %vm1739_vm3, %v8551_v32, 256.0 }
 0x400   : > { %v1804_v48 = vsel %vm1740_vm4, %v8554_v17, 256.0  ;;  %v1875_v24 = vmin.f32 %v1801_v39, %v1802_v40 }
 0x401   : > { %v1282_v61 = vpop.xlane.xlu0 %1281  ;;  %v1878_v5 = vmin.f32 %v1803_v35, %v1804_v48  ;;  %v1285_v54 = vpop.xlane.xlu1 %1284 }
 0x402   : > { %vm1346_vm6 = vcmp.eq.f32.partialorder %v8551_v32, %v1282_v61  ;;  %vm1347_vm7 = vcmp.eq.f32.partialorder %v8554_v17, %v1282_v61  ;;  %1876 = vmin.xlane.f32.xlu0 %v1875_v24  ;;  %vm1348_vm8 = vcmp.eq.f32.partialorder %v8551_v32, %v1285_v54  ;;  %vm1349_vm9 = vcmp.eq.f32.partialorder %v8554_v17, %v1285_v54 }
 0x403   : > { %v9175_v15 = vsel %vm1346_vm6, -inf, %v8542_v62  ;;  %v9178_v45 = vsel %vm1347_vm7, -inf, %v8643_v33  ;;  %1879 = vmin.xlane.f32.xlu1 %v1878_v5  ;;  %v9183_v57 = vsel %vm1348_vm8, -inf, %v8546_v52  ;;  %v9186_v39 = vsel %vm1349_vm9, -inf, %v8646_v22  ;;  %vm7657_vm10 = vmpackc.low %vm1349_vm9, %vm1347_vm7 }
 0x404   : > { %v1711_v40 = vmax.f32 %v9175_v15, %v9178_v45  ;;  %7658 = vmatprep.subr.msk.bf16.mxu1 %vm7657_vm10, %v13175_v29  ;;  %vm7659_vm11 = vmpackc.low %vm1348_vm8, %vm1346_vm6  ;;  %v1714_v33 = vmax.f32 %v9183_v57, %v9186_v39 }
 0x405   : > { %v1659_v62 = vpop.xlane.xlu0 %1658  ;;  %v1662_v52 = vpop.xlane.xlu1 %1661 }
 0x406   : > { %vm1741_vm12 = vcmp.ge.f32.partialorder %v8893_v6, %v1659_v62  ;;  %vm1742_vm13 = vcmp.ge.f32.partialorder %v8896_v13, %v1659_v62  ;;  %7660 = vmatpush1.bf16.xpose.msk.msra.mxu1 %vm7659_vm11, %v13175_v29  ;;  %1712 = vmax.xlane.f32.xlu0 %v1711_v40  ;;  %vm1743_vm14 = vcmp.ge.f32.partialorder %v8899_v11, %v1662_v52 }
 0x407   : > { %v1805_v22 = vsel %vm1741_vm12, %v8551_v32, 256.0  ;;  %v1806_v35 = vsel %vm1742_vm13, %v8554_v17, 256.0  ;;  %vm1744_vm15 = vcmp.ge.f32.partialorder %v8902_v7, %v1662_v52  ;;  %1715 = vmax.xlane.f32.xlu1 %v1714_v33  ;;  %v1807_v48 = vsel %vm1743_vm14, %v8551_v32, 256.0  ;;  %v13210_v52 = vld [vmem:[#allocation4_spill] sm:$0xff] }
 0x408   : > { %v1808_v24 = vsel %vm1744_vm15, %v8554_v17, 256.0  ;;  %v1881_v61 = vmin.f32 %v1805_v22, %v1806_v35  ;;  %v13211_v22 = vld [vmem:[#allocation5_spill] sm:$0xff] }
 0x409   : > { %v1665_v5 = vpop.xlane.xlu0 %1664  ;;  %v1884_v54 = vmin.f32 %v1807_v48, %v1808_v24 }
 0x40a   : > { %vm1745_vm1 = vcmp.ge.f32.partialorder %v8915_v28, %v1665_v5  ;;  %vm1746_vm2 = vcmp.ge.f32.partialorder %v8918_v36, %v1665_v5  ;;  %1882 = vmin.xlane.f32.xlu0 %v1881_v61 }
 0x40b   : > { %v1809_v40 = vsel %vm1745_vm1, %v8551_v32, 256.0  ;;  %v1810_v62 = vsel %vm1746_vm2, %v8554_v17, 256.0  ;;  %1885 = vmin.xlane.f32.xlu1 %v1884_v54 }
 0x40c   : > { %v1887_v11 = vmin.f32 %v1809_v40, %v1810_v62  ;;  %v1668_v33 = vpop.xlane.xlu1 %1667 }
 0x40d   : > { %1546 = vmatmul.mubr.f32.vlgmr.msra.gmra.mrb[0].mxu1 %v13210_v52  ;;  %vm1747_vm3 = vcmp.ge.f32.partialorder %v8925_v50, %v1668_v33  ;;  %vm1748_vm4 = vcmp.ge.f32.partialorder %v8928_v58, %v1668_v33  ;;  %v13219_v52 = vld [vmem:[#allocation25_spill] sm:$0xff] }
 0x40e   : > { %2849 = vmatprep.mubr.f32.mxu1 %v13211_v22  ;;  %1888 = vmin.xlane.f32.xlu0 %v1887_v11  ;;  %v1811_v35 = vsel %vm1747_vm3, %v8551_v32, 256.0  ;;  %v1812_v48 = vsel %vm1748_vm4, %v8554_v17, 256.0 }
 0x40f   : > { %v1890_v24 = vmin.f32 %v1811_v35, %v1812_v48 }
 0x411   : > { %v1671_v61 = vpop.xlane.xlu0 %1670  ;;  %1891 = vmin.xlane.f32.xlu1 %v1890_v24 }
 0x412   : > { %vm1749_vm6 = vcmp.ge.f32.partialorder %v8939_v53, %v1671_v61  ;;  %vm1750_vm7 = vcmp.ge.f32.partialorder %v8942_v56, %v1671_v61 }
 0x413   : > { %v1813_v5 = vsel %vm1749_vm6, %v8551_v32, 256.0  ;;  %v1814_v54 = vsel %vm1750_vm7, %v8554_v17, 256.0 }
 0x414   : > { %v1893_v40 = vmin.f32 %v1813_v5, %v1814_v54 }
 0x415   : > { %v1674_v62 = vpop.xlane.xlu1 %1673 }
 0x416   : > { %vm1751_vm8 = vcmp.ge.f32.partialorder %v8949_v51, %v1674_v62  ;;  %vm1752_vm9 = vcmp.ge.f32.partialorder %v8952_v18, %v1674_v62  ;;  %1894 = vmin.xlane.f32.xlu0 %v1893_v40 }
 0x417   : > { %v1815_v11 = vsel %vm1751_vm8, %v8551_v32, 256.0  ;;  %v1816_v33 = vsel %vm1752_vm9, %v8554_v17, 256.0 }
 0x418   : > { %v1896_v35 = vmin.f32 %v1815_v11, %v1816_v33 }
 0x419   : > { %v1677_v48 = vpop.xlane.xlu0 %1676 }
 0x41a   : > { %vm1753_vm10 = vcmp.ge.f32.partialorder %v8961_v27, %v1677_v48  ;;  %vm1754_vm11 = vcmp.ge.f32.partialorder %v8964_v19, %v1677_v48  ;;  %1897 = vmin.xlane.f32.xlu1 %v1896_v35  ;;  %v13212_v35 = vld [vmem:[#allocation11_spill] sm:$0xff] }
 0x41b   : > { %v1817_v24 = vsel %vm1753_vm10, %v8551_v32, 256.0  ;;  %v1818_v61 = vsel %vm1754_vm11, %v8554_v17, 256.0 }
 0x41c   : > { %v1899_v5 = vmin.f32 %v1817_v24, %v1818_v61  ;;  %v13214_v24 = vld [vmem:[#allocation24_spill] sm:$0xff] }
 0x41d   : > { %v1680_v54 = vpop.xlane.xlu1 %1679 }
 0x41e   : > { %vm1755_vm12 = vcmp.ge.f32.partialorder %v8971_v43, %v1680_v54  ;;  %vm1756_vm13 = vcmp.ge.f32.partialorder %v8974_v2, %v1680_v54  ;;  %1900 = vmin.xlane.f32.xlu0 %v1899_v5 }
 0x41f   : > { %v1819_v40 = vsel %vm1755_vm12, %v8551_v32, 256.0  ;;  %v1820_v62 = vsel %vm1756_vm13, %v8554_v17, 256.0 }
 0x420   : > { %v1902_v11 = vmin.f32 %v1819_v40, %v1820_v62  ;;  %v13216_v40 = vld [vmem:[#allocation10_spill] sm:$0xff] }
 0x422   : > { %1903 = vmin.xlane.f32.xlu1 %v1902_v11 }
 0x462   : > { %v1847_v33 = vpop.xlane.xlu0 %1846 }
 0x463   : > { %vm1941_vm14 = vcmp.eq.f32.partialorder %v8551_v32, %v1847_v33  ;;  %vm1942_vm15 = vcmp.eq.f32.partialorder %v8554_v17, %v1847_v33 }
 0x464   : > { %v9233_v48 = vsel %vm1941_vm14, -inf, %v13212_v35  ;;  %v9238_v61 = vsel %vm1942_vm15, -inf, %v13214_v24  ;;  %v13217_v24 = vld [vmem:[#allocation26_spill] sm:$0xff] }
 0x465   : > { %13213 = vst [vmem:[#allocation21_spill] sm:$0xff] %v9233_v48  ;;  %13215 = vst [vmem:[#allocation7_spill] sm:$0xff] %v9238_v61  ;;  %v2273_v5 = vmax.f32 %v9233_v48, %v9238_v61 }
 0x466   : > { %v1683_v54 = vpop.xlane.xlu0 %1682 }
 0x467   : > { %vm1757_vm1 = vcmp.ge.f32.partialorder %v8991_v46, %v1683_v54  ;;  %vm1758_vm2 = vcmp.ge.f32.partialorder %v13216_v40, %v1683_v54  ;;  %v1850_v62 = vpop.xlane.xlu1 %1849  ;;  %2274 = vmax.xlane.f32.xlu0 %v2273_v5 }
 0x468   : > { %v1821_v11 = vsel %vm1757_vm1, %v8551_v32, 256.0  ;;  %v1822_v35 = vsel %vm1758_vm2, %v8554_v17, 256.0  ;;  %vm1943_vm3 = vcmp.eq.f32.partialorder %v8551_v32, %v1850_v62  ;;  %vm1944_vm4 = vcmp.eq.f32.partialorder %v8554_v17, %v1850_v62 }
 0x469   : > { %vm7663_vm6 = vmpackc.low %vm1943_vm3, %vm1941_vm14  ;;  %v9249_v22 = vsel %vm1943_vm3, -inf, %v13217_v24  ;;  %v9252_v61 = vsel %vm1944_vm4, -inf, %v13219_v52  ;;  %v1905_v46 = vmin.f32 %v1821_v11, %v1822_v35  ;;  %v13222_v11 = vld [vmem:[#allocation12_spill] sm:$0xff]  ;;  %v13223_v35 = vld [vmem:[#allocation13_spill] sm:$0xff] }
 0x46a   : > { %13218 = vst [vmem:[#allocation23_spill] sm:$0xff] %v9249_v22  ;;  %13220 = vst [vmem:[#allocation11_spill] sm:$0xff] %v9252_v61  ;;  %v1853_v5 = vpop.xlane.xlu0 %1852  ;;  %v2276_v54 = vmax.f32 %v9249_v22, %v9252_v61 }
 0x46b   : > { %vm7661_vm7 = vmpackc.low %vm1944_vm4, %vm1942_vm15  ;;  %vm1945_vm8 = vcmp.eq.f32.partialorder %v8551_v32, %v1853_v5  ;;  %vm1946_vm9 = vcmp.eq.f32.partialorder %v8554_v17, %v1853_v5  ;;  %v1686_v62 = vpop.xlane.xlu1 %1685  ;;  %1906 = vmin.xlane.f32.xlu0 %v1905_v46 }
 0x46c   : > { %7662 = vmatprep.subr.msk.bf16.mxu0 %vm7661_vm7, %v13175_v29  ;;  %v9264_v52 = vsel %vm1945_vm8, -inf, %v8727_v16  ;;  %v9269_v33 = vsel %vm1946_vm9, -inf, %v8732_v47  ;;  %vm1759_vm10 = vcmp.ge.f32.partialorder %v13222_v11, %v1686_v62  ;;  %vm1760_vm11 = vcmp.ge.f32.partialorder %v13223_v35, %v1686_v62  ;;  %2277 = vmax.xlane.f32.xlu1 %v2276_v54  ;;  %v13224_v47 = vld [vmem:[#allocation15_spill] sm:$0xff]  ;;  %v13225_v54 = vld [vmem:[#allocation6_spill] sm:$0xff] }
 0x46d   : > { %13221 = vst [vmem:[#allocation24_spill] sm:$0xff] %v9269_v33  ;;  %7664 = vmatpush1.bf16.xpose.msk.msra.mxu0 %vm7663_vm6, %v13175_v29  ;;  %v1823_v24 = vsel %vm1759_vm10, %v8551_v32, 256.0  ;;  %v1824_v46 = vsel %vm1760_vm11, %v8554_v17, 256.0  ;;  %v2279_v16 = vmax.f32 %v9264_v52, %v9269_v33 }
 0x46e   : > { %v1689_v61 = vpop.xlane.xlu0 %1688  ;;  %v1908_v22 = vmin.f32 %v1823_v24, %v1824_v46  ;;  %v13227_v46 = vld [vmem:[#allocation27_spill] sm:$0xff] }
 0x46f   : > { %vm1761_vm12 = vcmp.ge.f32.partialorder %v9029_v9, %v1689_v61  ;;  %vm1762_vm13 = vcmp.ge.f32.partialorder %v13224_v47, %v1689_v61  ;;  %v1856_v40 = vpop.xlane.xlu1 %1855  ;;  %2280 = vmax.xlane.f32.xlu0 %v2279_v16 }
 0x470   : > { %v1825_v11 = vsel %vm1761_vm12, %v8551_v32, 256.0  ;;  %v1826_v62 = vsel %vm1762_vm13, %v8554_v17, 256.0  ;;  %vm1947_vm14 = vcmp.eq.f32.partialorder %v8551_v32, %v1856_v40  ;;  %vm1948_vm15 = vcmp.eq.f32.partialorder %v8554_v17, %v1856_v40  ;;  %1909 = vmin.xlane.f32.xlu1 %v1908_v22 }
 0x471   : > { %vm7667_vm1 = vmpackc.low %vm1947_vm14, %vm1945_vm8  ;;  %v9287_v24 = vsel %vm1947_vm14, -inf, %v13225_v54  ;;  %v9290_v9 = vsel %vm1948_vm15, -inf, %v13227_v46  ;;  %v1911_v61 = vmin.f32 %v1825_v11, %v1826_v62 }
 0x472   : > { %13226 = vst [vmem:[#allocation26_spill] sm:$0xff] %v9287_v24  ;;  %vm7665_vm2 = vmpackc.low %vm1948_vm15, %vm1946_vm9  ;;  %v1859_v16 = vpop.xlane.xlu0 %1858  ;;  %v2282_v47 = vmax.f32 %v9287_v24, %v9290_v9 }
 0x473   : > { %7666 = vmatprep.subr.msk.bf16.mxu0 %vm7665_vm2, %v13175_v29  ;;  %vm1949_vm3 = vcmp.eq.f32.partialorder %v8551_v32, %v1859_v16  ;;  %vm1950_vm4 = vcmp.eq.f32.partialorder %v8554_v17, %v1859_v16  ;;  %v1692_v22 = vpop.xlane.xlu1 %1691  ;;  %1912 = vmin.xlane.f32.xlu0 %v1911_v61 }
 0x474   : > { %v9302_v40 = vsel %vm1949_vm3, -inf, %v8767_v21  ;;  %v9307_v5 = vsel %vm1950_vm4, -inf, %v8772_v12  ;;  %vm1763_vm6 = vcmp.ge.f32.partialorder %v9047_v10, %v1692_v22  ;;  %vm1764_vm7 = vcmp.ge.f32.partialorder %v9050_v4, %v1692_v22  ;;  %2283 = vmax.xlane.f32.xlu1 %v2282_v47 }
 0x475   : > { %7668 = vmatpush1.bf16.xpose.msk.msra.mxu0 %vm7667_vm1, %v13175_v29  ;;  %v1827_v11 = vsel %vm1763_vm6, %v8551_v32, 256.0  ;;  %v1828_v62 = vsel %vm1764_vm7, %v8554_v17, 256.0  ;;  %v2285_v21 = vmax.f32 %v9302_v40, %v9307_v5 }
 0x476   : > { %v1695_v54 = vpop.xlane.xlu0 %1694  ;;  %v1914_v46 = vmin.f32 %v1827_v11, %v1828_v62 }
 0x477   : > { %vm1765_vm8 = vcmp.ge.f32.partialorder %v9067_v37, %v1695_v54  ;;  %vm1766_vm9 = vcmp.ge.f32.partialorder %v9072_v25, %v1695_v54  ;;  %v1862_v12 = vpop.xlane.xlu1 %1861  ;;  %2286 = vmax.xlane.f32.xlu0 %v2285_v21 }
 0x478   : > { %v1829_v61 = vsel %vm1765_vm8, %v8551_v32, 256.0  ;;  %v1830_v22 = vsel %vm1766_vm9, %v8554_v17, 256.0  ;;  %vm1951_vm10 = vcmp.eq.f32.partialorder %v8551_v32, %v1862_v12  ;;  %vm1952_vm11 = vcmp.eq.f32.partialorder %v8554_v17, %v1862_v12  ;;  %1915 = vmin.xlane.f32.xlu1 %v1914_v46  ;;  %v13230_v46 = vld [vmem:[#allocation16_spill] sm:$0xff] }
 0x479   : > { %vm7671_vm12 = vmpackc.low %vm1951_vm10, %vm1949_vm3  ;;  %v9325_v47 = vsel %vm1951_vm10, -inf, %v8783_v44  ;;  %v9328_v11 = vsel %vm1952_vm11, -inf, %v8786_v42  ;;  %v1917_v62 = vmin.f32 %v1829_v61, %v1830_v22  ;;  %v13231_v44 = vld [vmem:[#allocation17_spill] sm:$0xff] }
 0x47a   : > { %13228 = vst [vmem:[#allocation25_spill] sm:$0xff] %v9325_v47  ;;  %13229 = vst [vmem:[#allocation13_spill] sm:$0xff] %v9328_v11  ;;  %v2288_v21 = vmax.f32 %v9325_v47, %v9328_v11  ;;  %v13233_v11 = vld [vmem:[#allocation8_spill] sm:$0xff] }
 0x47b   : > { %vm7669_vm13 = vmpackc.low %vm1952_vm11, %vm1950_vm4  ;;  %1918 = vmin.xlane.f32.xlu0 %v1917_v62 }
 0x47c   : > { %7670 = vmatprep.subr.msk.bf16.mxu0 %vm7669_vm13, %v13175_v29  ;;  %v1698_v54 = vpop.xlane.xlu1 %1697  ;;  %2289 = vmax.xlane.f32.xlu1 %v2288_v21  ;;  %v13235_v21 = vld [vmem:[#allocation22_spill] sm:$0xff] }
 0x47d   : > { %7672 = vmatpush1.bf16.xpose.msk.msra.mxu0 %vm7671_vm12, %v13175_v29  ;;  %vm1767_vm14 = vcmp.ge.f32.partialorder %v13230_v46, %v1698_v54  ;;  %vm1768_vm15 = vcmp.ge.f32.partialorder %v13231_v44, %v1698_v54 }
 0x47e   : > { %v1831_v42 = vsel %vm1767_vm14, %v8551_v32, 256.0  ;;  %v1832_v12 = vsel %vm1768_vm15, %v8554_v17, 256.0 }
 0x47f   : > { %v1865_v16 = vpop.xlane.xlu0 %1864  ;;  %v1920_v61 = vmin.f32 %v1831_v42, %v1832_v12 }
 0x480   : > { %vm1953_vm1 = vcmp.eq.f32.partialorder %v8551_v32, %v1865_v16  ;;  %vm1954_vm2 = vcmp.eq.f32.partialorder %v8554_v17, %v1865_v16  ;;  %v1868_v22 = vpop.xlane.xlu1 %1867 }
 0x481   : > { %v9343_v62 = vsel %vm1953_vm1, -inf, %v8809_v38  ;;  %v9346_v47 = vsel %vm1954_vm2, -inf, %v13233_v11  ;;  %vm1955_vm3 = vcmp.eq.f32.partialorder %v8551_v32, %v1868_v22  ;;  %vm1956_vm4 = vcmp.eq.f32.partialorder %v8554_v17, %v1868_v22  ;;  %1921 = vmin.xlane.f32.xlu1 %v1920_v61 }
 0x482   : > { %13232 = vst [vmem:[#allocation6_spill] sm:$0xff] %v9343_v62  ;;  %13234 = vst [vmem:[#allocation27_spill] sm:$0xff] %v9346_v47  ;;  %v9351_v54 = vsel %vm1955_vm3, -inf, %v13235_v21  ;;  %v9354_v42 = vsel %vm1956_vm4, -inf, %v13205_v63  ;;  %v2291_v12 = vmax.f32 %v9343_v62, %v9346_v47 }
 0x483   : > { %vm7675_vm6 = vmpackc.low %vm1955_vm3, %vm1953_vm1  ;;  %13236 = vst [vmem:[#allocation16_spill] sm:$0xff] %v9351_v54  ;;  %v1701_v38 = vpop.xlane.xlu0 %1700  ;;  %v2294_v11 = vmax.f32 %v9351_v54, %v9354_v42 }
 0x484   : > { %13237 = vst [vmem:[#allocation17_spill] sm:$0xff] %v9354_v42  ;;  %vm7673_vm7 = vmpackc.low %vm1956_vm4, %vm1954_vm2  ;;  %vm1769_vm8 = vcmp.ge.f32.partialorder %v9107_v41, %v1701_v38  ;;  %vm1770_vm9 = vcmp.ge.f32.partialorder %v9110_v26, %v1701_v38  ;;  %v1704_v16 = vpop.xlane.xlu1 %1703  ;;  %2292 = vmax.xlane.f32.xlu0 %v2291_v12 }
 0x485   : > { %7674 = vmatprep.subr.msk.bf16.mxu0 %vm7673_vm7, %v13175_v29  ;;  %v1833_v61 = vsel %vm1769_vm8, %v8551_v32, 256.0  ;;  %v1834_v63 = vsel %vm1770_vm9, %v8554_v17, 256.0  ;;  %vm1771_vm10 = vcmp.ge.f32.partialorder %v9115_v8, %v1704_v16  ;;  %vm1772_vm11 = vcmp.ge.f32.partialorder %v9118_v31, %v1704_v16  ;;  %2295 = vmax.xlane.f32.xlu1 %v2294_v11 }
 0x486   : > { %7676 = vmatpush1.bf16.xpose.msk.msra.mxu0 %vm7675_vm6, %v13175_v29  ;;  %v1835_v22 = vsel %vm1771_vm10, %v8551_v32, 256.0  ;;  %v1836_v21 = vsel %vm1772_vm11, %v8554_v17, 256.0  ;;  %v1923_v41 = vmin.f32 %v1833_v61, %v1834_v63 }
 0x487   : > { %v1871_v42 = vpop.xlane.xlu0 %1870  ;;  %v1926_v38 = vmin.f32 %v1835_v22, %v1836_v21 }
 0x488   : > { %vm1957_vm12 = vcmp.eq.f32.partialorder %v8551_v32, %v1871_v42  ;;  %vm1958_vm13 = vcmp.eq.f32.partialorder %v8554_v17, %v1871_v42  ;;  %v1874_v12 = vpop.xlane.xlu1 %1873  ;;  %1924 = vmin.xlane.f32.xlu0 %v1923_v41 }
 0x489   : > { %v9373_v26 = vsel %vm1957_vm12, -inf, %v8833_v34  ;;  %v9376_v8 = vsel %vm1958_vm13, -inf, %v8836_v60  ;;  %vm1959_vm14 = vcmp.eq.f32.partialorder %v8551_v32, %v1874_v12  ;;  %vm1960_vm15 = vcmp.eq.f32.partialorder %v8554_v17, %v1874_v12  ;;  %1927 = vmin.xlane.f32.xlu1 %v1926_v38 }
 0x48a   : > { %vm7679_vm1 = vmpackc.low %vm1959_vm14, %vm1957_vm12  ;;  %v9381_v11 = vsel %vm1959_vm14, -inf, %v8839_v59  ;;  %v9384_v16 = vsel %vm1960_vm15, -inf, %v8842_v49  ;;  %v2297_v41 = vmax.f32 %v9373_v26, %v9376_v8 }
 0x48b   : > { %13238 = vst [vmem:[#allocation8_spill] sm:$0xff] %v9381_v11  ;;  %vm7677_vm2 = vmpackc.low %vm1960_vm15, %vm1958_vm13  ;;  %v1707_v34 = vpop.xlane.xlu0 %1706  ;;  %v2300_v60 = vmax.f32 %v9381_v11, %v9384_v16 }
 0x48c   : > { %7678 = vmatprep.subr.msk.bf16.mxu0 %vm7677_vm2, %v13175_v29  ;;  %vm1773_vm3 = vcmp.ge.f32.partialorder %v9141_v30, %v1707_v34  ;;  %vm1774_vm4 = vcmp.ge.f32.partialorder %v9144_v20, %v1707_v34  ;;  %v1710_v42 = vpop.xlane.xlu1 %1709  ;;  %2298 = vmax.xlane.f32.xlu0 %v2297_v41 }
 0x48d   : > { %v1837_v59 = vsel %vm1773_vm3, %v8551_v32, 256.0  ;;  %v1838_v49 = vsel %vm1774_vm4, %v8554_v17, 256.0  ;;  %vm1775_vm6 = vcmp.ge.f32.partialorder %v9149_v3, %v1710_v42  ;;  %vm1776_vm7 = vcmp.ge.f32.partialorder %v9152_v55, %v1710_v42  ;;  %2301 = vmax.xlane.f32.xlu1 %v2300_v60 }
 0x48e   : > { %7680 = vmatpush1.bf16.xpose.msk.msra.mxu0 %vm7679_vm1, %v13175_v29  ;;  %v1839_v61 = vsel %vm1775_vm6, %v8551_v32, 256.0  ;;  %v1840_v63 = vsel %vm1776_vm7, %v8554_v17, 256.0  ;;  %v1929_v22 = vmin.f32 %v1837_v59, %v1838_v49 }
 0x48f   : > { %v1877_v21 = vpop.xlane.xlu0 %1876  ;;  %v1932_v38 = vmin.f32 %v1839_v61, %v1840_v63 }
 0x490   : > { %vm1961_vm8 = vcmp.eq.f32.partialorder %v8551_v32, %v1877_v21  ;;  %vm1962_vm9 = vcmp.eq.f32.partialorder %v8554_v17, %v1877_v21  ;;  %v1880_v12 = vpop.xlane.xlu1 %1879  ;;  %1930 = vmin.xlane.f32.xlu0 %v1929_v22 }
 0x491   : > { %v9403_v41 = vsel %vm1961_vm8, -inf, %v8863_v23  ;;  %v9406_v34 = vsel %vm1962_vm9, -inf, %v8866_v1  ;;  %vm1963_vm10 = vcmp.eq.f32.partialorder %v8551_v32, %v1880_v12  ;;  %vm1964_vm11 = vcmp.eq.f32.partialorder %v8554_v17, %v1880_v12  ;;  %1933 = vmin.xlane.f32.xlu1 %v1932_v38 }
 0x492   : > { %vm7683_vm12 = vmpackc.low %vm1963_vm10, %vm1961_vm8  ;;  %v9411_v60 = vsel %vm1963_vm10, -inf, %v8869_v0  ;;  %v9414_v42 = vsel %vm1964_vm11, -inf, %v8872_v14  ;;  %v2303_v59 = vmax.f32 %v9403_v41, %v9406_v34 }
 0x493   : > { %vm7681_vm13 = vmpackc.low %vm1964_vm11, %vm1962_vm9  ;;  %v1713_v23 = vpop.xlane.xlu0 %1712  ;;  %v2306_v1 = vmax.f32 %v9411_v60, %v9414_v42 }
 0x494   : > { %7682 = vmatprep.subr.msk.bf16.mxu0 %vm7681_vm13, %v13175_v29  ;;  %vm1777_vm14 = vcmp.ge.f32.partialorder %v9175_v15, %v1713_v23  ;;  %vm1778_vm15 = vcmp.ge.f32.partialorder %v9178_v45, %v1713_v23  ;;  %v1716_v49 = vpop.xlane.xlu1 %1715  ;;  %2304 = vmax.xlane.f32.xlu0 %v2303_v59 }
 0x495   : > { %v1841_v0 = vsel %vm1777_vm14, %v8551_v32, 256.0  ;;  %v1842_v14 = vsel %vm1778_vm15, %v8554_v17, 256.0  ;;  %vm1779_vm1 = vcmp.ge.f32.partialorder %v9183_v57, %v1716_v49  ;;  %vm1780_vm2 = vcmp.ge.f32.partialorder %v9186_v39, %v1716_v49  ;;  %2307 = vmax.xlane.f32.xlu1 %v2306_v1  ;;  %v13239_v1 = vld [vmem:[#allocation28_spill] sm:$0xff] }
 0x496   : > { %7684 = vmatpush1.bf16.xpose.msk.msra.mxu0 %vm7683_vm12, %v13175_v29  ;;  %v1843_v61 = vsel %vm1779_vm1, %v8551_v32, 256.0  ;;  %v1844_v63 = vsel %vm1780_vm2, %v8554_v17, 256.0  ;;  %v1935_v22 = vmin.f32 %v1841_v0, %v1842_v14 }
 0x497   : > { %v1883_v21 = vpop.xlane.xlu0 %1882  ;;  %v1938_v38 = vmin.f32 %v1843_v61, %v1844_v63 }
 0x498   : > { %vm1965_vm3 = vcmp.eq.f32.partialorder %v8551_v32, %v1883_v21  ;;  %vm1966_vm4 = vcmp.eq.f32.partialorder %v8554_v17, %v1883_v21  ;;  %v1886_v12 = vpop.xlane.xlu1 %1885  ;;  %1936 = vmin.xlane.f32.xlu0 %v1935_v22 }
 0x499   : > { %v9433_v59 = vsel %vm1965_vm3, -inf, %v8893_v6  ;;  %v9436_v23 = vsel %vm1966_vm4, -inf, %v8896_v13  ;;  %vm1967_vm6 = vcmp.eq.f32.partialorder %v8551_v32, %v1886_v12  ;;  %vm1968_vm7 = vcmp.eq.f32.partialorder %v8554_v17, %v1886_v12  ;;  %1939 = vmin.xlane.f32.xlu1 %v1938_v38 }
 0x49a   : > { %vm7687_vm8 = vmpackc.low %vm1967_vm6, %vm1965_vm3  ;;  %v9441_v49 = vsel %vm1967_vm6, -inf, %v13239_v1  ;;  %v9444_v0 = vsel %vm1968_vm7, -inf, %v8902_v7  ;;  %v2309_v14 = vmax.f32 %v9433_v59, %v9436_v23 }
 0x49b   : > { %vm7685_vm9 = vmpackc.low %vm1968_vm7, %vm1966_vm4  ;;  %v1889_v6 = vpop.xlane.xlu0 %1888  ;;  %v2312_v13 = vmax.f32 %v9441_v49, %v9444_v0 }
 0x49c   : > { %7686 = vmatprep.subr.msk.bf16.mxu0 %vm7685_vm9, %v13175_v29  ;;  %vm1969_vm10 = vcmp.eq.f32.partialorder %v8551_v32, %v1889_v6  ;;  %vm1970_vm11 = vcmp.eq.f32.partialorder %v8554_v17, %v1889_v6  ;;  %2310 = vmax.xlane.f32.xlu0 %v2309_v14 }
 0x49d   : > { %v9454_v61 = vsel %vm1969_vm10, -inf, %v8915_v28  ;;  %v9457_v7 = vsel %vm1970_vm11, -inf, %v8918_v36  ;;  %2313 = vmax.xlane.f32.xlu1 %v2312_v13 }
 0x49e   : > { %7688 = vmatpush1.bf16.xpose.msk.msra.mxu0 %vm7687_vm8, %v13175_v29  ;;  %v2315_v63 = vmax.f32 %v9454_v61, %v9457_v7  ;;  %v1892_v22 = vpop.xlane.xlu1 %1891 }
 0x49f   : > { %vm1971_vm12 = vcmp.eq.f32.partialorder %v8551_v32, %v1892_v22  ;;  %vm1972_vm13 = vcmp.eq.f32.partialorder %v8554_v17, %v1892_v22 }
 0x4a0   : > { %2316 = vmax.xlane.f32.xlu0 %v2315_v63  ;;  %vm7691_vm14 = vmpackc.low %vm1971_vm12, %vm1969_vm10  ;;  %v9465_v21 = vsel %vm1971_vm12, -inf, %v8925_v50  ;;  %v9468_v28 = vsel %vm1972_vm13, -inf, %v8928_v58 }
 0x4a1   : > { %vm7689_vm15 = vmpackc.low %vm1972_vm13, %vm1970_vm11  ;;  %v2318_v36 = vmax.f32 %v9465_v21, %v9468_v28 }
 0x4a2   : > { %7690 = vmatprep.subr.msk.bf16.mxu0 %vm7689_vm15, %v13175_v29 }
 0x4a3   : > { %v1895_v38 = vpop.xlane.xlu0 %1894  ;;  %2319 = vmax.xlane.f32.xlu1 %v2318_v36 }
 0x4a4   : > { %vm1973_vm1 = vcmp.eq.f32.partialorder %v8551_v32, %v1895_v38  ;;  %vm1974_vm2 = vcmp.eq.f32.partialorder %v8554_v17, %v1895_v38 }
 0x4a5   : > { %v9477_v50 = vsel %vm1973_vm1, -inf, %v8939_v53  ;;  %v9480_v58 = vsel %vm1974_vm2, -inf, %v8942_v56 }
 0x4a6   : > { %7692 = vmatpush1.bf16.xpose.msk.msra.mxu0 %vm7691_vm14, %v13175_v29  ;;  %v2321_v12 = vmax.f32 %v9477_v50, %v9480_v58 }
 0x4a7   : > { %v1898_v1 = vpop.xlane.xlu1 %1897 }
 0x4a8   : > { %vm1975_vm3 = vcmp.eq.f32.partialorder %v8551_v32, %v1898_v1  ;;  %vm1976_vm4 = vcmp.eq.f32.partialorder %v8554_v17, %v1898_v1  ;;  %2322 = vmax.xlane.f32.xlu0 %v2321_v12 }
 0x4a9   : > { %vm7695_vm6 = vmpackc.low %vm1975_vm3, %vm1973_vm1  ;;  %v9487_v14 = vsel %vm1975_vm3, -inf, %v8949_v51  ;;  %v9490_v6 = vsel %vm1976_vm4, -inf, %v8952_v18 }
 0x4aa   : > { %vm7693_vm7 = vmpackc.low %vm1976_vm4, %vm1974_vm2  ;;  %v2324_v53 = vmax.f32 %v9487_v14, %v9490_v6 }
 0x4ab   : > { %7694 = vmatprep.subr.msk.bf16.mxu0 %vm7693_vm7, %v13175_v29  ;;  %v1901_v56 = vpop.xlane.xlu0 %1900 }
 0x4ac   : > { %vm1977_vm8 = vcmp.eq.f32.partialorder %v8551_v32, %v1901_v56  ;;  %vm1978_vm9 = vcmp.eq.f32.partialorder %v8554_v17, %v1901_v56  ;;  %2325 = vmax.xlane.f32.xlu1 %v2324_v53 }
 0x4ad   : > { %v9499_v51 = vsel %vm1977_vm8, -inf, %v8961_v27  ;;  %v9502_v18 = vsel %vm1978_vm9, -inf, %v8964_v19 }
 0x4ae   : > { %7696 = vmatpush1.bf16.xpose.msk.msra.mxu0 %vm7695_vm6, %v13175_v29  ;;  %v2327_v13 = vmax.f32 %v9499_v51, %v9502_v18 }
 0x4af   : > { %v1904_v63 = vpop.xlane.xlu1 %1903 }
 0x4b0   : > { %vm1979_vm10 = vcmp.eq.f32.partialorder %v8551_v32, %v1904_v63  ;;  %vm1980_vm11 = vcmp.eq.f32.partialorder %v8554_v17, %v1904_v63  ;;  %2328 = vmax.xlane.f32.xlu0 %v2327_v13 }
 0x4b1   : > { %vm7699_vm12 = vmpackc.low %vm1979_vm10, %vm1977_vm8  ;;  %v9509_v22 = vsel %vm1979_vm10, -inf, %v8971_v43  ;;  %v9512_v36 = vsel %vm1980_vm11, -inf, %v8974_v2  ;;  %v13243_v2 = vld [vmem:[#allocation7_spill] sm:$0xff] }
 0x4b2   : > { %13240 = vst [vmem:[#allocation22_spill] sm:$0xff] %v9512_v36  ;;  %vm7697_vm13 = vmpackc.low %vm1980_vm11, %vm1978_vm9  ;;  %v2330_v27 = vmax.f32 %v9509_v22, %v9512_v36 }
 0x4b3   : > { %7698 = vmatprep.subr.msk.bf16.mxu0 %vm7697_vm13, %v13175_v29 }
 0x4b4   : > { %2331 = vmax.xlane.f32.xlu1 %v2330_v27  ;;  %v13244_v27 = vld [vmem:[#allocation9_spill] sm:$0xff] }
 0x4b6   : > { %7700 = vmatpush1.bf16.xpose.msk.msra.mxu0 %vm7699_vm12, %v13175_v29 }
 0x4e0   : > { %v9518_v19 = vpop.f32.mrb[0].mxu1 }
 0x4e1   : > { %13241 = vst [vmem:[#allocation28_spill] sm:$0xff] %v9518_v19  ;;  %v9520_v38 = vpop.f32.mrb[1].mxu1  ;;  %v13248_v19 = vld [vmem:[#allocation23_spill] sm:$0xff] }
 0x4e2   : > { %13242 = vst [vmem:[#allocation29_spill] sm:$0xff] %v9520_v38  ;;  %v13246_v38 = vld [vmem:[#allocation10_spill] sm:$0xff] }
 0x4f4   : > { %v2275_v12 = vpop.xlane.xlu0 %2274 }
 0x4f5   : > { %vm2369_vm14 = vcmp.ge.f32.partialorder %v9233_v48, %v2275_v12  ;;  %vm2370_vm15 = vcmp.ge.f32.partialorder %v13243_v2, %v2275_v12 }
 0x4f6   : > { %v2433_v1 = vsel %vm2369_vm14, %v8551_v32, 256.0  ;;  %v2434_v53 = vsel %vm2370_vm15, %v8554_v17, 256.0 }
 0x4f7   : > { %v2497_v56 = vmin.f32 %v2433_v1, %v2434_v53  ;;  %v13249_v1 = vld [vmem:[#allocation11_spill] sm:$0xff] }
 0x4f8   : > { %v1907_v13 = vpop.xlane.xlu0 %1906 }
 0x4f9   : > { %vm1981_vm1 = vcmp.eq.f32.partialorder %v8551_v32, %v1907_v13  ;;  %vm1982_vm2 = vcmp.eq.f32.partialorder %v8554_v17, %v1907_v13  ;;  %v2278_v63 = vpop.xlane.xlu1 %2277  ;;  %2498 = vmin.xlane.f32.xlu0 %v2497_v56 }
 0x4fa   : > { %v9533_v43 = vsel %vm1981_vm1, -inf, %v13244_v27  ;;  %v9538_v12 = vsel %vm1982_vm2, -inf, %v13246_v38  ;;  %vm2371_vm3 = vcmp.ge.f32.partialorder %v13248_v19, %v2278_v63  ;;  %vm2372_vm4 = vcmp.ge.f32.partialorder %v13249_v1, %v2278_v63  ;;  %v13250_v63 = vld [vmem:[#allocation12_spill] sm:$0xff] }
 0x4fb   : > { %13245 = vst [vmem:[#allocation9_spill] sm:$0xff] %v9533_v43  ;;  %13247 = vst [vmem:[#allocation10_spill] sm:$0xff] %v9538_v12  ;;  %v2435_v53 = vsel %vm2371_vm3, %v8551_v32, 256.0  ;;  %v2436_v2 = vsel %vm2372_vm4, %v8554_v17, 256.0  ;;  %v2333_v56 = vmax.f32 %v9533_v43, %v9538_v12 }
 0x4fc   : > { %v2281_v48 = vpop.xlane.xlu0 %2280  ;;  %v2500_v36 = vmin.f32 %v2435_v53, %v2436_v2 }
 0x4fd   : > { %vm2373_vm6 = vcmp.ge.f32.partialorder %v9264_v52, %v2281_v48  ;;  %vm2374_vm7 = vcmp.ge.f32.partialorder %v9269_v33, %v2281_v48  ;;  %v1910_v27 = vpop.xlane.xlu1 %1909  ;;  %2334 = vmax.xlane.f32.xlu0 %v2333_v56 }
 0x4fe   : > { %v2437_v38 = vsel %vm2373_vm6, %v8551_v32, 256.0  ;;  %v2438_v19 = vsel %vm2374_vm7, %v8554_v17, 256.0  ;;  %vm1983_vm8 = vcmp.eq.f32.partialorder %v8551_v32, %v1910_v27  ;;  %vm1984_vm9 = vcmp.eq.f32.partialorder %v8554_v17, %v1910_v27  ;;  %2501 = vmin.xlane.f32.xlu1 %v2500_v36  ;;  %v13252_v27 = vld [vmem:[#allocation14_spill] sm:$0xff] }
 0x4ff   : > { %vm7703_vm10 = vmpackc.low %vm1983_vm8, %vm1981_vm1  ;;  %v9555_v2 = vsel %vm1983_vm8, -inf, %v13250_v63  ;;  %v9558_v53 = vsel %vm1984_vm9, -inf, %v13223_v35  ;;  %v2503_v48 = vmin.f32 %v2437_v38, %v2438_v19  ;;  %v13253_v19 = vld [vmem:[#allocation15_spill] sm:$0xff] }
 0x500   : > { %13251 = vst [vmem:[#allocation11_spill] sm:$0xff] %v9558_v53  ;;  %vm7701_vm11 = vmpackc.low %vm1984_vm9, %vm1982_vm2  ;;  %v1913_v56 = vpop.xlane.xlu0 %1912  ;;  %v2336_v33 = vmax.f32 %v9555_v2, %v9558_v53 }
 0x501   : > { %7702 = vmatprep.subr.msk.bf16.mxu0 %vm7701_vm11, %v13175_v29  ;;  %vm1985_vm12 = vcmp.eq.f32.partialorder %v8551_v32, %v1913_v56  ;;  %vm1986_vm13 = vcmp.eq.f32.partialorder %v8554_v17, %v1913_v56  ;;  %v2284_v36 = vpop.xlane.xlu1 %2283  ;;  %2504 = vmin.xlane.f32.xlu0 %v2503_v48  ;;  %v13258_v56 = vld [vmem:[#allocation13_spill] sm:$0xff] }
 0x502   : > { %v9570_v35 = vsel %vm1985_vm12, -inf, %v13252_v27  ;;  %v9575_v13 = vsel %vm1986_vm13, -inf, %v13253_v19  ;;  %7704 = vmatpush1.bf16.xpose.msk.msra.mxu0 %vm7703_vm10, %v13175_v29  ;;  %vm2375_vm14 = vcmp.ge.f32.partialorder %v9287_v24, %v2284_v36  ;;  %vm2376_vm15 = vcmp.ge.f32.partialorder %v9290_v9, %v2284_v36  ;;  %2337 = vmax.xlane.f32.xlu1 %v2336_v33 }
 0x503   : > { %13254 = vst [vmem:[#allocation12_spill] sm:$0xff] %v9575_v13  ;;  %v2439_v38 = vsel %vm2375_vm14, %v8551_v32, 256.0  ;;  %v2440_v63 = vsel %vm2376_vm15, %v8554_v17, 256.0  ;;  %v2339_v48 = vmax.f32 %v9570_v35, %v9575_v13 }
 0x504   : > { %v2287_v27 = vpop.xlane.xlu0 %2286  ;;  %v2506_v53 = vmin.f32 %v2439_v38, %v2440_v63 }
 0x505   : > { %vm2377_vm1 = vcmp.ge.f32.partialorder %v9302_v40, %v2287_v27  ;;  %vm2378_vm2 = vcmp.ge.f32.partialorder %v9307_v5, %v2287_v27  ;;  %v1916_v19 = vpop.xlane.xlu1 %1915  ;;  %2340 = vmax.xlane.f32.xlu0 %v2339_v48 }
 0x506   : > { %v2441_v24 = vsel %vm2377_vm1, %v8551_v32, 256.0  ;;  %v2442_v36 = vsel %vm2378_vm2, %v8554_v17, 256.0  ;;  %vm1987_vm3 = vcmp.eq.f32.partialorder %v8551_v32, %v1916_v19  ;;  %vm1988_vm4 = vcmp.eq.f32.partialorder %v8554_v17, %v1916_v19  ;;  %2507 = vmin.xlane.f32.xlu1 %v2506_v53 }
 0x507   : > { %vm7707_vm6 = vmpackc.low %vm1987_vm3, %vm1985_vm12  ;;  %v9593_v33 = vsel %vm1987_vm3, -inf, %v9047_v10  ;;  %v9596_v38 = vsel %vm1988_vm4, -inf, %v9050_v4  ;;  %v2509_v63 = vmin.f32 %v2441_v24, %v2442_v36  ;;  %v13257_v24 = vld [vmem:[#allocation25_spill] sm:$0xff] }
 0x508   : > { %13255 = vst [vmem:[#allocation14_spill] sm:$0xff] %v9596_v38  ;;  %vm7705_vm7 = vmpackc.low %vm1988_vm4, %vm1986_vm13  ;;  %v1919_v48 = vpop.xlane.xlu0 %1918  ;;  %v2342_v27 = vmax.f32 %v9593_v33, %v9596_v38 }
 0x509   : > { %7706 = vmatprep.subr.msk.bf16.mxu0 %vm7705_vm7, %v13175_v29  ;;  %vm1989_vm8 = vcmp.eq.f32.partialorder %v8551_v32, %v1919_v48  ;;  %vm1990_vm9 = vcmp.eq.f32.partialorder %v8554_v17, %v1919_v48  ;;  %v2290_v53 = vpop.xlane.xlu1 %2289  ;;  %2510 = vmin.xlane.f32.xlu0 %v2509_v63 }
 0x50a   : > { %v9608_v10 = vsel %vm1989_vm8, -inf, %v9067_v37  ;;  %v9613_v4 = vsel %vm1990_vm9, -inf, %v9072_v25  ;;  %7708 = vmatpush1.bf16.xpose.msk.msra.mxu0 %vm7707_vm6, %v13175_v29  ;;  %vm2379_vm10 = vcmp.ge.f32.partialorder %v13257_v24, %v2290_v53  ;;  %vm2380_vm11 = vcmp.ge.f32.partialorder %v13258_v56, %v2290_v53  ;;  %2343 = vmax.xlane.f32.xlu1 %v2342_v27 }
 0x50b   : > { %13256 = vst [vmem:[#allocation15_spill] sm:$0xff] %v9613_v4  ;;  %v2443_v19 = vsel %vm2379_vm10, %v8551_v32, 256.0  ;;  %v2444_v36 = vsel %vm2380_vm11, %v8554_v17, 256.0  ;;  %v2345_v37 = vmax.f32 %v9608_v10, %v9613_v4 }
 0x50c   : > { %v2512_v63 = vmin.f32 %v2443_v19, %v2444_v36 }
 0x50d   : > { %2346 = vmax.xlane.f32.xlu0 %v2345_v37 }
 0x50e   : > { %v1922_v38 = vpop.xlane.xlu1 %1921  ;;  %2513 = vmin.xlane.f32.xlu1 %v2512_v63 }
 0x50f   : > { %vm1991_vm12 = vcmp.eq.f32.partialorder %v8551_v32, %v1922_v38  ;;  %vm1992_vm13 = vcmp.eq.f32.partialorder %v8554_v17, %v1922_v38 }
 0x510   : > { %vm7711_vm14 = vmpackc.low %vm1991_vm12, %vm1989_vm8  ;;  %v9627_v25 = vsel %vm1991_vm12, -inf, %v13230_v46  ;;  %v9630_v27 = vsel %vm1992_vm13, -inf, %v13231_v44  ;;  %v13261_v44 = vld [vmem:[#allocation17_spill] sm:$0xff] }
 0x511   : > { %13259 = vst [vmem:[#allocation25_spill] sm:$0xff] %v9627_v25  ;;  %13260 = vst [vmem:[#allocation30_spill] sm:$0xff] %v9630_v27  ;;  %v2293_v53 = vpop.xlane.xlu0 %2292  ;;  %v2348_v19 = vmax.f32 %v9627_v25, %v9630_v27 }
 0x512   : > { %vm7709_vm15 = vmpackc.low %vm1992_vm13, %vm1990_vm9  ;;  %vm2381_vm1 = vcmp.ge.f32.partialorder %v9343_v62, %v2293_v53  ;;  %vm2382_vm2 = vcmp.ge.f32.partialorder %v9346_v47, %v2293_v53  ;;  %v2296_v38 = vpop.xlane.xlu1 %2295  ;;  %v13262_v47 = vld [vmem:[#allocation18_spill] sm:$0xff] }
 0x513   : > { %7710 = vmatprep.subr.msk.bf16.mxu0 %vm7709_vm15, %v13175_v29  ;;  %v2445_v46 = vsel %vm2381_vm1, %v8551_v32, 256.0  ;;  %v2446_v36 = vsel %vm2382_vm2, %v8554_v17, 256.0  ;;  %vm2383_vm3 = vcmp.ge.f32.partialorder %v9351_v54, %v2296_v38  ;;  %vm2384_vm4 = vcmp.ge.f32.partialorder %v13261_v44, %v2296_v38  ;;  %2349 = vmax.xlane.f32.xlu1 %v2348_v19  ;;  %v13264_v54 = vld [vmem:[#allocation19_spill] sm:$0xff]  ;;  %v13266_v19 = vld [vmem:[#allocation20_spill] sm:$0xff] }
 0x514   : > { %7712 = vmatpush1.bf16.xpose.msk.msra.mxu0 %vm7711_vm14, %v13175_v29  ;;  %v2447_v48 = vsel %vm2383_vm3, %v8551_v32, 256.0  ;;  %v2448_v37 = vsel %vm2384_vm4, %v8554_v17, 256.0  ;;  %v2515_v63 = vmin.f32 %v2445_v46, %v2446_v36 }
 0x515   : > { %v1925_v62 = vpop.xlane.xlu0 %1924  ;;  %v2518_v27 = vmin.f32 %v2447_v48, %v2448_v37 }
 0x516   : > { %vm1993_vm6 = vcmp.eq.f32.partialorder %v8551_v32, %v1925_v62  ;;  %vm1994_vm7 = vcmp.eq.f32.partialorder %v8554_v17, %v1925_v62  ;;  %v1928_v53 = vpop.xlane.xlu1 %1927  ;;  %2516 = vmin.xlane.f32.xlu0 %v2515_v63 }
 0x517   : > { %v9649_v25 = vsel %vm1993_vm6, -inf, %v13262_v47  ;;  %v9652_v56 = vsel %vm1994_vm7, -inf, %v13264_v54  ;;  %vm1995_vm8 = vcmp.eq.f32.partialorder %v8551_v32, %v1928_v53  ;;  %vm1996_vm9 = vcmp.eq.f32.partialorder %v8554_v17, %v1928_v53  ;;  %2519 = vmin.xlane.f32.xlu1 %v2518_v27 }
 0x518   : > { %13263 = vst [vmem:[#allocation17_spill] sm:$0xff] %v9649_v25  ;;  %13265 = vst [vmem:[#allocation18_spill] sm:$0xff] %v9652_v56  ;;  %v9657_v38 = vsel %vm1995_vm8, -inf, %v13266_v19  ;;  %v9660_v46 = vsel %vm1996_vm9, -inf, %v9118_v31  ;;  %v2351_v62 = vmax.f32 %v9649_v25, %v9652_v56 }
 0x519   : > { %vm7715_vm10 = vmpackc.low %vm1995_vm8, %vm1993_vm6  ;;  %v2299_v47 = vpop.xlane.xlu0 %2298  ;;  %v2354_v54 = vmax.f32 %v9657_v38, %v9660_v46 }
 0x51a   : > { %vm7713_vm11 = vmpackc.low %vm1996_vm9, %vm1994_vm7  ;;  %vm2385_vm12 = vcmp.ge.f32.partialorder %v9373_v26, %v2299_v47  ;;  %vm2386_vm13 = vcmp.ge.f32.partialorder %v9376_v8, %v2299_v47  ;;  %v2302_v27 = vpop.xlane.xlu1 %2301  ;;  %2352 = vmax.xlane.f32.xlu0 %v2351_v62 }
 0x51b   : > { %7714 = vmatprep.subr.msk.bf16.mxu0 %vm7713_vm11, %v13175_v29  ;;  %v2449_v36 = vsel %vm2385_vm12, %v8551_v32, 256.0  ;;  %v2450_v31 = vsel %vm2386_vm13, %v8554_v17, 256.0  ;;  %vm2387_vm14 = vcmp.ge.f32.partialorder %v9381_v11, %v2302_v27  ;;  %vm2388_vm15 = vcmp.ge.f32.partialorder %v9384_v16, %v2302_v27  ;;  %2355 = vmax.xlane.f32.xlu1 %v2354_v54 }
 0x51c   : > { %7716 = vmatpush1.bf16.xpose.msk.msra.mxu0 %vm7715_vm10, %v13175_v29  ;;  %v2451_v48 = vsel %vm2387_vm14, %v8551_v32, 256.0  ;;  %v2452_v37 = vsel %vm2388_vm15, %v8554_v17, 256.0  ;;  %v2521_v63 = vmin.f32 %v2449_v36, %v2450_v31 }
 0x51d   : > { %v1931_v53 = vpop.xlane.xlu0 %1930  ;;  %v2524_v19 = vmin.f32 %v2451_v48, %v2452_v37 }
 0x51e   : > { %vm1997_vm1 = vcmp.eq.f32.partialorder %v8551_v32, %v1931_v53  ;;  %vm1998_vm2 = vcmp.eq.f32.partialorder %v8554_v17, %v1931_v53  ;;  %v1934_v62 = vpop.xlane.xlu1 %1933  ;;  %2522 = vmin.xlane.f32.xlu0 %v2521_v63 }
 0x51f   : > { %v9679_v47 = vsel %vm1997_vm1, -inf, %v9141_v30  ;;  %v9682_v11 = vsel %vm1998_vm2, -inf, %v9144_v20  ;;  %vm1999_vm3 = vcmp.eq.f32.partialorder %v8551_v32, %v1934_v62  ;;  %vm2000_vm4 = vcmp.eq.f32.partialorder %v8554_v17, %v1934_v62  ;;  %2525 = vmin.xlane.f32.xlu1 %v2524_v19 }
 0x520   : > { %13267 = vst [vmem:[#allocation19_spill] sm:$0xff] %v9682_v11  ;;  %vm7719_vm6 = vmpackc.low %vm1999_vm3, %vm1997_vm1  ;;  %v9687_v54 = vsel %vm1999_vm3, -inf, %v9149_v3  ;;  %v9690_v27 = vsel %vm2000_vm4, -inf, %v9152_v55  ;;  %v2357_v36 = vmax.f32 %v9679_v47, %v9682_v11 }
 0x521   : > { %vm7717_vm7 = vmpackc.low %vm2000_vm4, %vm1998_vm2  ;;  %v2305_v30 = vpop.xlane.xlu0 %2304  ;;  %v2360_v20 = vmax.f32 %v9687_v54, %v9690_v27 }
 0x522   : > { %7718 = vmatprep.subr.msk.bf16.mxu0 %vm7717_vm7, %v13175_v29  ;;  %vm2389_vm8 = vcmp.ge.f32.partialorder %v9403_v41, %v2305_v30  ;;  %vm2390_vm9 = vcmp.ge.f32.partialorder %v9406_v34, %v2305_v30  ;;  %v2308_v31 = vpop.xlane.xlu1 %2307  ;;  %2358 = vmax.xlane.f32.xlu0 %v2357_v36 }
 0x523   : > { %v2453_v3 = vsel %vm2389_vm8, %v8551_v32, 256.0  ;;  %v2454_v55 = vsel %vm2390_vm9, %v8554_v17, 256.0  ;;  %vm2391_vm10 = vcmp.ge.f32.partialorder %v9411_v60, %v2308_v31  ;;  %vm2392_vm11 = vcmp.ge.f32.partialorder %v9414_v42, %v2308_v31  ;;  %2361 = vmax.xlane.f32.xlu1 %v2360_v20 }
 0x524   : > { %7720 = vmatpush1.bf16.xpose.msk.msra.mxu0 %vm7719_vm6, %v13175_v29  ;;  %v2455_v48 = vsel %vm2391_vm10, %v8551_v32, 256.0  ;;  %v2456_v37 = vsel %vm2392_vm11, %v8554_v17, 256.0  ;;  %v2527_v63 = vmin.f32 %v2453_v3, %v2454_v55 }
 0x525   : > { %v1937_v53 = vpop.xlane.xlu0 %1936  ;;  %v2530_v19 = vmin.f32 %v2455_v48, %v2456_v37 }
 0x526   : > { %vm2001_vm12 = vcmp.eq.f32.partialorder %v8551_v32, %v1937_v53  ;;  %vm2002_vm13 = vcmp.eq.f32.partialorder %v8554_v17, %v1937_v53  ;;  %v1940_v62 = vpop.xlane.xlu1 %1939  ;;  %2528 = vmin.xlane.f32.xlu0 %v2527_v63 }
 0x527   : > { %v9709_v36 = vsel %vm2001_vm12, -inf, %v9175_v15  ;;  %v9712_v30 = vsel %vm2002_vm13, -inf, %v9178_v45  ;;  %vm2003_vm14 = vcmp.eq.f32.partialorder %v8551_v32, %v1940_v62  ;;  %vm2004_vm15 = vcmp.eq.f32.partialorder %v8554_v17, %v1940_v62  ;;  %2531 = vmin.xlane.f32.xlu1 %v2530_v19 }
 0x528   : > { %vm7723_vm1 = vmpackc.low %vm2003_vm14, %vm2001_vm12  ;;  %v9717_v20 = vsel %vm2003_vm14, -inf, %v9183_v57  ;;  %v9720_v31 = vsel %vm2004_vm15, -inf, %v9186_v39  ;;  %v2363_v3 = vmax.f32 %v9709_v36, %v9712_v30 }
 0x529   : > { %vm7721_vm2 = vmpackc.low %vm2004_vm15, %vm2002_vm13  ;;  %v2311_v15 = vpop.xlane.xlu0 %2310  ;;  %v2366_v45 = vmax.f32 %v9717_v20, %v9720_v31 }
 0x52a   : > { %7722 = vmatprep.subr.msk.bf16.mxu0 %vm7721_vm2, %v13175_v29  ;;  %vm2393_vm3 = vcmp.ge.f32.partialorder %v9433_v59, %v2311_v15  ;;  %vm2394_vm4 = vcmp.ge.f32.partialorder %v9436_v23, %v2311_v15  ;;  %v2314_v55 = vpop.xlane.xlu1 %2313  ;;  %2364 = vmax.xlane.f32.xlu0 %v2363_v3 }
 0x52b   : > { %v2457_v57 = vsel %vm2393_vm3, %v8551_v32, 256.0  ;;  %v2458_v39 = vsel %vm2394_vm4, %v8554_v17, 256.0  ;;  %vm2395_vm6 = vcmp.ge.f32.partialorder %v9441_v49, %v2314_v55  ;;  %vm2396_vm7 = vcmp.ge.f32.partialorder %v9444_v0, %v2314_v55  ;;  %2367 = vmax.xlane.f32.xlu1 %v2366_v45  ;;  %v13268_v45 = vld [vmem:[#allocation4_spill] sm:$0xff] }
 0x52c   : > { %7724 = vmatpush1.bf16.xpose.msk.msra.mxu0 %vm7723_vm1, %v13175_v29  ;;  %v2459_v48 = vsel %vm2395_vm6, %v8551_v32, 256.0  ;;  %v2460_v37 = vsel %vm2396_vm7, %v8554_v17, 256.0  ;;  %v2533_v63 = vmin.f32 %v2457_v57, %v2458_v39 }
 0x52d   : > { %v2317_v53 = vpop.xlane.xlu0 %2316  ;;  %v2536_v19 = vmin.f32 %v2459_v48, %v2460_v37  ;;  %v13269_v48 = vld [vmem:[#allocation5_spill] sm:$0xff] }
 0x52e   : > { %vm2397_vm8 = vcmp.ge.f32.partialorder %v9454_v61, %v2317_v53  ;;  %vm2398_vm9 = vcmp.ge.f32.partialorder %v9457_v7, %v2317_v53  ;;  %2534 = vmin.xlane.f32.xlu0 %v2533_v63 }
 0x52f   : > { %v2461_v62 = vsel %vm2397_vm8, %v8551_v32, 256.0  ;;  %v2462_v3 = vsel %vm2398_vm9, %v8554_v17, 256.0  ;;  %2537 = vmin.xlane.f32.xlu1 %v2536_v19 }
 0x530   : > { %v2539_v15 = vmin.f32 %v2461_v62, %v2462_v3  ;;  %v2320_v55 = vpop.xlane.xlu1 %2319 }
 0x531   : > { %vm2399_vm10 = vcmp.ge.f32.partialorder %v9465_v21, %v2320_v55  ;;  %vm2400_vm11 = vcmp.ge.f32.partialorder %v9468_v28, %v2320_v55 }
 0x532   : > { %2540 = vmin.xlane.f32.xlu0 %v2539_v15  ;;  %v2463_v57 = vsel %vm2399_vm10, %v8551_v32, 256.0  ;;  %v2464_v39 = vsel %vm2400_vm11, %v8554_v17, 256.0 }
 0x533   : > { %2198 = vmatmul.mubr.f32.vlgmr.msra.gmra.mrb[64].mxu0 %v13268_v45  ;;  %v2542_v37 = vmin.f32 %v2463_v57, %v2464_v39 }
 0x534   : > { %3501 = vmatprep.mubr.f32.mxu0 %v13269_v48 }
 0x535   : > { %v2323_v63 = vpop.xlane.xlu0 %2322  ;;  %2543 = vmin.xlane.f32.xlu1 %v2542_v37 }
 0x536   : > { %vm2401_vm12 = vcmp.ge.f32.partialorder %v9477_v50, %v2323_v63  ;;  %vm2402_vm13 = vcmp.ge.f32.partialorder %v9480_v58, %v2323_v63 }
 0x537   : > { %v2465_v53 = vsel %vm2401_vm12, %v8551_v32, 256.0  ;;  %v2466_v19 = vsel %vm2402_vm13, %v8554_v17, 256.0 }
 0x538   : > { %v2545_v62 = vmin.f32 %v2465_v53, %v2466_v19 }
 0x539   : > { %v2326_v3 = vpop.xlane.xlu1 %2325 }
 0x53a   : > { %vm2403_vm14 = vcmp.ge.f32.partialorder %v9487_v14, %v2326_v3  ;;  %vm2404_vm15 = vcmp.ge.f32.partialorder %v9490_v6, %v2326_v3  ;;  %2546 = vmin.xlane.f32.xlu0 %v2545_v62  ;;  %v13270_v62 = vld [vmem:[#allocation22_spill] sm:$0xff] }
 0x53b   : > { %v2467_v15 = vsel %vm2403_vm14, %v8551_v32, 256.0  ;;  %v2468_v55 = vsel %vm2404_vm15, %v8554_v17, 256.0 }
 0x53c   : > { %v2548_v57 = vmin.f32 %v2467_v15, %v2468_v55 }
 0x53d   : > { %v2329_v39 = vpop.xlane.xlu0 %2328 }
 0x53e   : > { %vm2405_vm1 = vcmp.ge.f32.partialorder %v9499_v51, %v2329_v39  ;;  %vm2406_vm2 = vcmp.ge.f32.partialorder %v9502_v18, %v2329_v39  ;;  %2549 = vmin.xlane.f32.xlu1 %v2548_v57  ;;  %v13271_v57 = vld [vmem:[#allocation21_spill] sm:$0xff] }
 0x53f   : > { %v2469_v37 = vsel %vm2405_vm1, %v8551_v32, 256.0  ;;  %v2470_v63 = vsel %vm2406_vm2, %v8554_v17, 256.0 }
 0x540   : > { %v2551_v53 = vmin.f32 %v2469_v37, %v2470_v63  ;;  %v13272_v37 = vld [vmem:[#allocation7_spill] sm:$0xff] }
 0x541   : > { %v2332_v19 = vpop.xlane.xlu1 %2331 }
 0x542   : > { %vm2407_vm3 = vcmp.ge.f32.partialorder %v9509_v22, %v2332_v19  ;;  %vm2408_vm4 = vcmp.ge.f32.partialorder %v13270_v62, %v2332_v19  ;;  %2552 = vmin.xlane.f32.xlu0 %v2551_v53 }
 0x543   : > { %v2471_v3 = vsel %vm2407_vm3, %v8551_v32, 256.0  ;;  %v2472_v15 = vsel %vm2408_vm4, %v8554_v17, 256.0 }
 0x544   : > { %v2554_v55 = vmin.f32 %v2471_v3, %v2472_v15 }
 0x546   : > { %2555 = vmin.xlane.f32.xlu1 %v2554_v55 }
 0x586   : > { %v2499_v48 = vpop.xlane.xlu0 %2498 }
 0x587   : > { %vm2593_vm6 = vcmp.eq.f32.partialorder %v8551_v32, %v2499_v48  ;;  %vm2594_vm7 = vcmp.eq.f32.partialorder %v8554_v17, %v2499_v48 }
 0x588   : > { %v9765_v39 = vsel %vm2593_vm6, -inf, %v13271_v57  ;;  %v9770_v63 = vsel %vm2594_vm7, -inf, %v13272_v37  ;;  %v13276_v37 = vld [vmem:[#allocation23_spill] sm:$0xff] }
 0x589   : > { %13273 = vst [vmem:[#allocation20_spill] sm:$0xff] %v9770_v63  ;;  %v2925_v53 = vmax.f32 %v9765_v39, %v9770_v63 }
 0x58a   : > { %v2335_v19 = vpop.xlane.xlu0 %2334 }
 0x58b   : > { %vm2409_vm8 = vcmp.ge.f32.partialorder %v9533_v43, %v2335_v19  ;;  %vm2410_vm9 = vcmp.ge.f32.partialorder %v9538_v12, %v2335_v19  ;;  %v2502_v3 = vpop.xlane.xlu1 %2501  ;;  %2926 = vmax.xlane.f32.xlu0 %v2925_v53 }
 0x58c   : > { %v2473_v15 = vsel %vm2409_vm8, %v8551_v32, 256.0  ;;  %v2474_v55 = vsel %vm2410_vm9, %v8554_v17, 256.0  ;;  %vm2595_vm10 = vcmp.eq.f32.partialorder %v8551_v32, %v2502_v3  ;;  %vm2596_vm11 = vcmp.eq.f32.partialorder %v8554_v17, %v2502_v3 }
 0x58d   : > { %vm9780_vm12 = vmpackc.low %vm2595_vm10, %vm2593_vm6  ;;  %v9785_v63 = vsel %vm2595_vm10, -inf, %v13276_v37  ;;  %v9788_v43 = vsel %vm2596_vm11, -inf, %v13249_v1  ;;  %v2557_v19 = vmin.f32 %v2473_v15, %v2474_v55  ;;  %v13279_v15 = vld [vmem:[#allocation24_spill] sm:$0xff]  ;;  %v13280_v55 = vld [vmem:[#allocation11_spill] sm:$0xff] }
 0x58e   : > { %13277 = vst [vmem:[#allocation22_spill] sm:$0xff] %v9785_v63  ;;  %13278 = vst [vmem:[#allocation21_spill] sm:$0xff] %v9788_v43  ;;  %v2505_v53 = vpop.xlane.xlu0 %2504  ;;  %v2928_v12 = vmax.f32 %v9785_v63, %v9788_v43 }
 0x58f   : > { %vm7725_vm13 = vmpackc.low %vm2596_vm11, %vm2594_vm7  ;;  %vm2597_vm14 = vcmp.eq.f32.partialorder %v8551_v32, %v2505_v53  ;;  %vm2598_vm15 = vcmp.eq.f32.partialorder %v8554_v17, %v2505_v53  ;;  %v2338_v3 = vpop.xlane.xlu1 %2337  ;;  %2558 = vmin.xlane.f32.xlu0 %v2557_v19 }
 0x590   : > { %7726 = vmatprep.subr.msk.bf16.mxu1 %vm7725_vm13, %v13175_v29  ;;  %v9800_v1 = vsel %vm2597_vm14, -inf, %v9264_v52  ;;  %v9805_v48 = vsel %vm2598_vm15, -inf, %v13279_v15  ;;  %vm2411_vm1 = vcmp.ge.f32.partialorder %v9555_v2, %v2338_v3  ;;  %vm2412_vm2 = vcmp.ge.f32.partialorder %v13280_v55, %v2338_v3  ;;  %2929 = vmax.xlane.f32.xlu1 %v2928_v12 }
 0x591   : > { %7728 = vmatpush1.bf16.xpose.msk.msra.mxu1 %vm9780_vm12, %v13175_v29  ;;  %v2475_v37 = vsel %vm2411_vm1, %v8551_v32, 256.0  ;;  %v2476_v19 = vsel %vm2412_vm2, %v8554_v17, 256.0  ;;  %v2931_v52 = vmax.f32 %v9800_v1, %v9805_v48 }
 0x592   : > { %v2341_v43 = vpop.xlane.xlu0 %2340  ;;  %v2560_v63 = vmin.f32 %v2475_v37, %v2476_v19  ;;  %v13283_v37 = vld [vmem:[#allocation26_spill] sm:$0xff] }
 0x593   : > { %vm2413_vm3 = vcmp.ge.f32.partialorder %v9570_v35, %v2341_v43  ;;  %vm2414_vm4 = vcmp.ge.f32.partialorder %v9575_v13, %v2341_v43  ;;  %v2508_v15 = vpop.xlane.xlu1 %2507  ;;  %2932 = vmax.xlane.f32.xlu0 %v2931_v52 }
 0x594   : > { %v2477_v3 = vsel %vm2413_vm3, %v8551_v32, 256.0  ;;  %v2478_v57 = vsel %vm2414_vm4, %v8554_v17, 256.0  ;;  %vm2599_vm6 = vcmp.eq.f32.partialorder %v8551_v32, %v2508_v15  ;;  %vm2600_vm7 = vcmp.eq.f32.partialorder %v8554_v17, %v2508_v15  ;;  %2561 = vmin.xlane.f32.xlu1 %v2560_v63 }
 0x595   : > { %vm9824_vm8 = vmpackc.low %vm2599_vm6, %vm2597_vm14  ;;  %v9829_v19 = vsel %vm2599_vm6, -inf, %v13283_v37  ;;  %v9832_v43 = vsel %vm2600_vm7, -inf, %v9290_v9  ;;  %v2563_v52 = vmin.f32 %v2477_v3, %v2478_v57  ;;  %v13286_v3 = vld [vmem:[#allocation14_spill] sm:$0xff] }
 0x596   : > { %13284 = vst [vmem:[#allocation7_spill] sm:$0xff] %v9832_v43  ;;  %vm7729_vm9 = vmpackc.low %vm2600_vm7, %vm2598_vm15  ;;  %v2511_v13 = vpop.xlane.xlu0 %2510  ;;  %v2934_v63 = vmax.f32 %v9829_v19, %v9832_v43 }
 0x597   : > { %7730 = vmatprep.subr.msk.bf16.mxu1 %vm7729_vm9, %v13175_v29  ;;  %vm2601_vm10 = vcmp.eq.f32.partialorder %v8551_v32, %v2511_v13  ;;  %vm2602_vm11 = vcmp.eq.f32.partialorder %v8554_v17, %v2511_v13  ;;  %v2344_v15 = vpop.xlane.xlu1 %2343  ;;  %2564 = vmin.xlane.f32.xlu0 %v2563_v52 }
 0x598   : > { %v9844_v9 = vsel %vm2601_vm10, -inf, %v9302_v40  ;;  %v9849_v53 = vsel %vm2602_vm11, -inf, %v9307_v5  ;;  %vm2415_vm12 = vcmp.ge.f32.partialorder %v9593_v33, %v2344_v15  ;;  %vm2416_vm13 = vcmp.ge.f32.partialorder %v13286_v3, %v2344_v15  ;;  %2935 = vmax.xlane.f32.xlu1 %v2934_v63 }
 0x599   : > { %13285 = vst [vmem:[#allocation23_spill] sm:$0xff] %v9849_v53  ;;  %7732 = vmatpush1.bf16.xpose.msk.msra.mxu1 %vm9824_vm8, %v13175_v29  ;;  %v2479_v57 = vsel %vm2415_vm12, %v8551_v32, 256.0  ;;  %v2480_v37 = vsel %vm2416_vm13, %v8554_v17, 256.0  ;;  %v2937_v40 = vmax.f32 %v9844_v9, %v9849_v53 }
 0x59a   : > { %v2347_v52 = vpop.xlane.xlu0 %2346  ;;  %v2566_v43 = vmin.f32 %v2479_v57, %v2480_v37  ;;  %v13288_v57 = vld [vmem:[#allocation13_spill] sm:$0xff] }
 0x59b   : > { %vm2417_vm14 = vcmp.ge.f32.partialorder %v9608_v10, %v2347_v52  ;;  %vm2418_vm15 = vcmp.ge.f32.partialorder %v9613_v4, %v2347_v52  ;;  %v2514_v5 = vpop.xlane.xlu1 %2513  ;;  %2938 = vmax.xlane.f32.xlu0 %v2937_v40  ;;  %v13291_v4 = vld [vmem:[#allocation30_spill] sm:$0xff] }
 0x59c   : > { %v2481_v15 = vsel %vm2417_vm14, %v8551_v32, 256.0  ;;  %v2482_v12 = vsel %vm2418_vm15, %v8554_v17, 256.0  ;;  %vm2603_vm1 = vcmp.eq.f32.partialorder %v8551_v32, %v2514_v5  ;;  %vm2604_vm2 = vcmp.eq.f32.partialorder %v8554_v17, %v2514_v5  ;;  %2567 = vmin.xlane.f32.xlu1 %v2566_v43  ;;  %v13290_v43 = vld [vmem:[#allocation25_spill] sm:$0xff] }
 0x59d   : > { %vm7735_vm3 = vmpackc.low %vm2603_vm1, %vm2601_vm10  ;;  %v9869_v63 = vsel %vm2603_vm1, -inf, %v13257_v24  ;;  %v9872_v37 = vsel %vm2604_vm2, -inf, %v13288_v57  ;;  %v2569_v52 = vmin.f32 %v2481_v15, %v2482_v12 }
 0x59e   : > { %13287 = vst [vmem:[#allocation24_spill] sm:$0xff] %v9869_v63  ;;  %13289 = vst [vmem:[#allocation11_spill] sm:$0xff] %v9872_v37  ;;  %v2940_v40 = vmax.f32 %v9869_v63, %v9872_v37  ;;  %v13292_v37 = vld [vmem:[#allocation6_spill] sm:$0xff] }
 0x59f   : > { %vm7733_vm4 = vmpackc.low %vm2604_vm2, %vm2602_vm11  ;;  %2570 = vmin.xlane.f32.xlu0 %v2569_v52 }
 0x5a0   : > { %7734 = vmatprep.subr.msk.bf16.mxu1 %vm7733_vm4, %v13175_v29  ;;  %v2350_v5 = vpop.xlane.xlu1 %2349  ;;  %2941 = vmax.xlane.f32.xlu1 %v2940_v40 }
 0x5a1   : > { %vm2419_vm6 = vcmp.ge.f32.partialorder %v13290_v43, %v2350_v5  ;;  %vm2420_vm7 = vcmp.ge.f32.partialorder %v13291_v4, %v2350_v5  ;;  %7736 = vmatpush1.bf16.xpose.msk.msra.mxu1 %vm7735_vm3, %v13175_v29  ;;  %v13294_v43 = vld [vmem:[#allocation27_spill] sm:$0xff]  ;;  %v13298_v5 = vld [vmem:[#allocation16_spill] sm:$0xff] }
 0x5a2   : > { %v2483_v24 = vsel %vm2419_vm6, %v8551_v32, 256.0  ;;  %v2484_v15 = vsel %vm2420_vm7, %v8554_v17, 256.0 }
 0x5a3   : > { %v2517_v13 = vpop.xlane.xlu0 %2516  ;;  %v2572_v12 = vmin.f32 %v2483_v24, %v2484_v15 }
 0x5a4   : > { %vm2605_vm8 = vcmp.eq.f32.partialorder %v8551_v32, %v2517_v13  ;;  %vm2606_vm9 = vcmp.eq.f32.partialorder %v8554_v17, %v2517_v13  ;;  %v2520_v57 = vpop.xlane.xlu1 %2519 }
 0x5a5   : > { %v9887_v52 = vsel %vm2605_vm8, -inf, %v13292_v37  ;;  %v9890_v63 = vsel %vm2606_vm9, -inf, %v13294_v43  ;;  %vm2607_vm10 = vcmp.eq.f32.partialorder %v8551_v32, %v2520_v57  ;;  %vm2608_vm11 = vcmp.eq.f32.partialorder %v8554_v17, %v2520_v57  ;;  %2573 = vmin.xlane.f32.xlu1 %v2572_v12 }
 0x5a6   : > { %13293 = vst [vmem:[#allocation26_spill] sm:$0xff] %v9887_v52  ;;  %13295 = vst [vmem:[#allocation14_spill] sm:$0xff] %v9890_v63  ;;  %v9899_v24 = vsel %vm2607_vm10, -inf, %v13298_v5  ;;  %v9902_v15 = vsel %vm2608_vm11, -inf, %v13261_v44  ;;  %v2943_v37 = vmax.f32 %v9887_v52, %v9890_v63 }
 0x5a7   : > { %vm9894_vm12 = vmpackc.low %vm2607_vm10, %vm2605_vm8  ;;  %13299 = vst [vmem:[#allocation13_spill] sm:$0xff] %v9899_v24  ;;  %v2353_v43 = vpop.xlane.xlu0 %2352  ;;  %v2946_v13 = vmax.f32 %v9899_v24, %v9902_v15 }
 0x5a8   : > { %13300 = vst [vmem:[#allocation30_spill] sm:$0xff] %v9902_v15  ;;  %vm7737_vm13 = vmpackc.low %vm2608_vm11, %vm2606_vm9  ;;  %vm2421_vm14 = vcmp.ge.f32.partialorder %v9649_v25, %v2353_v43  ;;  %vm2422_vm15 = vcmp.ge.f32.partialorder %v9652_v56, %v2353_v43  ;;  %v2356_v12 = vpop.xlane.xlu1 %2355  ;;  %2944 = vmax.xlane.f32.xlu0 %v2943_v37 }
 0x5a9   : > { %7738 = vmatprep.subr.msk.bf16.mxu1 %vm7737_vm13, %v13175_v29  ;;  %v2485_v57 = vsel %vm2421_vm14, %v8551_v32, 256.0  ;;  %v2486_v44 = vsel %vm2422_vm15, %v8554_v17, 256.0  ;;  %vm2423_vm1 = vcmp.ge.f32.partialorder %v9657_v38, %v2356_v12  ;;  %vm2424_vm2 = vcmp.ge.f32.partialorder %v9660_v46, %v2356_v12  ;;  %2947 = vmax.xlane.f32.xlu1 %v2946_v13 }
 0x5aa   : > { %7740 = vmatpush1.bf16.xpose.msk.msra.mxu1 %vm9894_vm12, %v13175_v29  ;;  %v2487_v5 = vsel %vm2423_vm1, %v8551_v32, 256.0  ;;  %v2488_v25 = vsel %vm2424_vm2, %v8554_v17, 256.0  ;;  %v2575_v43 = vmin.f32 %v2485_v57, %v2486_v44 }
 0x5ab   : > { %v2523_v56 = vpop.xlane.xlu0 %2522  ;;  %v2578_v37 = vmin.f32 %v2487_v5, %v2488_v25  ;;  %v13303_v25 = vld [vmem:[#allocation8_spill] sm:$0xff] }
 0x5ac   : > { %vm2609_vm3 = vcmp.eq.f32.partialorder %v8551_v32, %v2523_v56  ;;  %vm2610_vm4 = vcmp.eq.f32.partialorder %v8554_v17, %v2523_v56  ;;  %v2526_v15 = vpop.xlane.xlu1 %2525  ;;  %2576 = vmin.xlane.f32.xlu0 %v2575_v43 }
 0x5ad   : > { %v9923_v12 = vsel %vm2609_vm3, -inf, %v9373_v26  ;;  %v9926_v40 = vsel %vm2610_vm4, -inf, %v9376_v8  ;;  %vm2611_vm6 = vcmp.eq.f32.partialorder %v8551_v32, %v2526_v15  ;;  %vm2612_vm7 = vcmp.eq.f32.partialorder %v8554_v17, %v2526_v15  ;;  %2579 = vmin.xlane.f32.xlu1 %v2578_v37 }
 0x5ae   : > { %vm9930_vm8 = vmpackc.low %vm2611_vm6, %vm2609_vm3  ;;  %v9935_v57 = vsel %vm2611_vm6, -inf, %v13303_v25  ;;  %v9938_v56 = vsel %vm2612_vm7, -inf, %v9384_v16  ;;  %v2949_v26 = vmax.f32 %v9923_v12, %v9926_v40 }
 0x5af   : > { %13304 = vst [vmem:[#allocation6_spill] sm:$0xff] %v9938_v56  ;;  %vm7741_vm9 = vmpackc.low %vm2612_vm7, %vm2610_vm4  ;;  %v2359_v8 = vpop.xlane.xlu0 %2358  ;;  %v2952_v44 = vmax.f32 %v9935_v57, %v9938_v56 }
 0x5b0   : > { %7742 = vmatprep.subr.msk.bf16.mxu1 %vm7741_vm9, %v13175_v29  ;;  %vm2425_vm10 = vcmp.ge.f32.partialorder %v9679_v47, %v2359_v8  ;;  %vm2426_vm11 = vcmp.ge.f32.partialorder %v9682_v11, %v2359_v8  ;;  %v2362_v15 = vpop.xlane.xlu1 %2361  ;;  %2950 = vmax.xlane.f32.xlu0 %v2949_v26 }
 0x5b1   : > { %v2489_v5 = vsel %vm2425_vm10, %v8551_v32, 256.0  ;;  %v2490_v16 = vsel %vm2426_vm11, %v8554_v17, 256.0  ;;  %vm2427_vm12 = vcmp.ge.f32.partialorder %v9687_v54, %v2362_v15  ;;  %vm2428_vm13 = vcmp.ge.f32.partialorder %v9690_v27, %v2362_v15  ;;  %2953 = vmax.xlane.f32.xlu1 %v2952_v44 }
 0x5b2   : > { %7744 = vmatpush1.bf16.xpose.msk.msra.mxu1 %vm9930_vm8, %v13175_v29  ;;  %v2491_v43 = vsel %vm2427_vm12, %v8551_v32, 256.0  ;;  %v2492_v37 = vsel %vm2428_vm13, %v8554_v17, 256.0  ;;  %v2581_v25 = vmin.f32 %v2489_v5, %v2490_v16 }
 0x5b3   : > { %v2529_v8 = vpop.xlane.xlu0 %2528  ;;  %v2584_v26 = vmin.f32 %v2491_v43, %v2492_v37 }
 0x5b4   : > { %vm2613_vm14 = vcmp.eq.f32.partialorder %v8551_v32, %v2529_v8  ;;  %vm2614_vm15 = vcmp.eq.f32.partialorder %v8554_v17, %v2529_v8  ;;  %v2532_v11 = vpop.xlane.xlu1 %2531  ;;  %2582 = vmin.xlane.f32.xlu0 %v2581_v25 }
 0x5b5   : > { %v9959_v15 = vsel %vm2613_vm14, -inf, %v9403_v41  ;;  %v9962_v13 = vsel %vm2614_vm15, -inf, %v9406_v34  ;;  %vm2615_vm1 = vcmp.eq.f32.partialorder %v8551_v32, %v2532_v11  ;;  %vm2616_vm2 = vcmp.eq.f32.partialorder %v8554_v17, %v2532_v11  ;;  %2585 = vmin.xlane.f32.xlu1 %v2584_v26 }
 0x5b6   : > { %vm9966_vm3 = vmpackc.low %vm2615_vm1, %vm2613_vm14  ;;  %v9971_v5 = vsel %vm2615_vm1, -inf, %v9411_v60  ;;  %v9974_v16 = vsel %vm2616_vm2, -inf, %v9414_v42  ;;  %v2955_v41 = vmax.f32 %v9959_v15, %v9962_v13 }
 0x5b7   : > { %vm7745_vm4 = vmpackc.low %vm2616_vm2, %vm2614_vm15  ;;  %v2365_v34 = vpop.xlane.xlu0 %2364  ;;  %v2958_v43 = vmax.f32 %v9971_v5, %v9974_v16 }
 0x5b8   : > { %7746 = vmatprep.subr.msk.bf16.mxu1 %vm7745_vm4, %v13175_v29  ;;  %vm2429_vm6 = vcmp.ge.f32.partialorder %v9709_v36, %v2365_v34  ;;  %vm2430_vm7 = vcmp.ge.f32.partialorder %v9712_v30, %v2365_v34  ;;  %v2368_v11 = vpop.xlane.xlu1 %2367  ;;  %2956 = vmax.xlane.f32.xlu0 %v2955_v41 }
 0x5b9   : > { %v2493_v60 = vsel %vm2429_vm6, %v8551_v32, 256.0  ;;  %v2494_v42 = vsel %vm2430_vm7, %v8554_v17, 256.0  ;;  %vm2431_vm8 = vcmp.ge.f32.partialorder %v9717_v20, %v2368_v11  ;;  %vm2432_vm9 = vcmp.ge.f32.partialorder %v9720_v31, %v2368_v11  ;;  %2959 = vmax.xlane.f32.xlu1 %v2958_v43 }
 0x5ba   : > { %7748 = vmatpush1.bf16.xpose.msk.msra.mxu1 %vm9966_vm3, %v13175_v29  ;;  %v2495_v37 = vsel %vm2431_vm8, %v8551_v32, 256.0  ;;  %v2496_v25 = vsel %vm2432_vm9, %v8554_v17, 256.0  ;;  %v2587_v8 = vmin.f32 %v2493_v60, %v2494_v42 }
 0x5bb   : > { %v2535_v26 = vpop.xlane.xlu0 %2534  ;;  %v2590_v41 = vmin.f32 %v2495_v37, %v2496_v25 }
 0x5bc   : > { %vm2617_vm10 = vcmp.eq.f32.partialorder %v8551_v32, %v2535_v26  ;;  %vm2618_vm11 = vcmp.eq.f32.partialorder %v8554_v17, %v2535_v26  ;;  %v2538_v34 = vpop.xlane.xlu1 %2537  ;;  %2588 = vmin.xlane.f32.xlu0 %v2587_v8 }
 0x5bd   : > { %v9995_v11 = vsel %vm2617_vm10, -inf, %v9433_v59  ;;  %v9998_v44 = vsel %vm2618_vm11, -inf, %v9436_v23  ;;  %vm2619_vm12 = vcmp.eq.f32.partialorder %v8551_v32, %v2538_v34  ;;  %vm2620_vm13 = vcmp.eq.f32.partialorder %v8554_v17, %v2538_v34  ;;  %2591 = vmin.xlane.f32.xlu1 %v2590_v41 }
 0x5be   : > { %vm7751_vm14 = vmpackc.low %vm2619_vm12, %vm2617_vm10  ;;  %v10003_v43 = vsel %vm2619_vm12, -inf, %v9441_v49  ;;  %v10006_v60 = vsel %vm2620_vm13, -inf, %v9444_v0  ;;  %v2961_v42 = vmax.f32 %v9995_v11, %v9998_v44 }
 0x5bf   : > { %13307 = vst [vmem:[#allocation27_spill] sm:$0xff] %v10006_v60  ;;  %vm7749_vm15 = vmpackc.low %vm2620_vm13, %vm2618_vm11  ;;  %v2541_v59 = vpop.xlane.xlu0 %2540  ;;  %v2964_v23 = vmax.f32 %v10003_v43, %v10006_v60 }
 0x5c0   : > { %7750 = vmatprep.subr.msk.bf16.mxu1 %vm7749_vm15, %v13175_v29  ;;  %vm2621_vm1 = vcmp.eq.f32.partialorder %v8551_v32, %v2541_v59  ;;  %vm2622_vm2 = vcmp.eq.f32.partialorder %v8554_v17, %v2541_v59  ;;  %2962 = vmax.xlane.f32.xlu0 %v2961_v42 }
 0x5c1   : > { %v10016_v49 = vsel %vm2621_vm1, -inf, %v9454_v61  ;;  %v10019_v0 = vsel %vm2622_vm2, -inf, %v9457_v7  ;;  %2965 = vmax.xlane.f32.xlu1 %v2964_v23 }
 0x5c2   : > { %7752 = vmatpush1.bf16.xpose.msk.msra.mxu1 %vm7751_vm14, %v13175_v29  ;;  %v2967_v37 = vmax.f32 %v10016_v49, %v10019_v0  ;;  %v2544_v25 = vpop.xlane.xlu1 %2543 }
 0x5c3   : > { %vm2623_vm3 = vcmp.eq.f32.partialorder %v8551_v32, %v2544_v25  ;;  %vm2624_vm4 = vcmp.eq.f32.partialorder %v8554_v17, %v2544_v25 }
 0x5c4   : > { %2968 = vmax.xlane.f32.xlu0 %v2967_v37  ;;  %vm7755_vm6 = vmpackc.low %vm2623_vm3, %vm2621_vm1  ;;  %v10027_v8 = vsel %vm2623_vm3, -inf, %v9465_v21  ;;  %v10030_v61 = vsel %vm2624_vm4, -inf, %v9468_v28 }
 0x5c5   : > { %vm7753_vm7 = vmpackc.low %vm2624_vm4, %vm2622_vm2  ;;  %v2970_v7 = vmax.f32 %v10027_v8, %v10030_v61 }
 0x5c6   : > { %7754 = vmatprep.subr.msk.bf16.mxu1 %vm7753_vm7, %v13175_v29 }
 0x5c7   : > { %v2547_v26 = vpop.xlane.xlu0 %2546  ;;  %2971 = vmax.xlane.f32.xlu1 %v2970_v7 }
 0x5c8   : > { %vm2625_vm8 = vcmp.eq.f32.partialorder %v8551_v32, %v2547_v26  ;;  %vm2626_vm9 = vcmp.eq.f32.partialorder %v8554_v17, %v2547_v26 }
 0x5c9   : > { %v10039_v21 = vsel %vm2625_vm8, -inf, %v9477_v50  ;;  %v10042_v28 = vsel %vm2626_vm9, -inf, %v9480_v58 }
 0x5ca   : > { %7756 = vmatpush1.bf16.xpose.msk.msra.mxu1 %vm7755_vm6, %v13175_v29  ;;  %v2973_v41 = vmax.f32 %v10039_v21, %v10042_v28 }
 0x5cb   : > { %v2550_v34 = vpop.xlane.xlu1 %2549 }
 0x5cc   : > { %vm2627_vm10 = vcmp.eq.f32.partialorder %v8551_v32, %v2550_v34  ;;  %vm2628_vm11 = vcmp.eq.f32.partialorder %v8554_v17, %v2550_v34  ;;  %2974 = vmax.xlane.f32.xlu0 %v2973_v41  ;;  %v13311_v41 = vld [vmem:[#allocation28_spill] sm:$0xff]  ;;  %v13312_v34 = vld [vmem:[#allocation29_spill] sm:$0xff] }
 0x5cd   : > { %vm7759_vm12 = vmpackc.low %vm2627_vm10, %vm2625_vm8  ;;  %v10049_v42 = vsel %vm2627_vm10, -inf, %v9487_v14  ;;  %v10052_v59 = vsel %vm2628_vm11, -inf, %v9490_v6 }
 0x5ce   : > { %vm7757_vm13 = vmpackc.low %vm2628_vm11, %vm2626_vm9  ;;  %v2976_v50 = vmax.f32 %v10049_v42, %v10052_v59 }
 0x5cf   : > { %7758 = vmatprep.subr.msk.bf16.mxu1 %vm7757_vm13, %v13175_v29  ;;  %v2553_v58 = vpop.xlane.xlu0 %2552 }
 0x5d0   : > { %vm2629_vm14 = vcmp.eq.f32.partialorder %v8551_v32, %v2553_v58  ;;  %vm2630_vm15 = vcmp.eq.f32.partialorder %v8554_v17, %v2553_v58  ;;  %2977 = vmax.xlane.f32.xlu1 %v2976_v50  ;;  %v13313_v50 = vcombine.low %v13311_v41, %v13312_v34  ;;  %v13317_v34 = vld [vmem:[#allocation10_spill] sm:$0xff] }
 0x5d1   : > { %v10061_v14 = vsel %vm2629_vm14, -inf, %v9499_v51  ;;  %v10064_v6 = vsel %vm2630_vm15, -inf, %v9502_v18 }
 0x5d2   : > { %7760 = vmatpush1.bf16.xpose.msk.msra.mxu1 %vm7759_vm12, %v13175_v29  ;;  %13308 = vst [vmem:[#allocation16_spill] sm:$0xff] %v10064_v6  ;;  %v2979_v23 = vmax.f32 %v10061_v14, %v10064_v6 }
 0x5d3   : > { %v2556_v37 = vpop.xlane.xlu1 %2555 }
 0x5d4   : > { %vm2631_vm1 = vcmp.eq.f32.partialorder %v8551_v32, %v2556_v37  ;;  %vm2632_vm2 = vcmp.eq.f32.partialorder %v8554_v17, %v2556_v37  ;;  %2980 = vmax.xlane.f32.xlu0 %v2979_v23  ;;  %v13315_v37 = vld [vmem:[#allocation20_spill] sm:$0xff] }
 0x5d5   : > { %vm7763_vm3 = vmpackc.low %vm2631_vm1, %vm2629_vm14  ;;  %v10071_v25 = vsel %vm2631_vm1, -inf, %v9509_v22  ;;  %v10074_v7 = vsel %vm2632_vm2, -inf, %v13270_v62  ;;  %v1556_v22 = vmax.f32 %v13268_v45, %v13313_v50 }
 0x5d6   : > { %13309 = vst [vmem:[#allocation8_spill] sm:$0xff] %v10071_v25  ;;  %13310 = vst [vmem:[#allocation31_spill] sm:$0xff] %v10074_v7  ;;  %v2982_v51 = vmax.f32 %v10071_v25, %v10074_v7 }
 0x5d7   : > { %vm7761_vm4 = vmpackc.low %vm2632_vm2, %vm2630_vm15 }
 0x5d8   : > { %7762 = vmatprep.subr.msk.bf16.mxu1 %vm7761_vm4, %v13175_v29  ;;  %2983 = vmax.xlane.f32.xlu1 %v2982_v51 }
 0x5da   : > { %7764 = vmatpush1.bf16.xpose.msk.msra.mxu1 %vm7763_vm3, %v13175_v29 }
 0x606   : > { %v2199_v18 = vpop.f32.mrb[64].mxu0 }
 0x607   : > { %v2201_v26 = vpop.f32.mrb[65].mxu0 }
 0x608   : > { %v2206_v58 = vcombine.low %v2199_v18, %v2201_v26  ;;  %v13316_v18 = vld [vmem:[#allocation9_spill] sm:$0xff] }
 0x60a   : > { %v10084_v23 = vmax.f32 %v1556_v22, %v2206_v58  ;;  %v13319_v22 = vld [vmem:[#allocation22_spill] sm:$0xff] }
 0x60c   : > { %13314 = vst [vmem:[#allocation28_spill] sm:$0xff] %v10084_v23 }
 0x618   : > { %v2927_v62 = vpop.xlane.xlu0 %2926 }
 0x619   : > { %vm3021_vm6 = vcmp.ge.f32.partialorder %v9765_v39, %v2927_v62  ;;  %vm3022_vm7 = vcmp.ge.f32.partialorder %v13315_v37, %v2927_v62 }
 0x61a   : > { %v3085_v7 = vsel %vm3021_vm6, %v8551_v32, 256.0  ;;  %v3086_v25 = vsel %vm3022_vm7, %v8554_v17, 256.0 }
 0x61b   : > { %v3149_v51 = vmin.f32 %v3085_v7, %v3086_v25  ;;  %v13320_v25 = vld [vmem:[#allocation21_spill] sm:$0xff] }
 0x61c   : > { %v2559_v6 = vpop.xlane.xlu0 %2558 }
 0x61d   : > { %vm2633_vm8 = vcmp.eq.f32.partialorder %v8551_v32, %v2559_v6  ;;  %vm2634_vm9 = vcmp.eq.f32.partialorder %v8554_v17, %v2559_v6  ;;  %v2930_v41 = vpop.xlane.xlu1 %2929  ;;  %3150 = vmin.xlane.f32.xlu0 %v3149_v51 }
 0x61e   : > { %v10095_v26 = vsel %vm2633_vm8, -inf, %v13316_v18  ;;  %v10100_v50 = vsel %vm2634_vm9, -inf, %v13317_v34  ;;  %vm3023_vm10 = vcmp.ge.f32.partialorder %v13319_v22, %v2930_v41  ;;  %vm3024_vm11 = vcmp.ge.f32.partialorder %v13320_v25, %v2930_v41 }
 0x61f   : > { %13318 = vst [vmem:[#allocation29_spill] sm:$0xff] %v10100_v50  ;;  %v3087_v7 = vsel %vm3023_vm10, %v8551_v32, 256.0  ;;  %v3088_v58 = vsel %vm3024_vm11, %v8554_v17, 256.0  ;;  %v2985_v62 = vmax.f32 %v10095_v26, %v10100_v50 }
 0x620   : > { %v2933_v51 = vpop.xlane.xlu0 %2932  ;;  %v3152_v23 = vmin.f32 %v3087_v7, %v3088_v58 }
 0x621   : > { %vm3025_vm12 = vcmp.ge.f32.partialorder %v9800_v1, %v2933_v51  ;;  %vm3026_vm13 = vcmp.ge.f32.partialorder %v9805_v48, %v2933_v51  ;;  %v2562_v18 = vpop.xlane.xlu1 %2561  ;;  %2986 = vmax.xlane.f32.xlu0 %v2985_v62 }
 0x622   : > { %v3089_v34 = vsel %vm3025_vm12, %v8551_v32, 256.0  ;;  %v3090_v22 = vsel %vm3026_vm13, %v8554_v17, 256.0  ;;  %vm2635_vm14 = vcmp.eq.f32.partialorder %v8551_v32, %v2562_v18  ;;  %vm2636_vm15 = vcmp.eq.f32.partialorder %v8554_v17, %v2562_v18  ;;  %3153 = vmin.xlane.f32.xlu1 %v3152_v23 }
 0x623   : > { %vm10116_vm1 = vmpackc.low %vm2635_vm14, %vm2633_vm8  ;;  %v10121_v7 = vsel %vm2635_vm14, -inf, %v9555_v2  ;;  %v10124_v58 = vsel %vm2636_vm15, -inf, %v13280_v55  ;;  %v3155_v62 = vmin.f32 %v3089_v34, %v3090_v22  ;;  %v13325_v55 = vld [vmem:[#allocation12_spill] sm:$0xff]  ;;  %v13327_v22 = vld [vmem:[#allocation7_spill] sm:$0xff] }
 0x624   : > { %13323 = vst [vmem:[#allocation20_spill] sm:$0xff] %v10121_v7  ;;  %13324 = vst [vmem:[#allocation9_spill] sm:$0xff] %v10124_v58  ;;  %v2565_v51 = vpop.xlane.xlu0 %2564  ;;  %v2988_v23 = vmax.f32 %v10121_v7, %v10124_v58 }
 0x625   : > { %vm7765_vm2 = vmpackc.low %vm2636_vm15, %vm2634_vm9  ;;  %vm2637_vm3 = vcmp.eq.f32.partialorder %v8551_v32, %v2565_v51  ;;  %vm2638_vm4 = vcmp.eq.f32.partialorder %v8554_v17, %v2565_v51  ;;  %v2936_v18 = vpop.xlane.xlu1 %2935  ;;  %3156 = vmin.xlane.f32.xlu0 %v3155_v62 }
 0x626   : > { %7766 = vmatprep.subr.msk.bf16.mxu1 %vm7765_vm2, %v13175_v29  ;;  %v10136_v2 = vsel %vm2637_vm3, -inf, %v9570_v35  ;;  %v10141_v6 = vsel %vm2638_vm4, -inf, %v13325_v55  ;;  %vm3027_vm6 = vcmp.ge.f32.partialorder %v9829_v19, %v2936_v18  ;;  %vm3028_vm7 = vcmp.ge.f32.partialorder %v13327_v22, %v2936_v18  ;;  %2989 = vmax.xlane.f32.xlu1 %v2988_v23  ;;  %v13335_v23 = vld [vmem:[#allocation25_spill] sm:$0xff] }
 0x627   : > { %13326 = vst [vmem:[#allocation10_spill] sm:$0xff] %v10141_v6  ;;  %7768 = vmatpush1.bf16.xpose.msk.msra.mxu1 %vm10116_vm1, %v13175_v29  ;;  %v3091_v34 = vsel %vm3027_vm6, %v8551_v32, 256.0  ;;  %v3092_v62 = vsel %vm3028_vm7, %v8554_v17, 256.0  ;;  %v2991_v35 = vmax.f32 %v10136_v2, %v10141_v6 }
 0x628   : > { %v2939_v58 = vpop.xlane.xlu0 %2938  ;;  %v3158_v7 = vmin.f32 %v3091_v34, %v3092_v62 }
 0x629   : > { %vm3029_vm8 = vcmp.ge.f32.partialorder %v9844_v9, %v2939_v58  ;;  %vm3030_vm9 = vcmp.ge.f32.partialorder %v9849_v53, %v2939_v58  ;;  %v2568_v55 = vpop.xlane.xlu1 %2567  ;;  %2992 = vmax.xlane.f32.xlu0 %v2991_v35 }
 0x62a   : > { %v3093_v18 = vsel %vm3029_vm8, %v8551_v32, 256.0  ;;  %v3094_v41 = vsel %vm3030_vm9, %v8554_v17, 256.0  ;;  %vm2639_vm10 = vcmp.eq.f32.partialorder %v8551_v32, %v2568_v55  ;;  %vm2640_vm11 = vcmp.eq.f32.partialorder %v8554_v17, %v2568_v55  ;;  %3159 = vmin.xlane.f32.xlu1 %v3158_v7 }
 0x62b   : > { %vm10160_vm12 = vmpackc.low %vm2639_vm10, %vm2637_vm3  ;;  %v10165_v34 = vsel %vm2639_vm10, -inf, %v9593_v33  ;;  %v10168_v58 = vsel %vm2640_vm11, -inf, %v13286_v3  ;;  %v3161_v62 = vmin.f32 %v3093_v18, %v3094_v41  ;;  %v13332_v3 = vld [vmem:[#allocation15_spill] sm:$0xff]  ;;  %v13333_v18 = vld [vmem:[#allocation24_spill] sm:$0xff] }
 0x62c   : > { %13330 = vst [vmem:[#allocation21_spill] sm:$0xff] %v10165_v34  ;;  %13331 = vst [vmem:[#allocation12_spill] sm:$0xff] %v10168_v58  ;;  %v2571_v35 = vpop.xlane.xlu0 %2570  ;;  %v2994_v7 = vmax.f32 %v10165_v34, %v10168_v58  ;;  %v13334_v41 = vld [vmem:[#allocation11_spill] sm:$0xff] }
 0x62d   : > { %vm7769_vm13 = vmpackc.low %vm2640_vm11, %vm2638_vm4  ;;  %vm2641_vm14 = vcmp.eq.f32.partialorder %v8551_v32, %v2571_v35  ;;  %vm2642_vm15 = vcmp.eq.f32.partialorder %v8554_v17, %v2571_v35  ;;  %v2942_v55 = vpop.xlane.xlu1 %2941  ;;  %3162 = vmin.xlane.f32.xlu0 %v3161_v62 }
 0x62e   : > { %7770 = vmatprep.subr.msk.bf16.mxu1 %vm7769_vm13, %v13175_v29  ;;  %v10180_v33 = vsel %vm2641_vm14, -inf, %v9608_v10  ;;  %v10185_v51 = vsel %vm2642_vm15, -inf, %v13332_v3  ;;  %vm3031_vm1 = vcmp.ge.f32.partialorder %v13333_v18, %v2942_v55  ;;  %vm3032_vm2 = vcmp.ge.f32.partialorder %v13334_v41, %v2942_v55  ;;  %2995 = vmax.xlane.f32.xlu1 %v2994_v7 }
 0x62f   : > { %7772 = vmatpush1.bf16.xpose.msk.msra.mxu1 %vm10160_vm12, %v13175_v29  ;;  %v3095_v62 = vsel %vm3031_vm1, %v8551_v32, 256.0  ;;  %v3096_v58 = vsel %vm3032_vm2, %v8554_v17, 256.0  ;;  %v2997_v10 = vmax.f32 %v10180_v33, %v10185_v51 }
 0x630   : > { %v3164_v34 = vmin.f32 %v3095_v62, %v3096_v58 }
 0x631   : > { %2998 = vmax.xlane.f32.xlu0 %v2997_v10 }
 0x632   : > { %v2574_v53 = vpop.xlane.xlu1 %2573  ;;  %3165 = vmin.xlane.f32.xlu1 %v3164_v34 }
 0x633   : > { %vm2643_vm3 = vcmp.eq.f32.partialorder %v8551_v32, %v2574_v53  ;;  %vm2644_vm4 = vcmp.eq.f32.partialorder %v8554_v17, %v2574_v53 }
 0x634   : > { %vm7775_vm6 = vmpackc.low %vm2643_vm3, %vm2641_vm14  ;;  %v10201_v7 = vsel %vm2643_vm3, -inf, %v13335_v23  ;;  %v10204_v55 = vsel %vm2644_vm4, -inf, %v13291_v4  ;;  %v13338_v4 = vld [vmem:[#allocation30_spill] sm:$0xff] }
 0x635   : > { %13336 = vst [vmem:[#allocation7_spill] sm:$0xff] %v10201_v7  ;;  %13337 = vst [vmem:[#allocation15_spill] sm:$0xff] %v10204_v55  ;;  %v2945_v58 = vpop.xlane.xlu0 %2944  ;;  %v3000_v3 = vmax.f32 %v10201_v7, %v10204_v55 }
 0x636   : > { %vm7773_vm7 = vmpackc.low %vm2644_vm4, %vm2642_vm15  ;;  %vm3033_vm8 = vcmp.ge.f32.partialorder %v9887_v52, %v2945_v58  ;;  %vm3034_vm9 = vcmp.ge.f32.partialorder %v9890_v63, %v2945_v58  ;;  %v2948_v53 = vpop.xlane.xlu1 %2947  ;;  %v13339_v63 = vld [vmem:[#allocation17_spill] sm:$0xff] }
 0x637   : > { %7774 = vmatprep.subr.msk.bf16.mxu1 %vm7773_vm7, %v13175_v29  ;;  %v3097_v34 = vsel %vm3033_vm8, %v8551_v32, 256.0  ;;  %v3098_v62 = vsel %vm3034_vm9, %v8554_v17, 256.0  ;;  %vm3035_vm10 = vcmp.ge.f32.partialorder %v9899_v24, %v2948_v53  ;;  %vm3036_vm11 = vcmp.ge.f32.partialorder %v13338_v4, %v2948_v53  ;;  %3001 = vmax.xlane.f32.xlu1 %v3000_v3  ;;  %v13341_v53 = vld [vmem:[#allocation18_spill] sm:$0xff] }
 0x638   : > { %7776 = vmatpush1.bf16.xpose.msk.msra.mxu1 %vm7775_vm6, %v13175_v29  ;;  %v3099_v35 = vsel %vm3035_vm10, %v8551_v32, 256.0  ;;  %v3100_v10 = vsel %vm3036_vm11, %v8554_v17, 256.0  ;;  %v3167_v23 = vmin.f32 %v3097_v34, %v3098_v62 }
 0x639   : > { %v2577_v52 = vpop.xlane.xlu0 %2576  ;;  %v3170_v55 = vmin.f32 %v3099_v35, %v3100_v10 }
 0x63a   : > { %vm2645_vm12 = vcmp.eq.f32.partialorder %v8551_v32, %v2577_v52  ;;  %vm2646_vm13 = vcmp.eq.f32.partialorder %v8554_v17, %v2577_v52  ;;  %v2580_v58 = vpop.xlane.xlu1 %2579  ;;  %3168 = vmin.xlane.f32.xlu0 %v3167_v23 }
 0x63b   : > { %v10223_v24 = vsel %vm2645_vm12, -inf, %v13339_v63  ;;  %v10226_v4 = vsel %vm2646_vm13, -inf, %v13341_v53  ;;  %vm2647_vm14 = vcmp.eq.f32.partialorder %v8551_v32, %v2580_v58  ;;  %vm2648_vm15 = vcmp.eq.f32.partialorder %v8554_v17, %v2580_v58  ;;  %3171 = vmin.xlane.f32.xlu1 %v3170_v55 }
 0x63c   : > { %13340 = vst [vmem:[#allocation24_spill] sm:$0xff] %v10223_v24  ;;  %13342 = vst [vmem:[#allocation11_spill] sm:$0xff] %v10226_v4  ;;  %v10235_v34 = vsel %vm2647_vm14, -inf, %v9657_v38  ;;  %v10238_v52 = vsel %vm2648_vm15, -inf, %v9660_v46  ;;  %v3003_v63 = vmax.f32 %v10223_v24, %v10226_v4 }
 0x63d   : > { %vm10230_vm1 = vmpackc.low %vm2647_vm14, %vm2645_vm12  ;;  %v2951_v62 = vpop.xlane.xlu0 %2950  ;;  %v3006_v35 = vmax.f32 %v10235_v34, %v10238_v52 }
 0x63e   : > { %vm7777_vm2 = vmpackc.low %vm2648_vm15, %vm2646_vm13  ;;  %vm3037_vm3 = vcmp.ge.f32.partialorder %v9923_v12, %v2951_v62  ;;  %vm3038_vm4 = vcmp.ge.f32.partialorder %v9926_v40, %v2951_v62  ;;  %v2954_v55 = vpop.xlane.xlu1 %2953  ;;  %3004 = vmax.xlane.f32.xlu0 %v3003_v63 }
 0x63f   : > { %7778 = vmatprep.subr.msk.bf16.mxu1 %vm7777_vm2, %v13175_v29  ;;  %v3101_v38 = vsel %vm3037_vm3, %v8551_v32, 256.0  ;;  %v3102_v46 = vsel %vm3038_vm4, %v8554_v17, 256.0  ;;  %vm3039_vm6 = vcmp.ge.f32.partialorder %v9935_v57, %v2954_v55  ;;  %vm3040_vm7 = vcmp.ge.f32.partialorder %v9938_v56, %v2954_v55  ;;  %3007 = vmax.xlane.f32.xlu1 %v3006_v35  ;;  %v13345_v56 = vld [vmem:[#allocation19_spill] sm:$0xff] }
 0x640   : > { %7780 = vmatpush1.bf16.xpose.msk.msra.mxu1 %vm10230_vm1, %v13175_v29  ;;  %v3103_v10 = vsel %vm3039_vm6, %v8551_v32, 256.0  ;;  %v3104_v23 = vsel %vm3040_vm7, %v8554_v17, 256.0  ;;  %v3173_v58 = vmin.f32 %v3101_v38, %v3102_v46 }
 0x641   : > { %v2583_v53 = vpop.xlane.xlu0 %2582  ;;  %v3176_v63 = vmin.f32 %v3103_v10, %v3104_v23 }
 0x642   : > { %vm2649_vm8 = vcmp.eq.f32.partialorder %v8551_v32, %v2583_v53  ;;  %vm2650_vm9 = vcmp.eq.f32.partialorder %v8554_v17, %v2583_v53  ;;  %v2586_v62 = vpop.xlane.xlu1 %2585  ;;  %3174 = vmin.xlane.f32.xlu0 %v3173_v58 }
 0x643   : > { %v10259_v55 = vsel %vm2649_vm8, -inf, %v9679_v47  ;;  %v10262_v3 = vsel %vm2650_vm9, -inf, %v13345_v56  ;;  %vm2651_vm10 = vcmp.eq.f32.partialorder %v8551_v32, %v2586_v62  ;;  %vm2652_vm11 = vcmp.eq.f32.partialorder %v8554_v17, %v2586_v62  ;;  %3177 = vmin.xlane.f32.xlu1 %v3176_v63 }
 0x644   : > { %13346 = vst [vmem:[#allocation25_spill] sm:$0xff] %v10262_v3  ;;  %vm10266_vm12 = vmpackc.low %vm2651_vm10, %vm2649_vm8  ;;  %v10271_v38 = vsel %vm2651_vm10, -inf, %v9687_v54  ;;  %v10274_v46 = vsel %vm2652_vm11, -inf, %v9690_v27  ;;  %v3009_v47 = vmax.f32 %v10259_v55, %v10262_v3 }
 0x645   : > { %vm7781_vm13 = vmpackc.low %vm2652_vm11, %vm2650_vm9  ;;  %v2957_v56 = vpop.xlane.xlu0 %2956  ;;  %v3012_v10 = vmax.f32 %v10271_v38, %v10274_v46 }
 0x646   : > { %7782 = vmatprep.subr.msk.bf16.mxu1 %vm7781_vm13, %v13175_v29  ;;  %vm3041_vm14 = vcmp.ge.f32.partialorder %v9959_v15, %v2957_v56  ;;  %vm3042_vm15 = vcmp.ge.f32.partialorder %v9962_v13, %v2957_v56  ;;  %v2960_v23 = vpop.xlane.xlu1 %2959  ;;  %3010 = vmax.xlane.f32.xlu0 %v3009_v47 }
 0x647   : > { %v3105_v54 = vsel %vm3041_vm14, %v8551_v32, 256.0  ;;  %v3106_v27 = vsel %vm3042_vm15, %v8554_v17, 256.0  ;;  %vm3043_vm1 = vcmp.ge.f32.partialorder %v9971_v5, %v2960_v23  ;;  %vm3044_vm2 = vcmp.ge.f32.partialorder %v9974_v16, %v2960_v23  ;;  %3013 = vmax.xlane.f32.xlu1 %v3012_v10 }
 0x648   : > { %7784 = vmatpush1.bf16.xpose.msk.msra.mxu1 %vm10266_vm12, %v13175_v29  ;;  %v3107_v58 = vsel %vm3043_vm1, %v8551_v32, 256.0  ;;  %v3108_v53 = vsel %vm3044_vm2, %v8554_v17, 256.0  ;;  %v3179_v63 = vmin.f32 %v3105_v54, %v3106_v27 }
 0x649   : > { %v2589_v62 = vpop.xlane.xlu0 %2588  ;;  %v3182_v47 = vmin.f32 %v3107_v58, %v3108_v53 }
 0x64a   : > { %vm2653_vm3 = vcmp.eq.f32.partialorder %v8551_v32, %v2589_v62  ;;  %vm2654_vm4 = vcmp.eq.f32.partialorder %v8554_v17, %v2589_v62  ;;  %v2592_v56 = vpop.xlane.xlu1 %2591  ;;  %3180 = vmin.xlane.f32.xlu0 %v3179_v63 }
 0x64b   : > { %v10295_v23 = vsel %vm2653_vm3, -inf, %v9709_v36  ;;  %v10298_v35 = vsel %vm2654_vm4, -inf, %v9712_v30  ;;  %vm2655_vm6 = vcmp.eq.f32.partialorder %v8551_v32, %v2592_v56  ;;  %vm2656_vm7 = vcmp.eq.f32.partialorder %v8554_v17, %v2592_v56  ;;  %3183 = vmin.xlane.f32.xlu1 %v3182_v47 }
 0x64c   : > { %vm10302_vm8 = vmpackc.low %vm2655_vm6, %vm2653_vm3  ;;  %v10307_v54 = vsel %vm2655_vm6, -inf, %v9717_v20  ;;  %v10310_v27 = vsel %vm2656_vm7, -inf, %v9720_v31  ;;  %v3015_v36 = vmax.f32 %v10295_v23, %v10298_v35 }
 0x64d   : > { %vm7785_vm9 = vmpackc.low %vm2656_vm7, %vm2654_vm4  ;;  %v2963_v30 = vpop.xlane.xlu0 %2962  ;;  %v3018_v58 = vmax.f32 %v10307_v54, %v10310_v27 }
 0x64e   : > { %7786 = vmatprep.subr.msk.bf16.mxu1 %vm7785_vm9, %v13175_v29  ;;  %vm3045_vm10 = vcmp.ge.f32.partialorder %v9995_v11, %v2963_v30  ;;  %vm3046_vm11 = vcmp.ge.f32.partialorder %v9998_v44, %v2963_v30  ;;  %v2966_v53 = vpop.xlane.xlu1 %2965  ;;  %3016 = vmax.xlane.f32.xlu0 %v3015_v36 }
 0x64f   : > { %v3109_v20 = vsel %vm3045_vm10, %v8551_v32, 256.0  ;;  %v3110_v31 = vsel %vm3046_vm11, %v8554_v17, 256.0  ;;  %vm3047_vm12 = vcmp.ge.f32.partialorder %v10003_v43, %v2966_v53  ;;  %vm3048_vm13 = vcmp.ge.f32.partialorder %v10006_v60, %v2966_v53  ;;  %3019 = vmax.xlane.f32.xlu1 %v3018_v58 }
 0x650   : > { %7788 = vmatpush1.bf16.xpose.msk.msra.mxu1 %vm10302_vm8, %v13175_v29  ;;  %v3111_v63 = vsel %vm3047_vm12, %v8551_v32, 256.0  ;;  %v3112_v62 = vsel %vm3048_vm13, %v8554_v17, 256.0  ;;  %v3185_v47 = vmin.f32 %v3109_v20, %v3110_v31  ;;  %v13351_v31 = vld [vmem:[#allocation5_spill] sm:$0xff] }
 0x651   : > { %v2969_v56 = vpop.xlane.xlu0 %2968  ;;  %v3188_v36 = vmin.f32 %v3111_v63, %v3112_v62 }
 0x652   : > { %vm3049_vm14 = vcmp.ge.f32.partialorder %v10016_v49, %v2969_v56  ;;  %vm3050_vm15 = vcmp.ge.f32.partialorder %v10019_v0, %v2969_v56  ;;  %3186 = vmin.xlane.f32.xlu0 %v3185_v47 }
 0x653   : > { %v3113_v30 = vsel %vm3049_vm14, %v8551_v32, 256.0  ;;  %v3114_v53 = vsel %vm3050_vm15, %v8554_v17, 256.0  ;;  %3189 = vmin.xlane.f32.xlu1 %v3188_v36 }
 0x654   : > { %v3191_v10 = vmin.f32 %v3113_v30, %v3114_v53  ;;  %v2972_v60 = vpop.xlane.xlu1 %2971 }
 0x655   : > { %vm3051_vm1 = vcmp.ge.f32.partialorder %v10027_v8, %v2972_v60  ;;  %vm3052_vm2 = vcmp.ge.f32.partialorder %v10030_v61, %v2972_v60 }
 0x656   : > { %3192 = vmin.xlane.f32.xlu0 %v3191_v10  ;;  %v3115_v58 = vsel %vm3051_vm1, %v8551_v32, 256.0  ;;  %v3116_v20 = vsel %vm3052_vm2, %v8554_v17, 256.0 }
 0x657   : > { %2850 = vmatmul.mubr.f32.vlgmr.msra.gmra.mrb[2].mxu1 %v13268_v45  ;;  %v3194_v63 = vmin.f32 %v3115_v58, %v3116_v20  ;;  %v13352_v20 = vld [vmem:[#allocation16_spill] sm:$0xff] }
 0x658   : > { %4153 = vmatprep.mubr.f32.mxu1 %v13351_v31  ;;  %v13353_v31 = vld [vmem:[#allocation8_spill] sm:$0xff] }
 0x659   : > { %v2975_v62 = vpop.xlane.xlu0 %2974  ;;  %3195 = vmin.xlane.f32.xlu1 %v3194_v63 }
 0x65a   : > { %vm3053_vm3 = vcmp.ge.f32.partialorder %v10039_v21, %v2975_v62  ;;  %vm3054_vm4 = vcmp.ge.f32.partialorder %v10042_v28, %v2975_v62 }
 0x65b   : > { %v3117_v47 = vsel %vm3053_vm3, %v8551_v32, 256.0  ;;  %v3118_v56 = vsel %vm3054_vm4, %v8554_v17, 256.0 }
 0x65c   : > { %v3197_v36 = vmin.f32 %v3117_v47, %v3118_v56 }
 0x65d   : > { %v2978_v60 = vpop.xlane.xlu1 %2977 }
 0x65e   : > { %vm3055_vm6 = vcmp.ge.f32.partialorder %v10049_v42, %v2978_v60  ;;  %vm3056_vm7 = vcmp.ge.f32.partialorder %v10052_v59, %v2978_v60  ;;  %3198 = vmin.xlane.f32.xlu0 %v3197_v36  ;;  %v13354_v36 = vld [vmem:[#allocation31_spill] sm:$0xff] }
 0x65f   : > { %v3119_v30 = vsel %vm3055_vm6, %v8551_v32, 256.0  ;;  %v3120_v53 = vsel %vm3056_vm7, %v8554_v17, 256.0 }
 0x660   : > { %v3200_v10 = vmin.f32 %v3119_v30, %v3120_v53 }
 0x661   : > { %v2981_v58 = vpop.xlane.xlu0 %2980 }
 0x662   : > { %vm3057_vm8 = vcmp.ge.f32.partialorder %v10061_v14, %v2981_v58  ;;  %vm3058_vm9 = vcmp.ge.f32.partialorder %v13352_v20, %v2981_v58  ;;  %3201 = vmin.xlane.f32.xlu1 %v3200_v10 }
 0x663   : > { %v3121_v63 = vsel %vm3057_vm8, %v8551_v32, 256.0  ;;  %v3122_v62 = vsel %vm3058_vm9, %v8554_v17, 256.0 }
 0x664   : > { %v3203_v47 = vmin.f32 %v3121_v63, %v3122_v62 }
 0x665   : > { %v2984_v56 = vpop.xlane.xlu1 %2983 }
 0x666   : > { %vm3059_vm10 = vcmp.ge.f32.partialorder %v13353_v31, %v2984_v56  ;;  %vm3060_vm11 = vcmp.ge.f32.partialorder %v13354_v36, %v2984_v56  ;;  %3204 = vmin.xlane.f32.xlu0 %v3203_v47 }
 0x667   : > { %v3123_v60 = vsel %vm3059_vm10, %v8551_v32, 256.0  ;;  %v3124_v30 = vsel %vm3060_vm11, %v8554_v17, 256.0 }
 0x668   : > { %v3206_v53 = vmin.f32 %v3123_v60, %v3124_v30  ;;  %v13358_v60 = vld [vmem:[#allocation22_spill] sm:$0xff] }
 0x66a   : > { %3207 = vmin.xlane.f32.xlu1 %v3206_v53 }
 0x6aa   : > { %v3151_v45 = vpop.xlane.xlu0 %3150 }
 0x6ab   : > { %vm3245_vm12 = vcmp.eq.f32.partialorder %v8551_v32, %v3151_v45  ;;  %vm3246_vm13 = vcmp.eq.f32.partialorder %v8554_v17, %v3151_v45 }
 0x6ac   : > { %v10357_v10 = vsel %vm3245_vm12, -inf, %v9765_v39  ;;  %v10362_v58 = vsel %vm3246_vm13, -inf, %v13315_v37 }
 0x6ad   : > { %13355 = vst [vmem:[#allocation17_spill] sm:$0xff] %v10362_v58  ;;  %v3577_v63 = vmax.f32 %v10357_v10, %v10362_v58 }
 0x6ae   : > { %v2987_v62 = vpop.xlane.xlu0 %2986 }
 0x6af   : > { %vm3061_vm14 = vcmp.ge.f32.partialorder %v10095_v26, %v2987_v62  ;;  %vm3062_vm15 = vcmp.ge.f32.partialorder %v10100_v50, %v2987_v62  ;;  %v3154_v47 = vpop.xlane.xlu1 %3153  ;;  %3578 = vmax.xlane.f32.xlu0 %v3577_v63 }
 0x6b0   : > { %v3125_v56 = vsel %vm3061_vm14, %v8551_v32, 256.0  ;;  %v3126_v39 = vsel %vm3062_vm15, %v8554_v17, 256.0  ;;  %vm3247_vm1 = vcmp.eq.f32.partialorder %v8551_v32, %v3154_v47  ;;  %vm3248_vm2 = vcmp.eq.f32.partialorder %v8554_v17, %v3154_v47 }
 0x6b1   : > { %vm10372_vm3 = vmpackc.low %vm3247_vm1, %vm3245_vm12  ;;  %v10377_v30 = vsel %vm3247_vm1, -inf, %v13358_v60  ;;  %v10380_v53 = vsel %vm3248_vm2, -inf, %v13320_v25  ;;  %v3209_v62 = vmin.f32 %v3125_v56, %v3126_v39  ;;  %v13362_v56 = vld [vmem:[#allocation20_spill] sm:$0xff]  ;;  %v13363_v39 = vld [vmem:[#allocation9_spill] sm:$0xff] }
 0x6b2   : > { %13359 = vst [vmem:[#allocation18_spill] sm:$0xff] %v10377_v30  ;;  %13360 = vst [vmem:[#allocation19_spill] sm:$0xff] %v10380_v53  ;;  %v3157_v63 = vpop.xlane.xlu0 %3156  ;;  %v3580_v50 = vmax.f32 %v10377_v30, %v10380_v53 }
 0x6b3   : > { %vm7789_vm4 = vmpackc.low %vm3248_vm2, %vm3246_vm13  ;;  %vm3249_vm6 = vcmp.eq.f32.partialorder %v8551_v32, %v3157_v63  ;;  %vm3250_vm7 = vcmp.eq.f32.partialorder %v8554_v17, %v3157_v63  ;;  %v2990_v47 = vpop.xlane.xlu1 %2989  ;;  %3210 = vmin.xlane.f32.xlu0 %v3209_v62 }
 0x6b4   : > { %7790 = vmatprep.subr.msk.bf16.mxu0 %vm7789_vm4, %v13175_v29  ;;  %v10392_v25 = vsel %vm3249_vm6, -inf, %v9800_v1  ;;  %v10397_v45 = vsel %vm3250_vm7, -inf, %v9805_v48  ;;  %vm3063_vm8 = vcmp.ge.f32.partialorder %v13362_v56, %v2990_v47  ;;  %vm3064_vm9 = vcmp.ge.f32.partialorder %v13363_v39, %v2990_v47  ;;  %3581 = vmax.xlane.f32.xlu1 %v3580_v50 }
 0x6b5   : > { %13361 = vst [vmem:[#allocation16_spill] sm:$0xff] %v10397_v45  ;;  %7792 = vmatpush1.bf16.xpose.msk.msra.mxu0 %vm10372_vm3, %v13175_v29  ;;  %v3127_v60 = vsel %vm3063_vm8, %v8551_v32, 256.0  ;;  %v3128_v62 = vsel %vm3064_vm9, %v8554_v17, 256.0  ;;  %v3583_v1 = vmax.f32 %v10392_v25, %v10397_v45 }
 0x6b6   : > { %v2993_v53 = vpop.xlane.xlu0 %2992  ;;  %v3212_v30 = vmin.f32 %v3127_v60, %v3128_v62 }
 0x6b7   : > { %vm3065_vm10 = vcmp.ge.f32.partialorder %v10136_v2, %v2993_v53  ;;  %vm3066_vm11 = vcmp.ge.f32.partialorder %v10141_v6, %v2993_v53  ;;  %v3160_v48 = vpop.xlane.xlu1 %3159  ;;  %3584 = vmax.xlane.f32.xlu0 %v3583_v1 }
 0x6b8   : > { %v3129_v47 = vsel %vm3065_vm10, %v8551_v32, 256.0  ;;  %v3130_v37 = vsel %vm3066_vm11, %v8554_v17, 256.0  ;;  %vm3251_vm12 = vcmp.eq.f32.partialorder %v8551_v32, %v3160_v48  ;;  %vm3252_vm13 = vcmp.eq.f32.partialorder %v8554_v17, %v3160_v48  ;;  %3213 = vmin.xlane.f32.xlu1 %v3212_v30 }
 0x6b9   : > { %vm10416_vm14 = vmpackc.low %vm3251_vm12, %vm3249_vm6  ;;  %v10421_v60 = vsel %vm3251_vm12, -inf, %v9829_v19  ;;  %v10424_v53 = vsel %vm3252_vm13, -inf, %v13327_v22  ;;  %v3215_v62 = vmin.f32 %v3129_v47, %v3130_v37  ;;  %v13368_v22 = vld [vmem:[#allocation23_spill] sm:$0xff]  ;;  %v13369_v47 = vld [vmem:[#allocation21_spill] sm:$0xff] }
 0x6ba   : > { %13366 = vst [vmem:[#allocation8_spill] sm:$0xff] %v10421_v60  ;;  %13367 = vst [vmem:[#allocation31_spill] sm:$0xff] %v10424_v53  ;;  %v3163_v1 = vpop.xlane.xlu0 %3162  ;;  %v3586_v30 = vmax.f32 %v10421_v60, %v10424_v53  ;;  %v13370_v37 = vld [vmem:[#allocation12_spill] sm:$0xff] }
 0x6bb   : > { %vm7793_vm15 = vmpackc.low %vm3252_vm13, %vm3250_vm7  ;;  %vm3253_vm1 = vcmp.eq.f32.partialorder %v8551_v32, %v3163_v1  ;;  %vm3254_vm2 = vcmp.eq.f32.partialorder %v8554_v17, %v3163_v1  ;;  %v2996_v48 = vpop.xlane.xlu1 %2995  ;;  %3216 = vmin.xlane.f32.xlu0 %v3215_v62 }
 0x6bc   : > { %7794 = vmatprep.subr.msk.bf16.mxu0 %vm7793_vm15, %v13175_v29  ;;  %v10436_v19 = vsel %vm3253_vm1, -inf, %v9844_v9  ;;  %v10441_v63 = vsel %vm3254_vm2, -inf, %v13368_v22  ;;  %vm3067_vm3 = vcmp.ge.f32.partialorder %v13369_v47, %v2996_v48  ;;  %vm3068_vm4 = vcmp.ge.f32.partialorder %v13370_v37, %v2996_v48  ;;  %3587 = vmax.xlane.f32.xlu1 %v3586_v30 }
 0x6bd   : > { %7796 = vmatpush1.bf16.xpose.msk.msra.mxu0 %vm10416_vm14, %v13175_v29  ;;  %v3131_v62 = vsel %vm3067_vm3, %v8551_v32, 256.0  ;;  %v3132_v53 = vsel %vm3068_vm4, %v8554_v17, 256.0  ;;  %v3589_v9 = vmax.f32 %v10436_v19, %v10441_v63 }
 0x6be   : > { %v2999_v60 = vpop.xlane.xlu0 %2998  ;;  %v3218_v6 = vmin.f32 %v3131_v62, %v3132_v53 }
 0x6bf   : > { %vm3069_vm6 = vcmp.ge.f32.partialorder %v10180_v33, %v2999_v60  ;;  %vm3070_vm7 = vcmp.ge.f32.partialorder %v10185_v51, %v2999_v60  ;;  %v3166_v22 = vpop.xlane.xlu1 %3165  ;;  %3590 = vmax.xlane.f32.xlu0 %v3589_v9 }
 0x6c0   : > { %v3133_v48 = vsel %vm3069_vm6, %v8551_v32, 256.0  ;;  %v3134_v50 = vsel %vm3070_vm7, %v8554_v17, 256.0  ;;  %vm3255_vm8 = vcmp.eq.f32.partialorder %v8551_v32, %v3166_v22  ;;  %vm3256_vm9 = vcmp.eq.f32.partialorder %v8554_v17, %v3166_v22  ;;  %3219 = vmin.xlane.f32.xlu1 %v3218_v6  ;;  %v13372_v6 = vld [vmem:[#allocation15_spill] sm:$0xff] }
 0x6c1   : > { %vm7799_vm10 = vmpackc.low %vm3255_vm8, %vm3253_vm1  ;;  %v10461_v53 = vsel %vm3255_vm8, -inf, %v13333_v18  ;;  %v10464_v30 = vsel %vm3256_vm9, -inf, %v13334_v41  ;;  %v3221_v60 = vmin.f32 %v3133_v48, %v3134_v50  ;;  %v13373_v50 = vld [vmem:[#allocation26_spill] sm:$0xff] }
 0x6c2   : > { %13371 = vst [vmem:[#allocation22_spill] sm:$0xff] %v10464_v30  ;;  %vm7797_vm11 = vmpackc.low %vm3256_vm9, %vm3254_vm2  ;;  %v3592_v62 = vmax.f32 %v10461_v53, %v10464_v30 }
 0x6c3   : > { %7798 = vmatprep.subr.msk.bf16.mxu0 %vm7797_vm11, %v13175_v29  ;;  %3222 = vmin.xlane.f32.xlu0 %v3221_v60 }
 0x6c4   : > { %v3002_v9 = vpop.xlane.xlu1 %3001  ;;  %3593 = vmax.xlane.f32.xlu1 %v3592_v62 }
 0x6c5   : > { %vm3071_vm12 = vcmp.ge.f32.partialorder %v10201_v7, %v3002_v9  ;;  %vm3072_vm13 = vcmp.ge.f32.partialorder %v13372_v6, %v3002_v9  ;;  %7800 = vmatpush1.bf16.xpose.msk.msra.mxu0 %vm7799_vm10, %v13175_v29  ;;  %v13375_v7 = vld [vmem:[#allocation14_spill] sm:$0xff]  ;;  %v13379_v9 = vld [vmem:[#allocation13_spill] sm:$0xff] }
 0x6c6   : > { %v3135_v18 = vsel %vm3071_vm12, %v8551_v32, 256.0  ;;  %v3136_v41 = vsel %vm3072_vm13, %v8554_v17, 256.0 }
 0x6c7   : > { %v3169_v1 = vpop.xlane.xlu0 %3168  ;;  %v3224_v22 = vmin.f32 %v3135_v18, %v3136_v41  ;;  %v13381_v41 = vld [vmem:[#allocation30_spill] sm:$0xff] }
 0x6c8   : > { %vm3257_vm14 = vcmp.eq.f32.partialorder %v8551_v32, %v3169_v1  ;;  %vm3258_vm15 = vcmp.eq.f32.partialorder %v8554_v17, %v3169_v1  ;;  %v3172_v48 = vpop.xlane.xlu1 %3171 }
 0x6c9   : > { %v10479_v60 = vsel %vm3257_vm14, -inf, %v13373_v50  ;;  %v10482_v30 = vsel %vm3258_vm15, -inf, %v13375_v7  ;;  %vm3259_vm1 = vcmp.eq.f32.partialorder %v8551_v32, %v3172_v48  ;;  %vm3260_vm2 = vcmp.eq.f32.partialorder %v8554_v17, %v3172_v48  ;;  %3225 = vmin.xlane.f32.xlu1 %v3224_v22 }
 0x6ca   : > { %13374 = vst [vmem:[#allocation20_spill] sm:$0xff] %v10479_v60  ;;  %13376 = vst [vmem:[#allocation9_spill] sm:$0xff] %v10482_v30  ;;  %v10491_v18 = vsel %vm3259_vm1, -inf, %v13379_v9  ;;  %v10494_v1 = vsel %vm3260_vm2, -inf, %v13381_v41  ;;  %v3595_v50 = vmax.f32 %v10479_v60, %v10482_v30 }
 0x6cb   : > { %vm10486_vm3 = vmpackc.low %vm3259_vm1, %vm3257_vm14  ;;  %13380 = vst [vmem:[#allocation23_spill] sm:$0xff] %v10491_v18  ;;  %v3005_v7 = vpop.xlane.xlu0 %3004  ;;  %v3598_v6 = vmax.f32 %v10491_v18, %v10494_v1 }
 0x6cc   : > { %13382 = vst [vmem:[#allocation21_spill] sm:$0xff] %v10494_v1  ;;  %vm7801_vm4 = vmpackc.low %vm3260_vm2, %vm3258_vm15  ;;  %vm3073_vm6 = vcmp.ge.f32.partialorder %v10223_v24, %v3005_v7  ;;  %vm3074_vm7 = vcmp.ge.f32.partialorder %v10226_v4, %v3005_v7  ;;  %v3008_v22 = vpop.xlane.xlu1 %3007  ;;  %3596 = vmax.xlane.f32.xlu0 %v3595_v50 }
 0x6cd   : > { %7802 = vmatprep.subr.msk.bf16.mxu0 %vm7801_vm4, %v13175_v29  ;;  %v3137_v48 = vsel %vm3073_vm6, %v8551_v32, 256.0  ;;  %v3138_v9 = vsel %vm3074_vm7, %v8554_v17, 256.0  ;;  %vm3075_vm8 = vcmp.ge.f32.partialorder %v10235_v34, %v3008_v22  ;;  %vm3076_vm9 = vcmp.ge.f32.partialorder %v10238_v52, %v3008_v22  ;;  %3599 = vmax.xlane.f32.xlu1 %v3598_v6 }
 0x6ce   : > { %7804 = vmatpush1.bf16.xpose.msk.msra.mxu0 %vm10486_vm3, %v13175_v29  ;;  %v3139_v41 = vsel %vm3075_vm8, %v8551_v32, 256.0  ;;  %v3140_v24 = vsel %vm3076_vm9, %v8554_v17, 256.0  ;;  %v3227_v7 = vmin.f32 %v3137_v48, %v3138_v9 }
 0x6cf   : > { %v3175_v4 = vpop.xlane.xlu0 %3174  ;;  %v3230_v50 = vmin.f32 %v3139_v41, %v3140_v24 }
 0x6d0   : > { %vm3261_vm10 = vcmp.eq.f32.partialorder %v8551_v32, %v3175_v4  ;;  %vm3262_vm11 = vcmp.eq.f32.partialorder %v8554_v17, %v3175_v4  ;;  %v3178_v1 = vpop.xlane.xlu1 %3177  ;;  %3228 = vmin.xlane.f32.xlu0 %v3227_v7  ;;  %v13385_v4 = vld [vmem:[#allocation6_spill] sm:$0xff] }
 0x6d1   : > { %v10515_v22 = vsel %vm3261_vm10, -inf, %v9923_v12  ;;  %v10518_v62 = vsel %vm3262_vm11, -inf, %v9926_v40  ;;  %vm3263_vm12 = vcmp.eq.f32.partialorder %v8551_v32, %v3178_v1  ;;  %vm3264_vm13 = vcmp.eq.f32.partialorder %v8554_v17, %v3178_v1  ;;  %3231 = vmin.xlane.f32.xlu1 %v3230_v50 }
 0x6d2   : > { %vm10522_vm14 = vmpackc.low %vm3263_vm12, %vm3261_vm10  ;;  %v10527_v24 = vsel %vm3263_vm12, -inf, %v9935_v57  ;;  %v10530_v48 = vsel %vm3264_vm13, -inf, %v13385_v4  ;;  %v3601_v12 = vmax.f32 %v10515_v22, %v10518_v62 }
 0x6d3   : > { %13386 = vst [vmem:[#allocation12_spill] sm:$0xff] %v10530_v48  ;;  %vm7805_vm15 = vmpackc.low %vm3264_vm13, %vm3262_vm11  ;;  %v3011_v40 = vpop.xlane.xlu0 %3010  ;;  %v3604_v9 = vmax.f32 %v10527_v24, %v10530_v48 }
 0x6d4   : > { %7806 = vmatprep.subr.msk.bf16.mxu0 %vm7805_vm15, %v13175_v29  ;;  %vm3077_vm1 = vcmp.ge.f32.partialorder %v10259_v55, %v3011_v40  ;;  %vm3078_vm2 = vcmp.ge.f32.partialorder %v10262_v3, %v3011_v40  ;;  %v3014_v1 = vpop.xlane.xlu1 %3013  ;;  %3602 = vmax.xlane.f32.xlu0 %v3601_v12 }
 0x6d5   : > { %v3141_v57 = vsel %vm3077_vm1, %v8551_v32, 256.0  ;;  %v3142_v41 = vsel %vm3078_vm2, %v8554_v17, 256.0  ;;  %vm3079_vm3 = vcmp.ge.f32.partialorder %v10271_v38, %v3014_v1  ;;  %vm3080_vm4 = vcmp.ge.f32.partialorder %v10274_v46, %v3014_v1  ;;  %3605 = vmax.xlane.f32.xlu1 %v3604_v9 }
 0x6d6   : > { %7808 = vmatpush1.bf16.xpose.msk.msra.mxu0 %vm10522_vm14, %v13175_v29  ;;  %v3143_v7 = vsel %vm3079_vm3, %v8551_v32, 256.0  ;;  %v3144_v50 = vsel %vm3080_vm4, %v8554_v17, 256.0  ;;  %v3233_v4 = vmin.f32 %v3141_v57, %v3142_v41 }
 0x6d7   : > { %v3181_v40 = vpop.xlane.xlu0 %3180  ;;  %v3236_v12 = vmin.f32 %v3143_v7, %v3144_v50 }
 0x6d8   : > { %vm3265_vm6 = vcmp.eq.f32.partialorder %v8551_v32, %v3181_v40  ;;  %vm3266_vm7 = vcmp.eq.f32.partialorder %v8554_v17, %v3181_v40  ;;  %v3184_v3 = vpop.xlane.xlu1 %3183  ;;  %3234 = vmin.xlane.f32.xlu0 %v3233_v4 }
 0x6d9   : > { %v10551_v1 = vsel %vm3265_vm6, -inf, %v9959_v15  ;;  %v10554_v6 = vsel %vm3266_vm7, -inf, %v9962_v13  ;;  %vm3267_vm8 = vcmp.eq.f32.partialorder %v8551_v32, %v3184_v3  ;;  %vm3268_vm9 = vcmp.eq.f32.partialorder %v8554_v17, %v3184_v3  ;;  %3237 = vmin.xlane.f32.xlu1 %v3236_v12 }
 0x6da   : > { %vm10558_vm10 = vmpackc.low %vm3267_vm8, %vm3265_vm6  ;;  %v10563_v57 = vsel %vm3267_vm8, -inf, %v9971_v5  ;;  %v10566_v41 = vsel %vm3268_vm9, -inf, %v9974_v16  ;;  %v3607_v15 = vmax.f32 %v10551_v1, %v10554_v6 }
 0x6db   : > { %vm7809_vm11 = vmpackc.low %vm3268_vm9, %vm3266_vm7  ;;  %v3017_v13 = vpop.xlane.xlu0 %3016  ;;  %v3610_v7 = vmax.f32 %v10563_v57, %v10566_v41 }
 0x6dc   : > { %7810 = vmatprep.subr.msk.bf16.mxu0 %vm7809_vm11, %v13175_v29  ;;  %vm3081_vm12 = vcmp.ge.f32.partialorder %v10295_v23, %v3017_v13  ;;  %vm3082_vm13 = vcmp.ge.f32.partialorder %v10298_v35, %v3017_v13  ;;  %v3020_v3 = vpop.xlane.xlu1 %3019  ;;  %3608 = vmax.xlane.f32.xlu0 %v3607_v15 }
 0x6dd   : > { %v3145_v5 = vsel %vm3081_vm12, %v8551_v32, 256.0  ;;  %v3146_v16 = vsel %vm3082_vm13, %v8554_v17, 256.0  ;;  %vm3083_vm14 = vcmp.ge.f32.partialorder %v10307_v54, %v3020_v3  ;;  %vm3084_vm15 = vcmp.ge.f32.partialorder %v10310_v27, %v3020_v3  ;;  %3611 = vmax.xlane.f32.xlu1 %v3610_v7 }
 0x6de   : > { %7812 = vmatpush1.bf16.xpose.msk.msra.mxu0 %vm10558_vm10, %v13175_v29  ;;  %v3147_v50 = vsel %vm3083_vm14, %v8551_v32, 256.0  ;;  %v3148_v4 = vsel %vm3084_vm15, %v8554_v17, 256.0  ;;  %v3239_v40 = vmin.f32 %v3145_v5, %v3146_v16  ;;  %v13389_v5 = vld [vmem:[#allocation27_spill] sm:$0xff] }
 0x6df   : > { %v3187_v12 = vpop.xlane.xlu0 %3186  ;;  %v3242_v15 = vmin.f32 %v3147_v50, %v3148_v4 }
 0x6e0   : > { %vm3269_vm1 = vcmp.eq.f32.partialorder %v8551_v32, %v3187_v12  ;;  %vm3270_vm2 = vcmp.eq.f32.partialorder %v8554_v17, %v3187_v12  ;;  %v3190_v13 = vpop.xlane.xlu1 %3189  ;;  %3240 = vmin.xlane.f32.xlu0 %v3239_v40 }
 0x6e1   : > { %v10587_v3 = vsel %vm3269_vm1, -inf, %v9995_v11  ;;  %v10590_v9 = vsel %vm3270_vm2, -inf, %v9998_v44  ;;  %vm3271_vm3 = vcmp.eq.f32.partialorder %v8551_v32, %v3190_v13  ;;  %vm3272_vm4 = vcmp.eq.f32.partialorder %v8554_v17, %v3190_v13  ;;  %3243 = vmin.xlane.f32.xlu1 %v3242_v15 }
 0x6e2   : > { %vm7815_vm6 = vmpackc.low %vm3271_vm3, %vm3269_vm1  ;;  %v10595_v7 = vsel %vm3271_vm3, -inf, %v10003_v43  ;;  %v10598_v16 = vsel %vm3272_vm4, -inf, %v13389_v5  ;;  %v3613_v50 = vmax.f32 %v10587_v3, %v10590_v9 }
 0x6e3   : > { %13390 = vst [vmem:[#allocation26_spill] sm:$0xff] %v10598_v16  ;;  %vm7813_vm7 = vmpackc.low %vm3272_vm4, %vm3270_vm2  ;;  %v3193_v11 = vpop.xlane.xlu0 %3192  ;;  %v3616_v44 = vmax.f32 %v10595_v7, %v10598_v16 }
 0x6e4   : > { %7814 = vmatprep.subr.msk.bf16.mxu0 %vm7813_vm7, %v13175_v29  ;;  %vm3273_vm8 = vcmp.eq.f32.partialorder %v8551_v32, %v3193_v11  ;;  %vm3274_vm9 = vcmp.eq.f32.partialorder %v8554_v17, %v3193_v11  ;;  %3614 = vmax.xlane.f32.xlu0 %v3613_v50 }
 0x6e5   : > { %v10608_v43 = vsel %vm3273_vm8, -inf, %v10016_v49  ;;  %v10611_v4 = vsel %vm3274_vm9, -inf, %v10019_v0  ;;  %3617 = vmax.xlane.f32.xlu1 %v3616_v44 }
 0x6e6   : > { %7816 = vmatpush1.bf16.xpose.msk.msra.mxu0 %vm7815_vm6, %v13175_v29  ;;  %v3619_v40 = vmax.f32 %v10608_v43, %v10611_v4  ;;  %v3196_v12 = vpop.xlane.xlu1 %3195 }
 0x6e7   : > { %vm3275_vm10 = vcmp.eq.f32.partialorder %v8551_v32, %v3196_v12  ;;  %vm3276_vm11 = vcmp.eq.f32.partialorder %v8554_v17, %v3196_v12 }
 0x6e8   : > { %3620 = vmax.xlane.f32.xlu0 %v3619_v40  ;;  %vm7819_vm12 = vmpackc.low %vm3275_vm10, %vm3273_vm8  ;;  %v10619_v15 = vsel %vm3275_vm10, -inf, %v10027_v8  ;;  %v10622_v49 = vsel %vm3276_vm11, -inf, %v10030_v61 }
 0x6e9   : > { %vm7817_vm13 = vmpackc.low %vm3276_vm11, %vm3274_vm9  ;;  %v3622_v0 = vmax.f32 %v10619_v15, %v10622_v49 }
 0x6ea   : > { %7818 = vmatprep.subr.msk.bf16.mxu0 %vm7817_vm13, %v13175_v29 }
 0x6eb   : > { %v3199_v13 = vpop.xlane.xlu0 %3198  ;;  %3623 = vmax.xlane.f32.xlu1 %v3622_v0 }
 0x6ec   : > { %vm3277_vm14 = vcmp.eq.f32.partialorder %v8551_v32, %v3199_v13  ;;  %vm3278_vm15 = vcmp.eq.f32.partialorder %v8554_v17, %v3199_v13 }
 0x6ed   : > { %v10631_v8 = vsel %vm3277_vm14, -inf, %v10039_v21  ;;  %v10634_v61 = vsel %vm3278_vm15, -inf, %v10042_v28 }
 0x6ee   : > { %7820 = vmatpush1.bf16.xpose.msk.msra.mxu0 %vm7819_vm12, %v13175_v29  ;;  %v3625_v5 = vmax.f32 %v10631_v8, %v10634_v61 }
 0x6ef   : > { %v3202_v50 = vpop.xlane.xlu1 %3201 }
 0x6f0   : > { %vm3279_vm1 = vcmp.eq.f32.partialorder %v8551_v32, %v3202_v50  ;;  %vm3280_vm2 = vcmp.eq.f32.partialorder %v8554_v17, %v3202_v50  ;;  %3626 = vmax.xlane.f32.xlu0 %v3625_v5 }
 0x6f1   : > { %vm7823_vm3 = vmpackc.low %vm3279_vm1, %vm3277_vm14  ;;  %v10641_v11 = vsel %vm3279_vm1, -inf, %v10049_v42  ;;  %v10644_v44 = vsel %vm3280_vm2, -inf, %v10052_v59 }
 0x6f2   : > { %vm7821_vm4 = vmpackc.low %vm3280_vm2, %vm3278_vm15  ;;  %v3628_v21 = vmax.f32 %v10641_v11, %v10644_v44 }
 0x6f3   : > { %7822 = vmatprep.subr.msk.bf16.mxu0 %vm7821_vm4, %v13175_v29  ;;  %v3205_v28 = vpop.xlane.xlu0 %3204 }
 0x6f4   : > { %vm3281_vm6 = vcmp.eq.f32.partialorder %v8551_v32, %v3205_v28  ;;  %vm3282_vm7 = vcmp.eq.f32.partialorder %v8554_v17, %v3205_v28  ;;  %3629 = vmax.xlane.f32.xlu1 %v3628_v21  ;;  %v13392_v21 = vld [vmem:[#allocation28_spill] sm:$0xff] }
 0x6f5   : > { %v10653_v42 = vsel %vm3281_vm6, -inf, %v10061_v14  ;;  %v10656_v59 = vsel %vm3282_vm7, -inf, %v13352_v20 }
 0x6f6   : > { %7824 = vmatpush1.bf16.xpose.msk.msra.mxu0 %vm7823_vm3, %v13175_v29  ;;  %v3631_v40 = vmax.f32 %v10653_v42, %v10656_v59 }
 0x6f7   : > { %v3208_v12 = vpop.xlane.xlu1 %3207 }
 0x6f8   : > { %vm3283_vm8 = vcmp.eq.f32.partialorder %v8551_v32, %v3208_v12  ;;  %vm3284_vm9 = vcmp.eq.f32.partialorder %v8554_v17, %v3208_v12  ;;  %3632 = vmax.xlane.f32.xlu0 %v3631_v40 }
 0x6f9   : > { %vm7827_vm10 = vmpackc.low %vm3283_vm8, %vm3281_vm6  ;;  %v10663_v0 = vsel %vm3283_vm8, -inf, %v13353_v31  ;;  %v10666_v13 = vsel %vm3284_vm9, -inf, %v13354_v36 }
 0x6fa   : > { %13391 = vst [vmem:[#allocation14_spill] sm:$0xff] %v10666_v13  ;;  %vm7825_vm11 = vmpackc.low %vm3284_vm9, %vm3282_vm7  ;;  %v3634_v14 = vmax.f32 %v10663_v0, %v10666_v13 }
 0x6fb   : > { %7826 = vmatprep.subr.msk.bf16.mxu0 %vm7825_vm11, %v13175_v29 }
 0x6fc   : > { %3635 = vmax.xlane.f32.xlu1 %v3634_v14 }
 0x6fe   : > { %7828 = vmatpush1.bf16.xpose.msk.msra.mxu0 %vm7827_vm10, %v13175_v29 }
 0x72a   : > { %v2851_v20 = vpop.f32.mrb[2].mxu1 }
 0x72b   : > { %v2853_v5 = vpop.f32.mrb[3].mxu1 }
 0x72c   : > { %v2858_v50 = vcombine.low %v2851_v20, %v2853_v5  ;;  %v13395_v5 = vld [vmem:[#allocation29_spill] sm:$0xff] }
 0x72e   : > { %v10673_v28 = vmax.f32 %v13392_v21, %v2858_v50  ;;  %v13397_v21 = vld [vmem:[#allocation18_spill] sm:$0xff] }
 0x730   : > { %13393 = vst [vmem:[#allocation13_spill] sm:$0xff] %v10673_v28 }
 0x73c   : > { %v3579_v31 = vpop.xlane.xlu0 %3578 }
 0x73d   : > { %vm3673_vm12 = vcmp.ge.f32.partialorder %v10357_v10, %v3579_v31  ;;  %vm3674_vm13 = vcmp.ge.f32.partialorder %v10362_v58, %v3579_v31  ;;  %v13398_v31 = vld [vmem:[#allocation19_spill] sm:$0xff] }
 0x73e   : > { %v3737_v36 = vsel %vm3673_vm12, %v8551_v32, 256.0  ;;  %v3738_v40 = vsel %vm3674_vm13, %v8554_v17, 256.0 }
 0x73f   : > { %v3801_v12 = vmin.f32 %v3737_v36, %v3738_v40 }
 0x740   : > { %v3211_v13 = vpop.xlane.xlu0 %3210 }
 0x741   : > { %vm3285_vm14 = vcmp.eq.f32.partialorder %v8551_v32, %v3211_v13  ;;  %vm3286_vm15 = vcmp.eq.f32.partialorder %v8554_v17, %v3211_v13  ;;  %v3582_v14 = vpop.xlane.xlu1 %3581  ;;  %3802 = vmin.xlane.f32.xlu0 %v3801_v12 }
 0x742   : > { %v10684_v20 = vsel %vm3285_vm14, -inf, %v10095_v26  ;;  %v10689_v50 = vsel %vm3286_vm15, -inf, %v13395_v5  ;;  %vm3675_vm1 = vcmp.ge.f32.partialorder %v13397_v21, %v3582_v14  ;;  %vm3676_vm2 = vcmp.ge.f32.partialorder %v13398_v31, %v3582_v14 }
 0x743   : > { %13394 = vst [vmem:[#allocation30_spill] sm:$0xff] %v10684_v20  ;;  %13396 = vst [vmem:[#allocation6_spill] sm:$0xff] %v10689_v50  ;;  %v3739_v36 = vsel %vm3675_vm1, %v8551_v32, 256.0  ;;  %v3740_v40 = vsel %vm3676_vm2, %v8554_v17, 256.0  ;;  %v3637_v12 = vmax.f32 %v10684_v20, %v10689_v50 }
 0x744   : > { %v3585_v28 = vpop.xlane.xlu0 %3584  ;;  %v3804_v58 = vmin.f32 %v3739_v36, %v3740_v40 }
 0x745   : > { %vm3677_vm3 = vcmp.ge.f32.partialorder %v10392_v25, %v3585_v28  ;;  %vm3678_vm4 = vcmp.ge.f32.partialorder %v10397_v45, %v3585_v28  ;;  %v3214_v26 = vpop.xlane.xlu1 %3213  ;;  %3638 = vmax.xlane.f32.xlu0 %v3637_v12 }
 0x746   : > { %v3741_v5 = vsel %vm3677_vm3, %v8551_v32, 256.0  ;;  %v3742_v21 = vsel %vm3678_vm4, %v8554_v17, 256.0  ;;  %vm3287_vm6 = vcmp.eq.f32.partialorder %v8551_v32, %v3214_v26  ;;  %vm3288_vm7 = vcmp.eq.f32.partialorder %v8554_v17, %v3214_v26  ;;  %3805 = vmin.xlane.f32.xlu1 %v3804_v58 }
 0x747   : > { %vm10705_vm8 = vmpackc.low %vm3287_vm6, %vm3285_vm14  ;;  %v10710_v36 = vsel %vm3287_vm6, -inf, %v13362_v56  ;;  %v10713_v28 = vsel %vm3288_vm7, -inf, %v13363_v39  ;;  %v3807_v40 = vmin.f32 %v3741_v5, %v3742_v21  ;;  %v13403_v39 = vld [vmem:[#allocation10_spill] sm:$0xff]  ;;  %v13404_v21 = vld [vmem:[#allocation8_spill] sm:$0xff] }
 0x748   : > { %13401 = vst [vmem:[#allocation27_spill] sm:$0xff] %v10710_v36  ;;  %13402 = vst [vmem:[#allocation28_spill] sm:$0xff] %v10713_v28  ;;  %v3217_v12 = vpop.xlane.xlu0 %3216  ;;  %v3640_v58 = vmax.f32 %v10710_v36, %v10713_v28  ;;  %v13405_v5 = vld [vmem:[#allocation31_spill] sm:$0xff] }
 0x749   : > { %vm7829_vm9 = vmpackc.low %vm3288_vm7, %vm3286_vm15  ;;  %vm3289_vm10 = vcmp.eq.f32.partialorder %v8551_v32, %v3217_v12  ;;  %vm3290_vm11 = vcmp.eq.f32.partialorder %v8554_v17, %v3217_v12  ;;  %v3588_v26 = vpop.xlane.xlu1 %3587  ;;  %3808 = vmin.xlane.f32.xlu0 %v3807_v40  ;;  %v13409_v12 = vld [vmem:[#allocation22_spill] sm:$0xff] }
 0x74a   : > { %7830 = vmatprep.subr.msk.bf16.mxu0 %vm7829_vm9, %v13175_v29  ;;  %v10725_v56 = vsel %vm3289_vm10, -inf, %v10136_v2  ;;  %v10730_v13 = vsel %vm3290_vm11, -inf, %v13403_v39  ;;  %vm3679_vm12 = vcmp.ge.f32.partialorder %v13404_v21, %v3588_v26  ;;  %vm3680_vm13 = vcmp.ge.f32.partialorder %v13405_v5, %v3588_v26  ;;  %3641 = vmax.xlane.f32.xlu1 %v3640_v58 }
 0x74b   : > { %7832 = vmatpush1.bf16.xpose.msk.msra.mxu0 %vm10705_vm8, %v13175_v29  ;;  %v3743_v40 = vsel %vm3679_vm12, %v8551_v32, 256.0  ;;  %v3744_v28 = vsel %vm3680_vm13, %v8554_v17, 256.0  ;;  %v3643_v2 = vmax.f32 %v10725_v56, %v10730_v13 }
 0x74c   : > { %v3591_v36 = vpop.xlane.xlu0 %3590  ;;  %v3810_v45 = vmin.f32 %v3743_v40, %v3744_v28 }
 0x74d   : > { %vm3681_vm14 = vcmp.ge.f32.partialorder %v10436_v19, %v3591_v36  ;;  %vm3682_vm15 = vcmp.ge.f32.partialorder %v10441_v63, %v3591_v36  ;;  %v3220_v39 = vpop.xlane.xlu1 %3219  ;;  %3644 = vmax.xlane.f32.xlu0 %v3643_v2 }
 0x74e   : > { %v3745_v26 = vsel %vm3681_vm14, %v8551_v32, 256.0  ;;  %v3746_v14 = vsel %vm3682_vm15, %v8554_v17, 256.0  ;;  %vm3291_vm1 = vcmp.eq.f32.partialorder %v8551_v32, %v3220_v39  ;;  %vm3292_vm2 = vcmp.eq.f32.partialorder %v8554_v17, %v3220_v39  ;;  %3811 = vmin.xlane.f32.xlu1 %v3810_v45 }
 0x74f   : > { %vm10749_vm3 = vmpackc.low %vm3291_vm1, %vm3289_vm10  ;;  %v10754_v28 = vsel %vm3291_vm1, -inf, %v13369_v47  ;;  %v10757_v36 = vsel %vm3292_vm2, -inf, %v13370_v37  ;;  %v3813_v40 = vmin.f32 %v3745_v26, %v3746_v14 }
 0x750   : > { %13408 = vst [vmem:[#allocation29_spill] sm:$0xff] %v10757_v36  ;;  %vm7833_vm4 = vmpackc.low %vm3292_vm2, %vm3290_vm11  ;;  %v3223_v2 = vpop.xlane.xlu0 %3222  ;;  %v3646_v45 = vmax.f32 %v10754_v28, %v10757_v36 }
 0x751   : > { %7834 = vmatprep.subr.msk.bf16.mxu0 %vm7833_vm4, %v13175_v29  ;;  %vm3293_vm6 = vcmp.eq.f32.partialorder %v8551_v32, %v3223_v2  ;;  %vm3294_vm7 = vcmp.eq.f32.partialorder %v8554_v17, %v3223_v2  ;;  %v3594_v39 = vpop.xlane.xlu1 %3593  ;;  %3814 = vmin.xlane.f32.xlu0 %v3813_v40 }
 0x752   : > { %v10769_v47 = vsel %vm3293_vm6, -inf, %v10180_v33  ;;  %v10774_v37 = vsel %vm3294_vm7, -inf, %v10185_v51  ;;  %vm3683_vm8 = vcmp.ge.f32.partialorder %v10461_v53, %v3594_v39  ;;  %vm3684_vm9 = vcmp.ge.f32.partialorder %v13409_v12, %v3594_v39  ;;  %3647 = vmax.xlane.f32.xlu1 %v3646_v45  ;;  %v13410_v51 = vld [vmem:[#allocation7_spill] sm:$0xff] }
 0x753   : > { %7836 = vmatpush1.bf16.xpose.msk.msra.mxu0 %vm10749_vm3, %v13175_v29  ;;  %v3747_v26 = vsel %vm3683_vm8, %v8551_v32, 256.0  ;;  %v3748_v14 = vsel %vm3684_vm9, %v8554_v17, 256.0  ;;  %v3649_v33 = vmax.f32 %v10769_v47, %v10774_v37  ;;  %v13412_v45 = vld [vmem:[#allocation15_spill] sm:$0xff] }
 0x754   : > { %v3816_v40 = vmin.f32 %v3747_v26, %v3748_v14 }
 0x755   : > { %3650 = vmax.xlane.f32.xlu0 %v3649_v33 }
 0x756   : > { %v3226_v36 = vpop.xlane.xlu1 %3225  ;;  %3817 = vmin.xlane.f32.xlu1 %v3816_v40 }
 0x757   : > { %vm3295_vm10 = vcmp.eq.f32.partialorder %v8551_v32, %v3226_v36  ;;  %vm3296_vm11 = vcmp.eq.f32.partialorder %v8554_v17, %v3226_v36 }
 0x758   : > { %vm7839_vm12 = vmpackc.low %vm3295_vm10, %vm3293_vm6  ;;  %v10790_v58 = vsel %vm3295_vm10, -inf, %v13410_v51  ;;  %v10793_v39 = vsel %vm3296_vm11, -inf, %v13412_v45  ;;  %v13414_v51 = vld [vmem:[#allocation21_spill] sm:$0xff] }
 0x759   : > { %13411 = vst [vmem:[#allocation19_spill] sm:$0xff] %v10790_v58  ;;  %13413 = vst [vmem:[#allocation10_spill] sm:$0xff] %v10793_v39  ;;  %v3597_v26 = vpop.xlane.xlu0 %3596  ;;  %v3652_v14 = vmax.f32 %v10790_v58, %v10793_v39 }
 0x75a   : > { %vm7837_vm13 = vmpackc.low %vm3296_vm11, %vm3294_vm7  ;;  %vm3685_vm14 = vcmp.ge.f32.partialorder %v10479_v60, %v3597_v26  ;;  %vm3686_vm15 = vcmp.ge.f32.partialorder %v10482_v30, %v3597_v26  ;;  %v3600_v36 = vpop.xlane.xlu1 %3599  ;;  %v13415_v30 = vld [vmem:[#allocation24_spill] sm:$0xff] }
 0x75b   : > { %7838 = vmatprep.subr.msk.bf16.mxu0 %vm7837_vm13, %v13175_v29  ;;  %v3749_v33 = vsel %vm3685_vm14, %v8551_v32, 256.0  ;;  %v3750_v40 = vsel %vm3686_vm15, %v8554_v17, 256.0  ;;  %vm3687_vm1 = vcmp.ge.f32.partialorder %v10491_v18, %v3600_v36  ;;  %vm3688_vm2 = vcmp.ge.f32.partialorder %v13414_v51, %v3600_v36  ;;  %3653 = vmax.xlane.f32.xlu1 %v3652_v14  ;;  %v13417_v36 = vld [vmem:[#allocation11_spill] sm:$0xff] }
 0x75c   : > { %7840 = vmatpush1.bf16.xpose.msk.msra.mxu0 %vm7839_vm12, %v13175_v29  ;;  %v3751_v2 = vsel %vm3687_vm1, %v8551_v32, 256.0  ;;  %v3752_v45 = vsel %vm3688_vm2, %v8554_v17, 256.0  ;;  %v3819_v39 = vmin.f32 %v3749_v33, %v3750_v40 }
 0x75d   : > { %v3229_v60 = vpop.xlane.xlu0 %3228  ;;  %v3822_v58 = vmin.f32 %v3751_v2, %v3752_v45 }
 0x75e   : > { %vm3297_vm3 = vcmp.eq.f32.partialorder %v8551_v32, %v3229_v60  ;;  %vm3298_vm4 = vcmp.eq.f32.partialorder %v8554_v17, %v3229_v60  ;;  %v3232_v26 = vpop.xlane.xlu1 %3231  ;;  %3820 = vmin.xlane.f32.xlu0 %v3819_v39 }
 0x75f   : > { %v10812_v18 = vsel %vm3297_vm3, -inf, %v13415_v30  ;;  %v10815_v51 = vsel %vm3298_vm4, -inf, %v13417_v36  ;;  %vm3299_vm6 = vcmp.eq.f32.partialorder %v8551_v32, %v3232_v26  ;;  %vm3300_vm7 = vcmp.eq.f32.partialorder %v8554_v17, %v3232_v26  ;;  %3823 = vmin.xlane.f32.xlu1 %v3822_v58 }
 0x760   : > { %13416 = vst [vmem:[#allocation8_spill] sm:$0xff] %v10812_v18  ;;  %13418 = vst [vmem:[#allocation31_spill] sm:$0xff] %v10815_v51  ;;  %v10824_v33 = vsel %vm3299_vm6, -inf, %v10235_v34  ;;  %v10827_v60 = vsel %vm3300_vm7, -inf, %v10238_v52  ;;  %v3655_v30 = vmax.f32 %v10812_v18, %v10815_v51 }
 0x761   : > { %vm10819_vm8 = vmpackc.low %vm3299_vm6, %vm3297_vm3  ;;  %v3603_v39 = vpop.xlane.xlu0 %3602  ;;  %v3658_v40 = vmax.f32 %v10824_v33, %v10827_v60 }
 0x762   : > { %vm7841_vm9 = vmpackc.low %vm3300_vm7, %vm3298_vm4  ;;  %vm3689_vm10 = vcmp.ge.f32.partialorder %v10515_v22, %v3603_v39  ;;  %vm3690_vm11 = vcmp.ge.f32.partialorder %v10518_v62, %v3603_v39  ;;  %v3606_v58 = vpop.xlane.xlu1 %3605  ;;  %3656 = vmax.xlane.f32.xlu0 %v3655_v30 }
 0x763   : > { %7842 = vmatprep.subr.msk.bf16.mxu0 %vm7841_vm9, %v13175_v29  ;;  %v3753_v34 = vsel %vm3689_vm10, %v8551_v32, 256.0  ;;  %v3754_v52 = vsel %vm3690_vm11, %v8554_v17, 256.0  ;;  %vm3691_vm12 = vcmp.ge.f32.partialorder %v10527_v24, %v3606_v58  ;;  %vm3692_vm13 = vcmp.ge.f32.partialorder %v10530_v48, %v3606_v58  ;;  %3659 = vmax.xlane.f32.xlu1 %v3658_v40  ;;  %v13421_v48 = vld [vmem:[#allocation25_spill] sm:$0xff] }
 0x764   : > { %7844 = vmatpush1.bf16.xpose.msk.msra.mxu0 %vm10819_vm8, %v13175_v29  ;;  %v3755_v2 = vsel %vm3691_vm12, %v8551_v32, 256.0  ;;  %v3756_v45 = vsel %vm3692_vm13, %v8554_v17, 256.0  ;;  %v3825_v26 = vmin.f32 %v3753_v34, %v3754_v52 }
 0x765   : > { %v3235_v36 = vpop.xlane.xlu0 %3234  ;;  %v3828_v30 = vmin.f32 %v3755_v2, %v3756_v45 }
 0x766   : > { %vm3301_vm14 = vcmp.eq.f32.partialorder %v8551_v32, %v3235_v36  ;;  %vm3302_vm15 = vcmp.eq.f32.partialorder %v8554_v17, %v3235_v36  ;;  %v3238_v39 = vpop.xlane.xlu1 %3237  ;;  %3826 = vmin.xlane.f32.xlu0 %v3825_v26 }
 0x767   : > { %v10848_v58 = vsel %vm3301_vm14, -inf, %v10259_v55  ;;  %v10851_v14 = vsel %vm3302_vm15, -inf, %v13421_v48  ;;  %vm3303_vm1 = vcmp.eq.f32.partialorder %v8551_v32, %v3238_v39  ;;  %vm3304_vm2 = vcmp.eq.f32.partialorder %v8554_v17, %v3238_v39  ;;  %3829 = vmin.xlane.f32.xlu1 %v3828_v30 }
 0x768   : > { %13422 = vst [vmem:[#allocation22_spill] sm:$0xff] %v10851_v14  ;;  %vm10855_vm3 = vmpackc.low %vm3303_vm1, %vm3301_vm14  ;;  %v10860_v34 = vsel %vm3303_vm1, -inf, %v10271_v38  ;;  %v10863_v52 = vsel %vm3304_vm2, -inf, %v10274_v46  ;;  %v3661_v55 = vmax.f32 %v10848_v58, %v10851_v14 }
 0x769   : > { %vm7845_vm4 = vmpackc.low %vm3304_vm2, %vm3302_vm15  ;;  %v3609_v48 = vpop.xlane.xlu0 %3608  ;;  %v3664_v2 = vmax.f32 %v10860_v34, %v10863_v52 }
 0x76a   : > { %7846 = vmatprep.subr.msk.bf16.mxu0 %vm7845_vm4, %v13175_v29  ;;  %vm3693_vm6 = vcmp.ge.f32.partialorder %v10551_v1, %v3609_v48  ;;  %vm3694_vm7 = vcmp.ge.f32.partialorder %v10554_v6, %v3609_v48  ;;  %v3612_v45 = vpop.xlane.xlu1 %3611  ;;  %3662 = vmax.xlane.f32.xlu0 %v3661_v55 }
 0x76b   : > { %v3757_v38 = vsel %vm3693_vm6, %v8551_v32, 256.0  ;;  %v3758_v46 = vsel %vm3694_vm7, %v8554_v17, 256.0  ;;  %vm3695_vm8 = vcmp.ge.f32.partialorder %v10563_v57, %v3612_v45  ;;  %vm3696_vm9 = vcmp.ge.f32.partialorder %v10566_v41, %v3612_v45  ;;  %3665 = vmax.xlane.f32.xlu1 %v3664_v2 }
 0x76c   : > { %7848 = vmatpush1.bf16.xpose.msk.msra.mxu0 %vm10855_vm3, %v13175_v29  ;;  %v3759_v26 = vsel %vm3695_vm8, %v8551_v32, 256.0  ;;  %v3760_v36 = vsel %vm3696_vm9, %v8554_v17, 256.0  ;;  %v3831_v30 = vmin.f32 %v3757_v38, %v3758_v46 }
 0x76d   : > { %v3241_v39 = vpop.xlane.xlu0 %3240  ;;  %v3834_v55 = vmin.f32 %v3759_v26, %v3760_v36 }
 0x76e   : > { %vm3305_vm10 = vcmp.eq.f32.partialorder %v8551_v32, %v3241_v39  ;;  %vm3306_vm11 = vcmp.eq.f32.partialorder %v8554_v17, %v3241_v39  ;;  %v3244_v48 = vpop.xlane.xlu1 %3243  ;;  %3832 = vmin.xlane.f32.xlu0 %v3831_v30 }
 0x76f   : > { %v10884_v45 = vsel %vm3305_vm10, -inf, %v10295_v23  ;;  %v10887_v40 = vsel %vm3306_vm11, -inf, %v10298_v35  ;;  %vm3307_vm12 = vcmp.eq.f32.partialorder %v8551_v32, %v3244_v48  ;;  %vm3308_vm13 = vcmp.eq.f32.partialorder %v8554_v17, %v3244_v48  ;;  %3835 = vmin.xlane.f32.xlu1 %v3834_v55 }
 0x770   : > { %vm10891_vm14 = vmpackc.low %vm3307_vm12, %vm3305_vm10  ;;  %v10896_v38 = vsel %vm3307_vm12, -inf, %v10307_v54  ;;  %v10899_v46 = vsel %vm3308_vm13, -inf, %v10310_v27  ;;  %v3667_v23 = vmax.f32 %v10884_v45, %v10887_v40 }
 0x771   : > { %vm7849_vm15 = vmpackc.low %vm3308_vm13, %vm3306_vm11  ;;  %v3615_v35 = vpop.xlane.xlu0 %3614  ;;  %v3670_v26 = vmax.f32 %v10896_v38, %v10899_v46 }
 0x772   : > { %7850 = vmatprep.subr.msk.bf16.mxu0 %vm7849_vm15, %v13175_v29  ;;  %vm3697_vm1 = vcmp.ge.f32.partialorder %v10587_v3, %v3615_v35  ;;  %vm3698_vm2 = vcmp.ge.f32.partialorder %v10590_v9, %v3615_v35  ;;  %v3618_v36 = vpop.xlane.xlu1 %3617  ;;  %3668 = vmax.xlane.f32.xlu0 %v3667_v23 }
 0x773   : > { %v3761_v54 = vsel %vm3697_vm1, %v8551_v32, 256.0  ;;  %v3762_v27 = vsel %vm3698_vm2, %v8554_v17, 256.0  ;;  %vm3699_vm3 = vcmp.ge.f32.partialorder %v10595_v7, %v3618_v36  ;;  %vm3700_vm4 = vcmp.ge.f32.partialorder %v10598_v16, %v3618_v36  ;;  %3671 = vmax.xlane.f32.xlu1 %v3670_v26  ;;  %v13427_v26 = vld [vmem:[#allocation4_spill] sm:$0xff] }
 0x774   : > { %7852 = vmatpush1.bf16.xpose.msk.msra.mxu0 %vm10891_vm14, %v13175_v29  ;;  %v3763_v30 = vsel %vm3699_vm3, %v8551_v32, 256.0  ;;  %v3764_v39 = vsel %vm3700_vm4, %v8554_v17, 256.0  ;;  %v3837_v55 = vmin.f32 %v3761_v54, %v3762_v27 }
 0x775   : > { %v3621_v48 = vpop.xlane.xlu0 %3620  ;;  %v3840_v23 = vmin.f32 %v3763_v30, %v3764_v39  ;;  %v13428_v30 = vld [vmem:[#allocation5_spill] sm:$0xff] }
 0x776   : > { %vm3701_vm6 = vcmp.ge.f32.partialorder %v10608_v43, %v3621_v48  ;;  %vm3702_vm7 = vcmp.ge.f32.partialorder %v10611_v4, %v3621_v48  ;;  %3838 = vmin.xlane.f32.xlu0 %v3837_v55 }
 0x777   : > { %v3765_v35 = vsel %vm3701_vm6, %v8551_v32, 256.0  ;;  %v3766_v36 = vsel %vm3702_vm7, %v8554_v17, 256.0  ;;  %3841 = vmin.xlane.f32.xlu1 %v3840_v23 }
 0x778   : > { %v3843_v2 = vmin.f32 %v3765_v35, %v3766_v36  ;;  %v3624_v16 = vpop.xlane.xlu1 %3623 }
 0x779   : > { %vm3703_vm8 = vcmp.ge.f32.partialorder %v10619_v15, %v3624_v16  ;;  %vm3704_vm9 = vcmp.ge.f32.partialorder %v10622_v49, %v3624_v16 }
 0x77a   : > { %3844 = vmin.xlane.f32.xlu0 %v3843_v2  ;;  %v3767_v54 = vsel %vm3703_vm8, %v8551_v32, 256.0  ;;  %v3768_v27 = vsel %vm3704_vm9, %v8554_v17, 256.0 }
 0x77b   : > { %3502 = vmatmul.mubr.f32.vlgmr.msra.gmra.mrb[66].mxu0 %v13427_v26  ;;  %v3846_v39 = vmin.f32 %v3767_v54, %v3768_v27 }
 0x77c   : > { %4805 = vmatprep.mubr.f32.mxu0 %v13428_v30 }
 0x77d   : > { %v3627_v55 = vpop.xlane.xlu0 %3626  ;;  %3847 = vmin.xlane.f32.xlu1 %v3846_v39 }
 0x77e   : > { %vm3705_vm10 = vcmp.ge.f32.partialorder %v10631_v8, %v3627_v55  ;;  %vm3706_vm11 = vcmp.ge.f32.partialorder %v10634_v61, %v3627_v55 }
 0x77f   : > { %v3769_v48 = vsel %vm3705_vm10, %v8551_v32, 256.0  ;;  %v3770_v23 = vsel %vm3706_vm11, %v8554_v17, 256.0 }
 0x780   : > { %v3849_v35 = vmin.f32 %v3769_v48, %v3770_v23 }
 0x781   : > { %v3630_v16 = vpop.xlane.xlu1 %3629 }
 0x782   : > { %vm3707_vm12 = vcmp.ge.f32.partialorder %v10641_v11, %v3630_v16  ;;  %vm3708_vm13 = vcmp.ge.f32.partialorder %v10644_v44, %v3630_v16  ;;  %3850 = vmin.xlane.f32.xlu0 %v3849_v35  ;;  %v13429_v35 = vld [vmem:[#allocation14_spill] sm:$0xff] }
 0x783   : > { %v3771_v36 = vsel %vm3707_vm12, %v8551_v32, 256.0  ;;  %v3772_v2 = vsel %vm3708_vm13, %v8554_v17, 256.0 }
 0x784   : > { %v3852_v54 = vmin.f32 %v3771_v36, %v3772_v2 }
 0x785   : > { %v3633_v27 = vpop.xlane.xlu0 %3632 }
 0x786   : > { %vm3709_vm14 = vcmp.ge.f32.partialorder %v10653_v42, %v3633_v27  ;;  %vm3710_vm15 = vcmp.ge.f32.partialorder %v10656_v59, %v3633_v27  ;;  %3853 = vmin.xlane.f32.xlu1 %v3852_v54  ;;  %v13431_v27 = vld [vmem:[#allocation17_spill] sm:$0xff] }
 0x787   : > { %v3773_v39 = vsel %vm3709_vm14, %v8551_v32, 256.0  ;;  %v3774_v55 = vsel %vm3710_vm15, %v8554_v17, 256.0 }
 0x788   : > { %v3855_v48 = vmin.f32 %v3773_v39, %v3774_v55 }
 0x789   : > { %v3636_v23 = vpop.xlane.xlu1 %3635 }
 0x78a   : > { %vm3711_vm1 = vcmp.ge.f32.partialorder %v10663_v0, %v3636_v23  ;;  %vm3712_vm2 = vcmp.ge.f32.partialorder %v13429_v35, %v3636_v23  ;;  %3856 = vmin.xlane.f32.xlu0 %v3855_v48 }
 0x78b   : > { %v3775_v16 = vsel %vm3711_vm1, %v8551_v32, 256.0  ;;  %v3776_v36 = vsel %vm3712_vm2, %v8554_v17, 256.0 }
 0x78c   : > { %v3858_v2 = vmin.f32 %v3775_v16, %v3776_v36 }
 0x78e   : > { %3859 = vmin.xlane.f32.xlu1 %v3858_v2  ;;  %v13435_v2 = vld [vmem:[#allocation18_spill] sm:$0xff] }
 0x7ce   : > { %v3803_v30 = vpop.xlane.xlu0 %3802 }
 0x7cf   : > { %vm3897_vm3 = vcmp.eq.f32.partialorder %v8551_v32, %v3803_v30  ;;  %vm3898_vm4 = vcmp.eq.f32.partialorder %v8554_v17, %v3803_v30 }
 0x7d0   : > { %v10946_v54 = vsel %vm3897_vm3, -inf, %v10357_v10  ;;  %v10951_v39 = vsel %vm3898_vm4, -inf, %v13431_v27 }
 0x7d1   : > { %13430 = vst [vmem:[#allocation7_spill] sm:$0xff] %v10946_v54  ;;  %13432 = vst [vmem:[#allocation15_spill] sm:$0xff] %v10951_v39  ;;  %v4229_v55 = vmax.f32 %v10946_v54, %v10951_v39 }
 0x7d2   : > { %v3639_v48 = vpop.xlane.xlu0 %3638 }
 0x7d3   : > { %vm3713_vm6 = vcmp.ge.f32.partialorder %v10684_v20, %v3639_v48  ;;  %vm3714_vm7 = vcmp.ge.f32.partialorder %v10689_v50, %v3639_v48  ;;  %v3806_v23 = vpop.xlane.xlu1 %3805  ;;  %4230 = vmax.xlane.f32.xlu0 %v4229_v55 }
 0x7d4   : > { %v3777_v16 = vsel %vm3713_vm6, %v8551_v32, 256.0  ;;  %v3778_v10 = vsel %vm3714_vm7, %v8554_v17, 256.0  ;;  %vm3899_vm8 = vcmp.eq.f32.partialorder %v8551_v32, %v3806_v23  ;;  %vm3900_vm9 = vcmp.eq.f32.partialorder %v8554_v17, %v3806_v23 }
 0x7d5   : > { %vm10961_vm10 = vmpackc.low %vm3899_vm8, %vm3897_vm3  ;;  %v10966_v27 = vsel %vm3899_vm8, -inf, %v13435_v2  ;;  %v10969_v26 = vsel %vm3900_vm9, -inf, %v13398_v31  ;;  %v3861_v48 = vmin.f32 %v3777_v16, %v3778_v10  ;;  %v13438_v16 = vld [vmem:[#allocation16_spill] sm:$0xff]  ;;  %v13439_v10 = vld [vmem:[#allocation27_spill] sm:$0xff] }
 0x7d6   : > { %13436 = vst [vmem:[#allocation24_spill] sm:$0xff] %v10966_v27  ;;  %13437 = vst [vmem:[#allocation11_spill] sm:$0xff] %v10969_v26  ;;  %v3809_v55 = vpop.xlane.xlu0 %3808  ;;  %v4232_v50 = vmax.f32 %v10966_v27, %v10969_v26  ;;  %v13440_v2 = vld [vmem:[#allocation28_spill] sm:$0xff] }
 0x7d7   : > { %vm7853_vm11 = vmpackc.low %vm3900_vm9, %vm3898_vm4  ;;  %vm3901_vm12 = vcmp.eq.f32.partialorder %v8551_v32, %v3809_v55  ;;  %vm3902_vm13 = vcmp.eq.f32.partialorder %v8554_v17, %v3809_v55  ;;  %v3642_v23 = vpop.xlane.xlu1 %3641  ;;  %3862 = vmin.xlane.f32.xlu0 %v3861_v48  ;;  %v13444_v55 = vld [vmem:[#allocation29_spill] sm:$0xff] }
 0x7d8   : > { %7854 = vmatprep.subr.msk.bf16.mxu1 %vm7853_vm11, %v13175_v29  ;;  %v10981_v31 = vsel %vm3901_vm12, -inf, %v10392_v25  ;;  %v10986_v30 = vsel %vm3902_vm13, -inf, %v13438_v16  ;;  %vm3715_vm14 = vcmp.ge.f32.partialorder %v13439_v10, %v3642_v23  ;;  %vm3716_vm15 = vcmp.ge.f32.partialorder %v13440_v2, %v3642_v23  ;;  %4233 = vmax.xlane.f32.xlu1 %v4232_v50 }
 0x7d9   : > { %7856 = vmatpush1.bf16.xpose.msk.msra.mxu1 %vm10961_vm10, %v13175_v29  ;;  %v3779_v48 = vsel %vm3715_vm14, %v8551_v32, 256.0  ;;  %v3780_v26 = vsel %vm3716_vm15, %v8554_v17, 256.0  ;;  %v4235_v25 = vmax.f32 %v10981_v31, %v10986_v30 }
 0x7da   : > { %v3645_v27 = vpop.xlane.xlu0 %3644  ;;  %v3864_v20 = vmin.f32 %v3779_v48, %v3780_v26 }
 0x7db   : > { %vm3717_vm1 = vcmp.ge.f32.partialorder %v10725_v56, %v3645_v27  ;;  %vm3718_vm2 = vcmp.ge.f32.partialorder %v10730_v13, %v3645_v27  ;;  %v3812_v16 = vpop.xlane.xlu1 %3811  ;;  %4236 = vmax.xlane.f32.xlu0 %v4235_v25 }
 0x7dc   : > { %v3781_v23 = vsel %vm3717_vm1, %v8551_v32, 256.0  ;;  %v3782_v36 = vsel %vm3718_vm2, %v8554_v17, 256.0  ;;  %vm3903_vm3 = vcmp.eq.f32.partialorder %v8551_v32, %v3812_v16  ;;  %vm3904_vm4 = vcmp.eq.f32.partialorder %v8554_v17, %v3812_v16  ;;  %3865 = vmin.xlane.f32.xlu1 %v3864_v20 }
 0x7dd   : > { %vm11005_vm6 = vmpackc.low %vm3903_vm3, %vm3901_vm12  ;;  %v11010_v26 = vsel %vm3903_vm3, -inf, %v13404_v21  ;;  %v11013_v27 = vsel %vm3904_vm4, -inf, %v13405_v5  ;;  %v3867_v48 = vmin.f32 %v3781_v23, %v3782_v36 }
 0x7de   : > { %13443 = vst [vmem:[#allocation25_spill] sm:$0xff] %v11013_v27  ;;  %vm7857_vm7 = vmpackc.low %vm3904_vm4, %vm3902_vm13  ;;  %v3815_v25 = vpop.xlane.xlu0 %3814  ;;  %v4238_v20 = vmax.f32 %v11010_v26, %v11013_v27 }
 0x7df   : > { %7858 = vmatprep.subr.msk.bf16.mxu1 %vm7857_vm7, %v13175_v29  ;;  %vm3905_vm8 = vcmp.eq.f32.partialorder %v8551_v32, %v3815_v25  ;;  %vm3906_vm9 = vcmp.eq.f32.partialorder %v8554_v17, %v3815_v25  ;;  %v3648_v16 = vpop.xlane.xlu1 %3647  ;;  %3868 = vmin.xlane.f32.xlu0 %v3867_v48 }
 0x7e0   : > { %v11025_v21 = vsel %vm3905_vm8, -inf, %v10436_v19  ;;  %v11030_v5 = vsel %vm3906_vm9, -inf, %v10441_v63  ;;  %vm3719_vm10 = vcmp.ge.f32.partialorder %v10754_v28, %v3648_v16  ;;  %vm3720_vm11 = vcmp.ge.f32.partialorder %v13444_v55, %v3648_v16  ;;  %4239 = vmax.xlane.f32.xlu1 %v4238_v20 }
 0x7e1   : > { %7860 = vmatpush1.bf16.xpose.msk.msra.mxu1 %vm11005_vm6, %v13175_v29  ;;  %v3783_v23 = vsel %vm3719_vm10, %v8551_v32, 256.0  ;;  %v3784_v36 = vsel %vm3720_vm11, %v8554_v17, 256.0  ;;  %v4241_v19 = vmax.f32 %v11025_v21, %v11030_v5 }
 0x7e2   : > { %v3651_v48 = vpop.xlane.xlu0 %3650  ;;  %v3870_v27 = vmin.f32 %v3783_v23, %v3784_v36 }
 0x7e3   : > { %vm3721_vm12 = vcmp.ge.f32.partialorder %v10769_v47, %v3651_v48  ;;  %vm3722_vm13 = vcmp.ge.f32.partialorder %v10774_v37, %v3651_v48  ;;  %v3818_v63 = vpop.xlane.xlu1 %3817  ;;  %4242 = vmax.xlane.f32.xlu0 %v4241_v19 }
 0x7e4   : > { %v3785_v16 = vsel %vm3721_vm12, %v8551_v32, 256.0  ;;  %v3786_v50 = vsel %vm3722_vm13, %v8554_v17, 256.0  ;;  %vm3907_vm14 = vcmp.eq.f32.partialorder %v8551_v32, %v3818_v63  ;;  %vm3908_vm15 = vcmp.eq.f32.partialorder %v8554_v17, %v3818_v63  ;;  %3871 = vmin.xlane.f32.xlu1 %v3870_v27  ;;  %v13447_v27 = vld [vmem:[#allocation19_spill] sm:$0xff]  ;;  %v13448_v63 = vld [vmem:[#allocation10_spill] sm:$0xff] }
 0x7e5   : > { %vm7863_vm1 = vmpackc.low %vm3907_vm14, %vm3905_vm8  ;;  %v11050_v20 = vsel %vm3907_vm14, -inf, %v10461_v53  ;;  %v11053_v23 = vsel %vm3908_vm15, -inf, %v13409_v12  ;;  %v3873_v36 = vmin.f32 %v3785_v16, %v3786_v50 }
 0x7e6   : > { %13445 = vst [vmem:[#allocation14_spill] sm:$0xff] %v11050_v20  ;;  %13446 = vst [vmem:[#allocation17_spill] sm:$0xff] %v11053_v23  ;;  %v4244_v19 = vmax.f32 %v11050_v20, %v11053_v23  ;;  %v13449_v23 = vld [vmem:[#allocation20_spill] sm:$0xff] }
 0x7e7   : > { %vm7861_vm2 = vmpackc.low %vm3908_vm15, %vm3906_vm9  ;;  %3874 = vmin.xlane.f32.xlu0 %v3873_v36 }
 0x7e8   : > { %7862 = vmatprep.subr.msk.bf16.mxu1 %vm7861_vm2, %v13175_v29  ;;  %v3654_v48 = vpop.xlane.xlu1 %3653  ;;  %4245 = vmax.xlane.f32.xlu1 %v4244_v19 }
 0x7e9   : > { %vm3723_vm3 = vcmp.ge.f32.partialorder %v13447_v27, %v3654_v48  ;;  %vm3724_vm4 = vcmp.ge.f32.partialorder %v13448_v63, %v3654_v48  ;;  %7864 = vmatpush1.bf16.xpose.msk.msra.mxu1 %vm7863_vm1, %v13175_v29  ;;  %v13451_v27 = vld [vmem:[#allocation9_spill] sm:$0xff]  ;;  %v13455_v48 = vld [vmem:[#allocation23_spill] sm:$0xff] }
 0x7ea   : > { %v3787_v53 = vsel %vm3723_vm3, %v8551_v32, 256.0  ;;  %v3788_v12 = vsel %vm3724_vm4, %v8554_v17, 256.0 }
 0x7eb   : > { %v3821_v25 = vpop.xlane.xlu0 %3820  ;;  %v3876_v16 = vmin.f32 %v3787_v53, %v3788_v12  ;;  %v13457_v12 = vld [vmem:[#allocation21_spill] sm:$0xff] }
 0x7ec   : > { %vm3909_vm6 = vcmp.eq.f32.partialorder %v8551_v32, %v3821_v25  ;;  %vm3910_vm7 = vcmp.eq.f32.partialorder %v8554_v17, %v3821_v25  ;;  %v3824_v50 = vpop.xlane.xlu1 %3823 }
 0x7ed   : > { %v11068_v36 = vsel %vm3909_vm6, -inf, %v13449_v23  ;;  %v11071_v20 = vsel %vm3910_vm7, -inf, %v13451_v27  ;;  %vm3911_vm8 = vcmp.eq.f32.partialorder %v8551_v32, %v3824_v50  ;;  %vm3912_vm9 = vcmp.eq.f32.partialorder %v8554_v17, %v3824_v50  ;;  %3877 = vmin.xlane.f32.xlu1 %v3876_v16 }
 0x7ee   : > { %13450 = vst [vmem:[#allocation18_spill] sm:$0xff] %v11068_v36  ;;  %13452 = vst [vmem:[#allocation16_spill] sm:$0xff] %v11071_v20  ;;  %v11080_v53 = vsel %vm3911_vm8, -inf, %v13455_v48  ;;  %v11083_v25 = vsel %vm3912_vm9, -inf, %v13457_v12  ;;  %v4247_v23 = vmax.f32 %v11068_v36, %v11071_v20 }
 0x7ef   : > { %vm11075_vm10 = vmpackc.low %vm3911_vm8, %vm3909_vm6  ;;  %13456 = vst [vmem:[#allocation27_spill] sm:$0xff] %v11080_v53  ;;  %v3657_v27 = vpop.xlane.xlu0 %3656  ;;  %v4250_v63 = vmax.f32 %v11080_v53, %v11083_v25 }
 0x7f0   : > { %13458 = vst [vmem:[#allocation28_spill] sm:$0xff] %v11083_v25  ;;  %vm7865_vm11 = vmpackc.low %vm3912_vm9, %vm3910_vm7  ;;  %vm3725_vm12 = vcmp.ge.f32.partialorder %v10812_v18, %v3657_v27  ;;  %vm3726_vm13 = vcmp.ge.f32.partialorder %v10815_v51, %v3657_v27  ;;  %v3660_v16 = vpop.xlane.xlu1 %3659  ;;  %4248 = vmax.xlane.f32.xlu0 %v4247_v23 }
 0x7f1   : > { %7866 = vmatprep.subr.msk.bf16.mxu1 %vm7865_vm11, %v13175_v29  ;;  %v3789_v50 = vsel %vm3725_vm12, %v8551_v32, 256.0  ;;  %v3790_v48 = vsel %vm3726_vm13, %v8554_v17, 256.0  ;;  %vm3727_vm14 = vcmp.ge.f32.partialorder %v10824_v33, %v3660_v16  ;;  %vm3728_vm15 = vcmp.ge.f32.partialorder %v10827_v60, %v3660_v16  ;;  %4251 = vmax.xlane.f32.xlu1 %v4250_v63 }
 0x7f2   : > { %7868 = vmatpush1.bf16.xpose.msk.msra.mxu1 %vm11075_vm10, %v13175_v29  ;;  %v3791_v12 = vsel %vm3727_vm14, %v8551_v32, 256.0  ;;  %v3792_v18 = vsel %vm3728_vm15, %v8554_v17, 256.0  ;;  %v3879_v27 = vmin.f32 %v3789_v50, %v3790_v48 }
 0x7f3   : > { %v3827_v51 = vpop.xlane.xlu0 %3826  ;;  %v3882_v23 = vmin.f32 %v3791_v12, %v3792_v18 }
 0x7f4   : > { %vm3913_vm1 = vcmp.eq.f32.partialorder %v8551_v32, %v3827_v51  ;;  %vm3914_vm2 = vcmp.eq.f32.partialorder %v8554_v17, %v3827_v51  ;;  %v3830_v25 = vpop.xlane.xlu1 %3829  ;;  %3880 = vmin.xlane.f32.xlu0 %v3879_v27  ;;  %v13461_v51 = vld [vmem:[#allocation12_spill] sm:$0xff] }
 0x7f5   : > { %v11104_v16 = vsel %vm3913_vm1, -inf, %v10515_v22  ;;  %v11107_v19 = vsel %vm3914_vm2, -inf, %v10518_v62  ;;  %vm3915_vm3 = vcmp.eq.f32.partialorder %v8551_v32, %v3830_v25  ;;  %vm3916_vm4 = vcmp.eq.f32.partialorder %v8554_v17, %v3830_v25  ;;  %3883 = vmin.xlane.f32.xlu1 %v3882_v23 }
 0x7f6   : > { %vm11111_vm6 = vmpackc.low %vm3915_vm3, %vm3913_vm1  ;;  %v11116_v18 = vsel %vm3915_vm3, -inf, %v10527_v24  ;;  %v11119_v50 = vsel %vm3916_vm4, -inf, %v13461_v51  ;;  %v4253_v22 = vmax.f32 %v11104_v16, %v11107_v19 }
 0x7f7   : > { %13462 = vst [vmem:[#allocation29_spill] sm:$0xff] %v11119_v50  ;;  %vm7869_vm7 = vmpackc.low %vm3916_vm4, %vm3914_vm2  ;;  %v3663_v62 = vpop.xlane.xlu0 %3662  ;;  %v4256_v48 = vmax.f32 %v11116_v18, %v11119_v50 }
 0x7f8   : > { %7870 = vmatprep.subr.msk.bf16.mxu1 %vm7869_vm7, %v13175_v29  ;;  %vm3729_vm8 = vcmp.ge.f32.partialorder %v10848_v58, %v3663_v62  ;;  %vm3730_vm9 = vcmp.ge.f32.partialorder %v10851_v14, %v3663_v62  ;;  %v3666_v25 = vpop.xlane.xlu1 %3665  ;;  %4254 = vmax.xlane.f32.xlu0 %v4253_v22 }
 0x7f9   : > { %v3793_v24 = vsel %vm3729_vm8, %v8551_v32, 256.0  ;;  %v3794_v12 = vsel %vm3730_vm9, %v8554_v17, 256.0  ;;  %vm3731_vm10 = vcmp.ge.f32.partialorder %v10860_v34, %v3666_v25  ;;  %vm3732_vm11 = vcmp.ge.f32.partialorder %v10863_v52, %v3666_v25  ;;  %4257 = vmax.xlane.f32.xlu1 %v4256_v48 }
 0x7fa   : > { %7872 = vmatpush1.bf16.xpose.msk.msra.mxu1 %vm11111_vm6, %v13175_v29  ;;  %v3795_v27 = vsel %vm3731_vm10, %v8551_v32, 256.0  ;;  %v3796_v23 = vsel %vm3732_vm11, %v8554_v17, 256.0  ;;  %v3885_v51 = vmin.f32 %v3793_v24, %v3794_v12 }
 0x7fb   : > { %v3833_v62 = vpop.xlane.xlu0 %3832  ;;  %v3888_v22 = vmin.f32 %v3795_v27, %v3796_v23 }
 0x7fc   : > { %vm3917_vm12 = vcmp.eq.f32.partialorder %v8551_v32, %v3833_v62  ;;  %vm3918_vm13 = vcmp.eq.f32.partialorder %v8554_v17, %v3833_v62  ;;  %v3836_v14 = vpop.xlane.xlu1 %3835  ;;  %3886 = vmin.xlane.f32.xlu0 %v3885_v51 }
 0x7fd   : > { %v11140_v25 = vsel %vm3917_vm12, -inf, %v10551_v1  ;;  %v11143_v63 = vsel %vm3918_vm13, -inf, %v10554_v6  ;;  %vm3919_vm14 = vcmp.eq.f32.partialorder %v8551_v32, %v3836_v14  ;;  %vm3920_vm15 = vcmp.eq.f32.partialorder %v8554_v17, %v3836_v14  ;;  %3889 = vmin.xlane.f32.xlu1 %v3888_v22 }
 0x7fe   : > { %vm11147_vm1 = vmpackc.low %vm3919_vm14, %vm3917_vm12  ;;  %v11152_v24 = vsel %vm3919_vm14, -inf, %v10563_v57  ;;  %v11155_v12 = vsel %vm3920_vm15, -inf, %v10566_v41  ;;  %v4259_v1 = vmax.f32 %v11140_v25, %v11143_v63 }
 0x7ff   : > { %vm7873_vm2 = vmpackc.low %vm3920_vm15, %vm3918_vm13  ;;  %v3669_v6 = vpop.xlane.xlu0 %3668  ;;  %v4262_v27 = vmax.f32 %v11152_v24, %v11155_v12 }
 0x800   : > { %7874 = vmatprep.subr.msk.bf16.mxu1 %vm7873_vm2, %v13175_v29  ;;  %vm3733_vm3 = vcmp.ge.f32.partialorder %v10884_v45, %v3669_v6  ;;  %vm3734_vm4 = vcmp.ge.f32.partialorder %v10887_v40, %v3669_v6  ;;  %v3672_v14 = vpop.xlane.xlu1 %3671  ;;  %4260 = vmax.xlane.f32.xlu0 %v4259_v1 }
 0x801   : > { %v3797_v57 = vsel %vm3733_vm3, %v8551_v32, 256.0  ;;  %v3798_v41 = vsel %vm3734_vm4, %v8554_v17, 256.0  ;;  %vm3735_vm6 = vcmp.ge.f32.partialorder %v10896_v38, %v3672_v14  ;;  %vm3736_vm7 = vcmp.ge.f32.partialorder %v10899_v46, %v3672_v14  ;;  %4263 = vmax.xlane.f32.xlu1 %v4262_v27 }
 0x802   : > { %7876 = vmatpush1.bf16.xpose.msk.msra.mxu1 %vm11147_vm1, %v13175_v29  ;;  %v3799_v23 = vsel %vm3735_vm6, %v8551_v32, 256.0  ;;  %v3800_v51 = vsel %vm3736_vm7, %v8554_v17, 256.0  ;;  %v3891_v62 = vmin.f32 %v3797_v57, %v3798_v41  ;;  %v13465_v57 = vld [vmem:[#allocation26_spill] sm:$0xff] }
 0x803   : > { %v3839_v22 = vpop.xlane.xlu0 %3838  ;;  %v3894_v1 = vmin.f32 %v3799_v23, %v3800_v51 }
 0x804   : > { %vm3921_vm8 = vcmp.eq.f32.partialorder %v8551_v32, %v3839_v22  ;;  %vm3922_vm9 = vcmp.eq.f32.partialorder %v8554_v17, %v3839_v22  ;;  %v3842_v6 = vpop.xlane.xlu1 %3841  ;;  %3892 = vmin.xlane.f32.xlu0 %v3891_v62 }
 0x805   : > { %v11176_v14 = vsel %vm3921_vm8, -inf, %v10587_v3  ;;  %v11179_v48 = vsel %vm3922_vm9, -inf, %v10590_v9  ;;  %vm3923_vm10 = vcmp.eq.f32.partialorder %v8551_v32, %v3842_v6  ;;  %vm3924_vm11 = vcmp.eq.f32.partialorder %v8554_v17, %v3842_v6  ;;  %3895 = vmin.xlane.f32.xlu1 %v3894_v1 }
 0x806   : > { %vm7879_vm12 = vmpackc.low %vm3923_vm10, %vm3921_vm8  ;;  %v11184_v27 = vsel %vm3923_vm10, -inf, %v10595_v7  ;;  %v11187_v41 = vsel %vm3924_vm11, -inf, %v13465_v57  ;;  %v4265_v23 = vmax.f32 %v11176_v14, %v11179_v48 }
 0x807   : > { %13466 = vst [vmem:[#allocation20_spill] sm:$0xff] %v11187_v41  ;;  %vm7877_vm13 = vmpackc.low %vm3924_vm11, %vm3922_vm9  ;;  %v3845_v3 = vpop.xlane.xlu0 %3844  ;;  %v4268_v9 = vmax.f32 %v11184_v27, %v11187_v41 }
 0x808   : > { %7878 = vmatprep.subr.msk.bf16.mxu1 %vm7877_vm13, %v13175_v29  ;;  %vm3925_vm14 = vcmp.eq.f32.partialorder %v8551_v32, %v3845_v3  ;;  %vm3926_vm15 = vcmp.eq.f32.partialorder %v8554_v17, %v3845_v3  ;;  %4266 = vmax.xlane.f32.xlu0 %v4265_v23 }
 0x809   : > { %v11197_v7 = vsel %vm3925_vm14, -inf, %v10608_v43  ;;  %v11200_v51 = vsel %vm3926_vm15, -inf, %v10611_v4  ;;  %4269 = vmax.xlane.f32.xlu1 %v4268_v9 }
 0x80a   : > { %7880 = vmatpush1.bf16.xpose.msk.msra.mxu1 %vm7879_vm12, %v13175_v29  ;;  %v4271_v62 = vmax.f32 %v11197_v7, %v11200_v51  ;;  %v3848_v22 = vpop.xlane.xlu1 %3847 }
 0x80b   : > { %vm3927_vm1 = vcmp.eq.f32.partialorder %v8551_v32, %v3848_v22  ;;  %vm3928_vm2 = vcmp.eq.f32.partialorder %v8554_v17, %v3848_v22 }
 0x80c   : > { %4272 = vmax.xlane.f32.xlu0 %v4271_v62  ;;  %vm7883_vm3 = vmpackc.low %vm3927_vm1, %vm3925_vm14  ;;  %v11208_v1 = vsel %vm3927_vm1, -inf, %v10619_v15  ;;  %v11211_v43 = vsel %vm3928_vm2, -inf, %v10622_v49 }
 0x80d   : > { %vm7881_vm4 = vmpackc.low %vm3928_vm2, %vm3926_vm15  ;;  %v4274_v4 = vmax.f32 %v11208_v1, %v11211_v43 }
 0x80e   : > { %7882 = vmatprep.subr.msk.bf16.mxu1 %vm7881_vm4, %v13175_v29 }
 0x80f   : > { %v3851_v6 = vpop.xlane.xlu0 %3850  ;;  %4275 = vmax.xlane.f32.xlu1 %v4274_v4 }
 0x810   : > { %vm3929_vm6 = vcmp.eq.f32.partialorder %v8551_v32, %v3851_v6  ;;  %vm3930_vm7 = vcmp.eq.f32.partialorder %v8554_v17, %v3851_v6 }
 0x811   : > { %v11220_v15 = vsel %vm3929_vm6, -inf, %v10631_v8  ;;  %v11223_v49 = vsel %vm3930_vm7, -inf, %v10634_v61 }
 0x812   : > { %7884 = vmatpush1.bf16.xpose.msk.msra.mxu1 %vm7883_vm3, %v13175_v29  ;;  %v4277_v57 = vmax.f32 %v11220_v15, %v11223_v49 }
 0x813   : > { %v3854_v23 = vpop.xlane.xlu1 %3853 }
 0x814   : > { %vm3931_vm8 = vcmp.eq.f32.partialorder %v8551_v32, %v3854_v23  ;;  %vm3932_vm9 = vcmp.eq.f32.partialorder %v8554_v17, %v3854_v23  ;;  %4278 = vmax.xlane.f32.xlu0 %v4277_v57 }
 0x815   : > { %vm7887_vm10 = vmpackc.low %vm3931_vm8, %vm3929_vm6  ;;  %v11230_v3 = vsel %vm3931_vm8, -inf, %v10641_v11  ;;  %v11233_v9 = vsel %vm3932_vm9, -inf, %v10644_v44 }
 0x816   : > { %vm7885_vm11 = vmpackc.low %vm3932_vm9, %vm3930_vm7  ;;  %v4280_v8 = vmax.f32 %v11230_v3, %v11233_v9 }
 0x817   : > { %7886 = vmatprep.subr.msk.bf16.mxu1 %vm7885_vm11, %v13175_v29  ;;  %v3857_v61 = vpop.xlane.xlu0 %3856 }
 0x818   : > { %vm3933_vm12 = vcmp.eq.f32.partialorder %v8551_v32, %v3857_v61  ;;  %vm3934_vm13 = vcmp.eq.f32.partialorder %v8554_v17, %v3857_v61  ;;  %4281 = vmax.xlane.f32.xlu1 %v4280_v8  ;;  %v13468_v8 = vld [vmem:[#allocation13_spill] sm:$0xff] }
 0x819   : > { %v11242_v11 = vsel %vm3933_vm12, -inf, %v10653_v42  ;;  %v11245_v44 = vsel %vm3934_vm13, -inf, %v10656_v59 }
 0x81a   : > { %7888 = vmatpush1.bf16.xpose.msk.msra.mxu1 %vm7887_vm10, %v13175_v29  ;;  %v4283_v62 = vmax.f32 %v11242_v11, %v11245_v44 }
 0x81b   : > { %v3860_v22 = vpop.xlane.xlu1 %3859 }
 0x81c   : > { %vm3935_vm14 = vcmp.eq.f32.partialorder %v8551_v32, %v3860_v22  ;;  %vm3936_vm15 = vcmp.eq.f32.partialorder %v8554_v17, %v3860_v22  ;;  %4284 = vmax.xlane.f32.xlu0 %v4283_v62 }
 0x81d   : > { %vm7891_vm1 = vmpackc.low %vm3935_vm14, %vm3933_vm12  ;;  %v11252_v4 = vsel %vm3935_vm14, -inf, %v10663_v0  ;;  %v11255_v6 = vsel %vm3936_vm15, -inf, %v13429_v35 }
 0x81e   : > { %13467 = vst [vmem:[#allocation9_spill] sm:$0xff] %v11255_v6  ;;  %vm7889_vm2 = vmpackc.low %vm3936_vm15, %vm3934_vm13  ;;  %v4286_v42 = vmax.f32 %v11252_v4, %v11255_v6 }
 0x81f   : > { %7890 = vmatprep.subr.msk.bf16.mxu1 %vm7889_vm2, %v13175_v29 }
 0x820   : > { %4287 = vmax.xlane.f32.xlu1 %v4286_v42 }
 0x822   : > { %7892 = vmatpush1.bf16.xpose.msk.msra.mxu1 %vm7891_vm1, %v13175_v29 }
 0x84e   : > { %v3503_v59 = vpop.f32.mrb[66].mxu0 }
 0x84f   : > { %v3505_v57 = vpop.f32.mrb[67].mxu0 }
 0x850   : > { %v3510_v23 = vcombine.low %v3503_v59, %v3505_v57  ;;  %v13470_v59 = vld [vmem:[#allocation30_spill] sm:$0xff] }
 0x852   : > { %v11262_v61 = vmax.f32 %v13468_v8, %v3510_v23  ;;  %v13472_v23 = vld [vmem:[#allocation6_spill] sm:$0xff] }
 0x854   : > { %13469 = vst [vmem:[#allocation23_spill] sm:$0xff] %v11262_v61 }
 0x860   : > { %v4231_v0 = vpop.xlane.xlu0 %4230 }
 0x861   : > { %vm4325_vm3 = vcmp.ge.f32.partialorder %v10946_v54, %v4231_v0  ;;  %vm4326_vm4 = vcmp.ge.f32.partialorder %v10951_v39, %v4231_v0  ;;  %v13474_v0 = vld [vmem:[#allocation24_spill] sm:$0xff] }
 0x862   : > { %v4389_v35 = vsel %vm4325_vm3, %v8551_v32, 256.0  ;;  %v4390_v62 = vsel %vm4326_vm4, %v8554_v17, 256.0 }
 0x863   : > { %v4453_v22 = vmin.f32 %v4389_v35, %v4390_v62  ;;  %v13475_v35 = vld [vmem:[#allocation11_spill] sm:$0xff] }
 0x864   : > { %v3863_v6 = vpop.xlane.xlu0 %3862 }
 0x865   : > { %vm3937_vm6 = vcmp.eq.f32.partialorder %v8551_v32, %v3863_v6  ;;  %vm3938_vm7 = vcmp.eq.f32.partialorder %v8554_v17, %v3863_v6  ;;  %v4234_v42 = vpop.xlane.xlu1 %4233  ;;  %4454 = vmin.xlane.f32.xlu0 %v4453_v22  ;;  %v13479_v6 = vld [vmem:[#allocation25_spill] sm:$0xff] }
 0x866   : > { %v11273_v57 = vsel %vm3937_vm6, -inf, %v13470_v59  ;;  %v11278_v8 = vsel %vm3938_vm7, -inf, %v13472_v23  ;;  %vm4327_vm8 = vcmp.ge.f32.partialorder %v13474_v0, %v4234_v42  ;;  %vm4328_vm9 = vcmp.ge.f32.partialorder %v13475_v35, %v4234_v42 }
 0x867   : > { %13471 = vst [vmem:[#allocation21_spill] sm:$0xff] %v11273_v57  ;;  %13473 = vst [vmem:[#allocation12_spill] sm:$0xff] %v11278_v8  ;;  %v4391_v62 = vsel %vm4327_vm8, %v8551_v32, 256.0  ;;  %v4392_v61 = vsel %vm4328_vm9, %v8554_v17, 256.0  ;;  %v4289_v22 = vmax.f32 %v11273_v57, %v11278_v8 }
 0x868   : > { %v4237_v39 = vpop.xlane.xlu0 %4236  ;;  %v4456_v54 = vmin.f32 %v4391_v62, %v4392_v61 }
 0x869   : > { %vm4329_vm10 = vcmp.ge.f32.partialorder %v10981_v31, %v4237_v39  ;;  %vm4330_vm11 = vcmp.ge.f32.partialorder %v10986_v30, %v4237_v39  ;;  %v3866_v59 = vpop.xlane.xlu1 %3865  ;;  %4290 = vmax.xlane.f32.xlu0 %v4289_v22 }
 0x86a   : > { %v4393_v23 = vsel %vm4329_vm10, %v8551_v32, 256.0  ;;  %v4394_v0 = vsel %vm4330_vm11, %v8554_v17, 256.0  ;;  %vm3939_vm12 = vcmp.eq.f32.partialorder %v8551_v32, %v3866_v59  ;;  %vm3940_vm13 = vcmp.eq.f32.partialorder %v8554_v17, %v3866_v59  ;;  %4457 = vmin.xlane.f32.xlu1 %v4456_v54 }
 0x86b   : > { %vm11294_vm14 = vmpackc.low %vm3939_vm12, %vm3937_vm6  ;;  %v11299_v61 = vsel %vm3939_vm12, -inf, %v13439_v10  ;;  %v11302_v39 = vsel %vm3940_vm13, -inf, %v13440_v2  ;;  %v4459_v62 = vmin.f32 %v4393_v23, %v4394_v0 }
 0x86c   : > { %13478 = vst [vmem:[#allocation26_spill] sm:$0xff] %v11302_v39  ;;  %vm7893_vm15 = vmpackc.low %vm3940_vm13, %vm3938_vm7  ;;  %v3869_v22 = vpop.xlane.xlu0 %3868  ;;  %v4292_v54 = vmax.f32 %v11299_v61, %v11302_v39 }
 0x86d   : > { %7894 = vmatprep.subr.msk.bf16.mxu1 %vm7893_vm15, %v13175_v29  ;;  %vm3941_vm1 = vcmp.eq.f32.partialorder %v8551_v32, %v3869_v22  ;;  %vm3942_vm2 = vcmp.eq.f32.partialorder %v8554_v17, %v3869_v22  ;;  %v4240_v59 = vpop.xlane.xlu1 %4239  ;;  %4460 = vmin.xlane.f32.xlu0 %v4459_v62  ;;  %v13484_v22 = vld [vmem:[#allocation14_spill] sm:$0xff] }
 0x86e   : > { %v11314_v10 = vsel %vm3941_vm1, -inf, %v10725_v56  ;;  %v11319_v2 = vsel %vm3942_vm2, -inf, %v10730_v13  ;;  %vm4331_vm3 = vcmp.ge.f32.partialorder %v11010_v26, %v4240_v59  ;;  %vm4332_vm4 = vcmp.ge.f32.partialorder %v13479_v6, %v4240_v59  ;;  %7896 = vmatpush1.bf16.xpose.msk.msra.mxu1 %vm11294_vm14, %v13175_v29  ;;  %4293 = vmax.xlane.f32.xlu1 %v4292_v54 }
 0x86f   : > { %v4395_v0 = vsel %vm4331_vm3, %v8551_v32, 256.0  ;;  %v4396_v23 = vsel %vm4332_vm4, %v8554_v17, 256.0  ;;  %v4295_v56 = vmax.f32 %v11314_v10, %v11319_v2 }
 0x870   : > { %v4243_v62 = vpop.xlane.xlu0 %4242  ;;  %v4462_v39 = vmin.f32 %v4395_v0, %v4396_v23 }
 0x871   : > { %vm4333_vm6 = vcmp.ge.f32.partialorder %v11025_v21, %v4243_v62  ;;  %vm4334_vm7 = vcmp.ge.f32.partialorder %v11030_v5, %v4243_v62  ;;  %v3872_v13 = vpop.xlane.xlu1 %3871  ;;  %4296 = vmax.xlane.f32.xlu0 %v4295_v56 }
 0x872   : > { %v4397_v59 = vsel %vm4333_vm6, %v8551_v32, 256.0  ;;  %v4398_v42 = vsel %vm4334_vm7, %v8554_v17, 256.0  ;;  %vm3943_vm8 = vcmp.eq.f32.partialorder %v8551_v32, %v3872_v13  ;;  %vm3944_vm9 = vcmp.eq.f32.partialorder %v8554_v17, %v3872_v13  ;;  %4463 = vmin.xlane.f32.xlu1 %v4462_v39 }
 0x873   : > { %vm11338_vm10 = vmpackc.low %vm3943_vm8, %vm3941_vm1  ;;  %v11343_v0 = vsel %vm3943_vm8, -inf, %v10754_v28  ;;  %v11346_v23 = vsel %vm3944_vm9, -inf, %v13444_v55  ;;  %v4465_v56 = vmin.f32 %v4397_v59, %v4398_v42  ;;  %v13485_v59 = vld [vmem:[#allocation17_spill] sm:$0xff] }
 0x874   : > { %13482 = vst [vmem:[#allocation13_spill] sm:$0xff] %v11343_v0  ;;  %13483 = vst [vmem:[#allocation30_spill] sm:$0xff] %v11346_v23  ;;  %v3875_v62 = vpop.xlane.xlu0 %3874  ;;  %v4298_v39 = vmax.f32 %v11343_v0, %v11346_v23 }
 0x875   : > { %vm7897_vm11 = vmpackc.low %vm3944_vm9, %vm3942_vm2  ;;  %vm3945_vm12 = vcmp.eq.f32.partialorder %v8551_v32, %v3875_v62  ;;  %vm3946_vm13 = vcmp.eq.f32.partialorder %v8554_v17, %v3875_v62  ;;  %v4246_v13 = vpop.xlane.xlu1 %4245  ;;  %4466 = vmin.xlane.f32.xlu0 %v4465_v56 }
 0x876   : > { %7898 = vmatprep.subr.msk.bf16.mxu1 %vm7897_vm11, %v13175_v29  ;;  %v11358_v28 = vsel %vm3945_vm12, -inf, %v10769_v47  ;;  %v11363_v55 = vsel %vm3946_vm13, -inf, %v10774_v37  ;;  %vm4335_vm14 = vcmp.ge.f32.partialorder %v13484_v22, %v4246_v13  ;;  %vm4336_vm15 = vcmp.ge.f32.partialorder %v13485_v59, %v4246_v13  ;;  %4299 = vmax.xlane.f32.xlu1 %v4298_v39  ;;  %v13486_v37 = vld [vmem:[#allocation19_spill] sm:$0xff]  ;;  %v13488_v39 = vld [vmem:[#allocation10_spill] sm:$0xff] }
 0x877   : > { %7900 = vmatpush1.bf16.xpose.msk.msra.mxu1 %vm11338_vm10, %v13175_v29  ;;  %v4399_v42 = vsel %vm4335_vm14, %v8551_v32, 256.0  ;;  %v4400_v56 = vsel %vm4336_vm15, %v8554_v17, 256.0  ;;  %v4301_v47 = vmax.f32 %v11358_v28, %v11363_v55 }
 0x878   : > { %v4468_v23 = vmin.f32 %v4399_v42, %v4400_v56 }
 0x879   : > { %4302 = vmax.xlane.f32.xlu0 %v4301_v47 }
 0x87a   : > { %v3878_v0 = vpop.xlane.xlu1 %3877  ;;  %4469 = vmin.xlane.f32.xlu1 %v4468_v23 }
 0x87b   : > { %vm3947_vm1 = vcmp.eq.f32.partialorder %v8551_v32, %v3878_v0  ;;  %vm3948_vm2 = vcmp.eq.f32.partialorder %v8554_v17, %v3878_v0 }
 0x87c   : > { %vm7903_vm3 = vmpackc.low %vm3947_vm1, %vm3945_vm12  ;;  %v11379_v54 = vsel %vm3947_vm1, -inf, %v13486_v37  ;;  %v11382_v13 = vsel %vm3948_vm2, -inf, %v13488_v39  ;;  %v13490_v37 = vld [vmem:[#allocation28_spill] sm:$0xff] }
 0x87d   : > { %13487 = vst [vmem:[#allocation6_spill] sm:$0xff] %v11379_v54  ;;  %13489 = vst [vmem:[#allocation11_spill] sm:$0xff] %v11382_v13  ;;  %v4249_v42 = vpop.xlane.xlu0 %4248  ;;  %v4304_v56 = vmax.f32 %v11379_v54, %v11382_v13 }
 0x87e   : > { %vm7901_vm4 = vmpackc.low %vm3948_vm2, %vm3946_vm13  ;;  %vm4337_vm6 = vcmp.ge.f32.partialorder %v11068_v36, %v4249_v42  ;;  %vm4338_vm7 = vcmp.ge.f32.partialorder %v11071_v20, %v4249_v42  ;;  %v4252_v0 = vpop.xlane.xlu1 %4251  ;;  %v13491_v20 = vld [vmem:[#allocation8_spill] sm:$0xff] }
 0x87f   : > { %7902 = vmatprep.subr.msk.bf16.mxu1 %vm7901_vm4, %v13175_v29  ;;  %v4401_v23 = vsel %vm4337_vm6, %v8551_v32, 256.0  ;;  %v4402_v47 = vsel %vm4338_vm7, %v8554_v17, 256.0  ;;  %vm4339_vm8 = vcmp.ge.f32.partialorder %v11080_v53, %v4252_v0  ;;  %vm4340_vm9 = vcmp.ge.f32.partialorder %v13490_v37, %v4252_v0  ;;  %4305 = vmax.xlane.f32.xlu1 %v4304_v56  ;;  %v13493_v0 = vld [vmem:[#allocation31_spill] sm:$0xff] }
 0x880   : > { %7904 = vmatpush1.bf16.xpose.msk.msra.mxu1 %vm7903_vm3, %v13175_v29  ;;  %v4403_v62 = vsel %vm4339_vm8, %v8551_v32, 256.0  ;;  %v4404_v39 = vsel %vm4340_vm9, %v8554_v17, 256.0  ;;  %v4471_v13 = vmin.f32 %v4401_v23, %v4402_v47 }
 0x881   : > { %v3881_v36 = vpop.xlane.xlu0 %3880  ;;  %v4474_v54 = vmin.f32 %v4403_v62, %v4404_v39 }
 0x882   : > { %vm3949_vm10 = vcmp.eq.f32.partialorder %v8551_v32, %v3881_v36  ;;  %vm3950_vm11 = vcmp.eq.f32.partialorder %v8554_v17, %v3881_v36  ;;  %v3884_v42 = vpop.xlane.xlu1 %3883  ;;  %4472 = vmin.xlane.f32.xlu0 %v4471_v13 }
 0x883   : > { %v11401_v53 = vsel %vm3949_vm10, -inf, %v13491_v20  ;;  %v11404_v37 = vsel %vm3950_vm11, -inf, %v13493_v0  ;;  %vm3951_vm12 = vcmp.eq.f32.partialorder %v8551_v32, %v3884_v42  ;;  %vm3952_vm13 = vcmp.eq.f32.partialorder %v8554_v17, %v3884_v42  ;;  %4475 = vmin.xlane.f32.xlu1 %v4474_v54 }
 0x884   : > { %13492 = vst [vmem:[#allocation25_spill] sm:$0xff] %v11401_v53  ;;  %13494 = vst [vmem:[#allocation14_spill] sm:$0xff] %v11404_v37  ;;  %v11413_v23 = vsel %vm3951_vm12, -inf, %v10824_v33  ;;  %v11416_v36 = vsel %vm3952_vm13, -inf, %v10827_v60  ;;  %v4307_v20 = vmax.f32 %v11401_v53, %v11404_v37 }
 0x885   : > { %vm11408_vm14 = vmpackc.low %vm3951_vm12, %vm3949_vm10  ;;  %v4255_v13 = vpop.xlane.xlu0 %4254  ;;  %v4310_v47 = vmax.f32 %v11413_v23, %v11416_v36 }
 0x886   : > { %vm7905_vm15 = vmpackc.low %vm3952_vm13, %vm3950_vm11  ;;  %vm4341_vm1 = vcmp.ge.f32.partialorder %v11104_v16, %v4255_v13  ;;  %vm4342_vm2 = vcmp.ge.f32.partialorder %v11107_v19, %v4255_v13  ;;  %v4258_v54 = vpop.xlane.xlu1 %4257  ;;  %4308 = vmax.xlane.f32.xlu0 %v4307_v20 }
 0x887   : > { %7906 = vmatprep.subr.msk.bf16.mxu1 %vm7905_vm15, %v13175_v29  ;;  %v4405_v33 = vsel %vm4341_vm1, %v8551_v32, 256.0  ;;  %v4406_v60 = vsel %vm4342_vm2, %v8554_v17, 256.0  ;;  %vm4343_vm3 = vcmp.ge.f32.partialorder %v11116_v18, %v4258_v54  ;;  %vm4344_vm4 = vcmp.ge.f32.partialorder %v11119_v50, %v4258_v54  ;;  %4311 = vmax.xlane.f32.xlu1 %v4310_v47  ;;  %v13497_v50 = vld [vmem:[#allocation22_spill] sm:$0xff] }
 0x888   : > { %7908 = vmatpush1.bf16.xpose.msk.msra.mxu1 %vm11408_vm14, %v13175_v29  ;;  %v4407_v62 = vsel %vm4343_vm3, %v8551_v32, 256.0  ;;  %v4408_v39 = vsel %vm4344_vm4, %v8554_v17, 256.0  ;;  %v4477_v42 = vmin.f32 %v4405_v33, %v4406_v60 }
 0x889   : > { %v3887_v0 = vpop.xlane.xlu0 %3886  ;;  %v4480_v20 = vmin.f32 %v4407_v62, %v4408_v39 }
 0x88a   : > { %vm3953_vm6 = vcmp.eq.f32.partialorder %v8551_v32, %v3887_v0  ;;  %vm3954_vm7 = vcmp.eq.f32.partialorder %v8554_v17, %v3887_v0  ;;  %v3890_v13 = vpop.xlane.xlu1 %3889  ;;  %4478 = vmin.xlane.f32.xlu0 %v4477_v42 }
 0x88b   : > { %v11437_v54 = vsel %vm3953_vm6, -inf, %v10848_v58  ;;  %v11440_v56 = vsel %vm3954_vm7, -inf, %v13497_v50  ;;  %vm3955_vm8 = vcmp.eq.f32.partialorder %v8551_v32, %v3890_v13  ;;  %vm3956_vm9 = vcmp.eq.f32.partialorder %v8554_v17, %v3890_v13  ;;  %4481 = vmin.xlane.f32.xlu1 %v4480_v20 }
 0x88c   : > { %13498 = vst [vmem:[#allocation17_spill] sm:$0xff] %v11440_v56  ;;  %vm11444_vm10 = vmpackc.low %vm3955_vm8, %vm3953_vm6  ;;  %v11449_v33 = vsel %vm3955_vm8, -inf, %v10860_v34  ;;  %v11452_v60 = vsel %vm3956_vm9, -inf, %v10863_v52  ;;  %v4313_v58 = vmax.f32 %v11437_v54, %v11440_v56 }
 0x88d   : > { %vm7909_vm11 = vmpackc.low %vm3956_vm9, %vm3954_vm7  ;;  %v4261_v50 = vpop.xlane.xlu0 %4260  ;;  %v4316_v62 = vmax.f32 %v11449_v33, %v11452_v60 }
 0x88e   : > { %7910 = vmatprep.subr.msk.bf16.mxu1 %vm7909_vm11, %v13175_v29  ;;  %vm4345_vm12 = vcmp.ge.f32.partialorder %v11140_v25, %v4261_v50  ;;  %vm4346_vm13 = vcmp.ge.f32.partialorder %v11143_v63, %v4261_v50  ;;  %v4264_v39 = vpop.xlane.xlu1 %4263  ;;  %4314 = vmax.xlane.f32.xlu0 %v4313_v58 }
 0x88f   : > { %v4409_v34 = vsel %vm4345_vm12, %v8551_v32, 256.0  ;;  %v4410_v52 = vsel %vm4346_vm13, %v8554_v17, 256.0  ;;  %vm4347_vm14 = vcmp.ge.f32.partialorder %v11152_v24, %v4264_v39  ;;  %vm4348_vm15 = vcmp.ge.f32.partialorder %v11155_v12, %v4264_v39  ;;  %4317 = vmax.xlane.f32.xlu1 %v4316_v62 }
 0x890   : > { %7912 = vmatpush1.bf16.xpose.msk.msra.mxu1 %vm11444_vm10, %v13175_v29  ;;  %v4411_v42 = vsel %vm4347_vm14, %v8551_v32, 256.0  ;;  %v4412_v0 = vsel %vm4348_vm15, %v8554_v17, 256.0  ;;  %v4483_v20 = vmin.f32 %v4409_v34, %v4410_v52 }
 0x891   : > { %v3893_v13 = vpop.xlane.xlu0 %3892  ;;  %v4486_v58 = vmin.f32 %v4411_v42, %v4412_v0 }
 0x892   : > { %vm3957_vm1 = vcmp.eq.f32.partialorder %v8551_v32, %v3893_v13  ;;  %vm3958_vm2 = vcmp.eq.f32.partialorder %v8554_v17, %v3893_v13  ;;  %v3896_v50 = vpop.xlane.xlu1 %3895  ;;  %4484 = vmin.xlane.f32.xlu0 %v4483_v20 }
 0x893   : > { %v11473_v39 = vsel %vm3957_vm1, -inf, %v10884_v45  ;;  %v11476_v47 = vsel %vm3958_vm2, -inf, %v10887_v40  ;;  %vm3959_vm3 = vcmp.eq.f32.partialorder %v8551_v32, %v3896_v50  ;;  %vm3960_vm4 = vcmp.eq.f32.partialorder %v8554_v17, %v3896_v50  ;;  %4487 = vmin.xlane.f32.xlu1 %v4486_v58 }
 0x894   : > { %vm11480_vm6 = vmpackc.low %vm3959_vm3, %vm3957_vm1  ;;  %v11485_v34 = vsel %vm3959_vm3, -inf, %v10896_v38  ;;  %v11488_v52 = vsel %vm3960_vm4, -inf, %v10899_v46  ;;  %v4319_v45 = vmax.f32 %v11473_v39, %v11476_v47 }
 0x895   : > { %vm7913_vm7 = vmpackc.low %vm3960_vm4, %vm3958_vm2  ;;  %v4267_v40 = vpop.xlane.xlu0 %4266  ;;  %v4322_v42 = vmax.f32 %v11485_v34, %v11488_v52 }
 0x896   : > { %7914 = vmatprep.subr.msk.bf16.mxu1 %vm7913_vm7, %v13175_v29  ;;  %vm4349_vm8 = vcmp.ge.f32.partialorder %v11176_v14, %v4267_v40  ;;  %vm4350_vm9 = vcmp.ge.f32.partialorder %v11179_v48, %v4267_v40  ;;  %v4270_v0 = vpop.xlane.xlu1 %4269  ;;  %4320 = vmax.xlane.f32.xlu0 %v4319_v45 }
 0x897   : > { %v4413_v38 = vsel %vm4349_vm8, %v8551_v32, 256.0  ;;  %v4414_v46 = vsel %vm4350_vm9, %v8554_v17, 256.0  ;;  %vm4351_vm10 = vcmp.ge.f32.partialorder %v11184_v27, %v4270_v0  ;;  %vm4352_vm11 = vcmp.ge.f32.partialorder %v11187_v41, %v4270_v0  ;;  %4323 = vmax.xlane.f32.xlu1 %v4322_v42  ;;  %v13503_v42 = vld [vmem:[#allocation4_spill] sm:$0xff] }
 0x898   : > { %7916 = vmatpush1.bf16.xpose.msk.msra.mxu1 %vm11480_vm6, %v13175_v29  ;;  %v4415_v20 = vsel %vm4351_vm10, %v8551_v32, 256.0  ;;  %v4416_v13 = vsel %vm4352_vm11, %v8554_v17, 256.0  ;;  %v4489_v58 = vmin.f32 %v4413_v38, %v4414_v46 }
 0x899   : > { %v4273_v50 = vpop.xlane.xlu0 %4272  ;;  %v4492_v45 = vmin.f32 %v4415_v20, %v4416_v13  ;;  %v13504_v20 = vld [vmem:[#allocation5_spill] sm:$0xff] }
 0x89a   : > { %vm4353_vm12 = vcmp.ge.f32.partialorder %v11197_v7, %v4273_v50  ;;  %vm4354_vm13 = vcmp.ge.f32.partialorder %v11200_v51, %v4273_v50  ;;  %4490 = vmin.xlane.f32.xlu0 %v4489_v58 }
 0x89b   : > { %v4417_v40 = vsel %vm4353_vm12, %v8551_v32, 256.0  ;;  %v4418_v0 = vsel %vm4354_vm13, %v8554_v17, 256.0  ;;  %4493 = vmin.xlane.f32.xlu1 %v4492_v45 }
 0x89c   : > { %v4495_v62 = vmin.f32 %v4417_v40, %v4418_v0  ;;  %v4276_v41 = vpop.xlane.xlu1 %4275 }
 0x89d   : > { %vm4355_vm14 = vcmp.ge.f32.partialorder %v11208_v1, %v4276_v41  ;;  %vm4356_vm15 = vcmp.ge.f32.partialorder %v11211_v43, %v4276_v41 }
 0x89e   : > { %4496 = vmin.xlane.f32.xlu0 %v4495_v62  ;;  %v4419_v38 = vsel %vm4355_vm14, %v8551_v32, 256.0  ;;  %v4420_v46 = vsel %vm4356_vm15, %v8554_v17, 256.0 }
 0x89f   : > { %4154 = vmatmul.mubr.f32.vlgmr.msra.gmra.mrb[4].mxu1 %v13503_v42  ;;  %v4498_v13 = vmin.f32 %v4419_v38, %v4420_v46 }
 0x8a0   : > { %5457 = vmatprep.mubr.f32.mxu1 %v13504_v20 }
 0x8a1   : > { %v4279_v58 = vpop.xlane.xlu0 %4278  ;;  %4499 = vmin.xlane.f32.xlu1 %v4498_v13 }
 0x8a2   : > { %vm4357_vm1 = vcmp.ge.f32.partialorder %v11220_v15, %v4279_v58  ;;  %vm4358_vm2 = vcmp.ge.f32.partialorder %v11223_v49, %v4279_v58 }
 0x8a3   : > { %v4421_v50 = vsel %vm4357_vm1, %v8551_v32, 256.0  ;;  %v4422_v45 = vsel %vm4358_vm2, %v8554_v17, 256.0 }
 0x8a4   : > { %v4501_v40 = vmin.f32 %v4421_v50, %v4422_v45 }
 0x8a5   : > { %v4282_v41 = vpop.xlane.xlu1 %4281 }
 0x8a6   : > { %vm4359_vm3 = vcmp.ge.f32.partialorder %v11230_v3, %v4282_v41  ;;  %vm4360_vm4 = vcmp.ge.f32.partialorder %v11233_v9, %v4282_v41  ;;  %4502 = vmin.xlane.f32.xlu0 %v4501_v40  ;;  %v13505_v40 = vld [vmem:[#allocation9_spill] sm:$0xff] }
 0x8a7   : > { %v4423_v0 = vsel %vm4359_vm3, %v8551_v32, 256.0  ;;  %v4424_v62 = vsel %vm4360_vm4, %v8554_v17, 256.0 }
 0x8a8   : > { %v4504_v38 = vmin.f32 %v4423_v0, %v4424_v62 }
 0x8a9   : > { %v4285_v46 = vpop.xlane.xlu0 %4284 }
 0x8aa   : > { %vm4361_vm6 = vcmp.ge.f32.partialorder %v11242_v11, %v4285_v46  ;;  %vm4362_vm7 = vcmp.ge.f32.partialorder %v11245_v44, %v4285_v46  ;;  %4505 = vmin.xlane.f32.xlu1 %v4504_v38  ;;  %v13506_v38 = vld [vmem:[#allocation7_spill] sm:$0xff] }
 0x8ab   : > { %v4425_v13 = vsel %vm4361_vm6, %v8551_v32, 256.0  ;;  %v4426_v58 = vsel %vm4362_vm7, %v8554_v17, 256.0 }
 0x8ac   : > { %v4507_v50 = vmin.f32 %v4425_v13, %v4426_v58  ;;  %v13507_v13 = vld [vmem:[#allocation15_spill] sm:$0xff] }
 0x8ad   : > { %v4288_v45 = vpop.xlane.xlu1 %4287 }
 0x8ae   : > { %vm4363_vm8 = vcmp.ge.f32.partialorder %v11252_v4, %v4288_v45  ;;  %vm4364_vm9 = vcmp.ge.f32.partialorder %v13505_v40, %v4288_v45  ;;  %4508 = vmin.xlane.f32.xlu0 %v4507_v50 }
 0x8af   : > { %v4427_v41 = vsel %vm4363_vm8, %v8551_v32, 256.0  ;;  %v4428_v0 = vsel %vm4364_vm9, %v8554_v17, 256.0 }
 0x8b0   : > { %v4510_v62 = vmin.f32 %v4427_v41, %v4428_v0 }
 0x8b2   : > { %4511 = vmin.xlane.f32.xlu1 %v4510_v62 }
 0x8f2   : > { %v4455_v20 = vpop.xlane.xlu0 %4454 }
 0x8f3   : > { %vm4549_vm10 = vcmp.eq.f32.partialorder %v8551_v32, %v4455_v20  ;;  %vm4550_vm11 = vcmp.eq.f32.partialorder %v8554_v17, %v4455_v20 }
 0x8f4   : > { %v11535_v46 = vsel %vm4549_vm10, -inf, %v13506_v38  ;;  %v11540_v58 = vsel %vm4550_vm11, -inf, %v13507_v13  ;;  %v13511_v13 = vld [vmem:[#allocation24_spill] sm:$0xff] }
 0x8f5   : > { %13508 = vst [vmem:[#allocation19_spill] sm:$0xff] %v11540_v58  ;;  %v4881_v50 = vmax.f32 %v11535_v46, %v11540_v58 }
 0x8f6   : > { %v4291_v45 = vpop.xlane.xlu0 %4290 }
 0x8f7   : > { %vm4365_vm12 = vcmp.ge.f32.partialorder %v11273_v57, %v4291_v45  ;;  %vm4366_vm13 = vcmp.ge.f32.partialorder %v11278_v8, %v4291_v45  ;;  %v4458_v41 = vpop.xlane.xlu1 %4457  ;;  %4882 = vmax.xlane.f32.xlu0 %v4881_v50 }
 0x8f8   : > { %v4429_v0 = vsel %vm4365_vm12, %v8551_v32, 256.0  ;;  %v4430_v62 = vsel %vm4366_vm13, %v8554_v17, 256.0  ;;  %vm4551_vm14 = vcmp.eq.f32.partialorder %v8551_v32, %v4458_v41  ;;  %vm4552_vm15 = vcmp.eq.f32.partialorder %v8554_v17, %v4458_v41 }
 0x8f9   : > { %vm11550_vm1 = vmpackc.low %vm4551_vm14, %vm4549_vm10  ;;  %v11555_v42 = vsel %vm4551_vm14, -inf, %v13511_v13  ;;  %v11558_v57 = vsel %vm4552_vm15, -inf, %v13475_v35  ;;  %v4513_v45 = vmin.f32 %v4429_v0, %v4430_v62  ;;  %v13514_v0 = vld [vmem:[#allocation26_spill] sm:$0xff] }
 0x8fa   : > { %13512 = vst [vmem:[#allocation10_spill] sm:$0xff] %v11555_v42  ;;  %13513 = vst [vmem:[#allocation8_spill] sm:$0xff] %v11558_v57  ;;  %v4461_v50 = vpop.xlane.xlu0 %4460  ;;  %v4884_v8 = vmax.f32 %v11555_v42, %v11558_v57 }
 0x8fb   : > { %vm7917_vm2 = vmpackc.low %vm4552_vm15, %vm4550_vm11  ;;  %vm4553_vm3 = vcmp.eq.f32.partialorder %v8551_v32, %v4461_v50  ;;  %vm4554_vm4 = vcmp.eq.f32.partialorder %v8554_v17, %v4461_v50  ;;  %v4294_v41 = vpop.xlane.xlu1 %4293  ;;  %4514 = vmin.xlane.f32.xlu0 %v4513_v45  ;;  %v13519_v50 = vld [vmem:[#allocation13_spill] sm:$0xff] }
 0x8fc   : > { %7918 = vmatprep.subr.msk.bf16.mxu0 %vm7917_vm2, %v13175_v29  ;;  %v11570_v35 = vsel %vm4553_vm3, -inf, %v10981_v31  ;;  %v11575_v20 = vsel %vm4554_vm4, -inf, %v10986_v30  ;;  %vm4367_vm6 = vcmp.ge.f32.partialorder %v11299_v61, %v4294_v41  ;;  %vm4368_vm7 = vcmp.ge.f32.partialorder %v13514_v0, %v4294_v41  ;;  %4885 = vmax.xlane.f32.xlu1 %v4884_v8 }
 0x8fd   : > { %7920 = vmatpush1.bf16.xpose.msk.msra.mxu0 %vm11550_vm1, %v13175_v29  ;;  %v4431_v62 = vsel %vm4367_vm6, %v8551_v32, 256.0  ;;  %v4432_v13 = vsel %vm4368_vm7, %v8554_v17, 256.0  ;;  %v4887_v31 = vmax.f32 %v11570_v35, %v11575_v20 }
 0x8fe   : > { %v4297_v45 = vpop.xlane.xlu0 %4296  ;;  %v4516_v57 = vmin.f32 %v4431_v62, %v4432_v13 }
 0x8ff   : > { %vm4369_vm8 = vcmp.ge.f32.partialorder %v11314_v10, %v4297_v45  ;;  %vm4370_vm9 = vcmp.ge.f32.partialorder %v11319_v2, %v4297_v45  ;;  %v4464_v30 = vpop.xlane.xlu1 %4463  ;;  %4888 = vmax.xlane.f32.xlu0 %v4887_v31 }
 0x900   : > { %v4433_v41 = vsel %vm4369_vm8, %v8551_v32, 256.0  ;;  %v4434_v38 = vsel %vm4370_vm9, %v8554_v17, 256.0  ;;  %vm4555_vm10 = vcmp.eq.f32.partialorder %v8551_v32, %v4464_v30  ;;  %vm4556_vm11 = vcmp.eq.f32.partialorder %v8554_v17, %v4464_v30  ;;  %4517 = vmin.xlane.f32.xlu1 %v4516_v57 }
 0x901   : > { %vm11594_vm12 = vmpackc.low %vm4555_vm10, %vm4553_vm3  ;;  %v11599_v62 = vsel %vm4555_vm10, -inf, %v11010_v26  ;;  %v11602_v13 = vsel %vm4556_vm11, -inf, %v13479_v6  ;;  %v4519_v31 = vmin.f32 %v4433_v41, %v4434_v38  ;;  %v13520_v41 = vld [vmem:[#allocation30_spill] sm:$0xff] }
 0x902   : > { %13517 = vst [vmem:[#allocation31_spill] sm:$0xff] %v11599_v62  ;;  %13518 = vst [vmem:[#allocation22_spill] sm:$0xff] %v11602_v13  ;;  %v4467_v45 = vpop.xlane.xlu0 %4466  ;;  %v4890_v57 = vmax.f32 %v11599_v62, %v11602_v13 }
 0x903   : > { %vm7921_vm13 = vmpackc.low %vm4556_vm11, %vm4554_vm4  ;;  %vm4557_vm14 = vcmp.eq.f32.partialorder %v8551_v32, %v4467_v45  ;;  %vm4558_vm15 = vcmp.eq.f32.partialorder %v8554_v17, %v4467_v45  ;;  %v4300_v30 = vpop.xlane.xlu1 %4299  ;;  %4520 = vmin.xlane.f32.xlu0 %v4519_v31 }
 0x904   : > { %7922 = vmatprep.subr.msk.bf16.mxu0 %vm7921_vm13, %v13175_v29  ;;  %v11614_v26 = vsel %vm4557_vm14, -inf, %v11025_v21  ;;  %v11619_v6 = vsel %vm4558_vm15, -inf, %v11030_v5  ;;  %vm4371_vm1 = vcmp.ge.f32.partialorder %v13519_v50, %v4300_v30  ;;  %vm4372_vm2 = vcmp.ge.f32.partialorder %v13520_v41, %v4300_v30  ;;  %4891 = vmax.xlane.f32.xlu1 %v4890_v57 }
 0x905   : > { %7924 = vmatpush1.bf16.xpose.msk.msra.mxu0 %vm11594_vm12, %v13175_v29  ;;  %v4435_v38 = vsel %vm4371_vm1, %v8551_v32, 256.0  ;;  %v4436_v31 = vsel %vm4372_vm2, %v8554_v17, 256.0  ;;  %v4893_v21 = vmax.f32 %v11614_v26, %v11619_v6 }
 0x906   : > { %v4303_v13 = vpop.xlane.xlu0 %4302  ;;  %v4522_v62 = vmin.f32 %v4435_v38, %v4436_v31 }
 0x907   : > { %vm4373_vm3 = vcmp.ge.f32.partialorder %v11358_v28, %v4303_v13  ;;  %vm4374_vm4 = vcmp.ge.f32.partialorder %v11363_v55, %v4303_v13  ;;  %v4470_v5 = vpop.xlane.xlu1 %4469  ;;  %4894 = vmax.xlane.f32.xlu0 %v4893_v21 }
 0x908   : > { %v4437_v30 = vsel %vm4373_vm3, %v8551_v32, 256.0  ;;  %v4438_v8 = vsel %vm4374_vm4, %v8554_v17, 256.0  ;;  %vm4559_vm6 = vcmp.eq.f32.partialorder %v8551_v32, %v4470_v5  ;;  %vm4560_vm7 = vcmp.eq.f32.partialorder %v8554_v17, %v4470_v5  ;;  %4523 = vmin.xlane.f32.xlu1 %v4522_v62  ;;  %v13523_v62 = vld [vmem:[#allocation6_spill] sm:$0xff]  ;;  %v13524_v5 = vld [vmem:[#allocation11_spill] sm:$0xff] }
 0x909   : > { %vm7927_vm8 = vmpackc.low %vm4559_vm6, %vm4557_vm14  ;;  %v11639_v57 = vsel %vm4559_vm6, -inf, %v13484_v22  ;;  %v11642_v38 = vsel %vm4560_vm7, -inf, %v13485_v59  ;;  %v4525_v13 = vmin.f32 %v4437_v30, %v4438_v8 }
 0x90a   : > { %13521 = vst [vmem:[#allocation9_spill] sm:$0xff] %v11639_v57  ;;  %13522 = vst [vmem:[#allocation7_spill] sm:$0xff] %v11642_v38  ;;  %v4896_v31 = vmax.f32 %v11639_v57, %v11642_v38  ;;  %v13525_v38 = vld [vmem:[#allocation18_spill] sm:$0xff] }
 0x90b   : > { %vm7925_vm9 = vmpackc.low %vm4560_vm7, %vm4558_vm15  ;;  %4526 = vmin.xlane.f32.xlu0 %v4525_v13 }
 0x90c   : > { %7926 = vmatprep.subr.msk.bf16.mxu0 %vm7925_vm9, %v13175_v29  ;;  %v4306_v21 = vpop.xlane.xlu1 %4305  ;;  %4897 = vmax.xlane.f32.xlu1 %v4896_v31 }
 0x90d   : > { %vm4375_vm10 = vcmp.ge.f32.partialorder %v13523_v62, %v4306_v21  ;;  %vm4376_vm11 = vcmp.ge.f32.partialorder %v13524_v5, %v4306_v21  ;;  %7928 = vmatpush1.bf16.xpose.msk.msra.mxu0 %vm7927_vm8, %v13175_v29  ;;  %v13527_v62 = vld [vmem:[#allocation16_spill] sm:$0xff]  ;;  %v13531_v21 = vld [vmem:[#allocation27_spill] sm:$0xff] }
 0x90e   : > { %v4439_v22 = vsel %vm4375_vm10, %v8551_v32, 256.0  ;;  %v4440_v59 = vsel %vm4376_vm11, %v8554_v17, 256.0 }
 0x90f   : > { %v4473_v45 = vpop.xlane.xlu0 %4472  ;;  %v4528_v30 = vmin.f32 %v4439_v22, %v4440_v59  ;;  %v13533_v59 = vld [vmem:[#allocation28_spill] sm:$0xff] }
 0x910   : > { %vm4561_vm12 = vcmp.eq.f32.partialorder %v8551_v32, %v4473_v45  ;;  %vm4562_vm13 = vcmp.eq.f32.partialorder %v8554_v17, %v4473_v45  ;;  %v4476_v8 = vpop.xlane.xlu1 %4475 }
 0x911   : > { %v11657_v13 = vsel %vm4561_vm12, -inf, %v13525_v38  ;;  %v11660_v57 = vsel %vm4562_vm13, -inf, %v13527_v62  ;;  %vm4563_vm14 = vcmp.eq.f32.partialorder %v8551_v32, %v4476_v8  ;;  %vm4564_vm15 = vcmp.eq.f32.partialorder %v8554_v17, %v4476_v8  ;;  %4529 = vmin.xlane.f32.xlu1 %v4528_v30 }
 0x912   : > { %13526 = vst [vmem:[#allocation15_spill] sm:$0xff] %v11657_v13  ;;  %13528 = vst [vmem:[#allocation24_spill] sm:$0xff] %v11660_v57  ;;  %v11669_v22 = vsel %vm4563_vm14, -inf, %v13531_v21  ;;  %v11672_v45 = vsel %vm4564_vm15, -inf, %v13533_v59  ;;  %v4899_v38 = vmax.f32 %v11657_v13, %v11660_v57 }
 0x913   : > { %vm11664_vm1 = vmpackc.low %vm4563_vm14, %vm4561_vm12  ;;  %13532 = vst [vmem:[#allocation26_spill] sm:$0xff] %v11669_v22  ;;  %v4309_v62 = vpop.xlane.xlu0 %4308  ;;  %v4902_v5 = vmax.f32 %v11669_v22, %v11672_v45 }
 0x914   : > { %13534 = vst [vmem:[#allocation13_spill] sm:$0xff] %v11672_v45  ;;  %vm7929_vm2 = vmpackc.low %vm4564_vm15, %vm4562_vm13  ;;  %vm4377_vm3 = vcmp.ge.f32.partialorder %v11401_v53, %v4309_v62  ;;  %vm4378_vm4 = vcmp.ge.f32.partialorder %v11404_v37, %v4309_v62  ;;  %v4312_v30 = vpop.xlane.xlu1 %4311  ;;  %4900 = vmax.xlane.f32.xlu0 %v4899_v38 }
 0x915   : > { %7930 = vmatprep.subr.msk.bf16.mxu0 %vm7929_vm2, %v13175_v29  ;;  %v4441_v8 = vsel %vm4377_vm3, %v8551_v32, 256.0  ;;  %v4442_v21 = vsel %vm4378_vm4, %v8554_v17, 256.0  ;;  %vm4379_vm6 = vcmp.ge.f32.partialorder %v11413_v23, %v4312_v30  ;;  %vm4380_vm7 = vcmp.ge.f32.partialorder %v11416_v36, %v4312_v30  ;;  %4903 = vmax.xlane.f32.xlu1 %v4902_v5 }
 0x916   : > { %7932 = vmatpush1.bf16.xpose.msk.msra.mxu0 %vm11664_vm1, %v13175_v29  ;;  %v4443_v59 = vsel %vm4379_vm6, %v8551_v32, 256.0  ;;  %v4444_v53 = vsel %vm4380_vm7, %v8554_v17, 256.0  ;;  %v4531_v62 = vmin.f32 %v4441_v8, %v4442_v21 }
 0x917   : > { %v4479_v37 = vpop.xlane.xlu0 %4478  ;;  %v4534_v38 = vmin.f32 %v4443_v59, %v4444_v53 }
 0x918   : > { %vm4565_vm8 = vcmp.eq.f32.partialorder %v8551_v32, %v4479_v37  ;;  %vm4566_vm9 = vcmp.eq.f32.partialorder %v8554_v17, %v4479_v37  ;;  %v4482_v45 = vpop.xlane.xlu1 %4481  ;;  %4532 = vmin.xlane.f32.xlu0 %v4531_v62  ;;  %v13537_v37 = vld [vmem:[#allocation29_spill] sm:$0xff] }
 0x919   : > { %v11693_v30 = vsel %vm4565_vm8, -inf, %v11104_v16  ;;  %v11696_v31 = vsel %vm4566_vm9, -inf, %v11107_v19  ;;  %vm4567_vm10 = vcmp.eq.f32.partialorder %v8551_v32, %v4482_v45  ;;  %vm4568_vm11 = vcmp.eq.f32.partialorder %v8554_v17, %v4482_v45  ;;  %4535 = vmin.xlane.f32.xlu1 %v4534_v38 }
 0x91a   : > { %vm11700_vm12 = vmpackc.low %vm4567_vm10, %vm4565_vm8  ;;  %v11705_v53 = vsel %vm4567_vm10, -inf, %v11116_v18  ;;  %v11708_v8 = vsel %vm4568_vm11, -inf, %v13537_v37  ;;  %v4905_v16 = vmax.f32 %v11693_v30, %v11696_v31 }
 0x91b   : > { %13538 = vst [vmem:[#allocation30_spill] sm:$0xff] %v11708_v8  ;;  %vm7933_vm13 = vmpackc.low %vm4568_vm11, %vm4566_vm9  ;;  %v4315_v19 = vpop.xlane.xlu0 %4314  ;;  %v4908_v21 = vmax.f32 %v11705_v53, %v11708_v8 }
 0x91c   : > { %7934 = vmatprep.subr.msk.bf16.mxu0 %vm7933_vm13, %v13175_v29  ;;  %vm4381_vm14 = vcmp.ge.f32.partialorder %v11437_v54, %v4315_v19  ;;  %vm4382_vm15 = vcmp.ge.f32.partialorder %v11440_v56, %v4315_v19  ;;  %v4318_v45 = vpop.xlane.xlu1 %4317  ;;  %4906 = vmax.xlane.f32.xlu0 %v4905_v16 }
 0x91d   : > { %v4445_v18 = vsel %vm4381_vm14, %v8551_v32, 256.0  ;;  %v4446_v59 = vsel %vm4382_vm15, %v8554_v17, 256.0  ;;  %vm4383_vm1 = vcmp.ge.f32.partialorder %v11449_v33, %v4318_v45  ;;  %vm4384_vm2 = vcmp.ge.f32.partialorder %v11452_v60, %v4318_v45  ;;  %4909 = vmax.xlane.f32.xlu1 %v4908_v21 }
 0x91e   : > { %7936 = vmatpush1.bf16.xpose.msk.msra.mxu0 %vm11700_vm12, %v13175_v29  ;;  %v4447_v62 = vsel %vm4383_vm1, %v8551_v32, 256.0  ;;  %v4448_v38 = vsel %vm4384_vm2, %v8554_v17, 256.0  ;;  %v4537_v37 = vmin.f32 %v4445_v18, %v4446_v59 }
 0x91f   : > { %v4485_v19 = vpop.xlane.xlu0 %4484  ;;  %v4540_v16 = vmin.f32 %v4447_v62, %v4448_v38 }
 0x920   : > { %vm4569_vm3 = vcmp.eq.f32.partialorder %v8551_v32, %v4485_v19  ;;  %vm4570_vm4 = vcmp.eq.f32.partialorder %v8554_v17, %v4485_v19  ;;  %v4488_v56 = vpop.xlane.xlu1 %4487  ;;  %4538 = vmin.xlane.f32.xlu0 %v4537_v37 }
 0x921   : > { %v11729_v45 = vsel %vm4569_vm3, -inf, %v11140_v25  ;;  %v11732_v5 = vsel %vm4570_vm4, -inf, %v11143_v63  ;;  %vm4571_vm6 = vcmp.eq.f32.partialorder %v8551_v32, %v4488_v56  ;;  %vm4572_vm7 = vcmp.eq.f32.partialorder %v8554_v17, %v4488_v56  ;;  %4541 = vmin.xlane.f32.xlu1 %v4540_v16 }
 0x922   : > { %vm11736_vm8 = vmpackc.low %vm4571_vm6, %vm4569_vm3  ;;  %v11741_v18 = vsel %vm4571_vm6, -inf, %v11152_v24  ;;  %v11744_v59 = vsel %vm4572_vm7, -inf, %v11155_v12  ;;  %v4911_v25 = vmax.f32 %v11729_v45, %v11732_v5 }
 0x923   : > { %vm7937_vm9 = vmpackc.low %vm4572_vm7, %vm4570_vm4  ;;  %v4321_v63 = vpop.xlane.xlu0 %4320  ;;  %v4914_v62 = vmax.f32 %v11741_v18, %v11744_v59 }
 0x924   : > { %7938 = vmatprep.subr.msk.bf16.mxu0 %vm7937_vm9, %v13175_v29  ;;  %vm4385_vm10 = vcmp.ge.f32.partialorder %v11473_v39, %v4321_v63  ;;  %vm4386_vm11 = vcmp.ge.f32.partialorder %v11476_v47, %v4321_v63  ;;  %v4324_v56 = vpop.xlane.xlu1 %4323  ;;  %4912 = vmax.xlane.f32.xlu0 %v4911_v25 }
 0x925   : > { %v4449_v24 = vsel %vm4385_vm10, %v8551_v32, 256.0  ;;  %v4450_v12 = vsel %vm4386_vm11, %v8554_v17, 256.0  ;;  %vm4387_vm12 = vcmp.ge.f32.partialorder %v11485_v34, %v4324_v56  ;;  %vm4388_vm13 = vcmp.ge.f32.partialorder %v11488_v52, %v4324_v56  ;;  %4915 = vmax.xlane.f32.xlu1 %v4914_v62 }
 0x926   : > { %7940 = vmatpush1.bf16.xpose.msk.msra.mxu0 %vm11736_vm8, %v13175_v29  ;;  %v4451_v38 = vsel %vm4387_vm12, %v8551_v32, 256.0  ;;  %v4452_v37 = vsel %vm4388_vm13, %v8554_v17, 256.0  ;;  %v4543_v19 = vmin.f32 %v4449_v24, %v4450_v12  ;;  %v13541_v24 = vld [vmem:[#allocation20_spill] sm:$0xff] }
 0x927   : > { %v4491_v16 = vpop.xlane.xlu0 %4490  ;;  %v4546_v25 = vmin.f32 %v4451_v38, %v4452_v37 }
 0x928   : > { %vm4573_vm14 = vcmp.eq.f32.partialorder %v8551_v32, %v4491_v16  ;;  %vm4574_vm15 = vcmp.eq.f32.partialorder %v8554_v17, %v4491_v16  ;;  %v4494_v63 = vpop.xlane.xlu1 %4493  ;;  %4544 = vmin.xlane.f32.xlu0 %v4543_v19 }
 0x929   : > { %v11765_v56 = vsel %vm4573_vm14, -inf, %v11176_v14  ;;  %v11768_v21 = vsel %vm4574_vm15, -inf, %v11179_v48  ;;  %vm4575_vm1 = vcmp.eq.f32.partialorder %v8551_v32, %v4494_v63  ;;  %vm4576_vm2 = vcmp.eq.f32.partialorder %v8554_v17, %v4494_v63  ;;  %4547 = vmin.xlane.f32.xlu1 %v4546_v25 }
 0x92a   : > { %vm7943_vm3 = vmpackc.low %vm4575_vm1, %vm4573_vm14  ;;  %v11773_v62 = vsel %vm4575_vm1, -inf, %v11184_v27  ;;  %v11776_v12 = vsel %vm4576_vm2, -inf, %v13541_v24  ;;  %v4917_v38 = vmax.f32 %v11765_v56, %v11768_v21 }
 0x92b   : > { %13542 = vst [vmem:[#allocation18_spill] sm:$0xff] %v11776_v12  ;;  %vm7941_vm4 = vmpackc.low %vm4576_vm2, %vm4574_vm15  ;;  %v4497_v14 = vpop.xlane.xlu0 %4496  ;;  %v4920_v48 = vmax.f32 %v11773_v62, %v11776_v12 }
 0x92c   : > { %7942 = vmatprep.subr.msk.bf16.mxu0 %vm7941_vm4, %v13175_v29  ;;  %vm4577_vm6 = vcmp.eq.f32.partialorder %v8551_v32, %v4497_v14  ;;  %vm4578_vm7 = vcmp.eq.f32.partialorder %v8554_v17, %v4497_v14  ;;  %4918 = vmax.xlane.f32.xlu0 %v4917_v38 }
 0x92d   : > { %v11786_v27 = vsel %vm4577_vm6, -inf, %v11197_v7  ;;  %v11789_v37 = vsel %vm4578_vm7, -inf, %v11200_v51  ;;  %4921 = vmax.xlane.f32.xlu1 %v4920_v48 }
 0x92e   : > { %7944 = vmatpush1.bf16.xpose.msk.msra.mxu0 %vm7943_vm3, %v13175_v29  ;;  %v4923_v19 = vmax.f32 %v11786_v27, %v11789_v37  ;;  %v4500_v16 = vpop.xlane.xlu1 %4499 }
 0x92f   : > { %vm4579_vm8 = vcmp.eq.f32.partialorder %v8551_v32, %v4500_v16  ;;  %vm4580_vm9 = vcmp.eq.f32.partialorder %v8554_v17, %v4500_v16 }
 0x930   : > { %4924 = vmax.xlane.f32.xlu0 %v4923_v19  ;;  %vm7947_vm10 = vmpackc.low %vm4579_vm8, %vm4577_vm6  ;;  %v11797_v25 = vsel %vm4579_vm8, -inf, %v11208_v1  ;;  %v11800_v7 = vsel %vm4580_vm9, -inf, %v11211_v43 }
 0x931   : > { %vm7945_vm11 = vmpackc.low %vm4580_vm9, %vm4578_vm7  ;;  %v4926_v51 = vmax.f32 %v11797_v25, %v11800_v7 }
 0x932   : > { %7946 = vmatprep.subr.msk.bf16.mxu0 %vm7945_vm11, %v13175_v29 }
 0x933   : > { %v4503_v63 = vpop.xlane.xlu0 %4502  ;;  %4927 = vmax.xlane.f32.xlu1 %v4926_v51 }
 0x934   : > { %vm4581_vm12 = vcmp.eq.f32.partialorder %v8551_v32, %v4503_v63  ;;  %vm4582_vm13 = vcmp.eq.f32.partialorder %v8554_v17, %v4503_v63 }
 0x935   : > { %v11809_v1 = vsel %vm4581_vm12, -inf, %v11220_v15  ;;  %v11812_v43 = vsel %vm4582_vm13, -inf, %v11223_v49 }
 0x936   : > { %7948 = vmatpush1.bf16.xpose.msk.msra.mxu0 %vm7947_vm10, %v13175_v29  ;;  %v4929_v24 = vmax.f32 %v11809_v1, %v11812_v43 }
 0x937   : > { %v4506_v38 = vpop.xlane.xlu1 %4505 }
 0x938   : > { %vm4583_vm14 = vcmp.eq.f32.partialorder %v8551_v32, %v4506_v38  ;;  %vm4584_vm15 = vcmp.eq.f32.partialorder %v8554_v17, %v4506_v38  ;;  %4930 = vmax.xlane.f32.xlu0 %v4929_v24 }
 0x939   : > { %vm7951_vm1 = vmpackc.low %vm4583_vm14, %vm4581_vm12  ;;  %v11819_v14 = vsel %vm4583_vm14, -inf, %v11230_v3  ;;  %v11822_v48 = vsel %vm4584_vm15, -inf, %v11233_v9 }
 0x93a   : > { %vm7949_vm2 = vmpackc.low %vm4584_vm15, %vm4582_vm13  ;;  %v4932_v15 = vmax.f32 %v11819_v14, %v11822_v48 }
 0x93b   : > { %7950 = vmatprep.subr.msk.bf16.mxu0 %vm7949_vm2, %v13175_v29  ;;  %v4509_v49 = vpop.xlane.xlu0 %4508 }
 0x93c   : > { %vm4585_vm3 = vcmp.eq.f32.partialorder %v8551_v32, %v4509_v49  ;;  %vm4586_vm4 = vcmp.eq.f32.partialorder %v8554_v17, %v4509_v49  ;;  %4933 = vmax.xlane.f32.xlu1 %v4932_v15  ;;  %v13544_v15 = vld [vmem:[#allocation23_spill] sm:$0xff] }
 0x93d   : > { %v11831_v3 = vsel %vm4585_vm3, -inf, %v11242_v11  ;;  %v11834_v9 = vsel %vm4586_vm4, -inf, %v11245_v44 }
 0x93e   : > { %7952 = vmatpush1.bf16.xpose.msk.msra.mxu0 %vm7951_vm1, %v13175_v29  ;;  %v4935_v19 = vmax.f32 %v11831_v3, %v11834_v9 }
 0x93f   : > { %v4512_v16 = vpop.xlane.xlu1 %4511 }
 0x940   : > { %vm4587_vm6 = vcmp.eq.f32.partialorder %v8551_v32, %v4512_v16  ;;  %vm4588_vm7 = vcmp.eq.f32.partialorder %v8554_v17, %v4512_v16  ;;  %4936 = vmax.xlane.f32.xlu0 %v4935_v19 }
 0x941   : > { %vm7955_vm8 = vmpackc.low %vm4587_vm6, %vm4585_vm3  ;;  %v11841_v51 = vsel %vm4587_vm6, -inf, %v11252_v4  ;;  %v11844_v63 = vsel %vm4588_vm7, -inf, %v13505_v40 }
 0x942   : > { %13543 = vst [vmem:[#allocation16_spill] sm:$0xff] %v11844_v63  ;;  %vm7953_vm9 = vmpackc.low %vm4588_vm7, %vm4586_vm4  ;;  %v4938_v11 = vmax.f32 %v11841_v51, %v11844_v63 }
 0x943   : > { %7954 = vmatprep.subr.msk.bf16.mxu0 %vm7953_vm9, %v13175_v29 }
 0x944   : > { %4939 = vmax.xlane.f32.xlu1 %v4938_v11 }
 0x946   : > { %7956 = vmatpush1.bf16.xpose.msk.msra.mxu0 %vm7955_vm8, %v13175_v29 }
 0x972   : > { %v4155_v44 = vpop.f32.mrb[4].mxu1 }
 0x973   : > { %v4157_v24 = vpop.f32.mrb[5].mxu1 }
 0x974   : > { %v4162_v38 = vcombine.low %v4155_v44, %v4157_v24  ;;  %v13546_v44 = vld [vmem:[#allocation21_spill] sm:$0xff] }
 0x976   : > { %v11851_v49 = vmax.f32 %v13544_v15, %v4162_v38  ;;  %v13547_v38 = vld [vmem:[#allocation12_spill] sm:$0xff] }
 0x978   : > { %13545 = vst [vmem:[#allocation27_spill] sm:$0xff] %v11851_v49 }
 0x984   : > { %v4883_v4 = vpop.xlane.xlu0 %4882 }
 0x985   : > { %vm4977_vm10 = vcmp.ge.f32.partialorder %v11535_v46, %v4883_v4  ;;  %vm4978_vm11 = vcmp.ge.f32.partialorder %v11540_v58, %v4883_v4  ;;  %v13549_v4 = vld [vmem:[#allocation8_spill] sm:$0xff] }
 0x986   : > { %v5041_v40 = vsel %vm4977_vm10, %v8551_v32, 256.0  ;;  %v5042_v19 = vsel %vm4978_vm11, %v8554_v17, 256.0 }
 0x987   : > { %v5105_v16 = vmin.f32 %v5041_v40, %v5042_v19 }
 0x988   : > { %v4515_v63 = vpop.xlane.xlu0 %4514 }
 0x989   : > { %vm4589_vm12 = vcmp.eq.f32.partialorder %v8551_v32, %v4515_v63  ;;  %vm4590_vm13 = vcmp.eq.f32.partialorder %v8554_v17, %v4515_v63  ;;  %v4886_v11 = vpop.xlane.xlu1 %4885  ;;  %5106 = vmin.xlane.f32.xlu0 %v5105_v16  ;;  %v13555_v63 = vld [vmem:[#allocation22_spill] sm:$0xff] }
 0x98a   : > { %v11862_v24 = vsel %vm4589_vm12, -inf, %v13546_v44  ;;  %v11867_v15 = vsel %vm4590_vm13, -inf, %v13547_v38  ;;  %vm4979_vm14 = vcmp.ge.f32.partialorder %v11555_v42, %v4886_v11  ;;  %vm4980_vm15 = vcmp.ge.f32.partialorder %v13549_v4, %v4886_v11 }
 0x98b   : > { %13548 = vst [vmem:[#allocation28_spill] sm:$0xff] %v11867_v15  ;;  %v5043_v40 = vsel %vm4979_vm14, %v8551_v32, 256.0  ;;  %v5044_v19 = vsel %vm4980_vm15, %v8554_v17, 256.0  ;;  %v4941_v16 = vmax.f32 %v11862_v24, %v11867_v15 }
 0x98c   : > { %v4889_v49 = vpop.xlane.xlu0 %4888  ;;  %v5108_v58 = vmin.f32 %v5043_v40, %v5044_v19 }
 0x98d   : > { %vm4981_vm1 = vcmp.ge.f32.partialorder %v11570_v35, %v4889_v49  ;;  %vm4982_vm2 = vcmp.ge.f32.partialorder %v11575_v20, %v4889_v49  ;;  %v4518_v44 = vpop.xlane.xlu1 %4517  ;;  %4942 = vmax.xlane.f32.xlu0 %v4941_v16 }
 0x98e   : > { %v5045_v38 = vsel %vm4981_vm1, %v8551_v32, 256.0  ;;  %v5046_v42 = vsel %vm4982_vm2, %v8554_v17, 256.0  ;;  %vm4591_vm3 = vcmp.eq.f32.partialorder %v8551_v32, %v4518_v44  ;;  %vm4592_vm4 = vcmp.eq.f32.partialorder %v8554_v17, %v4518_v44  ;;  %5109 = vmin.xlane.f32.xlu1 %v5108_v58 }
 0x98f   : > { %vm11883_vm6 = vmpackc.low %vm4591_vm3, %vm4589_vm12  ;;  %v11888_v40 = vsel %vm4591_vm3, -inf, %v11299_v61  ;;  %v11891_v49 = vsel %vm4592_vm4, -inf, %v13514_v0  ;;  %v5111_v19 = vmin.f32 %v5045_v38, %v5046_v42  ;;  %v13554_v0 = vld [vmem:[#allocation31_spill] sm:$0xff] }
 0x990   : > { %13552 = vst [vmem:[#allocation29_spill] sm:$0xff] %v11888_v40  ;;  %13553 = vst [vmem:[#allocation20_spill] sm:$0xff] %v11891_v49  ;;  %v4521_v16 = vpop.xlane.xlu0 %4520  ;;  %v4944_v58 = vmax.f32 %v11888_v40, %v11891_v49 }
 0x991   : > { %vm7957_vm7 = vmpackc.low %vm4592_vm4, %vm4590_vm13  ;;  %vm4593_vm8 = vcmp.eq.f32.partialorder %v8551_v32, %v4521_v16  ;;  %vm4594_vm9 = vcmp.eq.f32.partialorder %v8554_v17, %v4521_v16  ;;  %v4892_v44 = vpop.xlane.xlu1 %4891  ;;  %5112 = vmin.xlane.f32.xlu0 %v5111_v19  ;;  %v13560_v16 = vld [vmem:[#allocation9_spill] sm:$0xff] }
 0x992   : > { %7958 = vmatprep.subr.msk.bf16.mxu0 %vm7957_vm7, %v13175_v29  ;;  %v11903_v61 = vsel %vm4593_vm8, -inf, %v11314_v10  ;;  %v11908_v42 = vsel %vm4594_vm9, -inf, %v11319_v2  ;;  %vm4983_vm10 = vcmp.ge.f32.partialorder %v13554_v0, %v4892_v44  ;;  %vm4984_vm11 = vcmp.ge.f32.partialorder %v13555_v63, %v4892_v44  ;;  %4945 = vmax.xlane.f32.xlu1 %v4944_v58 }
 0x993   : > { %7960 = vmatpush1.bf16.xpose.msk.msra.mxu0 %vm11883_vm6, %v13175_v29  ;;  %v5047_v38 = vsel %vm4983_vm10, %v8551_v32, 256.0  ;;  %v5048_v19 = vsel %vm4984_vm11, %v8554_v17, 256.0  ;;  %v4947_v10 = vmax.f32 %v11903_v61, %v11908_v42 }
 0x994   : > { %v4895_v49 = vpop.xlane.xlu0 %4894  ;;  %v5114_v40 = vmin.f32 %v5047_v38, %v5048_v19 }
 0x995   : > { %vm4985_vm12 = vcmp.ge.f32.partialorder %v11614_v26, %v4895_v49  ;;  %vm4986_vm13 = vcmp.ge.f32.partialorder %v11619_v6, %v4895_v49  ;;  %v4524_v2 = vpop.xlane.xlu1 %4523  ;;  %4948 = vmax.xlane.f32.xlu0 %v4947_v10 }
 0x996   : > { %v5049_v44 = vsel %vm4985_vm12, %v8551_v32, 256.0  ;;  %v5050_v11 = vsel %vm4986_vm13, %v8554_v17, 256.0  ;;  %vm4595_vm14 = vcmp.eq.f32.partialorder %v8551_v32, %v4524_v2  ;;  %vm4596_vm15 = vcmp.eq.f32.partialorder %v8554_v17, %v4524_v2  ;;  %5115 = vmin.xlane.f32.xlu1 %v5114_v40 }
 0x997   : > { %vm11927_vm1 = vmpackc.low %vm4595_vm14, %vm4593_vm8  ;;  %v11932_v38 = vsel %vm4595_vm14, -inf, %v13519_v50  ;;  %v11935_v49 = vsel %vm4596_vm15, -inf, %v13520_v41  ;;  %v5117_v19 = vmin.f32 %v5049_v44, %v5050_v11  ;;  %v13561_v44 = vld [vmem:[#allocation7_spill] sm:$0xff] }
 0x998   : > { %13558 = vst [vmem:[#allocation23_spill] sm:$0xff] %v11932_v38  ;;  %13559 = vst [vmem:[#allocation21_spill] sm:$0xff] %v11935_v49  ;;  %v4527_v10 = vpop.xlane.xlu0 %4526  ;;  %v4950_v40 = vmax.f32 %v11932_v38, %v11935_v49 }
 0x999   : > { %vm7961_vm2 = vmpackc.low %vm4596_vm15, %vm4594_vm9  ;;  %vm4597_vm3 = vcmp.eq.f32.partialorder %v8551_v32, %v4527_v10  ;;  %vm4598_vm4 = vcmp.eq.f32.partialorder %v8554_v17, %v4527_v10  ;;  %v4898_v2 = vpop.xlane.xlu1 %4897  ;;  %5118 = vmin.xlane.f32.xlu0 %v5117_v19 }
 0x99a   : > { %7962 = vmatprep.subr.msk.bf16.mxu0 %vm7961_vm2, %v13175_v29  ;;  %v11947_v50 = vsel %vm4597_vm3, -inf, %v11358_v28  ;;  %v11952_v41 = vsel %vm4598_vm4, -inf, %v11363_v55  ;;  %vm4987_vm6 = vcmp.ge.f32.partialorder %v13560_v16, %v4898_v2  ;;  %vm4988_vm7 = vcmp.ge.f32.partialorder %v13561_v44, %v4898_v2  ;;  %4951 = vmax.xlane.f32.xlu1 %v4950_v40  ;;  %v13562_v55 = vld [vmem:[#allocation6_spill] sm:$0xff]  ;;  %v13564_v40 = vld [vmem:[#allocation11_spill] sm:$0xff] }
 0x99b   : > { %7964 = vmatpush1.bf16.xpose.msk.msra.mxu0 %vm11927_vm1, %v13175_v29  ;;  %v5051_v11 = vsel %vm4987_vm6, %v8551_v32, 256.0  ;;  %v5052_v19 = vsel %vm4988_vm7, %v8554_v17, 256.0  ;;  %v4953_v28 = vmax.f32 %v11947_v50, %v11952_v41 }
 0x99c   : > { %v5120_v49 = vmin.f32 %v5051_v11, %v5052_v19 }
 0x99d   : > { %4954 = vmax.xlane.f32.xlu0 %v4953_v28 }
 0x99e   : > { %v4530_v38 = vpop.xlane.xlu1 %4529  ;;  %5121 = vmin.xlane.f32.xlu1 %v5120_v49 }
 0x99f   : > { %vm4599_vm8 = vcmp.eq.f32.partialorder %v8551_v32, %v4530_v38  ;;  %vm4600_vm9 = vcmp.eq.f32.partialorder %v8554_v17, %v4530_v38 }
 0x9a0   : > { %vm7967_vm10 = vmpackc.low %vm4599_vm8, %vm4597_vm3  ;;  %v11968_v58 = vsel %vm4599_vm8, -inf, %v13562_v55  ;;  %v11971_v2 = vsel %vm4600_vm9, -inf, %v13564_v40  ;;  %v13566_v55 = vld [vmem:[#allocation13_spill] sm:$0xff] }
 0x9a1   : > { %13563 = vst [vmem:[#allocation12_spill] sm:$0xff] %v11968_v58  ;;  %13565 = vst [vmem:[#allocation8_spill] sm:$0xff] %v11971_v2  ;;  %v4901_v11 = vpop.xlane.xlu0 %4900  ;;  %v4956_v19 = vmax.f32 %v11968_v58, %v11971_v2 }
 0x9a2   : > { %vm7965_vm11 = vmpackc.low %vm4600_vm9, %vm4598_vm4  ;;  %vm4989_vm12 = vcmp.ge.f32.partialorder %v11657_v13, %v4901_v11  ;;  %vm4990_vm13 = vcmp.ge.f32.partialorder %v11660_v57, %v4901_v11  ;;  %v4904_v38 = vpop.xlane.xlu1 %4903  ;;  %v13567_v57 = vld [vmem:[#allocation25_spill] sm:$0xff] }
 0x9a3   : > { %7966 = vmatprep.subr.msk.bf16.mxu0 %vm7965_vm11, %v13175_v29  ;;  %v5053_v49 = vsel %vm4989_vm12, %v8551_v32, 256.0  ;;  %v5054_v28 = vsel %vm4990_vm13, %v8554_v17, 256.0  ;;  %vm4991_vm14 = vcmp.ge.f32.partialorder %v11669_v22, %v4904_v38  ;;  %vm4992_vm15 = vcmp.ge.f32.partialorder %v13566_v55, %v4904_v38  ;;  %4957 = vmax.xlane.f32.xlu1 %v4956_v19  ;;  %v13569_v38 = vld [vmem:[#allocation14_spill] sm:$0xff] }
 0x9a4   : > { %7968 = vmatpush1.bf16.xpose.msk.msra.mxu0 %vm7967_vm10, %v13175_v29  ;;  %v5055_v10 = vsel %vm4991_vm14, %v8551_v32, 256.0  ;;  %v5056_v40 = vsel %vm4992_vm15, %v8554_v17, 256.0  ;;  %v5123_v2 = vmin.f32 %v5053_v49, %v5054_v28 }
 0x9a5   : > { %v4533_v13 = vpop.xlane.xlu0 %4532  ;;  %v5126_v58 = vmin.f32 %v5055_v10, %v5056_v40 }
 0x9a6   : > { %vm4601_vm1 = vcmp.eq.f32.partialorder %v8551_v32, %v4533_v13  ;;  %vm4602_vm2 = vcmp.eq.f32.partialorder %v8554_v17, %v4533_v13  ;;  %v4536_v11 = vpop.xlane.xlu1 %4535  ;;  %5124 = vmin.xlane.f32.xlu0 %v5123_v2 }
 0x9a7   : > { %v11990_v22 = vsel %vm4601_vm1, -inf, %v13567_v57  ;;  %v11993_v55 = vsel %vm4602_vm2, -inf, %v13569_v38  ;;  %vm4603_vm3 = vcmp.eq.f32.partialorder %v8551_v32, %v4536_v11  ;;  %vm4604_vm4 = vcmp.eq.f32.partialorder %v8554_v17, %v4536_v11  ;;  %5127 = vmin.xlane.f32.xlu1 %v5126_v58 }
 0x9a8   : > { %13568 = vst [vmem:[#allocation31_spill] sm:$0xff] %v11990_v22  ;;  %13570 = vst [vmem:[#allocation22_spill] sm:$0xff] %v11993_v55  ;;  %v12002_v49 = vsel %vm4603_vm3, -inf, %v11413_v23  ;;  %v12005_v13 = vsel %vm4604_vm4, -inf, %v11416_v36  ;;  %v4959_v57 = vmax.f32 %v11990_v22, %v11993_v55 }
 0x9a9   : > { %vm11997_vm6 = vmpackc.low %vm4603_vm3, %vm4601_vm1  ;;  %v4907_v2 = vpop.xlane.xlu0 %4906  ;;  %v4962_v28 = vmax.f32 %v12002_v49, %v12005_v13 }
 0x9aa   : > { %vm7969_vm7 = vmpackc.low %vm4604_vm4, %vm4602_vm2  ;;  %vm4993_vm8 = vcmp.ge.f32.partialorder %v11693_v30, %v4907_v2  ;;  %vm4994_vm9 = vcmp.ge.f32.partialorder %v11696_v31, %v4907_v2  ;;  %v4910_v58 = vpop.xlane.xlu1 %4909  ;;  %4960 = vmax.xlane.f32.xlu0 %v4959_v57 }
 0x9ab   : > { %7970 = vmatprep.subr.msk.bf16.mxu0 %vm7969_vm7, %v13175_v29  ;;  %v5057_v23 = vsel %vm4993_vm8, %v8551_v32, 256.0  ;;  %v5058_v36 = vsel %vm4994_vm9, %v8554_v17, 256.0  ;;  %vm4995_vm10 = vcmp.ge.f32.partialorder %v11705_v53, %v4910_v58  ;;  %vm4996_vm11 = vcmp.ge.f32.partialorder %v11708_v8, %v4910_v58  ;;  %4963 = vmax.xlane.f32.xlu1 %v4962_v28  ;;  %v13573_v8 = vld [vmem:[#allocation17_spill] sm:$0xff] }
 0x9ac   : > { %7972 = vmatpush1.bf16.xpose.msk.msra.mxu0 %vm11997_vm6, %v13175_v29  ;;  %v5059_v10 = vsel %vm4995_vm10, %v8551_v32, 256.0  ;;  %v5060_v40 = vsel %vm4996_vm11, %v8554_v17, 256.0  ;;  %v5129_v11 = vmin.f32 %v5057_v23, %v5058_v36 }
 0x9ad   : > { %v4539_v38 = vpop.xlane.xlu0 %4538  ;;  %v5132_v57 = vmin.f32 %v5059_v10, %v5060_v40 }
 0x9ae   : > { %vm4605_vm12 = vcmp.eq.f32.partialorder %v8551_v32, %v4539_v38  ;;  %vm4606_vm13 = vcmp.eq.f32.partialorder %v8554_v17, %v4539_v38  ;;  %v4542_v2 = vpop.xlane.xlu1 %4541  ;;  %5130 = vmin.xlane.f32.xlu0 %v5129_v11 }
 0x9af   : > { %v12026_v58 = vsel %vm4605_vm12, -inf, %v11437_v54  ;;  %v12029_v19 = vsel %vm4606_vm13, -inf, %v13573_v8  ;;  %vm4607_vm14 = vcmp.eq.f32.partialorder %v8551_v32, %v4542_v2  ;;  %vm4608_vm15 = vcmp.eq.f32.partialorder %v8554_v17, %v4542_v2  ;;  %5133 = vmin.xlane.f32.xlu1 %v5132_v57 }
 0x9b0   : > { %vm12033_vm1 = vmpackc.low %vm4607_vm14, %vm4605_vm12  ;;  %v12038_v23 = vsel %vm4607_vm14, -inf, %v11449_v33  ;;  %v12041_v36 = vsel %vm4608_vm15, -inf, %v11452_v60  ;;  %v4965_v54 = vmax.f32 %v12026_v58, %v12029_v19 }
 0x9b1   : > { %13576 = vst [vmem:[#allocation9_spill] sm:$0xff] %v12038_v23  ;;  %vm7973_vm2 = vmpackc.low %vm4608_vm15, %vm4606_vm13  ;;  %v4913_v8 = vpop.xlane.xlu0 %4912  ;;  %v4968_v10 = vmax.f32 %v12038_v23, %v12041_v36 }
 0x9b2   : > { %7974 = vmatprep.subr.msk.bf16.mxu0 %vm7973_vm2, %v13175_v29  ;;  %vm4997_vm3 = vcmp.ge.f32.partialorder %v11729_v45, %v4913_v8  ;;  %vm4998_vm4 = vcmp.ge.f32.partialorder %v11732_v5, %v4913_v8  ;;  %v4916_v40 = vpop.xlane.xlu1 %4915  ;;  %4966 = vmax.xlane.f32.xlu0 %v4965_v54 }
 0x9b3   : > { %v5061_v33 = vsel %vm4997_vm3, %v8551_v32, 256.0  ;;  %v5062_v60 = vsel %vm4998_vm4, %v8554_v17, 256.0  ;;  %vm4999_vm6 = vcmp.ge.f32.partialorder %v11741_v18, %v4916_v40  ;;  %vm5000_vm7 = vcmp.ge.f32.partialorder %v11744_v59, %v4916_v40  ;;  %4969 = vmax.xlane.f32.xlu1 %v4968_v10 }
 0x9b4   : > { %7976 = vmatpush1.bf16.xpose.msk.msra.mxu0 %vm12033_vm1, %v13175_v29  ;;  %v5063_v11 = vsel %vm4999_vm6, %v8551_v32, 256.0  ;;  %v5064_v38 = vsel %vm5000_vm7, %v8554_v17, 256.0  ;;  %v5135_v57 = vmin.f32 %v5061_v33, %v5062_v60 }
 0x9b5   : > { %v4545_v2 = vpop.xlane.xlu0 %4544  ;;  %v5138_v54 = vmin.f32 %v5063_v11, %v5064_v38 }
 0x9b6   : > { %vm4609_vm8 = vcmp.eq.f32.partialorder %v8551_v32, %v4545_v2  ;;  %vm4610_vm9 = vcmp.eq.f32.partialorder %v8554_v17, %v4545_v2  ;;  %v4548_v8 = vpop.xlane.xlu1 %4547  ;;  %5136 = vmin.xlane.f32.xlu0 %v5135_v57 }
 0x9b7   : > { %v12062_v40 = vsel %vm4609_vm8, -inf, %v11473_v39  ;;  %v12065_v28 = vsel %vm4610_vm9, -inf, %v11476_v47  ;;  %vm4611_vm10 = vcmp.eq.f32.partialorder %v8551_v32, %v4548_v8  ;;  %vm4612_vm11 = vcmp.eq.f32.partialorder %v8554_v17, %v4548_v8  ;;  %5139 = vmin.xlane.f32.xlu1 %v5138_v54 }
 0x9b8   : > { %vm12069_vm12 = vmpackc.low %vm4611_vm10, %vm4609_vm8  ;;  %v12074_v33 = vsel %vm4611_vm10, -inf, %v11485_v34  ;;  %v12077_v60 = vsel %vm4612_vm11, -inf, %v11488_v52  ;;  %v4971_v39 = vmax.f32 %v12062_v40, %v12065_v28 }
 0x9b9   : > { %vm7977_vm13 = vmpackc.low %vm4612_vm11, %vm4610_vm9  ;;  %v4919_v47 = vpop.xlane.xlu0 %4918  ;;  %v4974_v11 = vmax.f32 %v12074_v33, %v12077_v60 }
 0x9ba   : > { %7978 = vmatprep.subr.msk.bf16.mxu0 %vm7977_vm13, %v13175_v29  ;;  %vm5001_vm14 = vcmp.ge.f32.partialorder %v11765_v56, %v4919_v47  ;;  %vm5002_vm15 = vcmp.ge.f32.partialorder %v11768_v21, %v4919_v47  ;;  %v4922_v38 = vpop.xlane.xlu1 %4921  ;;  %4972 = vmax.xlane.f32.xlu0 %v4971_v39 }
 0x9bb   : > { %v5065_v34 = vsel %vm5001_vm14, %v8551_v32, 256.0  ;;  %v5066_v52 = vsel %vm5002_vm15, %v8554_v17, 256.0  ;;  %vm5003_vm1 = vcmp.ge.f32.partialorder %v11773_v62, %v4922_v38  ;;  %vm5004_vm2 = vcmp.ge.f32.partialorder %v11776_v12, %v4922_v38  ;;  %4975 = vmax.xlane.f32.xlu1 %v4974_v11  ;;  %v13579_v11 = vld [vmem:[#allocation4_spill] sm:$0xff] }
 0x9bc   : > { %7980 = vmatpush1.bf16.xpose.msk.msra.mxu0 %vm12069_vm12, %v13175_v29  ;;  %v5067_v57 = vsel %vm5003_vm1, %v8551_v32, 256.0  ;;  %v5068_v2 = vsel %vm5004_vm2, %v8554_v17, 256.0  ;;  %v5141_v54 = vmin.f32 %v5065_v34, %v5066_v52 }
 0x9bd   : > { %v4925_v8 = vpop.xlane.xlu0 %4924  ;;  %v5144_v39 = vmin.f32 %v5067_v57, %v5068_v2  ;;  %v13580_v57 = vld [vmem:[#allocation5_spill] sm:$0xff] }
 0x9be   : > { %vm5005_vm3 = vcmp.ge.f32.partialorder %v11786_v27, %v4925_v8  ;;  %vm5006_vm4 = vcmp.ge.f32.partialorder %v11789_v37, %v4925_v8  ;;  %5142 = vmin.xlane.f32.xlu0 %v5141_v54 }
 0x9bf   : > { %v5069_v47 = vsel %vm5005_vm3, %v8551_v32, 256.0  ;;  %v5070_v38 = vsel %vm5006_vm4, %v8554_v17, 256.0  ;;  %5145 = vmin.xlane.f32.xlu1 %v5144_v39 }
 0x9c0   : > { %v5147_v10 = vmin.f32 %v5069_v47, %v5070_v38  ;;  %v4928_v12 = vpop.xlane.xlu1 %4927 }
 0x9c1   : > { %vm5007_vm6 = vcmp.ge.f32.partialorder %v11797_v25, %v4928_v12  ;;  %vm5008_vm7 = vcmp.ge.f32.partialorder %v11800_v7, %v4928_v12 }
 0x9c2   : > { %5148 = vmin.xlane.f32.xlu0 %v5147_v10  ;;  %v5071_v34 = vsel %vm5007_vm6, %v8551_v32, 256.0  ;;  %v5072_v52 = vsel %vm5008_vm7, %v8554_v17, 256.0 }
 0x9c3   : > { %4806 = vmatmul.mubr.f32.vlgmr.msra.gmra.mrb[68].mxu0 %v13579_v11  ;;  %v5150_v2 = vmin.f32 %v5071_v34, %v5072_v52 }
 0x9c4   : > { %6109 = vmatprep.mubr.f32.mxu0 %v13580_v57 }
 0x9c5   : > { %v4931_v54 = vpop.xlane.xlu0 %4930  ;;  %5151 = vmin.xlane.f32.xlu1 %v5150_v2 }
 0x9c6   : > { %vm5009_vm8 = vcmp.ge.f32.partialorder %v11809_v1, %v4931_v54  ;;  %vm5010_vm9 = vcmp.ge.f32.partialorder %v11812_v43, %v4931_v54 }
 0x9c7   : > { %v5073_v8 = vsel %vm5009_vm8, %v8551_v32, 256.0  ;;  %v5074_v39 = vsel %vm5010_vm9, %v8554_v17, 256.0 }
 0x9c8   : > { %v5153_v47 = vmin.f32 %v5073_v8, %v5074_v39 }
 0x9c9   : > { %v4934_v12 = vpop.xlane.xlu1 %4933 }
 0x9ca   : > { %vm5011_vm10 = vcmp.ge.f32.partialorder %v11819_v14, %v4934_v12  ;;  %vm5012_vm11 = vcmp.ge.f32.partialorder %v11822_v48, %v4934_v12  ;;  %5154 = vmin.xlane.f32.xlu0 %v5153_v47  ;;  %v13581_v47 = vld [vmem:[#allocation16_spill] sm:$0xff] }
 0x9cb   : > { %v5075_v38 = vsel %vm5011_vm10, %v8551_v32, 256.0  ;;  %v5076_v10 = vsel %vm5012_vm11, %v8554_v17, 256.0 }
 0x9cc   : > { %v5156_v34 = vmin.f32 %v5075_v38, %v5076_v10 }
 0x9cd   : > { %v4937_v52 = vpop.xlane.xlu0 %4936 }
 0x9ce   : > { %vm5013_vm12 = vcmp.ge.f32.partialorder %v11831_v3, %v4937_v52  ;;  %vm5014_vm13 = vcmp.ge.f32.partialorder %v11834_v9, %v4937_v52  ;;  %5157 = vmin.xlane.f32.xlu1 %v5156_v34  ;;  %v13582_v52 = vld [vmem:[#allocation19_spill] sm:$0xff] }
 0x9cf   : > { %v5077_v2 = vsel %vm5013_vm12, %v8551_v32, 256.0  ;;  %v5078_v54 = vsel %vm5014_vm13, %v8554_v17, 256.0 }
 0x9d0   : > { %v5159_v8 = vmin.f32 %v5077_v2, %v5078_v54 }
 0x9d1   : > { %v4940_v39 = vpop.xlane.xlu1 %4939 }
 0x9d2   : > { %vm5015_vm14 = vcmp.ge.f32.partialorder %v11841_v51, %v4940_v39  ;;  %vm5016_vm15 = vcmp.ge.f32.partialorder %v13581_v47, %v4940_v39  ;;  %5160 = vmin.xlane.f32.xlu0 %v5159_v8 }
 0x9d3   : > { %v5079_v12 = vsel %vm5015_vm14, %v8551_v32, 256.0  ;;  %v5080_v38 = vsel %vm5016_vm15, %v8554_v17, 256.0 }
 0x9d4   : > { %v5162_v10 = vmin.f32 %v5079_v12, %v5080_v38 }
 0x9d6   : > { %5163 = vmin.xlane.f32.xlu1 %v5162_v10  ;;  %v13585_v10 = vld [vmem:[#allocation10_spill] sm:$0xff] }
 0xa16   : > { %v5107_v57 = vpop.xlane.xlu0 %5106 }
 0xa17   : > { %vm5201_vm1 = vcmp.eq.f32.partialorder %v8551_v32, %v5107_v57  ;;  %vm5202_vm2 = vcmp.eq.f32.partialorder %v8554_v17, %v5107_v57 }
 0xa18   : > { %v12124_v34 = vsel %vm5201_vm1, -inf, %v11535_v46  ;;  %v12129_v2 = vsel %vm5202_vm2, -inf, %v13582_v52 }
 0xa19   : > { %v5533_v54 = vmax.f32 %v12124_v34, %v12129_v2 }
 0xa1a   : > { %v4943_v8 = vpop.xlane.xlu0 %4942 }
 0xa1b   : > { %vm5017_vm3 = vcmp.ge.f32.partialorder %v11862_v24, %v4943_v8  ;;  %vm5018_vm4 = vcmp.ge.f32.partialorder %v11867_v15, %v4943_v8  ;;  %v5110_v39 = vpop.xlane.xlu1 %5109  ;;  %5534 = vmax.xlane.f32.xlu0 %v5533_v54 }
 0xa1c   : > { %v5081_v12 = vsel %vm5017_vm3, %v8551_v32, 256.0  ;;  %v5082_v46 = vsel %vm5018_vm4, %v8554_v17, 256.0  ;;  %vm5203_vm6 = vcmp.eq.f32.partialorder %v8551_v32, %v5110_v39  ;;  %vm5204_vm7 = vcmp.eq.f32.partialorder %v8554_v17, %v5110_v39 }
 0xa1d   : > { %vm12139_vm8 = vmpackc.low %vm5203_vm6, %vm5201_vm1  ;;  %v12144_v52 = vsel %vm5203_vm6, -inf, %v13585_v10  ;;  %v12147_v11 = vsel %vm5204_vm7, -inf, %v13549_v4  ;;  %v5165_v8 = vmin.f32 %v5081_v12, %v5082_v46  ;;  %v13588_v12 = vld [vmem:[#allocation29_spill] sm:$0xff]  ;;  %v13589_v46 = vld [vmem:[#allocation20_spill] sm:$0xff] }
 0xa1e   : > { %13586 = vst [vmem:[#allocation7_spill] sm:$0xff] %v12144_v52  ;;  %13587 = vst [vmem:[#allocation6_spill] sm:$0xff] %v12147_v11  ;;  %v5113_v54 = vpop.xlane.xlu0 %5112  ;;  %v5536_v15 = vmax.f32 %v12144_v52, %v12147_v11 }
 0xa1f   : > { %vm7981_vm9 = vmpackc.low %vm5204_vm7, %vm5202_vm2  ;;  %vm5205_vm10 = vcmp.eq.f32.partialorder %v8551_v32, %v5113_v54  ;;  %vm5206_vm11 = vcmp.eq.f32.partialorder %v8554_v17, %v5113_v54  ;;  %v4946_v39 = vpop.xlane.xlu1 %4945  ;;  %5166 = vmin.xlane.f32.xlu0 %v5165_v8  ;;  %v13594_v54 = vld [vmem:[#allocation23_spill] sm:$0xff] }
 0xa20   : > { %7982 = vmatprep.subr.msk.bf16.mxu1 %vm7981_vm9, %v13175_v29  ;;  %v12159_v4 = vsel %vm5205_vm10, -inf, %v11570_v35  ;;  %v12164_v57 = vsel %vm5206_vm11, -inf, %v11575_v20  ;;  %vm5019_vm12 = vcmp.ge.f32.partialorder %v13588_v12, %v4946_v39  ;;  %vm5020_vm13 = vcmp.ge.f32.partialorder %v13589_v46, %v4946_v39  ;;  %5537 = vmax.xlane.f32.xlu1 %v5536_v15 }
 0xa21   : > { %7984 = vmatpush1.bf16.xpose.msk.msra.mxu1 %vm12139_vm8, %v13175_v29  ;;  %v5083_v10 = vsel %vm5019_vm12, %v8551_v32, 256.0  ;;  %v5084_v8 = vsel %vm5020_vm13, %v8554_v17, 256.0  ;;  %v5539_v35 = vmax.f32 %v12159_v4, %v12164_v57 }
 0xa22   : > { %v4949_v11 = vpop.xlane.xlu0 %4948  ;;  %v5168_v52 = vmin.f32 %v5083_v10, %v5084_v8 }
 0xa23   : > { %vm5021_vm14 = vcmp.ge.f32.partialorder %v11903_v61, %v4949_v11  ;;  %vm5022_vm15 = vcmp.ge.f32.partialorder %v11908_v42, %v4949_v11  ;;  %v5116_v20 = vpop.xlane.xlu1 %5115  ;;  %5540 = vmax.xlane.f32.xlu0 %v5539_v35 }
 0xa24   : > { %v5085_v39 = vsel %vm5021_vm14, %v8551_v32, 256.0  ;;  %v5086_v38 = vsel %vm5022_vm15, %v8554_v17, 256.0  ;;  %vm5207_vm1 = vcmp.eq.f32.partialorder %v8551_v32, %v5116_v20  ;;  %vm5208_vm2 = vcmp.eq.f32.partialorder %v8554_v17, %v5116_v20  ;;  %5169 = vmin.xlane.f32.xlu1 %v5168_v52 }
 0xa25   : > { %vm12183_vm3 = vmpackc.low %vm5207_vm1, %vm5205_vm10  ;;  %v12188_v10 = vsel %vm5207_vm1, -inf, %v13554_v0  ;;  %v12191_v11 = vsel %vm5208_vm2, -inf, %v13555_v63  ;;  %v5171_v8 = vmin.f32 %v5085_v39, %v5086_v38  ;;  %v13595_v39 = vld [vmem:[#allocation21_spill] sm:$0xff] }
 0xa26   : > { %13592 = vst [vmem:[#allocation11_spill] sm:$0xff] %v12188_v10  ;;  %13593 = vst [vmem:[#allocation25_spill] sm:$0xff] %v12191_v11  ;;  %v5119_v35 = vpop.xlane.xlu0 %5118  ;;  %v5542_v52 = vmax.f32 %v12188_v10, %v12191_v11 }
 0xa27   : > { %vm7985_vm4 = vmpackc.low %vm5208_vm2, %vm5206_vm11  ;;  %vm5209_vm6 = vcmp.eq.f32.partialorder %v8551_v32, %v5119_v35  ;;  %vm5210_vm7 = vcmp.eq.f32.partialorder %v8554_v17, %v5119_v35  ;;  %v4952_v20 = vpop.xlane.xlu1 %4951  ;;  %5172 = vmin.xlane.f32.xlu0 %v5171_v8 }
 0xa28   : > { %7986 = vmatprep.subr.msk.bf16.mxu1 %vm7985_vm4, %v13175_v29  ;;  %v12203_v0 = vsel %vm5209_vm6, -inf, %v11614_v26  ;;  %v12208_v63 = vsel %vm5210_vm7, -inf, %v11619_v6  ;;  %vm5023_vm8 = vcmp.ge.f32.partialorder %v13594_v54, %v4952_v20  ;;  %vm5024_vm9 = vcmp.ge.f32.partialorder %v13595_v39, %v4952_v20  ;;  %5543 = vmax.xlane.f32.xlu1 %v5542_v52 }
 0xa29   : > { %7988 = vmatpush1.bf16.xpose.msk.msra.mxu1 %vm12183_vm3, %v13175_v29  ;;  %v5087_v38 = vsel %vm5023_vm8, %v8551_v32, 256.0  ;;  %v5088_v8 = vsel %vm5024_vm9, %v8554_v17, 256.0  ;;  %v5545_v26 = vmax.f32 %v12203_v0, %v12208_v63 }
 0xa2a   : > { %v4955_v11 = vpop.xlane.xlu0 %4954  ;;  %v5174_v10 = vmin.f32 %v5087_v38, %v5088_v8 }
 0xa2b   : > { %vm5025_vm10 = vcmp.ge.f32.partialorder %v11947_v50, %v4955_v11  ;;  %vm5026_vm11 = vcmp.ge.f32.partialorder %v11952_v41, %v4955_v11  ;;  %v5122_v6 = vpop.xlane.xlu1 %5121  ;;  %5546 = vmax.xlane.f32.xlu0 %v5545_v26 }
 0xa2c   : > { %v5089_v20 = vsel %vm5025_vm10, %v8551_v32, 256.0  ;;  %v5090_v15 = vsel %vm5026_vm11, %v8554_v17, 256.0  ;;  %vm5211_vm12 = vcmp.eq.f32.partialorder %v8551_v32, %v5122_v6  ;;  %vm5212_vm13 = vcmp.eq.f32.partialorder %v8554_v17, %v5122_v6  ;;  %5175 = vmin.xlane.f32.xlu1 %v5174_v10  ;;  %v13598_v10 = vld [vmem:[#allocation12_spill] sm:$0xff] }
 0xa2d   : > { %vm7991_vm14 = vmpackc.low %vm5211_vm12, %vm5209_vm6  ;;  %v12228_v52 = vsel %vm5211_vm12, -inf, %v13560_v16  ;;  %v12231_v38 = vsel %vm5212_vm13, -inf, %v13561_v44  ;;  %v5177_v11 = vmin.f32 %v5089_v20, %v5090_v15  ;;  %v13599_v6 = vld [vmem:[#allocation8_spill] sm:$0xff] }
 0xa2e   : > { %13596 = vst [vmem:[#allocation14_spill] sm:$0xff] %v12228_v52  ;;  %13597 = vst [vmem:[#allocation17_spill] sm:$0xff] %v12231_v38  ;;  %v5548_v8 = vmax.f32 %v12228_v52, %v12231_v38  ;;  %v13600_v38 = vld [vmem:[#allocation15_spill] sm:$0xff] }
 0xa2f   : > { %vm7989_vm15 = vmpackc.low %vm5212_vm13, %vm5210_vm7  ;;  %5178 = vmin.xlane.f32.xlu0 %v5177_v11 }
 0xa30   : > { %7990 = vmatprep.subr.msk.bf16.mxu1 %vm7989_vm15, %v13175_v29  ;;  %v4958_v26 = vpop.xlane.xlu1 %4957  ;;  %5549 = vmax.xlane.f32.xlu1 %v5548_v8 }
 0xa31   : > { %vm5027_vm1 = vcmp.ge.f32.partialorder %v13598_v10, %v4958_v26  ;;  %vm5028_vm2 = vcmp.ge.f32.partialorder %v13599_v6, %v4958_v26  ;;  %7992 = vmatpush1.bf16.xpose.msk.msra.mxu1 %vm7991_vm14, %v13175_v29  ;;  %v13601_v10 = vld [vmem:[#allocation24_spill] sm:$0xff]  ;;  %v13604_v26 = vld [vmem:[#allocation26_spill] sm:$0xff] }
 0xa32   : > { %v5091_v16 = vsel %vm5027_vm1, %v8551_v32, 256.0  ;;  %v5092_v44 = vsel %vm5028_vm2, %v8554_v17, 256.0 }
 0xa33   : > { %v5125_v35 = vpop.xlane.xlu0 %5124  ;;  %v5180_v20 = vmin.f32 %v5091_v16, %v5092_v44  ;;  %v13605_v44 = vld [vmem:[#allocation13_spill] sm:$0xff] }
 0xa34   : > { %vm5213_vm3 = vcmp.eq.f32.partialorder %v8551_v32, %v5125_v35  ;;  %vm5214_vm4 = vcmp.eq.f32.partialorder %v8554_v17, %v5125_v35  ;;  %v5128_v15 = vpop.xlane.xlu1 %5127 }
 0xa35   : > { %v12246_v11 = vsel %vm5213_vm3, -inf, %v13600_v38  ;;  %v12249_v52 = vsel %vm5214_vm4, -inf, %v13601_v10  ;;  %vm5215_vm6 = vcmp.eq.f32.partialorder %v8551_v32, %v5128_v15  ;;  %vm5216_vm7 = vcmp.eq.f32.partialorder %v8554_v17, %v5128_v15  ;;  %5181 = vmin.xlane.f32.xlu1 %v5180_v20 }
 0xa36   : > { %vm12253_vm8 = vmpackc.low %vm5215_vm6, %vm5213_vm3  ;;  %v12258_v16 = vsel %vm5215_vm6, -inf, %v13604_v26  ;;  %v12261_v35 = vsel %vm5216_vm7, -inf, %v13605_v44  ;;  %v5551_v38 = vmax.f32 %v12246_v11, %v12249_v52 }
 0xa37   : > { %13606 = vst [vmem:[#allocation16_spill] sm:$0xff] %v12261_v35  ;;  %vm7993_vm9 = vmpackc.low %vm5216_vm7, %vm5214_vm4  ;;  %v4961_v10 = vpop.xlane.xlu0 %4960  ;;  %v5554_v6 = vmax.f32 %v12258_v16, %v12261_v35 }
 0xa38   : > { %7994 = vmatprep.subr.msk.bf16.mxu1 %vm7993_vm9, %v13175_v29  ;;  %vm5029_vm10 = vcmp.ge.f32.partialorder %v11990_v22, %v4961_v10  ;;  %vm5030_vm11 = vcmp.ge.f32.partialorder %v11993_v55, %v4961_v10  ;;  %v4964_v20 = vpop.xlane.xlu1 %4963  ;;  %5552 = vmax.xlane.f32.xlu0 %v5551_v38 }
 0xa39   : > { %v5093_v15 = vsel %vm5029_vm10, %v8551_v32, 256.0  ;;  %v5094_v26 = vsel %vm5030_vm11, %v8554_v17, 256.0  ;;  %vm5031_vm12 = vcmp.ge.f32.partialorder %v12002_v49, %v4964_v20  ;;  %vm5032_vm13 = vcmp.ge.f32.partialorder %v12005_v13, %v4964_v20  ;;  %7996 = vmatpush1.bf16.xpose.msk.msra.mxu1 %vm12253_vm8, %v13175_v29  ;;  %5555 = vmax.xlane.f32.xlu1 %v5554_v6 }
 0xa3a   : > { %v5183_v44 = vmin.f32 %v5093_v15, %v5094_v26  ;;  %v5095_v22 = vsel %vm5031_vm12, %v8551_v32, 256.0  ;;  %v5096_v10 = vsel %vm5032_vm13, %v8554_v17, 256.0 }
 0xa3b   : > { %v5131_v55 = vpop.xlane.xlu0 %5130  ;;  %v5186_v38 = vmin.f32 %v5095_v22, %v5096_v10 }
 0xa3c   : > { %vm5217_vm14 = vcmp.eq.f32.partialorder %v8551_v32, %v5131_v55  ;;  %vm5218_vm15 = vcmp.eq.f32.partialorder %v8554_v17, %v5131_v55  ;;  %v5134_v35 = vpop.xlane.xlu1 %5133  ;;  %5184 = vmin.xlane.f32.xlu0 %v5183_v44  ;;  %v13607_v55 = vld [vmem:[#allocation30_spill] sm:$0xff] }
 0xa3d   : > { %v12282_v20 = vsel %vm5217_vm14, -inf, %v11693_v30  ;;  %v12285_v8 = vsel %vm5218_vm15, -inf, %v11696_v31  ;;  %vm5219_vm1 = vcmp.eq.f32.partialorder %v8551_v32, %v5134_v35  ;;  %vm5220_vm2 = vcmp.eq.f32.partialorder %v8554_v17, %v5134_v35  ;;  %5187 = vmin.xlane.f32.xlu1 %v5186_v38 }
 0xa3e   : > { %v5557_v22 = vmax.f32 %v12282_v20, %v12285_v8  ;;  %vm7997_vm3 = vmpackc.low %vm5220_vm2, %vm5218_vm15  ;;  %v12292_v6 = vsel %vm5219_vm1, -inf, %v11705_v53  ;;  %v12295_v15 = vsel %vm5220_vm2, -inf, %v13607_v55 }
 0xa3f   : > { %vm7999_vm4 = vmpackc.low %vm5219_vm1, %vm5217_vm14  ;;  %v5560_v30 = vmax.f32 %v12292_v6, %v12295_v15  ;;  %7998 = vmatprep.subr.msk.bf16.mxu1 %vm7997_vm3, %v13175_v29  ;;  %v4967_v31 = vpop.xlane.xlu0 %4966 }
 0xa40   : > { %vm5033_vm6 = vcmp.ge.f32.partialorder %v12026_v58, %v4967_v31  ;;  %vm5034_vm7 = vcmp.ge.f32.partialorder %v12029_v19, %v4967_v31  ;;  %v4970_v35 = vpop.xlane.xlu1 %4969  ;;  %5558 = vmax.xlane.f32.xlu0 %v5557_v22 }
 0xa41   : > { %v5097_v26 = vsel %vm5033_vm6, %v8551_v32, 256.0  ;;  %v5098_v53 = vsel %vm5034_vm7, %v8554_v17, 256.0  ;;  %vm5035_vm8 = vcmp.ge.f32.partialorder %v12038_v23, %v4970_v35  ;;  %vm5036_vm9 = vcmp.ge.f32.partialorder %v12041_v36, %v4970_v35  ;;  %8000 = vmatpush1.bf16.xpose.msk.msra.mxu1 %vm7999_vm4, %v13175_v29  ;;  %5561 = vmax.xlane.f32.xlu1 %v5560_v30 }
 0xa42   : > { %v5189_v44 = vmin.f32 %v5097_v26, %v5098_v53  ;;  %v5099_v10 = vsel %vm5035_vm8, %v8551_v32, 256.0  ;;  %v5100_v38 = vsel %vm5036_vm9, %v8554_v17, 256.0 }
 0xa43   : > { %v5192_v55 = vmin.f32 %v5099_v10, %v5100_v38  ;;  %v5137_v31 = vpop.xlane.xlu0 %5136 }
 0xa44   : > { %vm5221_vm10 = vcmp.eq.f32.partialorder %v8551_v32, %v5137_v31  ;;  %vm5222_vm11 = vcmp.eq.f32.partialorder %v8554_v17, %v5137_v31  ;;  %v5140_v22 = vpop.xlane.xlu1 %5139  ;;  %5190 = vmin.xlane.f32.xlu0 %v5189_v44 }
 0xa45   : > { %v12312_v23 = vsel %vm5221_vm10, -inf, %v11729_v45  ;;  %v12315_v35 = vsel %vm5222_vm11, -inf, %v11732_v5  ;;  %vm5223_vm12 = vcmp.eq.f32.partialorder %v8551_v32, %v5140_v22  ;;  %vm5224_vm13 = vcmp.eq.f32.partialorder %v8554_v17, %v5140_v22  ;;  %5193 = vmin.xlane.f32.xlu1 %v5192_v55 }
 0xa46   : > { %v5563_v30 = vmax.f32 %v12312_v23, %v12315_v35  ;;  %vm8001_vm14 = vmpackc.low %vm5224_vm13, %vm5222_vm11  ;;  %v12322_v26 = vsel %vm5223_vm12, -inf, %v11741_v18  ;;  %v12325_v53 = vsel %vm5224_vm13, -inf, %v11744_v59 }
 0xa47   : > { %vm8003_vm15 = vmpackc.low %vm5223_vm12, %vm5221_vm10  ;;  %v5566_v45 = vmax.f32 %v12322_v26, %v12325_v53  ;;  %8002 = vmatprep.subr.msk.bf16.mxu1 %vm8001_vm14, %v13175_v29  ;;  %v4973_v5 = vpop.xlane.xlu0 %4972 }
 0xa48   : > { %vm5037_vm1 = vcmp.ge.f32.partialorder %v12062_v40, %v4973_v5  ;;  %vm5038_vm2 = vcmp.ge.f32.partialorder %v12065_v28, %v4973_v5  ;;  %v4976_v44 = vpop.xlane.xlu1 %4975  ;;  %5564 = vmax.xlane.f32.xlu0 %v5563_v30 }
 0xa49   : > { %v5101_v10 = vsel %vm5037_vm1, %v8551_v32, 256.0  ;;  %v5102_v18 = vsel %vm5038_vm2, %v8554_v17, 256.0  ;;  %vm5039_vm3 = vcmp.ge.f32.partialorder %v12074_v33, %v4976_v44  ;;  %vm5040_vm4 = vcmp.ge.f32.partialorder %v12077_v60, %v4976_v44  ;;  %8004 = vmatpush1.bf16.xpose.msk.msra.mxu1 %vm8003_vm15, %v13175_v29  ;;  %5567 = vmax.xlane.f32.xlu1 %v5566_v45 }
 0xa4a   : > { %v5195_v59 = vmin.f32 %v5101_v10, %v5102_v18  ;;  %v5103_v38 = vsel %vm5039_vm3, %v8551_v32, 256.0  ;;  %v5104_v55 = vsel %vm5040_vm4, %v8554_v17, 256.0  ;;  %v13608_v18 = vld [vmem:[#allocation18_spill] sm:$0xff] }
 0xa4b   : > { %v5198_v31 = vmin.f32 %v5103_v38, %v5104_v55  ;;  %v5143_v22 = vpop.xlane.xlu0 %5142 }
 0xa4c   : > { %vm5225_vm6 = vcmp.eq.f32.partialorder %v8551_v32, %v5143_v22  ;;  %vm5226_vm7 = vcmp.eq.f32.partialorder %v8554_v17, %v5143_v22  ;;  %v5146_v30 = vpop.xlane.xlu1 %5145  ;;  %5196 = vmin.xlane.f32.xlu0 %v5195_v59 }
 0xa4d   : > { %v12342_v5 = vsel %vm5225_vm6, -inf, %v11765_v56  ;;  %v12345_v44 = vsel %vm5226_vm7, -inf, %v11768_v21  ;;  %vm5227_vm8 = vcmp.eq.f32.partialorder %v8551_v32, %v5146_v30  ;;  %vm5228_vm9 = vcmp.eq.f32.partialorder %v8554_v17, %v5146_v30  ;;  %5199 = vmin.xlane.f32.xlu1 %v5198_v31 }
 0xa4e   : > { %v5569_v45 = vmax.f32 %v12342_v5, %v12345_v44  ;;  %vm8005_vm10 = vmpackc.low %vm5228_vm9, %vm5226_vm7  ;;  %v12352_v10 = vsel %vm5227_vm8, -inf, %v11773_v62  ;;  %v12355_v59 = vsel %vm5228_vm9, -inf, %v13608_v18 }
 0xa4f   : > { %vm8007_vm11 = vmpackc.low %vm5227_vm8, %vm5225_vm6  ;;  %v5572_v56 = vmax.f32 %v12352_v10, %v12355_v59  ;;  %8006 = vmatprep.subr.msk.bf16.mxu1 %vm8005_vm10, %v13175_v29  ;;  %v5149_v21 = vpop.xlane.xlu0 %5148 }
 0xa50   : > { %vm5229_vm12 = vcmp.eq.f32.partialorder %v8551_v32, %v5149_v21  ;;  %vm5230_vm13 = vcmp.eq.f32.partialorder %v8554_v17, %v5149_v21  ;;  %5570 = vmax.xlane.f32.xlu0 %v5569_v45 }
 0xa51   : > { %v12365_v62 = vsel %vm5229_vm12, -inf, %v11786_v27  ;;  %v12368_v38 = vsel %vm5230_vm13, -inf, %v11789_v37  ;;  %8008 = vmatpush1.bf16.xpose.msk.msra.mxu1 %vm8007_vm11, %v13175_v29  ;;  %5573 = vmax.xlane.f32.xlu1 %v5572_v56 }
 0xa52   : > { %v5575_v55 = vmax.f32 %v12365_v62, %v12368_v38  ;;  %v5152_v31 = vpop.xlane.xlu1 %5151 }
 0xa53   : > { %vm5231_vm14 = vcmp.eq.f32.partialorder %v8551_v32, %v5152_v31  ;;  %vm5232_vm15 = vcmp.eq.f32.partialorder %v8554_v17, %v5152_v31 }
 0xa54   : > { %5576 = vmax.xlane.f32.xlu0 %v5575_v55  ;;  %vm8009_vm1 = vmpackc.low %vm5232_vm15, %vm5230_vm13  ;;  %v12376_v22 = vsel %vm5231_vm14, -inf, %v11797_v25  ;;  %v12379_v27 = vsel %vm5232_vm15, -inf, %v11800_v7 }
 0xa55   : > { %vm8011_vm2 = vmpackc.low %vm5231_vm14, %vm5229_vm12  ;;  %v5578_v37 = vmax.f32 %v12376_v22, %v12379_v27  ;;  %8010 = vmatprep.subr.msk.bf16.mxu1 %vm8009_vm1, %v13175_v29 }
 0xa57   : > { %v5155_v30 = vpop.xlane.xlu0 %5154  ;;  %5579 = vmax.xlane.f32.xlu1 %v5578_v37 }
 0xa58   : > { %vm5233_vm3 = vcmp.eq.f32.partialorder %v8551_v32, %v5155_v30  ;;  %vm5234_vm4 = vcmp.eq.f32.partialorder %v8554_v17, %v5155_v30 }
 0xa59   : > { %8012 = vmatpush1.bf16.xpose.msk.msra.mxu1 %vm8011_vm2, %v13175_v29  ;;  %v12390_v25 = vsel %vm5233_vm3, -inf, %v11809_v1  ;;  %v12393_v7 = vsel %vm5234_vm4, -inf, %v11812_v43 }
 0xa5a   : > { %v5581_v45 = vmax.f32 %v12390_v25, %v12393_v7 }
 0xa5b   : > { %v5158_v18 = vpop.xlane.xlu1 %5157 }
 0xa5c   : > { %vm5235_vm6 = vcmp.eq.f32.partialorder %v8551_v32, %v5158_v18  ;;  %vm5236_vm7 = vcmp.eq.f32.partialorder %v8554_v17, %v5158_v18  ;;  %5582 = vmax.xlane.f32.xlu0 %v5581_v45 }
 0xa5d   : > { %vm8013_vm8 = vmpackc.low %vm5236_vm7, %vm5234_vm4  ;;  %v12400_v56 = vsel %vm5235_vm6, -inf, %v11819_v14  ;;  %v12403_v21 = vsel %vm5236_vm7, -inf, %v11822_v48 }
 0xa5e   : > { %vm8015_vm9 = vmpackc.low %vm5235_vm6, %vm5233_vm3  ;;  %v5584_v1 = vmax.f32 %v12400_v56, %v12403_v21  ;;  %8014 = vmatprep.subr.msk.bf16.mxu1 %vm8013_vm8, %v13175_v29 }
 0xa5f   : > { %v5161_v43 = vpop.xlane.xlu0 %5160 }
 0xa60   : > { %vm5237_vm10 = vcmp.eq.f32.partialorder %v8551_v32, %v5161_v43  ;;  %vm5238_vm11 = vcmp.eq.f32.partialorder %v8554_v17, %v5161_v43  ;;  %5585 = vmax.xlane.f32.xlu1 %v5584_v1  ;;  %v13610_v1 = vld [vmem:[#allocation27_spill] sm:$0xff] }
 0xa61   : > { %8016 = vmatpush1.bf16.xpose.msk.msra.mxu1 %vm8015_vm9, %v13175_v29  ;;  %v12412_v14 = vsel %vm5237_vm10, -inf, %v11831_v3  ;;  %v12415_v48 = vsel %vm5238_vm11, -inf, %v11834_v9 }
 0xa62   : > { %v5587_v55 = vmax.f32 %v12412_v14, %v12415_v48 }
 0xa63   : > { %v5164_v31 = vpop.xlane.xlu1 %5163 }
 0xa64   : > { %vm5239_vm12 = vcmp.eq.f32.partialorder %v8551_v32, %v5164_v31  ;;  %vm5240_vm13 = vcmp.eq.f32.partialorder %v8554_v17, %v5164_v31  ;;  %5588 = vmax.xlane.f32.xlu0 %v5587_v55 }
 0xa65   : > { %vm8017_vm14 = vmpackc.low %vm5240_vm13, %vm5238_vm11  ;;  %v12422_v37 = vsel %vm5239_vm12, -inf, %v11841_v51  ;;  %v12425_v30 = vsel %vm5240_vm13, -inf, %v13581_v47 }
 0xa66   : > { %13609 = vst [vmem:[#allocation19_spill] sm:$0xff] %v12425_v30  ;;  %vm8019_vm15 = vmpackc.low %vm5239_vm12, %vm5237_vm10  ;;  %v5590_v3 = vmax.f32 %v12422_v37, %v12425_v30  ;;  %8018 = vmatprep.subr.msk.bf16.mxu1 %vm8017_vm14, %v13175_v29 }
 0xa68   : > { %5591 = vmax.xlane.f32.xlu1 %v5590_v3 }
 0xa69   : > { %8020 = vmatpush1.bf16.xpose.msk.msra.mxu1 %vm8019_vm15, %v13175_v29 }
 0xa96   : > { %v4807_v9 = vpop.f32.mrb[68].mxu0 }
 0xa97   : > { %v4809_v45 = vpop.f32.mrb[69].mxu0 }
 0xa98   : > { %v4814_v18 = vcombine.low %v4807_v9, %v4809_v45  ;;  %v13612_v45 = vld [vmem:[#allocation7_spill] sm:$0xff] }
 0xa9a   : > { %v12432_v43 = vmax.f32 %v13610_v1, %v4814_v18  ;;  %v13613_v18 = vld [vmem:[#allocation6_spill] sm:$0xff] }
 0xaa8   : > { %v5535_v51 = vpop.xlane.xlu0 %5534 }
 0xaa9   : > { %vm5629_vm1 = vcmp.ge.f32.partialorder %v12124_v34, %v5535_v51  ;;  %vm5630_vm2 = vcmp.ge.f32.partialorder %v12129_v2, %v5535_v51  ;;  %v13611_v34 = vld [vmem:[#allocation28_spill] sm:$0xff] }
 0xaaa   : > { %v5693_v47 = vsel %vm5629_vm1, %v8551_v32, 256.0  ;;  %v5694_v55 = vsel %vm5630_vm2, %v8554_v17, 256.0 }
 0xaab   : > { %v5757_v31 = vmin.f32 %v5693_v47, %v5694_v55 }
 0xaac   : > { %v5167_v30 = vpop.xlane.xlu0 %5166 }
 0xaad   : > { %vm5241_vm3 = vcmp.eq.f32.partialorder %v8551_v32, %v5167_v30  ;;  %vm5242_vm4 = vcmp.eq.f32.partialorder %v8554_v17, %v5167_v30  ;;  %v5538_v3 = vpop.xlane.xlu1 %5537  ;;  %5758 = vmin.xlane.f32.xlu0 %v5757_v31  ;;  %v13614_v30 = vld [vmem:[#allocation11_spill] sm:$0xff] }
 0xaae   : > { %v12443_v9 = vsel %vm5241_vm3, -inf, %v11862_v24  ;;  %v12448_v2 = vsel %vm5242_vm4, -inf, %v13611_v34  ;;  %vm5631_vm6 = vcmp.ge.f32.partialorder %v13612_v45, %v5538_v3  ;;  %vm5632_vm7 = vcmp.ge.f32.partialorder %v13613_v18, %v5538_v3 }
 0xaaf   : > { %v5593_v1 = vmax.f32 %v12443_v9, %v12448_v2  ;;  %v5695_v51 = vsel %vm5631_vm6, %v8551_v32, 256.0  ;;  %v5696_v47 = vsel %vm5632_vm7, %v8554_v17, 256.0 }
 0xab0   : > { %v5760_v55 = vmin.f32 %v5695_v51, %v5696_v47  ;;  %v5541_v31 = vpop.xlane.xlu0 %5540  ;;  %v13615_v47 = vld [vmem:[#allocation25_spill] sm:$0xff] }
 0xab1   : > { %vm5633_vm8 = vcmp.ge.f32.partialorder %v12159_v4, %v5541_v31  ;;  %vm5634_vm9 = vcmp.ge.f32.partialorder %v12164_v57, %v5541_v31  ;;  %v5170_v24 = vpop.xlane.xlu1 %5169  ;;  %5594 = vmax.xlane.f32.xlu0 %v5593_v1 }
 0xab2   : > { %v5697_v34 = vsel %vm5633_vm8, %v8551_v32, 256.0  ;;  %v5698_v45 = vsel %vm5634_vm9, %v8554_v17, 256.0  ;;  %vm5243_vm10 = vcmp.eq.f32.partialorder %v8551_v32, %v5170_v24  ;;  %vm5244_vm11 = vcmp.eq.f32.partialorder %v8554_v17, %v5170_v24  ;;  %5761 = vmin.xlane.f32.xlu1 %v5760_v55 }
 0xab3   : > { %v5763_v3 = vmin.f32 %v5697_v34, %v5698_v45  ;;  %vm8021_vm12 = vmpackc.low %vm5244_vm11, %vm5242_vm4  ;;  %v12465_v18 = vsel %vm5243_vm10, -inf, %v13588_v12  ;;  %v12468_v4 = vsel %vm5244_vm11, -inf, %v13589_v46 }
 0xab4   : > { %vm8023_vm13 = vmpackc.low %vm5243_vm10, %vm5241_vm3  ;;  %v5596_v57 = vmax.f32 %v12465_v18, %v12468_v4  ;;  %8022 = vmatprep.subr.msk.bf16.mxu1 %vm8021_vm12, %v13175_v29  ;;  %v5173_v1 = vpop.xlane.xlu0 %5172 }
 0xab5   : > { %vm5245_vm14 = vcmp.eq.f32.partialorder %v8551_v32, %v5173_v1  ;;  %vm5246_vm15 = vcmp.eq.f32.partialorder %v8554_v17, %v5173_v1  ;;  %v5544_v51 = vpop.xlane.xlu1 %5543  ;;  %8024 = vmatpush1.bf16.xpose.msk.msra.mxu1 %vm8023_vm13, %v13175_v29  ;;  %5764 = vmin.xlane.f32.xlu0 %v5763_v3  ;;  %v13616_v1 = vld [vmem:[#allocation14_spill] sm:$0xff] }
 0xab6   : > { %v12481_v12 = vsel %vm5245_vm14, -inf, %v11903_v61  ;;  %v12486_v46 = vsel %vm5246_vm15, -inf, %v11908_v42  ;;  %vm5635_vm1 = vcmp.ge.f32.partialorder %v13614_v30, %v5544_v51  ;;  %vm5636_vm2 = vcmp.ge.f32.partialorder %v13615_v47, %v5544_v51  ;;  %5597 = vmax.xlane.f32.xlu1 %v5596_v57 }
 0xab7   : > { %v5599_v55 = vmax.f32 %v12481_v12, %v12486_v46  ;;  %v5699_v31 = vsel %vm5635_vm1, %v8551_v32, 256.0  ;;  %v5700_v24 = vsel %vm5636_vm2, %v8554_v17, 256.0 }
 0xab8   : > { %v5766_v34 = vmin.f32 %v5699_v31, %v5700_v24  ;;  %v5547_v61 = vpop.xlane.xlu0 %5546 }
 0xab9   : > { %vm5637_vm3 = vcmp.ge.f32.partialorder %v12203_v0, %v5547_v61  ;;  %vm5638_vm4 = vcmp.ge.f32.partialorder %v12208_v63, %v5547_v61  ;;  %v5176_v42 = vpop.xlane.xlu1 %5175  ;;  %5600 = vmax.xlane.f32.xlu0 %v5599_v55  ;;  %v13617_v55 = vld [vmem:[#allocation17_spill] sm:$0xff] }
 0xaba   : > { %v5701_v45 = vsel %vm5637_vm3, %v8551_v32, 256.0  ;;  %v5702_v3 = vsel %vm5638_vm4, %v8554_v17, 256.0  ;;  %vm5247_vm6 = vcmp.eq.f32.partialorder %v8551_v32, %v5176_v42  ;;  %vm5248_vm7 = vcmp.eq.f32.partialorder %v8554_v17, %v5176_v42  ;;  %5767 = vmin.xlane.f32.xlu1 %v5766_v34 }
 0xabb   : > { %v5769_v57 = vmin.f32 %v5701_v45, %v5702_v3  ;;  %vm8025_vm8 = vmpackc.low %vm5248_vm7, %vm5246_vm15  ;;  %v12503_v51 = vsel %vm5247_vm6, -inf, %v13594_v54  ;;  %v12506_v0 = vsel %vm5248_vm7, -inf, %v13595_v39  ;;  %v13619_v45 = vld [vmem:[#allocation8_spill] sm:$0xff] }
 0xabc   : > { %vm8027_vm9 = vmpackc.low %vm5247_vm6, %vm5245_vm14  ;;  %v5602_v63 = vmax.f32 %v12503_v51, %v12506_v0  ;;  %8026 = vmatprep.subr.msk.bf16.mxu1 %vm8025_vm8, %v13175_v29  ;;  %v5179_v30 = vpop.xlane.xlu0 %5178 }
 0xabd   : > { %vm5249_vm10 = vcmp.eq.f32.partialorder %v8551_v32, %v5179_v30  ;;  %vm5250_vm11 = vcmp.eq.f32.partialorder %v8554_v17, %v5179_v30  ;;  %v5550_v47 = vpop.xlane.xlu1 %5549  ;;  %8028 = vmatpush1.bf16.xpose.msk.msra.mxu1 %vm8027_vm9, %v13175_v29  ;;  %5770 = vmin.xlane.f32.xlu0 %v5769_v57  ;;  %v13620_v30 = vld [vmem:[#allocation16_spill] sm:$0xff] }
 0xabe   : > { %v12519_v54 = vsel %vm5249_vm10, -inf, %v11947_v50  ;;  %v12524_v39 = vsel %vm5250_vm11, -inf, %v11952_v41  ;;  %vm5639_vm12 = vcmp.ge.f32.partialorder %v13616_v1, %v5550_v47  ;;  %vm5640_vm13 = vcmp.ge.f32.partialorder %v13617_v55, %v5550_v47  ;;  %5603 = vmax.xlane.f32.xlu1 %v5602_v63  ;;  %v13618_v41 = vld [vmem:[#allocation12_spill] sm:$0xff] }
 0xabf   : > { %v5605_v31 = vmax.f32 %v12519_v54, %v12524_v39  ;;  %v5703_v24 = vsel %vm5639_vm12, %v8551_v32, 256.0  ;;  %v5704_v34 = vsel %vm5640_vm13, %v8554_v17, 256.0 }
 0xac0   : > { %v5772_v61 = vmin.f32 %v5703_v24, %v5704_v34 }
 0xac1   : > { %5606 = vmax.xlane.f32.xlu0 %v5605_v31 }
 0xac2   : > { %v5182_v50 = vpop.xlane.xlu1 %5181  ;;  %5773 = vmin.xlane.f32.xlu1 %v5772_v61 }
 0xac3   : > { %vm5251_vm14 = vcmp.eq.f32.partialorder %v8551_v32, %v5182_v50  ;;  %vm5252_vm15 = vcmp.eq.f32.partialorder %v8554_v17, %v5182_v50  ;;  %v13621_v50 = vld [vmem:[#allocation31_spill] sm:$0xff] }
 0xac4   : > { %vm8029_vm1 = vmpackc.low %vm5252_vm15, %vm5250_vm11  ;;  %v12537_v42 = vsel %vm5251_vm14, -inf, %v13618_v41  ;;  %v12540_v3 = vsel %vm5252_vm15, -inf, %v13619_v45 }
 0xac5   : > { %vm8031_vm2 = vmpackc.low %vm5251_vm14, %vm5249_vm10  ;;  %v5608_v57 = vmax.f32 %v12537_v42, %v12540_v3  ;;  %8030 = vmatprep.subr.msk.bf16.mxu1 %vm8029_vm1, %v13175_v29  ;;  %v5553_v63 = vpop.xlane.xlu0 %5552 }
 0xac6   : > { %vm5641_vm3 = vcmp.ge.f32.partialorder %v12246_v11, %v5553_v63  ;;  %vm5642_vm4 = vcmp.ge.f32.partialorder %v12249_v52, %v5553_v63  ;;  %v5556_v47 = vpop.xlane.xlu1 %5555  ;;  %8032 = vmatpush1.bf16.xpose.msk.msra.mxu1 %vm8031_vm2, %v13175_v29 }
 0xac7   : > { %v5705_v1 = vsel %vm5641_vm3, %v8551_v32, 256.0  ;;  %v5706_v55 = vsel %vm5642_vm4, %v8554_v17, 256.0  ;;  %vm5643_vm6 = vcmp.ge.f32.partialorder %v12258_v16, %v5556_v47  ;;  %vm5644_vm7 = vcmp.ge.f32.partialorder %v13620_v30, %v5556_v47  ;;  %5609 = vmax.xlane.f32.xlu1 %v5608_v57  ;;  %v13622_v16 = vld [vmem:[#allocation22_spill] sm:$0xff] }
 0xac8   : > { %v5775_v31 = vmin.f32 %v5705_v1, %v5706_v55  ;;  %v5707_v24 = vsel %vm5643_vm6, %v8551_v32, 256.0  ;;  %v5708_v34 = vsel %vm5644_vm7, %v8554_v17, 256.0 }
 0xac9   : > { %v5778_v11 = vmin.f32 %v5707_v24, %v5708_v34  ;;  %v5185_v61 = vpop.xlane.xlu0 %5184 }
 0xaca   : > { %vm5253_vm8 = vcmp.eq.f32.partialorder %v8551_v32, %v5185_v61  ;;  %vm5254_vm9 = vcmp.eq.f32.partialorder %v8554_v17, %v5185_v61  ;;  %v5188_v52 = vpop.xlane.xlu1 %5187  ;;  %5776 = vmin.xlane.f32.xlu0 %v5775_v31 }
 0xacb   : > { %v12559_v41 = vsel %vm5253_vm8, -inf, %v13621_v50  ;;  %v12562_v45 = vsel %vm5254_vm9, -inf, %v13622_v16  ;;  %vm5255_vm10 = vcmp.eq.f32.partialorder %v8551_v32, %v5188_v52  ;;  %vm5256_vm11 = vcmp.eq.f32.partialorder %v8554_v17, %v5188_v52  ;;  %5779 = vmin.xlane.f32.xlu1 %v5778_v11  ;;  %v13623_v52 = vld [vmem:[#allocation9_spill] sm:$0xff] }
 0xacc   : > { %v5611_v57 = vmax.f32 %v12559_v41, %v12562_v45  ;;  %vm8033_vm12 = vmpackc.low %vm5256_vm11, %vm5254_vm9  ;;  %v12569_v63 = vsel %vm5255_vm10, -inf, %v12002_v49  ;;  %v12572_v47 = vsel %vm5256_vm11, -inf, %v12005_v13 }
 0xacd   : > { %vm8035_vm13 = vmpackc.low %vm5255_vm10, %vm5253_vm8  ;;  %v5614_v1 = vmax.f32 %v12569_v63, %v12572_v47  ;;  %8034 = vmatprep.subr.msk.bf16.mxu1 %vm8033_vm12, %v13175_v29  ;;  %v5559_v55 = vpop.xlane.xlu0 %5558 }
 0xace   : > { %vm5645_vm14 = vcmp.ge.f32.partialorder %v12282_v20, %v5559_v55  ;;  %vm5646_vm15 = vcmp.ge.f32.partialorder %v12285_v8, %v5559_v55  ;;  %v5562_v30 = vpop.xlane.xlu1 %5561  ;;  %8036 = vmatpush1.bf16.xpose.msk.msra.mxu1 %vm8035_vm13, %v13175_v29  ;;  %5612 = vmax.xlane.f32.xlu0 %v5611_v57 }
 0xacf   : > { %v5709_v49 = vsel %vm5645_vm14, %v8551_v32, 256.0  ;;  %v5710_v13 = vsel %vm5646_vm15, %v8554_v17, 256.0  ;;  %vm5647_vm1 = vcmp.ge.f32.partialorder %v12292_v6, %v5562_v30  ;;  %vm5648_vm2 = vcmp.ge.f32.partialorder %v12295_v15, %v5562_v30  ;;  %5615 = vmax.xlane.f32.xlu1 %v5614_v1 }
 0xad0   : > { %v5781_v31 = vmin.f32 %v5709_v49, %v5710_v13  ;;  %v5711_v24 = vsel %vm5647_vm1, %v8551_v32, 256.0  ;;  %v5712_v20 = vsel %vm5648_vm2, %v8554_v17, 256.0 }
 0xad1   : > { %v5784_v34 = vmin.f32 %v5711_v24, %v5712_v20  ;;  %v5191_v8 = vpop.xlane.xlu0 %5190 }
 0xad2   : > { %vm5257_vm3 = vcmp.eq.f32.partialorder %v8551_v32, %v5191_v8  ;;  %vm5258_vm4 = vcmp.eq.f32.partialorder %v8554_v17, %v5191_v8  ;;  %v5194_v11 = vpop.xlane.xlu1 %5193  ;;  %5782 = vmin.xlane.f32.xlu0 %v5781_v31 }
 0xad3   : > { %v12589_v61 = vsel %vm5257_vm3, -inf, %v12026_v58  ;;  %v12592_v6 = vsel %vm5258_vm4, -inf, %v12029_v19  ;;  %vm5259_vm6 = vcmp.eq.f32.partialorder %v8551_v32, %v5194_v11  ;;  %vm5260_vm7 = vcmp.eq.f32.partialorder %v8554_v17, %v5194_v11  ;;  %5785 = vmin.xlane.f32.xlu1 %v5784_v34 }
 0xad4   : > { %v5617_v15 = vmax.f32 %v12589_v61, %v12592_v6  ;;  %vm8037_vm8 = vmpackc.low %vm5260_vm7, %vm5258_vm4  ;;  %v12599_v50 = vsel %vm5259_vm6, -inf, %v13623_v52  ;;  %v12602_v16 = vsel %vm5260_vm7, -inf, %v12041_v36 }
 0xad5   : > { %vm8039_vm9 = vmpackc.low %vm5259_vm6, %vm5257_vm3  ;;  %v5620_v58 = vmax.f32 %v12599_v50, %v12602_v16  ;;  %8038 = vmatprep.subr.msk.bf16.mxu1 %vm8037_vm8, %v13175_v29  ;;  %v5565_v19 = vpop.xlane.xlu0 %5564 }
 0xad6   : > { %vm5649_vm10 = vcmp.ge.f32.partialorder %v12312_v23, %v5565_v19  ;;  %vm5650_vm11 = vcmp.ge.f32.partialorder %v12315_v35, %v5565_v19  ;;  %v5568_v57 = vpop.xlane.xlu1 %5567  ;;  %8040 = vmatpush1.bf16.xpose.msk.msra.mxu1 %vm8039_vm9, %v13175_v29  ;;  %5618 = vmax.xlane.f32.xlu0 %v5617_v15 }
 0xad7   : > { %v5713_v1 = vsel %vm5649_vm10, %v8551_v32, 256.0  ;;  %v5714_v36 = vsel %vm5650_vm11, %v8554_v17, 256.0  ;;  %vm5651_vm12 = vcmp.ge.f32.partialorder %v12322_v26, %v5568_v57  ;;  %vm5652_vm13 = vcmp.ge.f32.partialorder %v12325_v53, %v5568_v57  ;;  %5621 = vmax.xlane.f32.xlu1 %v5620_v58 }
 0xad8   : > { %v5787_v55 = vmin.f32 %v5713_v1, %v5714_v36  ;;  %v5715_v30 = vsel %vm5651_vm12, %v8551_v32, 256.0  ;;  %v5716_v23 = vsel %vm5652_vm13, %v8554_v17, 256.0  ;;  %v13625_v57 = vmov 0.0  }
 0xad9   : > { %v5790_v49 = vmin.f32 %v5715_v30, %v5716_v23  ;;  %v5197_v35 = vpop.xlane.xlu0 %5196 }
 0xada   : > { %vm5261_vm14 = vcmp.eq.f32.partialorder %v8551_v32, %v5197_v35  ;;  %vm5262_vm15 = vcmp.eq.f32.partialorder %v8554_v17, %v5197_v35  ;;  %v5200_v13 = vpop.xlane.xlu1 %5199  ;;  %5788 = vmin.xlane.f32.xlu0 %v5787_v55 }
 0xadb   : > { %v12619_v31 = vsel %vm5261_vm14, -inf, %v12062_v40  ;;  %v12622_v26 = vsel %vm5262_vm15, -inf, %v12065_v28  ;;  %vm5263_vm1 = vcmp.eq.f32.partialorder %v8551_v32, %v5200_v13  ;;  %vm5264_vm2 = vcmp.eq.f32.partialorder %v8554_v17, %v5200_v13  ;;  %5791 = vmin.xlane.f32.xlu1 %v5790_v49 }
 0xadc   : > { %v5623_v53 = vmax.f32 %v12619_v31, %v12622_v26  ;;  %vm8041_vm3 = vmpackc.low %vm5264_vm2, %vm5262_vm15  ;;  %v12629_v24 = vsel %vm5263_vm1, -inf, %v12074_v33  ;;  %v12632_v20 = vsel %vm5264_vm2, -inf, %v12077_v60 }
 0xadd   : > { %vm8043_vm4 = vmpackc.low %vm5263_vm1, %vm5261_vm14  ;;  %v5626_v40 = vmax.f32 %v12629_v24, %v12632_v20  ;;  %8042 = vmatprep.subr.msk.bf16.mxu1 %vm8041_vm3, %v13175_v29  ;;  %v5571_v28 = vpop.xlane.xlu0 %5570 }
 0xade   : > { %vm5653_vm6 = vcmp.ge.f32.partialorder %v12342_v5, %v5571_v28  ;;  %vm5654_vm7 = vcmp.ge.f32.partialorder %v12345_v44, %v5571_v28  ;;  %v5574_v34 = vpop.xlane.xlu1 %5573  ;;  %8044 = vmatpush1.bf16.xpose.msk.msra.mxu1 %vm8043_vm4, %v13175_v29  ;;  %5624 = vmax.xlane.f32.xlu0 %v5623_v53 }
 0xadf   : > { %v5717_v33 = vsel %vm5653_vm6, %v8551_v32, 256.0  ;;  %v5718_v60 = vsel %vm5654_vm7, %v8554_v17, 256.0  ;;  %vm5655_vm8 = vcmp.ge.f32.partialorder %v12352_v10, %v5574_v34  ;;  %vm5656_vm9 = vcmp.ge.f32.partialorder %v12355_v59, %v5574_v34  ;;  %5627 = vmax.xlane.f32.xlu1 %v5626_v40  ;;  %v13624_v59 = vld [vmem:[#allocation4_spill] sm:$0xff] }
 0xae0   : > { %v5793_v8 = vmin.f32 %v5717_v33, %v5718_v60  ;;  %v5719_v11 = vsel %vm5655_vm8, %v8551_v32, 256.0  ;;  %v5720_v5 = vsel %vm5656_vm9, %v8554_v17, 256.0 }
 0xae1   : > { %v5796_v15 = vmin.f32 %v5719_v11, %v5720_v5  ;;  %v5577_v44 = vpop.xlane.xlu0 %5576 }
 0xae2   : > { %vm5657_vm10 = vcmp.ge.f32.partialorder %v12365_v62, %v5577_v44  ;;  %vm5658_vm11 = vcmp.ge.f32.partialorder %v12368_v38, %v5577_v44  ;;  %5794 = vmin.xlane.f32.xlu0 %v5793_v8 }
 0xae3   : > { %v5721_v52 = vsel %vm5657_vm10, %v8551_v32, 256.0  ;;  %v5722_v58 = vsel %vm5658_vm11, %v8554_v17, 256.0  ;;  %5797 = vmin.xlane.f32.xlu1 %v5796_v15 }
 0xae4   : > { %v5799_v10 = vmin.f32 %v5721_v52, %v5722_v58  ;;  %v5580_v19 = vpop.xlane.xlu1 %5579 }
 0xae5   : > { %5458 = vmatmul.mubr.f32.vlgmr.msra.gmra.mrb[6].mxu1 %v13624_v59  ;;  %vm5659_vm12 = vcmp.ge.f32.partialorder %v12376_v22, %v5580_v19  ;;  %vm5660_vm13 = vcmp.ge.f32.partialorder %v12379_v27, %v5580_v19 }
 0xae6   : > { %5800 = vmin.xlane.f32.xlu0 %v5799_v10  ;;  %6198 = vmatprep.mubr.f32.mxu1 %v13625_v57  ;;  %v5723_v62 = vsel %vm5659_vm12, %v8551_v32, 256.0  ;;  %v5724_v38 = vsel %vm5660_vm13, %v8554_v17, 256.0 }
 0xae7   : > { %v5802_v1 = vmin.f32 %v5723_v62, %v5724_v38 }
 0xae9   : > { %v5583_v36 = vpop.xlane.xlu0 %5582  ;;  %5803 = vmin.xlane.f32.xlu1 %v5802_v1 }
 0xaea   : > { %vm5661_vm14 = vcmp.ge.f32.partialorder %v12390_v25, %v5583_v36  ;;  %vm5662_vm15 = vcmp.ge.f32.partialorder %v12393_v7, %v5583_v36 }
 0xaeb   : > { %v5725_v55 = vsel %vm5661_vm14, %v8551_v32, 256.0  ;;  %v5726_v22 = vsel %vm5662_vm15, %v8554_v17, 256.0 }
 0xaec   : > { %v5805_v30 = vmin.f32 %v5725_v55, %v5726_v22 }
 0xaed   : > { %v5586_v27 = vpop.xlane.xlu1 %5585 }
 0xaee   : > { %vm5663_vm1 = vcmp.ge.f32.partialorder %v12400_v56, %v5586_v27  ;;  %vm5664_vm2 = vcmp.ge.f32.partialorder %v12403_v21, %v5586_v27  ;;  %5806 = vmin.xlane.f32.xlu0 %v5805_v30  ;;  %v13626_v21 = vld [vmem:[#allocation19_spill] sm:$0xff] }
 0xaef   : > { %v5727_v23 = vsel %vm5663_vm1, %v8551_v32, 256.0  ;;  %v5728_v49 = vsel %vm5664_vm2, %v8554_v17, 256.0 }
 0xaf0   : > { %v5808_v35 = vmin.f32 %v5727_v23, %v5728_v49 }
 0xaf1   : > { %v5589_v13 = vpop.xlane.xlu0 %5588 }
 0xaf2   : > { %vm5665_vm3 = vcmp.ge.f32.partialorder %v12412_v14, %v5589_v13  ;;  %vm5666_vm4 = vcmp.ge.f32.partialorder %v12415_v48, %v5589_v13  ;;  %5809 = vmin.xlane.f32.xlu1 %v5808_v35 }
 0xaf3   : > { %v5729_v25 = vsel %vm5665_vm3, %v8551_v32, 256.0  ;;  %v5730_v7 = vsel %vm5666_vm4, %v8554_v17, 256.0 }
 0xaf4   : > { %v5811_v53 = vmin.f32 %v5729_v25, %v5730_v7 }
 0xaf5   : > { %v5592_v56 = vpop.xlane.xlu1 %5591 }
 0xaf6   : > { %vm5667_vm6 = vcmp.ge.f32.partialorder %v12422_v37, %v5592_v56  ;;  %vm5668_vm7 = vcmp.ge.f32.partialorder %v13626_v21, %v5592_v56  ;;  %5812 = vmin.xlane.f32.xlu0 %v5811_v53 }
 0xaf7   : > { %v5731_v40 = vsel %vm5667_vm6, %v8551_v32, 256.0  ;;  %v5732_v28 = vsel %vm5668_vm7, %v8554_v17, 256.0 }
 0xaf8   : > { %v5814_v34 = vmin.f32 %v5731_v40, %v5732_v28 }
 0xafa   : > { %5815 = vmin.xlane.f32.xlu1 %v5814_v34 }
 0xb3a   : > { %v5759_v14 = vpop.xlane.xlu0 %5758 }
 0xb3b   : > { %vm5854_vm8 = vcmp.eq.f32.partialorder %v8554_v17, %v5759_v14  ;;  %vm5853_vm13 = vcmp.eq.f32.partialorder %v8551_v32, %v5759_v14 }
 0xb3e   : > { %v5595_v48 = vpop.xlane.xlu0 %5594 }
 0xb3f   : > { %vm5669_vm9 = vcmp.ge.f32.partialorder %v12443_v9, %v5595_v48  ;;  %vm5670_vm10 = vcmp.ge.f32.partialorder %v12448_v2, %v5595_v48  ;;  %v5762_v33 = vpop.xlane.xlu1 %5761 }
 0xb40   : > { %v5733_v37 = vsel %vm5669_vm9, %v8551_v32, 256.0  ;;  %v5734_v60 = vsel %vm5670_vm10, %v8554_v17, 256.0  ;;  %vm5855_vm11 = vcmp.eq.f32.partialorder %v8551_v32, %v5762_v33  ;;  %vm5856_vm12 = vcmp.eq.f32.partialorder %v8554_v17, %v5762_v33 }
 0xb41   : > { %v5817_v8 = vmin.f32 %v5733_v37, %v5734_v60  ;;  %vm8045_vm14 = vmpackc.low %vm5856_vm12, %vm5854_vm8 }
 0xb42   : > { %vm8047_vm15 = vmpackc.low %vm5855_vm11, %vm5853_vm13  ;;  %8046 = vmatprep.subr.msk.bf16.mxu0 %vm8045_vm14, %v13175_v29  ;;  %v5765_v11 = vpop.xlane.xlu0 %5764 }
 0xb43   : > { %v5598_v9 = vpop.xlane.xlu1 %5597  ;;  %8048 = vmatpush1.bf16.xpose.msk.msra.mxu0 %vm8047_vm15, %v13175_v29  ;;  %5818 = vmin.xlane.f32.xlu0 %v5817_v8  ;;  %vm5858_vm3 = vcmp.eq.f32.partialorder %v8554_v17, %v5765_v11  ;;  %vm5857_vm9 = vcmp.eq.f32.partialorder %v8551_v32, %v5765_v11 }
 0xb44   : > { %vm5671_vm1 = vcmp.ge.f32.partialorder %v12465_v18, %v5598_v9  ;;  %vm5672_vm2 = vcmp.ge.f32.partialorder %v12468_v4, %v5598_v9 }
 0xb45   : > { %v5735_v2 = vsel %vm5671_vm1, %v8551_v32, 256.0  ;;  %v5736_v5 = vsel %vm5672_vm2, %v8554_v17, 256.0 }
 0xb46   : > { %v5820_v15 = vmin.f32 %v5735_v2, %v5736_v5  ;;  %v5601_v44 = vpop.xlane.xlu0 %5600 }
 0xb47   : > { %vm5673_vm4 = vcmp.ge.f32.partialorder %v12481_v12, %v5601_v44  ;;  %vm5674_vm6 = vcmp.ge.f32.partialorder %v12486_v46, %v5601_v44  ;;  %v5768_v52 = vpop.xlane.xlu1 %5767 }
 0xb48   : > { %v5737_v58 = vsel %vm5673_vm4, %v8551_v32, 256.0  ;;  %v5738_v10 = vsel %vm5674_vm6, %v8554_v17, 256.0  ;;  %vm5859_vm7 = vcmp.eq.f32.partialorder %v8551_v32, %v5768_v52  ;;  %vm5860_vm8 = vcmp.eq.f32.partialorder %v8554_v17, %v5768_v52  ;;  %5821 = vmin.xlane.f32.xlu1 %v5820_v15  ;;  %v12780_v15 = vld [vmem:[%s12868_s2] sm:$0xff] }
 0xb49   : > { %v5823_v18 = vmin.f32 %v5737_v58, %v5738_v10  ;;  %vm8049_vm10 = vmpackc.low %vm5860_vm8, %vm5858_vm3 }
 0xb4a   : > { %vm8051_vm11 = vmpackc.low %vm5859_vm7, %vm5857_vm9  ;;  %8050 = vmatprep.subr.msk.bf16.mxu0 %vm8049_vm10, %v13175_v29  ;;  %v5771_v4 = vpop.xlane.xlu0 %5770 }
 0xb4b   : > { %v5604_v12 = vpop.xlane.xlu1 %5603  ;;  %8052 = vmatpush1.bf16.xpose.msk.msra.mxu0 %vm8051_vm11, %v13175_v29  ;;  %5824 = vmin.xlane.f32.xlu0 %v5823_v18  ;;  %vm5862_vm14 = vcmp.eq.f32.partialorder %v8554_v17, %v5771_v4  ;;  %vm5861_vm4 = vcmp.eq.f32.partialorder %v8551_v32, %v5771_v4 }
 0xb4c   : > { %vm5675_vm12 = vcmp.ge.f32.partialorder %v12503_v51, %v5604_v12  ;;  %vm5676_vm13 = vcmp.ge.f32.partialorder %v12506_v0, %v5604_v12 }
 0xb4d   : > { %v5739_v46 = vsel %vm5675_vm12, %v8551_v32, 256.0  ;;  %v5740_v19 = vsel %vm5676_vm13, %v8554_v17, 256.0 }
 0xb4e   : > { %v5826_v62 = vmin.f32 %v5739_v46, %v5740_v19  ;;  %v5607_v38 = vpop.xlane.xlu0 %5606 }
 0xb4f   : > { %vm5677_vm15 = vcmp.ge.f32.partialorder %v12519_v54, %v5607_v38  ;;  %vm5678_vm1 = vcmp.ge.f32.partialorder %v12524_v39, %v5607_v38  ;;  %v5774_v1 = vpop.xlane.xlu1 %5773 }
 0xb50   : > { %v5741_v36 = vsel %vm5677_vm15, %v8551_v32, 256.0  ;;  %v5742_v55 = vsel %vm5678_vm1, %v8554_v17, 256.0  ;;  %vm5863_vm2 = vcmp.eq.f32.partialorder %v8551_v32, %v5774_v1  ;;  %vm5864_vm3 = vcmp.eq.f32.partialorder %v8554_v17, %v5774_v1  ;;  %5827 = vmin.xlane.f32.xlu1 %v5826_v62 }
 0xb51   : > { %v5829_v51 = vmin.f32 %v5741_v36, %v5742_v55  ;;  %vm8053_vm6 = vmpackc.low %vm5864_vm3, %vm5862_vm14 }
 0xb52   : > { %vm8055_vm7 = vmpackc.low %vm5863_vm2, %vm5861_vm4  ;;  %8054 = vmatprep.subr.msk.bf16.mxu0 %vm8053_vm6, %v13175_v29 }
 0xb53   : > { %8056 = vmatpush1.bf16.xpose.msk.msra.mxu0 %vm8055_vm7, %v13175_v29  ;;  %5830 = vmin.xlane.f32.xlu0 %v5829_v51 }
 0xb54   : > { %v5610_v0 = vpop.xlane.xlu1 %5609 }
 0xb55   : > { %vm5679_vm8 = vcmp.ge.f32.partialorder %v12537_v42, %v5610_v0  ;;  %vm5680_vm9 = vcmp.ge.f32.partialorder %v12540_v3, %v5610_v0  ;;  %v8183_v0 = vmov 8  }
 0xb56   : > { %v5743_v54 = vsel %vm5679_vm8, %v8551_v32, 256.0  ;;  %v5744_v39 = vsel %vm5680_vm9, %v8554_v17, 256.0  ;;  %8143 = vset.pattern.permute.xlu1 %v8183_v0  ;;  %8144 = vset.pattern.permute.xlu0 %v8183_v0 }
 0xb57   : > { %v5832_v22 = vmin.f32 %v5743_v54, %v5744_v39  ;;  %v5777_v30 = vpop.xlane.xlu0 %5776 }
 0xb58   : > { %vm5865_vm10 = vcmp.eq.f32.partialorder %v8551_v32, %v5777_v30  ;;  %vm5866_vm11 = vcmp.eq.f32.partialorder %v8554_v17, %v5777_v30  ;;  %v5780_v27 = vpop.xlane.xlu1 %5779 }
 0xb59   : > { %vm5867_vm12 = vcmp.eq.f32.partialorder %v8551_v32, %v5780_v27  ;;  %vm5868_vm13 = vcmp.eq.f32.partialorder %v8554_v17, %v5780_v27  ;;  %5833 = vmin.xlane.f32.xlu1 %v5832_v22 }
 0xb5a   : > { %vm8057_vm14 = vmpackc.low %vm5868_vm13, %vm5866_vm11 }
 0xb5b   : > { %vm8059_vm15 = vmpackc.low %vm5867_vm12, %vm5865_vm10  ;;  %8058 = vmatprep.subr.msk.bf16.mxu0 %vm8057_vm14, %v13175_v29  ;;  %v5613_v42 = vpop.xlane.xlu0 %5612 }
 0xb5c   : > { %vm5681_vm1 = vcmp.ge.f32.partialorder %v12559_v41, %v5613_v42  ;;  %vm5682_vm2 = vcmp.ge.f32.partialorder %v12562_v45, %v5613_v42  ;;  %v5616_v3 = vpop.xlane.xlu1 %5615  ;;  %8060 = vmatpush1.bf16.xpose.msk.msra.mxu0 %vm8059_vm15, %v13175_v29  ;;  %v13627_v42 = vld [vmem:[#allocation5_spill] sm:$0xff] }
 0xb5d   : > { %v5745_v23 = vsel %vm5681_vm1, %v8551_v32, 256.0  ;;  %v5746_v49 = vsel %vm5682_vm2, %v8554_v17, 256.0  ;;  %vm5683_vm3 = vcmp.ge.f32.partialorder %v12569_v63, %v5616_v3  ;;  %vm5684_vm4 = vcmp.ge.f32.partialorder %v12572_v47, %v5616_v3 }
 0xb5e   : > { %v5835_v35 = vmin.f32 %v5745_v23, %v5746_v49  ;;  %v5747_v13 = vsel %vm5683_vm3, %v8551_v32, 256.0  ;;  %v5748_v25 = vsel %vm5684_vm4, %v8554_v17, 256.0 }
 0xb5f   : > { %v5838_v7 = vmin.f32 %v5747_v13, %v5748_v25  ;;  %v5783_v41 = vpop.xlane.xlu0 %5782 }
 0xb60   : > { %vm5869_vm6 = vcmp.eq.f32.partialorder %v8551_v32, %v5783_v41  ;;  %vm5870_vm7 = vcmp.eq.f32.partialorder %v8554_v17, %v5783_v41  ;;  %v5786_v45 = vpop.xlane.xlu1 %5785  ;;  %5836 = vmin.xlane.f32.xlu0 %v5835_v35 }
 0xb61   : > { %vm5871_vm8 = vcmp.eq.f32.partialorder %v8551_v32, %v5786_v45  ;;  %vm5872_vm9 = vcmp.eq.f32.partialorder %v8554_v17, %v5786_v45  ;;  %5839 = vmin.xlane.f32.xlu1 %v5838_v7 }
 0xb62   : > { %vm8061_vm10 = vmpackc.low %vm5872_vm9, %vm5870_vm7 }
 0xb63   : > { %vm8063_vm11 = vmpackc.low %vm5871_vm8, %vm5869_vm6  ;;  %8062 = vmatprep.subr.msk.bf16.mxu0 %vm8061_vm10, %v13175_v29  ;;  %v5619_v63 = vpop.xlane.xlu0 %5618 }
 0xb64   : > { %vm5685_vm12 = vcmp.ge.f32.partialorder %v12589_v61, %v5619_v63  ;;  %vm5686_vm13 = vcmp.ge.f32.partialorder %v12592_v6, %v5619_v63  ;;  %v5622_v47 = vpop.xlane.xlu1 %5621  ;;  %8064 = vmatpush1.bf16.xpose.msk.msra.mxu0 %vm8063_vm11, %v13175_v29 }
 0xb65   : > { %v5749_v53 = vsel %vm5685_vm12, %v8551_v32, 256.0  ;;  %v5750_v56 = vsel %vm5686_vm13, %v8554_v17, 256.0  ;;  %vm5687_vm14 = vcmp.ge.f32.partialorder %v12599_v50, %v5622_v47  ;;  %vm5688_vm15 = vcmp.ge.f32.partialorder %v12602_v16, %v5622_v47 }
 0xb66   : > { %v5841_v21 = vmin.f32 %v5749_v53, %v5750_v56  ;;  %v5751_v40 = vsel %vm5687_vm14, %v8551_v32, 256.0  ;;  %v5752_v28 = vsel %vm5688_vm15, %v8554_v17, 256.0 }
 0xb67   : > { %v5844_v34 = vmin.f32 %v5751_v40, %v5752_v28  ;;  %v5789_v61 = vpop.xlane.xlu0 %5788 }
 0xb68   : > { %vm5873_vm1 = vcmp.eq.f32.partialorder %v8551_v32, %v5789_v61  ;;  %vm5874_vm2 = vcmp.eq.f32.partialorder %v8554_v17, %v5789_v61  ;;  %v5792_v6 = vpop.xlane.xlu1 %5791  ;;  %5842 = vmin.xlane.f32.xlu0 %v5841_v21 }
 0xb69   : > { %vm5875_vm3 = vcmp.eq.f32.partialorder %v8551_v32, %v5792_v6  ;;  %vm5876_vm4 = vcmp.eq.f32.partialorder %v8554_v17, %v5792_v6  ;;  %5845 = vmin.xlane.f32.xlu1 %v5844_v34 }
 0xb6a   : > { %vm8065_vm6 = vmpackc.low %vm5876_vm4, %vm5874_vm2 }
 0xb6b   : > { %vm8067_vm7 = vmpackc.low %vm5875_vm3, %vm5873_vm1  ;;  %8066 = vmatprep.subr.msk.bf16.mxu0 %vm8065_vm6, %v13175_v29  ;;  %v5625_v50 = vpop.xlane.xlu0 %5624 }
 0xb6c   : > { %vm5689_vm8 = vcmp.ge.f32.partialorder %v12619_v31, %v5625_v50  ;;  %vm5690_vm9 = vcmp.ge.f32.partialorder %v12622_v26, %v5625_v50  ;;  %v5628_v16 = vpop.xlane.xlu1 %5627  ;;  %8068 = vmatpush1.bf16.xpose.msk.msra.mxu0 %vm8067_vm7, %v13175_v29 }
 0xb6d   : > { %v5753_v14 = vsel %vm5689_vm8, %v8551_v32, 256.0  ;;  %v5754_v48 = vsel %vm5690_vm9, %v8554_v17, 256.0  ;;  %vm5691_vm10 = vcmp.ge.f32.partialorder %v12629_v24, %v5628_v16  ;;  %vm5692_vm11 = vcmp.ge.f32.partialorder %v12632_v20, %v5628_v16 }
 0xb6e   : > { %v5847_v33 = vmin.f32 %v5753_v14, %v5754_v48  ;;  %v5755_v37 = vsel %vm5691_vm10, %v8551_v32, 256.0  ;;  %v5756_v60 = vsel %vm5692_vm11, %v8554_v17, 256.0 }
 0xb6f   : > { %v5850_v8 = vmin.f32 %v5755_v37, %v5756_v60  ;;  %v5795_v31 = vpop.xlane.xlu0 %5794 }
 0xb70   : > { %vm5877_vm12 = vcmp.eq.f32.partialorder %v8551_v32, %v5795_v31  ;;  %vm5878_vm13 = vcmp.eq.f32.partialorder %v8554_v17, %v5795_v31  ;;  %v5798_v26 = vpop.xlane.xlu1 %5797  ;;  %5848 = vmin.xlane.f32.xlu0 %v5847_v33 }
 0xb71   : > { %vm5879_vm14 = vcmp.eq.f32.partialorder %v8551_v32, %v5798_v26  ;;  %vm5880_vm15 = vcmp.eq.f32.partialorder %v8554_v17, %v5798_v26  ;;  %5851 = vmin.xlane.f32.xlu1 %v5850_v8 }
 0xb72   : > { %vm8069_vm1 = vmpackc.low %vm5880_vm15, %vm5878_vm13 }
 0xb73   : > { %vm8071_vm2 = vmpackc.low %vm5879_vm14, %vm5877_vm12  ;;  %8070 = vmatprep.subr.msk.bf16.mxu0 %vm8069_vm1, %v13175_v29  ;;  %v5801_v24 = vpop.xlane.xlu0 %5800 }
 0xb74   : > { %8072 = vmatpush1.bf16.xpose.msk.msra.mxu0 %vm8071_vm2, %v13175_v29  ;;  %vm5882_vm3 = vcmp.eq.f32.partialorder %v8554_v17, %v5801_v24  ;;  %vm5881_vm7 = vcmp.eq.f32.partialorder %v8551_v32, %v5801_v24 }
 0xb76   : > { %v5804_v20 = vpop.xlane.xlu1 %5803 }
 0xb77   : > { %vm5883_vm4 = vcmp.eq.f32.partialorder %v8551_v32, %v5804_v20  ;;  %vm5884_vm6 = vcmp.eq.f32.partialorder %v8554_v17, %v5804_v20 }
 0xb78   : > { %vm8073_vm8 = vmpackc.low %vm5884_vm6, %vm5882_vm3 }
 0xb79   : > { %vm8075_vm9 = vmpackc.low %vm5883_vm4, %vm5881_vm7  ;;  %8074 = vmatprep.subr.msk.bf16.mxu0 %vm8073_vm8, %v13175_v29 }
 0xb7b   : > { %v5807_v11 = vpop.xlane.xlu0 %5806 }
 0xb7c   : > { %8076 = vmatpush1.bf16.xpose.msk.msra.mxu0 %vm8075_vm9, %v13175_v29  ;;  %vm5886_vm10 = vcmp.eq.f32.partialorder %v8554_v17, %v5807_v11  ;;  %vm5885_vm13 = vcmp.eq.f32.partialorder %v8551_v32, %v5807_v11 }
 0xb7f   : > { %v5810_v9 = vpop.xlane.xlu1 %5809 }
 0xb80   : > { %vm5887_vm11 = vcmp.eq.f32.partialorder %v8551_v32, %v5810_v9  ;;  %vm5888_vm12 = vcmp.eq.f32.partialorder %v8554_v17, %v5810_v9 }
 0xb81   : > { %vm8077_vm14 = vmpackc.low %vm5888_vm12, %vm5886_vm10 }
 0xb82   : > { %vm8079_vm15 = vmpackc.low %vm5887_vm11, %vm5885_vm13  ;;  %8078 = vmatprep.subr.msk.bf16.mxu0 %vm8077_vm14, %v13175_v29  ;;  %6285 = vperm.xlu1 %8143, %v12780_v15  }
 0xb83   : > { %v5813_v2 = vpop.xlane.xlu0 %5812 }
 0xb84   : > { %8080 = vmatpush1.bf16.xpose.msk.msra.mxu0 %vm8079_vm15, %v13175_v29  ;;  %vm5890_vm1 = vcmp.eq.f32.partialorder %v8554_v17, %v5813_v2  ;;  %vm5889_vm4 = vcmp.eq.f32.partialorder %v8551_v32, %v5813_v2 }
 0xb86   : > { %6124 = vrot.lane.b32.xlu0 %v12780_v15, %s8182_s30 }
 0xb87   : > { %v5816_v5 = vpop.xlane.xlu1 %5815 }
 0xb88   : > { %vm5891_vm2 = vcmp.eq.f32.partialorder %v8551_v32, %v5816_v5  ;;  %vm5892_vm3 = vcmp.eq.f32.partialorder %v8554_v17, %v5816_v5 }
 0xb89   : > { %vm8081_vm6 = vmpackc.low %vm5892_vm3, %vm5890_vm1 }
 0xb8a   : > { %vm8083_vm7 = vmpackc.low %vm5891_vm2, %vm5889_vm4  ;;  %8082 = vmatprep.subr.msk.bf16.mxu0 %vm8081_vm6, %v13175_v29 }
 0xb8c   : > { %8084 = vmatpush1.bf16.xpose.msk.msra.mxu0 %vm8083_vm7, %v13175_v29 }
 0xbb8   : > { %v5459_v44 = vpop.f32.mrb[6].mxu1 }
 0xbb9   : > { %v5461_v52 = vpop.f32.mrb[7].mxu1 }
 0xbba   : > { %v5466_v58 = vcombine.low %v5459_v44, %v5461_v52 }
 0xbbc   : > { %v12787_v10 = vmax.f32 %v12432_v43, %v5466_v58 }
 0xbd0   : > { %v5819_v18 = vpop.xlane.xlu0 %5818 }
 0xbd1   : > { %vm5894_vm8 = vcmp.eq.f32.partialorder %v8554_v17, %v5819_v18  ;;  %vm5893_vm11 = vcmp.eq.f32.partialorder %v8551_v32, %v5819_v18 }
 0xbd5   : > { %v5822_v4 = vpop.xlane.xlu1 %5821 }
 0xbd6   : > { %vm5895_vm9 = vcmp.eq.f32.partialorder %v8551_v32, %v5822_v4  ;;  %vm5896_vm10 = vcmp.eq.f32.partialorder %v8554_v17, %v5822_v4 }
 0xbd7   : > { %vm8085_vm12 = vmpackc.low %vm5896_vm10, %vm5894_vm8 }
 0xbd8   : > { %vm8087_vm13 = vmpackc.low %vm5895_vm9, %vm5893_vm11  ;;  %8086 = vmatprep.subr.msk.bf16.mxu0 %vm8085_vm12, %v13175_v29  ;;  %v5825_v12 = vpop.xlane.xlu0 %5824 }
 0xbd9   : > { %8088 = vmatpush1.bf16.xpose.msk.msra.mxu0 %vm8087_vm13, %v13175_v29  ;;  %vm5898_vm14 = vcmp.eq.f32.partialorder %v8554_v17, %v5825_v12  ;;  %vm5897_vm2 = vcmp.eq.f32.partialorder %v8551_v32, %v5825_v12 }
 0xbdd   : > { %v5828_v46 = vpop.xlane.xlu1 %5827 }
 0xbde   : > { %vm5899_vm15 = vcmp.eq.f32.partialorder %v8551_v32, %v5828_v46  ;;  %vm5900_vm1 = vcmp.eq.f32.partialorder %v8554_v17, %v5828_v46 }
 0xbdf   : > { %vm8089_vm3 = vmpackc.low %vm5900_vm1, %vm5898_vm14 }
 0xbe0   : > { %vm8091_vm4 = vmpackc.low %vm5899_vm15, %vm5897_vm2  ;;  %8090 = vmatprep.subr.msk.bf16.mxu0 %vm8089_vm3, %v13175_v29  ;;  %v5831_v43 = vpop.xlane.xlu0 %5830 }
 0xbe1   : > { %8092 = vmatpush1.bf16.xpose.msk.msra.mxu0 %vm8091_vm4, %v13175_v29  ;;  %vm5902_vm6 = vcmp.eq.f32.partialorder %v8554_v17, %v5831_v43  ;;  %vm5901_vm9 = vcmp.eq.f32.partialorder %v8551_v32, %v5831_v43 }
 0xbe6   : > { %v5834_v19 = vpop.xlane.xlu1 %5833 }
 0xbe7   : > { %vm5903_vm7 = vcmp.eq.f32.partialorder %v8551_v32, %v5834_v19  ;;  %vm5904_vm8 = vcmp.eq.f32.partialorder %v8554_v17, %v5834_v19 }
 0xbe8   : > { %vm8093_vm10 = vmpackc.low %vm5904_vm8, %vm5902_vm6 }
 0xbe9   : > { %vm8095_vm11 = vmpackc.low %vm5903_vm7, %vm5901_vm9  ;;  %8094 = vmatprep.subr.msk.bf16.mxu0 %vm8093_vm10, %v13175_v29 }
 0xbea   : > { %8096 = vmatpush1.bf16.xpose.msk.msra.mxu0 %vm8095_vm11, %v13175_v29 }
 0xbed   : > { %v5837_v62 = vpop.xlane.xlu0 %5836 }
 0xbee   : > { %vm5905_vm12 = vcmp.eq.f32.partialorder %v8551_v32, %v5837_v62  ;;  %vm5906_vm13 = vcmp.eq.f32.partialorder %v8554_v17, %v5837_v62  ;;  %v5840_v38 = vpop.xlane.xlu1 %5839 }
 0xbef   : > { %vm5907_vm14 = vcmp.eq.f32.partialorder %v8551_v32, %v5840_v38  ;;  %vm5908_vm15 = vcmp.eq.f32.partialorder %v8554_v17, %v5840_v38 }
 0xbf0   : > { %vm8097_vm1 = vmpackc.low %vm5908_vm15, %vm5906_vm13 }
 0xbf1   : > { %vm8099_vm2 = vmpackc.low %vm5907_vm14, %vm5905_vm12  ;;  %8098 = vmatprep.subr.msk.bf16.mxu0 %vm8097_vm1, %v13175_v29  ;;  %vm6298_vm1 = vcmask 64512  }
 0xbf2   : > { %8100 = vmatpush1.bf16.xpose.msk.msra.mxu0 %vm8099_vm2, %v13175_v29  ;;  %vm6389_vm2 = vcmask 7168  }
 0xbf5   : > { %v5843_v1 = vpop.xlane.xlu0 %5842 }
 0xbf6   : > { %vm5909_vm3 = vcmp.eq.f32.partialorder %v8551_v32, %v5843_v1  ;;  %vm5910_vm4 = vcmp.eq.f32.partialorder %v8554_v17, %v5843_v1  ;;  %v5846_v36 = vpop.xlane.xlu1 %5845 }
 0xbf7   : > { %vm5911_vm6 = vcmp.eq.f32.partialorder %v8551_v32, %v5846_v36  ;;  %vm5912_vm7 = vcmp.eq.f32.partialorder %v8554_v17, %v5846_v36 }
 0xbf8   : > { %vm8101_vm8 = vmpackc.low %vm5912_vm7, %vm5910_vm4 }
 0xbf9   : > { %vm8103_vm9 = vmpackc.low %vm5911_vm6, %vm5909_vm3  ;;  %8102 = vmatprep.subr.msk.bf16.mxu0 %vm8101_vm8, %v13175_v29 }
 0xbfa   : > { %8104 = vmatpush1.bf16.xpose.msk.msra.mxu0 %vm8103_vm9, %v13175_v29 }
 0xbfd   : > { %v5849_v55 = vpop.xlane.xlu0 %5848 }
 0xbfe   : > { %vm5913_vm10 = vcmp.eq.f32.partialorder %v8551_v32, %v5849_v55  ;;  %vm5914_vm11 = vcmp.eq.f32.partialorder %v8554_v17, %v5849_v55  ;;  %v5852_v51 = vpop.xlane.xlu1 %5851 }
 0xbff   : > { %vm5915_vm12 = vcmp.eq.f32.partialorder %v8551_v32, %v5852_v51  ;;  %vm5916_vm13 = vcmp.eq.f32.partialorder %v8554_v17, %v5852_v51  ;;  %v6292_v32 = vld [vmem:[%s12869_s3] sm:$0xf] }
 0xc00   : > { %vm8105_vm14 = vmpackc.low %vm5916_vm13, %vm5914_vm11  ;;  %6295 = vperm.xlu1 %8143, %v6292_v32  }
 0xc01   : > { %vm8107_vm15 = vmpackc.low %vm5915_vm12, %vm5913_vm10  ;;  %8106 = vmatprep.subr.msk.bf16.mxu0 %vm8105_vm14, %v13175_v29  ;;  %v6125_v27 = vpop.permute.xlu0 %6124 }
 0xc02   : > { %8108 = vmatpush1.bf16.xpose.msk.msra.mxu0 %vm8107_vm15, %v13175_v29  ;;  %v6286_v3 = vpop.permute.xlu1 %6285 }
 0xc09   : > { %6110 = vmatmul.mubr.f32.vlgmr.msra.gmra.mrb[70].mxu0 %v13624_v59 }
 0xc0a   : > { %6365 = vmatprep.mubr.f32.mxu0 %v13625_v57 }
 0xc7f   : > { %v6296_v41 = vpop.permute.xlu1 %6295 }
 0xcdc   : > { %v6111_v17 = vpop.f32.mrb[70].mxu0 }
 0xcdd   : > { %v6113_v54 = vpop.f32.mrb[71].mxu0 }
 0xcde   : > { %v6118_v39 = vcombine.low %v6111_v17, %v6113_v54 }
 0xce0   : > { %v6120_v22 = vmax.f32 %v12787_v10, %v6118_v39 }
 0xce2   : > { %v6121_v29 = vsub.f32 %v6120_v22, %v13624_v59 }
 0xce4   : > { %v6127_v30 = vcombine.high %v6121_v29, %v6121_v29 }
 0xce6   : > { %7584 = vmatprep.subr.msk.mxu1 %vm288_vm0, %v6127_v30 }
 0xce7   : > { %7585 = vmatpush1.msk.msra.mxu1 %vm288_vm0, %v6121_v29 }
 0xce8   : > { %7586 = vmatmul.mubr.msk.f32.vlgmr.msra.gmra.mrb[8].mxu1 %vm408_vm5, %v6125_v27  ;;  %7587 = vmatprep.subr.msk.mxu1 %vm288_vm0, %v13627_v42 }
 0xce9   : > { %7588 = vmatpush1.msk.msra.mxu1 %vm288_vm0, %v13624_v59  ;;  %6277 = vmatprep.mubr.f32.mxu1 %v13625_v57 }
 0xcf0   : > { %7589 = vmatmul.mubr.msk.f32.vlgmr.msra.gmra.mrb[8].mxu1 %vm408_vm5, %v12780_v15  ;;  %vm6394_vm5 = vcmask 11264  }
 0xcf1   : > { %6395 = vst.msk [vmem:[%s258_s14] sm:$0xf] %vm6394_vm5, %v13625_v57 }
 0xcf8   : > { %v6396_v16 = vld [vmem:[%s258_s14] sm:$0xf] }
 0xdc3   : > { %v6279_v23 = vpop.f32.mrb[8].mxu1 }
 0xdc4   : > { %v6288_v49 = vadd.f32 %v6286_v3, %v6279_v23  ;;  %v6281_v35 = vpop.f32.mrb[9].mxu1 }
 0xdc5   : > { %v6289_v13 = vadd.f32 %v6286_v3, %v6281_v35 }
 0xdc6   : > { %v6290_v7 = vmax.f32 %v6288_v49, 0.0 }
 0xdc7   : > { %v6291_v25 = vmax.f32 %v6289_v13, 0.0 }
 0xdc9   : > { %6301 = vmatprep.subr.mxu0 %v6291_v25 }
 0xdca   : > { %6302 = vmatpush1.msra.mxu0 %v6290_v7 }
 0xdcb   : > { %7590 = vmatmul.mubr.msk.f32.vlgmr.msra.gmra.mrb[72].mxu0 %vm6298_vm1, %v6292_v32 }
 0xe9e   : > { %v6367_v45 = vpop.f32.mrb[72].mxu0 }
 0xe9f   : > { %v6368_v59 = vadd.f32 %v6367_v45, %v6296_v41  ;;  %v6369_v63 = vpop.f32.mrb[73].mxu0 }
 0xea0   : > { %v6370_v47 = vadd.f32 %v6369_v63, %v6296_v41 }
 0xea1   : > { %v6382_v53 = vmul.f32 %v6368_v59, %v6368_v59  ;;  %v6377_v56 = vsel %vm288_vm0, %v6368_v59, 0.0 }
 0xea2   : > { %v6374_v21 = vcombine.low %v6368_v59, %v6370_v47  ;;  %v6383_v40 = vmul.f32 %v6370_v47, %v6370_v47  ;;  %v6378_v28 = vsel %vm288_vm0, %v6370_v47, 0.0 }
 0xea3   : > { %v6379_v34 = vadd.f32 %v6378_v28, %v6377_v56  ;;  %v6384_v61 = vsel %vm288_vm0, %v6382_v53, 0.0 }
 0xea4   : > { %6376 = vst [vmem:[%s253_s10] sm:$0xff] %v6374_v21  ;;  %v6385_v6 = vsel %vm288_vm0, %v6383_v40, 0.0 }
 0xea5   : > { %6380 = vadd.xlane.f32.xlu0 %v6379_v34  ;;  %v6386_v50 = vadd.f32 %v6385_v6, %v6384_v61 }
 0xea7   : > { %6387 = vadd.xlane.f32.xlu1 %v6386_v50 }
 0xf32   : > { %v6381_v14 = vpop.xlane.xlu0 %6380 }
 0xf34   : > { %v6388_v48 = vpop.xlane.xlu1 %6387 }
 0xf35   : > { %v6390_v33 = vsel %vm6389_vm2, %v6381_v14, %v6388_v48 }
 0xf36   : > { %v6397_v37 = vadd.f32 %v6396_v16, %v6390_v33 }
 0xf38   : > { %6399 = vst.msk [vmem:[%s258_s14] sm:$0xf] %vm6394_vm5, %v6397_v37 }
 0xf39 PF: > { %s16_s20 = sadd.s32 1, %s8176_s20   ;;  %s13628_s18 = smov %s8172_s19 }
 0xf3a   : > { %p13_p5 = scmp.ge.s32.totalorder %s16_s20, 4   ;;  %s13629_s19 = smov %s13631_s21 }
 0xf3c   :  { %15 = sbr.rel (!%p13_p5) target bundleno = 2 (0x2), region = 88 }

</bundles_post_ra>
